<compile_context>
chip_gen: v6e
topology: v6e:2x2x1
jax: 0.10.0
libtpu: 0.0.40
codegen_flags: <defaults>
</compile_context>

<pallas_src>
import jax
import jax.numpy as jnp
import numpy as np
from jax.experimental import pallas as pl
from jax.experimental.pallas import tpu as pltpu

FILTERS = 8          # conv output channels
ACTIVATION = "relu"  # 'relu' or 'tanh'
H = W = 32           # input spatial size ('same' keeps 32, pool -> 16)
PH = (H // 2) * (W // 2)   # 256 pooled locations
NS = 4 * PH                # 1024 conv output locations, parity-major
KP_RAW = 3 * 3 * 3         # 27 real im2col features
KP = 32                    # padded patch dim (sublane aligned)
HID = 64
NCLS = 10
NCLS_PAD = 128             # lane-dense logits
BN_EPS = 1e-5
# Batch tile per grid step.  32 keeps the demo grid at 2 steps (v7x dual-TC);
# raise to 64 for large batches (cols tile is ~64KiB*TB bf16, double-buffered,
# plus ~40KiB*TB of intermediates -> ~12MiB at TB=64, within the 32MiB budget).
TB = 32
VMEM_LIMIT_BYTES = 32 * 1024 * 1024


def _act(x):
    return jnp.maximum(x, 0.0) if ACTIVATION == "relu" else jnp.tanh(x)


def cnn_kernel(cols_ref, wconv_ref, scale_ref, shift_ref,
               w1_ref, b1_ref, w2_ref, b2_ref, out_ref, pooled_ref):
    tb = cols_ref.shape[0]
    # conv as a single batched MXU contraction over the (padded) im2col patch dim.
    wb = jnp.broadcast_to(wconv_ref[...][None, :, :], (tb, FILTERS, KP))     # (TB,F,32) bf16
    conv = jnp.einsum("bfk,bkn->bfn", wb, cols_ref[...],
                      preferred_element_type=jnp.float32)                    # (TB,F,1024) f32
    # folded conv-bias + BatchNorm (eval) as per-channel scale/shift, activation,
    # then cast to bf16 (halves live vregs / pool+store traffic; acc stays f32).
    y = _act(conv * scale_ref[...] + shift_ref[...]).astype(jnp.bfloat16)    # (TB,F,1024)
    # 2x2 max-pool: spatial lanes are parity-major, so pooling is a max over four
    # contiguous, 256-aligned lane slices (pure VPU).
    pooled = jnp.maximum(jnp.maximum(y[:, :, 0:PH], y[:, :, PH:2 * PH]),
                         jnp.maximum(y[:, :, 2 * PH:3 * PH], y[:, :, 3 * PH:4 * PH]))
    pooled_ref[...] = pooled                                                 # (TB,F,256) bf16
    # fc1: F independent (TB,256)x(256,64) matmuls on per-channel slabs read back
    # from the bf16 VMEM scratch, combined with a balanced tree sum (no serial chain).
    parts = [jnp.dot(pooled_ref[:, c, :], w1_ref[c],
                     preferred_element_type=jnp.float32)
             for c in range(FILTERS)]
    while len(parts) > 1:
        parts = [parts[i] + parts[i + 1] for i in range(0, len(parts), 2)]
    h = _act(parts[0] + b1_ref[...]).astype(jnp.bfloat16)                    # (TB,64)
    # TODO(synk): Dropout is the identity here (inference/eval semantics); train-mode
    # Bernoulli masking is not implemented.
    out_ref[...] = (jnp.dot(h, w2_ref[...], preferred_element_type=jnp.float32)
                    + b2_ref[...])                                           # (TB,128) f32


def prepare_params(p):
    """Fold PyTorch-shaped parameters into the kernel's layouts (plain-JAX glue)."""
    F = FILTERS
    # conv weight (F, cin, kh, kw) -> (F, kh, kw, cin) -> (F, 27) -> pad to (F, 32), bf16
    wconv = jnp.transpose(p["conv_w"], (0, 2, 3, 1)).reshape(F, KP_RAW)
    wconv = jnp.pad(wconv, ((0, 0), (0, KP - KP_RAW))).astype(jnp.bfloat16)
    inv = 1.0 / jnp.sqrt(p["bn_var"] + BN_EPS)
    scale = (p["bn_gamma"] * inv).reshape(1, F, 1)
    shift = (p["bn_beta"] + (p["conv_b"] - p["bn_mean"]) * p["bn_gamma"] * inv).reshape(1, F, 1)
    # fc1 weight (64, F*256) PyTorch (out,in) -> (F, 256, 64): w1[c, s, j] = W[j, c*256+s]
    w1 = jnp.transpose(p["fc1_w"].reshape(HID, F, PH), (1, 2, 0)).astype(jnp.bfloat16)
    b1 = p["fc1_b"].reshape(1, HID)
    # fc2: transpose to (64, 10), zero-pad the class dim to 128 lanes, bf16 weight.
    w2 = jnp.zeros((HID, NCLS_PAD), jnp.float32).at[:, :NCLS].set(jnp.transpose(p["fc2_w"]))
    w2 = w2.astype(jnp.bfloat16)
    b2 = jnp.zeros((1, NCLS_PAD), jnp.float32).at[:, :NCLS].set(p["fc2_b"].reshape(1, NCLS))
    return wconv, scale, shift, w1, b1, w2, b2


def im2col_parity_major(x_nchw):
    """NCHW input -> cols [B, 27, 1024] with pool-parity-major spatial lanes."""
    B = x_nchw.shape[0]
    x = jnp.transpose(x_nchw, (0, 2, 3, 1))                 # NHWC
    xp = jnp.pad(x, ((0, 0), (1, 1), (1, 1), (0, 0)))       # padding=1 ('same')
    chunks = []
    for ph in (0, 1):
        for pw in (0, 1):
            ks = []
            for dy in range(3):
                for dx in range(3):
                    sl = xp[:, ph + dy:ph + dy + 31:2, pw + dx:pw + dx + 31:2, :]  # (B,16,16,3)
                    ks.append(sl.reshape(B, PH, 3))
            chunks.append(jnp.concatenate(ks, axis=-1))      # (B, 256, 27)
    cols = jnp.concatenate(chunks, axis=1)                   # (B, 1024, 27)
    return jnp.transpose(cols, (0, 2, 1))                    # (B, 27, 1024)


def cnn_forward(x_nchw, params, tb=TB):
    B = x_nchw.shape[0]
    # Don't over-pad tiny batches: clamp the batch tile to ceil8(B).
    tb = max(8, min(tb, ((B + 7) // 8) * 8))
    Bp = ((B + tb - 1) // tb) * tb
    cols = im2col_parity_major(x_nchw.astype(jnp.float32))    # (B, 27, 1024) f32
    # pad batch to a TB multiple, pad patch dim 27 -> 32, and go bf16 for the DMA.
    cols = jnp.pad(cols, ((0, Bp - B), (0, KP - KP_RAW), (0, 0))).astype(jnp.bfloat16)
    wconv, scale, shift, w1, b1, w2, b2 = prepare_params(params)

    out = pl.pallas_call(
        cnn_kernel,
        out_shape=jax.ShapeDtypeStruct((Bp, NCLS_PAD), jnp.float32),
        grid=(Bp // tb,),
        in_specs=[
            pl.BlockSpec((tb, KP, NS), lambda i: (i, 0, 0)),        # cols (batch tile)
            pl.BlockSpec((FILTERS, KP), lambda i: (0, 0)),          # conv weight (bf16)
            pl.BlockSpec((1, FILTERS, 1), lambda i: (0, 0, 0)),     # bn scale
            pl.BlockSpec((1, FILTERS, 1), lambda i: (0, 0, 0)),     # bn shift
            pl.BlockSpec((FILTERS, PH, HID), lambda i: (0, 0, 0)),  # fc1 weight (bf16)
            pl.BlockSpec((1, HID), lambda i: (0, 0)),               # fc1 bias
            pl.BlockSpec((HID, NCLS_PAD), lambda i: (0, 0)),        # fc2 weight (bf16, padded)
            pl.BlockSpec((1, NCLS_PAD), lambda i: (0, 0)),          # fc2 bias (padded)
        ],
        out_specs=pl.BlockSpec((tb, NCLS_PAD), lambda i: (i, 0)),   # lane-dense logits
        scratch_shapes=[pltpu.VMEM((tb, FILTERS, PH), jnp.bfloat16)],
        compiler_params=pltpu.CompilerParams(
            dimension_semantics=("parallel",),
            vmem_limit_bytes=VMEM_LIMIT_BYTES),
    )(cols, wconv, scale, shift, w1, b1, w2, b2)
    return out[:B, :NCLS]                                           # (B, 10)


def cnn_reference(x, p):
    """Pure-JAX f32 reference reproducing the PyTorch forward (eval mode)."""
    conv = jax.lax.conv_general_dilated(
        x, p["conv_w"], (1, 1), ((1, 1), (1, 1)),
        dimension_numbers=("NCHW", "OIHW", "NCHW"))
    conv = conv + p["conv_b"][None, :, None, None]
    inv = 1.0 / jnp.sqrt(p["bn_var"] + BN_EPS)
    y = (conv - p["bn_mean"][None, :, None, None]) * (p["bn_gamma"] * inv)[None, :, None, None] \
        + p["bn_beta"][None, :, None, None]
    y = _act(y)
    B, F, Hh, Ww = y.shape
    pooled = y.reshape(B, F, Hh // 2, 2, Ww // 2, 2).max(axis=(3, 5))
    flat = pooled.reshape(B, -1)
    h = _act(flat @ p["fc1_w"].T + p["fc1_b"])
    return h @ p["fc2_w"].T + p["fc2_b"]


if __name__ == "__main__":
    key = jax.random.PRNGKey(0)
    ks = jax.random.split(key, 11)
    F = FILTERS

    def u(k, shape, bound):
        return jax.random.uniform(k, shape, jnp.float32, -bound, bound)

    params = {
        "conv_w":   u(ks[0], (F, 3, 3, 3), 1.0 / np.sqrt(27.0)),
        "conv_b":   u(ks[1], (F,), 1.0 / np.sqrt(27.0)),
        "bn_gamma": 1.0 + 0.1 * jax.random.normal(ks[2], (F,), jnp.float32),
        "bn_beta":  0.1 * jax.random.normal(ks[3], (F,), jnp.float32),
        "bn_mean":  0.1 * jax.random.normal(ks[4], (F,), jnp.float32),
        "bn_var":   jax.random.uniform(ks[5], (F,), jnp.float32, 0.5, 1.5),
        "fc1_w":    u(ks[6], (HID, F * PH), 1.0 / np.sqrt(F * PH)),
        "fc1_b":    u(ks[7], (HID,), 1.0 / np.sqrt(F * PH)),
        "fc2_w":    u(ks[8], (NCLS, HID), 1.0 / np.sqrt(HID)),
        "fc2_b":    u(ks[9], (NCLS,), 1.0 / np.sqrt(HID)),
    }
    # Module structure (fc1 = Linear(filters*16*16, 64)) fixes spatial=32x32, cin=3;
    # batch=64 keeps the grid at 2 steps with TB=32 (both v7x TensorCores busy).
    x = jax.random.normal(ks[10], (64, 3, H, W), jnp.float32)   # NCHW, like PyTorch

    out = jax.block_until_ready(cnn_forward(x, params))
    ref = cnn_reference(x, params)
    np.testing.assert_allclose(np.asarray(out), np.asarray(ref), rtol=2e-2, atol=2e-2)
    print("KERNEL_OK")
</pallas_src>

<mosaic_0001>
module attributes {stable_mosaic.version = 11 : i64} {
  func.func @cnn_kernel(%arg0: i32, %arg1: memref<32x32x1024xbf16, #tpu.memory_space<vmem>>, %arg2: memref<8x32xbf16, #tpu.memory_space<vmem>>, %arg3: memref<1x8x1xf32, #tpu.memory_space<vmem>>, %arg4: memref<1x8x1xf32, #tpu.memory_space<vmem>>, %arg5: memref<8x256x64xbf16, #tpu.memory_space<vmem>>, %arg6: memref<1x64xf32, #tpu.memory_space<vmem>>, %arg7: memref<64x128xbf16, #tpu.memory_space<vmem>>, %arg8: memref<1x128xf32, #tpu.memory_space<vmem>>, %arg9: memref<32x128xf32, #tpu.memory_space<vmem>>, %arg10: memref<32x8x256xbf16, #tpu.memory_space<vmem>>) attributes {dimension_semantics = [#tpu.dimension_semantics<parallel>], iteration_bounds = array<i64: 2>, scalar_prefetch = 0 : i64, scratch_operands = 1 : i64, tpu.core_type = #tpu.core_type<tc>, window_params = [{transform_indices = @transform_0, window_bounds = array<i64: 32, 32, 1024>}, {pipeline_mode = #tpu.pipeline_mode<synchronous>, transform_indices = @transform_1, window_bounds = array<i64: 8, 32>}, {pipeline_mode = #tpu.pipeline_mode<synchronous>, transform_indices = @transform_2, window_bounds = array<i64: 1, 8, 1>}, {pipeline_mode = #tpu.pipeline_mode<synchronous>, transform_indices = @transform_3, window_bounds = array<i64: 1, 8, 1>}, {pipeline_mode = #tpu.pipeline_mode<synchronous>, transform_indices = @transform_4, window_bounds = array<i64: 8, 256, 64>}, {pipeline_mode = #tpu.pipeline_mode<synchronous>, transform_indices = @transform_5, window_bounds = array<i64: 1, 64>}, {pipeline_mode = #tpu.pipeline_mode<synchronous>, transform_indices = @transform_6, window_bounds = array<i64: 64, 128>}, {pipeline_mode = #tpu.pipeline_mode<synchronous>, transform_indices = @transform_7, window_bounds = array<i64: 1, 128>}, {transform_indices = @transform_8, window_bounds = array<i64: 32, 128>}]} {
    %c0 = arith.constant 0 : index
    %c0_0 = arith.constant 0 : index
    %0 = vector.load %arg2[%c0, %c0_0] : memref<8x32xbf16, #tpu.memory_space<vmem>>, vector<8x32xbf16>
    %1 = vector.shape_cast %0 : vector<8x32xbf16> to vector<1x8x32xbf16>
    %2 = vector.shape_cast %1 : vector<1x8x32xbf16> to vector<1x8x32xbf16>
    %3 = vector.broadcast %2 : vector<1x8x32xbf16> to vector<32x8x32xbf16>
    %c0_1 = arith.constant 0 : index
    %c0_2 = arith.constant 0 : index
    %c0_3 = arith.constant 0 : index
    %4 = vector.load %arg1[%c0_1, %c0_2, %c0_3] : memref<32x32x1024xbf16, #tpu.memory_space<vmem>>, vector<32x32x1024xbf16>
    "tpu.trace_start"() <{level = 10 : i32, message = "bfk,bkn->bfn"}> : () -> ()
    %cst = arith.constant dense<0.000000e+00> : vector<32x8x1024xf32>
    %5 = tpu.matmul %3, %4, %cst {dimension_numbers = #tpu.dot_dimension_numbers<[2], [1], [1], [2], [0, 0, 0, 1, 1, 2], [0], [0]>} : vector<32x8x32xbf16>, vector<32x32x1024xbf16>, vector<32x8x1024xf32> -> vector<32x8x1024xf32>
    "tpu.trace_stop"() : () -> ()
    %c0_4 = arith.constant 0 : index
    %c0_5 = arith.constant 0 : index
    %c0_6 = arith.constant 0 : index
    %6 = vector.load %arg3[%c0_4, %c0_5, %c0_6] : memref<1x8x1xf32, #tpu.memory_space<vmem>>, vector<1x8x1xf32>
    %7 = vector.broadcast %6 : vector<1x8x1xf32> to vector<32x8x1024xf32>
    %8 = arith.mulf %5, %7 : vector<32x8x1024xf32>
    %c0_7 = arith.constant 0 : index
    %c0_8 = arith.constant 0 : index
    %c0_9 = arith.constant 0 : index
    %9 = vector.load %arg4[%c0_7, %c0_8, %c0_9] : memref<1x8x1xf32, #tpu.memory_space<vmem>>, vector<1x8x1xf32>
    %10 = vector.broadcast %9 : vector<1x8x1xf32> to vector<32x8x1024xf32>
    %11 = arith.addf %8, %10 : vector<32x8x1024xf32>
    %cst_10 = arith.constant 0.000000e+00 : f32
    %12 = vector.broadcast %cst_10 : f32 to vector<32x8x1024xf32>
    %13 = arith.maximumf %11, %12 : vector<32x8x1024xf32>
    %14 = arith.truncf %13 : vector<32x8x1024xf32> to vector<32x8x1024xbf16>
    %15 = vector.extract_strided_slice %14 {offsets = [0, 0, 0], sizes = [32, 8, 256], strides = [1, 1, 1]} : vector<32x8x1024xbf16> to vector<32x8x256xbf16>
    %16 = vector.extract_strided_slice %14 {offsets = [0, 0, 256], sizes = [32, 8, 256], strides = [1, 1, 1]} : vector<32x8x1024xbf16> to vector<32x8x256xbf16>
    %17 = arith.maximumf %15, %16 : vector<32x8x256xbf16>
    %18 = vector.extract_strided_slice %14 {offsets = [0, 0, 512], sizes = [32, 8, 256], strides = [1, 1, 1]} : vector<32x8x1024xbf16> to vector<32x8x256xbf16>
    %19 = vector.extract_strided_slice %14 {offsets = [0, 0, 768], sizes = [32, 8, 256], strides = [1, 1, 1]} : vector<32x8x1024xbf16> to vector<32x8x256xbf16>
    %20 = arith.maximumf %18, %19 : vector<32x8x256xbf16>
    %21 = arith.maximumf %17, %20 : vector<32x8x256xbf16>
    %c0_11 = arith.constant 0 : index
    %c0_12 = arith.constant 0 : index
    %c0_13 = arith.constant 0 : index
    %22 = vector.load %arg10[%c0_11, %c0_12, %c0_13] : memref<32x8x256xbf16, #tpu.memory_space<vmem>>, vector<32x8x256xbf16>
    tpu.vector_store %arg10[%c0_11, %c0_12, %c0_13], %21 {strides = array<i32>} : memref<32x8x256xbf16, #tpu.memory_space<vmem>>, vector<32x8x256xbf16>,
    %c0_14 = arith.constant 0 : index
    %c0_15 = arith.constant 0 : index
    %c0_16 = arith.constant 0 : index
    %23 = vector.load %arg10[%c0_14, %c0_15, %c0_16] : memref<32x8x256xbf16, #tpu.memory_space<vmem>>, vector<32x1x256xbf16>
    %24 = vector.shape_cast %23 : vector<32x1x256xbf16> to vector<32x256xbf16>
    %c0_17 = arith.constant 0 : index
    %c0_18 = arith.constant 0 : index
    %c0_19 = arith.constant 0 : index
    %25 = vector.load %arg5[%c0_17, %c0_18, %c0_19] : memref<8x256x64xbf16, #tpu.memory_space<vmem>>, vector<1x256x64xbf16>
    %26 = vector.shape_cast %25 : vector<1x256x64xbf16> to vector<256x64xbf16>
    %cst_20 = arith.constant dense<0.000000e+00> : vector<32x64xf32>
    %27 = tpu.matmul %24, %26, %cst_20 {dimension_numbers = #tpu.dot_dimension_numbers<[1], [0], [0], [1], [0, 0, 1, 1], [], []>} : vector<32x256xbf16>, vector<256x64xbf16>, vector<32x64xf32> -> vector<32x64xf32>
    %c0_21 = arith.constant 0 : index
    %c1 = arith.constant 1 : index
    %c0_22 = arith.constant 0 : index
    %28 = vector.load %arg10[%c0_21, %c1, %c0_22] : memref<32x8x256xbf16, #tpu.memory_space<vmem>>, vector<32x1x256xbf16>
    %29 = vector.shape_cast %28 : vector<32x1x256xbf16> to vector<32x256xbf16>
    %c1_23 = arith.constant 1 : index
    %c0_24 = arith.constant 0 : index
    %c0_25 = arith.constant 0 : index
    %30 = vector.load %arg5[%c1_23, %c0_24, %c0_25] : memref<8x256x64xbf16, #tpu.memory_space<vmem>>, vector<1x256x64xbf16>
    %31 = vector.shape_cast %30 : vector<1x256x64xbf16> to vector<256x64xbf16>
    %cst_26 = arith.constant dense<0.000000e+00> : vector<32x64xf32>
    %32 = tpu.matmul %29, %31, %cst_26 {dimension_numbers = #tpu.dot_dimension_numbers<[1], [0], [0], [1], [0, 0, 1, 1], [], []>} : vector<32x256xbf16>, vector<256x64xbf16>, vector<32x64xf32> -> vector<32x64xf32>
    %c0_27 = arith.constant 0 : index
    %c2 = arith.constant 2 : index
    %c0_28 = arith.constant 0 : index
    %33 = vector.load %arg10[%c0_27, %c2, %c0_28] : memref<32x8x256xbf16, #tpu.memory_space<vmem>>, vector<32x1x256xbf16>
    %34 = vector.shape_cast %33 : vector<32x1x256xbf16> to vector<32x256xbf16>
    %c2_29 = arith.constant 2 : index
    %c0_30 = arith.constant 0 : index
    %c0_31 = arith.constant 0 : index
    %35 = vector.load %arg5[%c2_29, %c0_30, %c0_31] : memref<8x256x64xbf16, #tpu.memory_space<vmem>>, vector<1x256x64xbf16>
    %36 = vector.shape_cast %35 : vector<1x256x64xbf16> to vector<256x64xbf16>
    %cst_32 = arith.constant dense<0.000000e+00> : vector<32x64xf32>
    %37 = tpu.matmul %34, %36, %cst_32 {dimension_numbers = #tpu.dot_dimension_numbers<[1], [0], [0], [1], [0, 0, 1, 1], [], []>} : vector<32x256xbf16>, vector<256x64xbf16>, vector<32x64xf32> -> vector<32x64xf32>
    %c0_33 = arith.constant 0 : index
    %c3 = arith.constant 3 : index
    %c0_34 = arith.constant 0 : index
    %38 = vector.load %arg10[%c0_33, %c3, %c0_34] : memref<32x8x256xbf16, #tpu.memory_space<vmem>>, vector<32x1x256xbf16>
    %39 = vector.shape_cast %38 : vector<32x1x256xbf16> to vector<32x256xbf16>
    %c3_35 = arith.constant 3 : index
    %c0_36 = arith.constant 0 : index
    %c0_37 = arith.constant 0 : index
    %40 = vector.load %arg5[%c3_35, %c0_36, %c0_37] : memref<8x256x64xbf16, #tpu.memory_space<vmem>>, vector<1x256x64xbf16>
    %41 = vector.shape_cast %40 : vector<1x256x64xbf16> to vector<256x64xbf16>
    %cst_38 = arith.constant dense<0.000000e+00> : vector<32x64xf32>
    %42 = tpu.matmul %39, %41, %cst_38 {dimension_numbers = #tpu.dot_dimension_numbers<[1], [0], [0], [1], [0, 0, 1, 1], [], []>} : vector<32x256xbf16>, vector<256x64xbf16>, vector<32x64xf32> -> vector<32x64xf32>
    %c0_39 = arith.constant 0 : index
    %c4 = arith.constant 4 : index
    %c0_40 = arith.constant 0 : index
    %43 = vector.load %arg10[%c0_39, %c4, %c0_40] : memref<32x8x256xbf16, #tpu.memory_space<vmem>>, vector<32x1x256xbf16>
    %44 = vector.shape_cast %43 : vector<32x1x256xbf16> to vector<32x256xbf16>
    %c4_41 = arith.constant 4 : index
    %c0_42 = arith.constant 0 : index
    %c0_43 = arith.constant 0 : index
    %45 = vector.load %arg5[%c4_41, %c0_42, %c0_43] : memref<8x256x64xbf16, #tpu.memory_space<vmem>>, vector<1x256x64xbf16>
    %46 = vector.shape_cast %45 : vector<1x256x64xbf16> to vector<256x64xbf16>
    %cst_44 = arith.constant dense<0.000000e+00> : vector<32x64xf32>
    %47 = tpu.matmul %44, %46, %cst_44 {dimension_numbers = #tpu.dot_dimension_numbers<[1], [0], [0], [1], [0, 0, 1, 1], [], []>} : vector<32x256xbf16>, vector<256x64xbf16>, vector<32x64xf32> -> vector<32x64xf32>
    %c0_45 = arith.constant 0 : index
    %c5 = arith.constant 5 : index
    %c0_46 = arith.constant 0 : index
    %48 = vector.load %arg10[%c0_45, %c5, %c0_46] : memref<32x8x256xbf16, #tpu.memory_space<vmem>>, vector<32x1x256xbf16>
    %49 = vector.shape_cast %48 : vector<32x1x256xbf16> to vector<32x256xbf16>
    %c5_47 = arith.constant 5 : index
    %c0_48 = arith.constant 0 : index
    %c0_49 = arith.constant 0 : index
    %50 = vector.load %arg5[%c5_47, %c0_48, %c0_49] : memref<8x256x64xbf16, #tpu.memory_space<vmem>>, vector<1x256x64xbf16>
    %51 = vector.shape_cast %50 : vector<1x256x64xbf16> to vector<256x64xbf16>
    %cst_50 = arith.constant dense<0.000000e+00> : vector<32x64xf32>
    %52 = tpu.matmul %49, %51, %cst_50 {dimension_numbers = #tpu.dot_dimension_numbers<[1], [0], [0], [1], [0, 0, 1, 1], [], []>} : vector<32x256xbf16>, vector<256x64xbf16>, vector<32x64xf32> -> vector<32x64xf32>
    %c0_51 = arith.constant 0 : index
    %c6 = arith.constant 6 : index
    %c0_52 = arith.constant 0 : index
    %53 = vector.load %arg10[%c0_51, %c6, %c0_52] : memref<32x8x256xbf16, #tpu.memory_space<vmem>>, vector<32x1x256xbf16>
    %54 = vector.shape_cast %53 : vector<32x1x256xbf16> to vector<32x256xbf16>
    %c6_53 = arith.constant 6 : index
    %c0_54 = arith.constant 0 : index
    %c0_55 = arith.constant 0 : index
    %55 = vector.load %arg5[%c6_53, %c0_54, %c0_55] : memref<8x256x64xbf16, #tpu.memory_space<vmem>>, vector<1x256x64xbf16>
    %56 = vector.shape_cast %55 : vector<1x256x64xbf16> to vector<256x64xbf16>
    %cst_56 = arith.constant dense<0.000000e+00> : vector<32x64xf32>
    %57 = tpu.matmul %54, %56, %cst_56 {dimension_numbers = #tpu.dot_dimension_numbers<[1], [0], [0], [1], [0, 0, 1, 1], [], []>} : vector<32x256xbf16>, vector<256x64xbf16>, vector<32x64xf32> -> vector<32x64xf32>
    %c0_57 = arith.constant 0 : index
    %c7 = arith.constant 7 : index
    %c0_58 = arith.constant 0 : index
    %58 = vector.load %arg10[%c0_57, %c7, %c0_58] : memref<32x8x256xbf16, #tpu.memory_space<vmem>>, vector<32x1x256xbf16>
    %59 = vector.shape_cast %58 : vector<32x1x256xbf16> to vector<32x256xbf16>
    %c7_59 = arith.constant 7 : index
    %c0_60 = arith.constant 0 : index
    %c0_61 = arith.constant 0 : index
    %60 = vector.load %arg5[%c7_59, %c0_60, %c0_61] : memref<8x256x64xbf16, #tpu.memory_space<vmem>>, vector<1x256x64xbf16>
    %61 = vector.shape_cast %60 : vector<1x256x64xbf16> to vector<256x64xbf16>
    %cst_62 = arith.constant dense<0.000000e+00> : vector<32x64xf32>
    %62 = tpu.matmul %59, %61, %cst_62 {dimension_numbers = #tpu.dot_dimension_numbers<[1], [0], [0], [1], [0, 0, 1, 1], [], []>} : vector<32x256xbf16>, vector<256x64xbf16>, vector<32x64xf32> -> vector<32x64xf32>
    %63 = arith.addf %27, %32 : vector<32x64xf32>
    %64 = arith.addf %37, %42 : vector<32x64xf32>
    %65 = arith.addf %47, %52 : vector<32x64xf32>
    %66 = arith.addf %57, %62 : vector<32x64xf32>
    %67 = arith.addf %63, %64 : vector<32x64xf32>
    %68 = arith.addf %65, %66 : vector<32x64xf32>
    %69 = arith.addf %67, %68 : vector<32x64xf32>
    %c0_63 = arith.constant 0 : index
    %c0_64 = arith.constant 0 : index
    %70 = vector.load %arg6[%c0_63, %c0_64] : memref<1x64xf32, #tpu.memory_space<vmem>>, vector<1x64xf32>
    %71 = vector.broadcast %70 : vector<1x64xf32> to vector<32x64xf32>
    %72 = arith.addf %69, %71 : vector<32x64xf32>
    %cst_65 = arith.constant 0.000000e+00 : f32
    %73 = vector.broadcast %cst_65 : f32 to vector<32x64xf32>
    %74 = arith.maximumf %72, %73 : vector<32x64xf32>
    %75 = arith.truncf %74 : vector<32x64xf32> to vector<32x64xbf16>
    %c0_66 = arith.constant 0 : index
    %c0_67 = arith.constant 0 : index
    %76 = vector.load %arg7[%c0_66, %c0_67] : memref<64x128xbf16, #tpu.memory_space<vmem>>, vector<64x128xbf16>
    %cst_68 = arith.constant dense<0.000000e+00> : vector<32x128xf32>
    %77 = tpu.matmul %75, %76, %cst_68 {dimension_numbers = #tpu.dot_dimension_numbers<[1], [0], [0], [1], [0, 0, 1, 1], [], []>} : vector<32x64xbf16>, vector<64x128xbf16>, vector<32x128xf32> -> vector<32x128xf32>
    %c0_69 = arith.constant 0 : index
    %c0_70 = arith.constant 0 : index
    %78 = vector.load %arg8[%c0_69, %c0_70] : memref<1x128xf32, #tpu.memory_space<vmem>>, vector<1x128xf32>
    %79 = vector.broadcast %78 : vector<1x128xf32> to vector<32x128xf32>
    %80 = arith.addf %77, %79 : vector<32x128xf32>
    %c0_71 = arith.constant 0 : index
    %c0_72 = arith.constant 0 : index
    %81 = vector.load %arg9[%c0_71, %c0_72] : memref<32x128xf32, #tpu.memory_space<vmem>>, vector<32x128xf32>
    tpu.vector_store %arg9[%c0_71, %c0_72], %80 {strides = array<i32>} : memref<32x128xf32, #tpu.memory_space<vmem>>, vector<32x128xf32>,
    return
  }
  func.func @transform_0(%arg0: i32) -> (i32, i32, i32) {
    %c0_i32 = arith.constant 0 : i32
    %c0_i32_0 = arith.constant 0 : i32
    %c0_i32_1 = arith.constant 0 : i32
    return %arg0, %c0_i32, %c0_i32_0 : i32, i32, i32
  }
  func.func @transform_1(%arg0: i32) -> (i32, i32) {
    %c0_i32 = arith.constant 0 : i32
    %c0_i32_0 = arith.constant 0 : i32
    %c0_i32_1 = arith.constant 0 : i32
    return %c0_i32, %c0_i32_0 : i32, i32
  }
  func.func @transform_2(%arg0: i32) -> (i32, i32, i32) {
    %c0_i32 = arith.constant 0 : i32
    %c0_i32_0 = arith.constant 0 : i32
    %c0_i32_1 = arith.constant 0 : i32
    %c0_i32_2 = arith.constant 0 : i32
    return %c0_i32, %c0_i32_0, %c0_i32_1 : i32, i32, i32
  }
  func.func @transform_3(%arg0: i32) -> (i32, i32, i32) {
    %c0_i32 = arith.constant 0 : i32
    %c0_i32_0 = arith.constant 0 : i32
    %c0_i32_1 = arith.constant 0 : i32
    %c0_i32_2 = arith.constant 0 : i32
    return %c0_i32, %c0_i32_0, %c0_i32_1 : i32, i32, i32
  }
  func.func @transform_4(%arg0: i32) -> (i32, i32, i32) {
    %c0_i32 = arith.constant 0 : i32
    %c0_i32_0 = arith.constant 0 : i32
    %c0_i32_1 = arith.constant 0 : i32
    %c0_i32_2 = arith.constant 0 : i32
    return %c0_i32, %c0_i32_0, %c0_i32_1 : i32, i32, i32
  }
  func.func @transform_5(%arg0: i32) -> (i32, i32) {
    %c0_i32 = arith.constant 0 : i32
    %c0_i32_0 = arith.constant 0 : i32
    %c0_i32_1 = arith.constant 0 : i32
    return %c0_i32, %c0_i32_0 : i32, i32
  }
  func.func @transform_6(%arg0: i32) -> (i32, i32) {
    %c0_i32 = arith.constant 0 : i32
    %c0_i32_0 = arith.constant 0 : i32
    %c0_i32_1 = arith.constant 0 : i32
    return %c0_i32, %c0_i32_0 : i32, i32
  }
  func.func @transform_7(%arg0: i32) -> (i32, i32) {
    %c0_i32 = arith.constant 0 : i32
    %c0_i32_0 = arith.constant 0 : i32
    %c0_i32_1 = arith.constant 0 : i32
    return %c0_i32, %c0_i32_0 : i32, i32
  }
  func.func @transform_8(%arg0: i32) -> (i32, i32) {
    %c0_i32 = arith.constant 0 : i32
    %c0_i32_0 = arith.constant 0 : i32
    return %arg0, %c0_i32 : i32, i32
  }
}

</mosaic_0001>

<bundles_post_ra>
// kernel: tpu_custom_call.1
= control target key start
LH: loop header
LB: loop body
LE: loop exit
PB: predicated region body
PF: predicated region fallthrough
CT: control target
= control target key end

     0   :  { %s23668_s0 = inlined_call_operand.hbm [shape: bf16[64,32,1024], index: 0, kind: input, shape index: {}]   ;;  %s23669_s1 = inlined_call_operand.hbm [shape: bf16[8,32], index: 1, kind: input, shape index: {}]   ;;  %s23670_s2 = inlined_call_operand.vmem [shape: f32[1,8,1], index: 2, kind: input, shape index: {}]   ;;  %s23671_s3 = inlined_call_operand.vmem [shape: f32[1,8,1], index: 3, kind: input, shape index: {}]   ;;  %s23672_s4 = inlined_call_operand.vmem [shape: bf16[8,256,64], index: 4, kind: input, shape index: {}]   ;;  %s23673_s5 = inlined_call_operand.hbm [shape: f32[1,64], index: 5, kind: input, shape index: {}]   ;;  %s23674_s6 = inlined_call_operand.hbm [shape: bf16[64,128], index: 6, kind: input, shape index: {}]   ;;  %s23675_s7 = inlined_call_operand.hbm [shape: f32[1,128], index: 7, kind: input, shape index: {}]   ;;  %s23676_s8 = inlined_call_operand.hbm [shape: f32[64,128], index: 8, kind: output, shape index: {}]  }
   0x1   :  { %24396 = sst [smem:[#allocation235_spill]] %s23669_s1 }
   0x2   :  { %24397 = sst [smem:[#allocation236_spill]] %s23673_s5 }
   0x3   :  { %13 = vsyncpa [#allocation4], 0 }
   0x4   :  { %15 = vsyncpa [#allocation4 + $0x1], 0 }
   0x5   :  { %16 = vsyncpa [#allocation7], 0 }
   0x6   :  { %17 = vsyncpa [#allocation10], 0 }
   0x7   :  { %18 = vsyncpa [#allocation5], 0 }
   0x8   :  { %20 = vsyncpa [#allocation5 + $0x1], 0  ;;  %s16133_s27 = smov 0   ;;  %s16135_s28 = smov 0  }
   0x9   :  { %s16137_s29 = smov 0   ;;  %s16139_s30 = smov 0  }
   0xa LB: > { %s16154_s9 = sadd.s32 4294967295, %s16073_s30   ;;  %s13824_s10 = sadd.s32 4294967294, %s16073_s30   ;;  %s16073_s30 = sphi %s16139_s30, %s25923_s30   ;;  %s16069_s29 = sphi %s16137_s29, %s25922_s29   ;;  %s16065_s28 = sphi %s16135_s28, %s25921_s28   ;;  %s16061_s27 = sphi %s16133_s27, %s25920_s27  }
   0xb   : > { %p46_p0 = scmp.ne.s32.totalorder %s16065_s28, %s16061_s27  ;;  %p23677_p1 = scmp.eq.s32.totalorder %s16154_s9, 0 }
   0xc   : > { %p223_p3 = scmp.eq.s32.totalorder %s13824_s10, 1  ;;  %p13825_p5 = scmp.ge.s32.totalorder %s16073_s30, 1 }
   0xd   : > { %p16163_p4 = por %p23677_p1, %p46_p0  ;;  %p230_p7 = scmp.lt.s32.totalorder %s16073_s30, 3 }
   0xe   : > { %p16168_p6 = por %p223_p3, %p46_p0  ;;  %s16075_s14 = smov [#allocation6]  }
   0xf   : > { %s24398_s11 = scalar_select %p16163_p4, 1, 0 }
  0x10   : > { %s24399_s12 = scalar_select %p16168_p6, 1, 0 }
  0x11   : > { %p16173_p8 = pnand %p13825_p5, %p230_p7  ;;  %s243_s15 = sshll.u32 %s16075_s14, 4  ;;  %s244_s15 = int_to_ptr.vmem [resolvable:$true] %s243_s15 }
  0x12   : > { %s16076_s16 = smov [#allocation9]   ;;  %s16077_s19 = smov [#allocation8]  }
  0x13   : > { %s24400_s13 = scalar_select %p16173_p8, 1, 0 }
  0x14   : > { %p15400_p10 = pneg %p16173_p8  ;;  %s273_s17 = sshll.u32 %s16076_s16, 4  ;;  %s274_s17 = int_to_ptr.vmem [resolvable:$true] %s273_s17 }
  0x15   : > { %s263_s20 = sshll.u32 %s16077_s19, 4  ;;  %s15880_s21 = scalar_lea.vmem %s244_s15, 64  ;;  %s264_s20 = int_to_ptr.vmem [resolvable:$true] %s263_s20 }
  0x16   : > { %p16182_p11 = pnand %p15400_p10, %p23677_p1  ;;  %p15881_p13 = scmp.ne.s32.totalorder %s244_s15, %s15880_s21 }
  0x17   : > { %p15888_p5 = scmp.lt.s32.totalorder %s244_s15, %s244_s15  ;;  %p15889_p7 = scmp.lt.s32.totalorder %s15880_s21, %s15880_s21 }
  0x18   : > { %p15871_p12 = pneg %p16182_p11 }
  0x19   : > { %p15890_p9 = por %p15889_p7, %p15888_p5 }
  0x1a   : > { %p15883_p0 = pnand %p15881_p13, %p15871_p12 }
  0x1c   : > { %p15884_p3 = pneg %p15883_p0 }
  0x1e   : > { %p15891_p10 = pnand %p15890_p9, %p15884_p3 }
  0x20   : > { %15894 = shalt.err (!%p15891_p10)
}
  0x21   : > { %s24402_s1 = sld [smem:[#allocation235_spill]]  ;;  %s15906_s24 = scalar_lea.vmem %s274_s17, 512 }
  0x22   : > { %p15907_p1 = scmp.ne.s32.totalorder %s274_s17, %s15906_s24  ;;  %p15914_p13 = scmp.lt.s32.totalorder %s274_s17, %s274_s17 }
  0x23   : > { %p15915_p0 = scmp.lt.s32.totalorder %s15906_s24, %s15906_s24 }
  0x24   : > { %p15909_p2 = pnand %p15907_p1, %p15871_p12 }
  0x25   : > { %p15916_p4 = por %p15915_p0, %p15914_p13 }
  0x26   : > { %p15910_p6 = pneg %p15909_p2 }
  0x27   : > { %15403 = dma.hbm_to_vmem [thread:$0]  (!%p16182_p11), %s24402_s1, 64, %s244_s15, [#allocation7]  }
  0x28   : > { %p15917_p8 = pnand %p15916_p4, %p15910_p6 }
  0x2a   : > { %15920 = shalt.err (!%p15917_p8)
}
  0x2b   : > { %s16078_s25 = smov 64   ;;  %s16079_s26 = smov 4  }
  0x2c   : > { %15409 = dma.hbm_to_vmem [thread:$0]  (!%p16182_p11), %s23674_s6, 512, %s274_s17, [#allocation10], %s16078_s25, %s16078_s25, %s16079_s26  }
  0x2d   : > { %s15932_s15 = scalar_lea.vmem %s264_s20, 16  ;;  %s15939_s16 = scalar_lea.vmem %s264_s20, 32 }
  0x2e   : > { %p15933_p9 = scmp.ne.s32.totalorder %s264_s20, %s15932_s15  ;;  %p15940_p3 = scmp.lt.s32.totalorder %s264_s20, %s264_s20 }
  0x2f   : > { %p15941_p4 = scmp.lt.s32.totalorder %s15939_s16, %s15932_s15 }
  0x30   : > { %p15935_p1 = pnand %p15933_p9, %p15871_p12 }
  0x31   : > { %p15942_p6 = por %p15941_p4, %p15940_p3 }
  0x32   : > { %p15936_p2 = pneg %p15935_p1 }
  0x34   : > { %p15943_p8 = pnand %p15942_p6, %p15936_p2 }
  0x36   : > { %15946 = shalt.err (!%p15943_p8)
}
  0x37   : > { %s24403_s5 = sld [smem:[#allocation236_spill]]  ;;  %s16080_s17 = smov [#allocation11]  }
  0x38   : > { %s287_s22 = sshll.u32 %s16080_s17, 4  ;;  %s288_s22 = int_to_ptr.vmem [resolvable:$true] %s287_s22 }
  0x39   : > { %s15958_s23 = scalar_lea.vmem %s288_s22, 16  ;;  %s15965_s24 = scalar_lea.vmem %s288_s22, 32 }
  0x3a   : > { %p15959_p5 = scmp.ne.s32.totalorder %s288_s22, %s15958_s23  ;;  %p15966_p13 = scmp.lt.s32.totalorder %s288_s22, %s288_s22 }
  0x3b   : > { %p15967_p0 = scmp.lt.s32.totalorder %s15965_s24, %s15958_s23 }
  0x3c   : > { %p15961_p7 = pnand %p15959_p5, %p15871_p12 }
  0x3d   : > { %15406 = dma.hbm_to_vmem [thread:$0]  (!%p16182_p11), %s24403_s5, 16, %s264_s20, [#allocation7]  }
  0x3e   : > { %p15962_p10 = pneg %p15961_p7  ;;  %p15968_p9 = por %p15967_p0, %p15966_p13 }
  0x40   : > { %p15969_p1 = pnand %p15968_p9, %p15962_p10 }
  0x42   : > { %15972 = shalt.err (!%p15969_p1)
}
  0x43   : > { %15412 = dma.hbm_to_vmem [thread:$0]  (!%p16182_p11), %s23675_s7, 16, %s288_s22, [#allocation10]  }
  0x44   : > { %s16221_s20 = sadd.s32 1, %s16073_s30   ;;  %s33_s10 = sadd.s32 1, %s16069_s29 }
  0x45   : > { %s30_s18 = ssub.s32 %s16073_s30, %s16221_s20  ;;  %p40_p12 = scmp.ne.s32.totalorder %s16069_s29, %s16065_s28 }
  0x46   : > { %p31_p2 = scmp.eq.s32.totalorder %s30_s18, 0  ;;  %p41_p3 = scmp.eq.s32.totalorder %s16073_s30, 0 }
  0x47   : > { %p24404_p4 = scmp.eq.s32.totalorder %s16154_s9, 1  ;;  %p15425_p8 = scmp.lt.s32.totalorder %s16073_s30, 2 }
  0x48   : > { %s16237_s15 = scalar_select %p31_p2, %s16069_s29, %s33_s10  }
  0x49   : > { %p16231_p6 = por %p24404_p4, %p40_p12  ;;  %p42_p5 = por %p41_p3, %p40_p12 }
  0x4a   : > { %s298_s16 = sand.u32 1, %s16069_s29   ;;  %s15136_s21 = sshll.u32 %s16073_s30, 16 }
  0x4b   : > { %s24405_s14 = scalar_select %p16231_p6, 1, 0 }
  0x4c   : > { %s13831_s19 = sshll.u32 %s298_s16, 12  ;;  %s16244_s23 = scalar_lea.hbm %s23668_s0, %s15136_s21 }
  0x4d   : > { %s302_s24 = scalar_lea.vmem [#allocation3], %s13831_s19  ;;  %p16248_p11 = pnand %p15425_p8, %p42_p5 }
  0x4e   : > { %s310_s25 = sshll.u32 %s302_s24, 4  ;;  %s16252_s10 = scalar_lea.sflag [#allocation4], %s298_s16  ;;  %s16246_s25 = int_to_ptr.vmem [resolvable:$true] %s310_s25 }
  0x4f   : > { %s15973_s18 = scalar_lea.hbm %s16244_s23, 65536  ;;  %p15975_p10 = pneg %p16248_p11 }
  0x50   : > { %p15974_p7 = scmp.ne.s32.totalorder %s16244_s23, %s15973_s18  ;;  %s15978_s19 = scalar_lea.hbm %s23668_s0, 131072 }
  0x51   : > { %p15979_p9 = scmp.lt.s32.totalorder %s16244_s23, %s23668_s0  ;;  %p15980_p1 = scmp.lt.s32.totalorder %s15978_s19, %s15973_s18 }
  0x52   : > { %p15976_p13 = pnand %p15975_p10, %p15974_p7 }
  0x53   : > { %p15981_p12 = por %p15980_p1, %p15979_p9 }
  0x54   : > { %p15977_p0 = pneg %p15976_p13 }
  0x56   : > { %p15982_p2 = pnand %p15981_p12, %p15977_p0 }
  0x58   : > { %15985 = shalt.err (!%p15982_p2)
}
  0x59   : > { %s15986_s16 = scalar_lea.vmem %s16246_s25, 65536  ;;  %s16081_s1 = smov [#allocation3]  }
  0x5a   : > { %p15987_p3 = scmp.ne.s32.totalorder %s16246_s25, %s15986_s16  ;;  %s15991_s5 = sshll.u32 %s16081_s1, 4  ;;  %s15992_s5 = int_to_ptr.vmem [resolvable:$false] %s15991_s5 }
  0x5b   : > { %s15993_s21 = scalar_lea.vmem %s15992_s5, 131072  ;;  %p15994_p5 = scmp.lt.s32.totalorder %s16246_s25, %s15992_s5 }
  0x5c   : > { %p15989_p4 = pnand %p15987_p3, %p15975_p10  ;;  %p15995_p7 = scmp.lt.s32.totalorder %s15993_s21, %s15986_s16 }
  0x5e   : > { %p15990_p8 = pneg %p15989_p4  ;;  %p15996_p13 = por %p15995_p7, %p15994_p5 }
  0x60   : > { %p15997_p6 = pnand %p15996_p13, %p15990_p8 }
  0x62   : > { %16000 = shalt.err (!%p15997_p6)
}
  0x63   : > { %s16082_s18 = smov 512   ;;  %s16083_s17 = smov 32  }
  0x64   : > { %15416 = dma.hbm_to_vmem [thread:$0]  (!%p16248_p11), %s16244_s23, 65536, %s16246_s25, %s16252_s10, %s16082_s18, %s16082_s18, %s16083_s17  }
  0x65   : > { %p24407_p10 = scmp.ne.s32.totalorder %s24400_s13, 0 }
  0x67   : > { %322 = sbr.rel (%p24407_p10) target bundleno = 1576 (0x628), region = 52 }
  0x6c   : > { %s16276_s1 = sand.u32 1, %s16065_s28   ;;  %p24408_p6 = scmp.ne.s32.totalorder %s24398_s11, 0 }
  0x6d   : > { %s13836_s5 = sshll.u32 %s16276_s1, 12  ;;  %s325_s19 = scalar_lea.sflag [#allocation4], %s16276_s1 }
  0x6e   : > { %s16280_s22 = scalar_lea.vmem [#allocation3], %s13836_s5 }
  0x6f   : > { %16044 = dma.done.wait (%p24408_p6), %s325_s19, 65536  }
  0x70   : > { %16046 = vsyncadd (%p24408_p6), %s325_s19, 4294901760  ;;  %p24409_p11 = scmp.eq.s32.totalorder %s16154_s9, 0 }
  0x72   : > { %16048 = dma.done.wait (%p24409_p11), [#allocation7], 80   ;;  %p24410_p0 = pmov %p24409_p11 }
  0x74   : > { %16050 = vsyncadd (%p24410_p0), [#allocation7], 4294967216  ;;  %p24411_p9 = pmov %p24410_p0 }
  0x75   : > { %p24412_p1 = pmov %p24410_p0 }
  0x76   : > { %16052 = dma.done.wait (%p24411_p9), [#allocation10], 528  }
  0x77   : > { %16054 = vsyncadd (%p24412_p1), [#allocation10], 4294966768  ;;  %v23681_v0 = vmov 0   ;;  %v389_v1 = vld [vmem:[%s16280_s22 + $0x40] sm:$0xff]  ;;  %v390_v3 = vld [vmem:[%s16280_s22 + $0x48] sm:$0xff]  ;;  %vm973_vm0 = vcmask 261120  }
  0x78   : > { %1009 = vmatprep.mubr.bf16.mxu0 %v23681_v0  ;;  %1050 = vmatprep.mubr.bf16.mxu1 %v23681_v0  ;;  %v393_v2 = vld [vmem:[%s16280_s22 + $0x60] sm:$0xff]  ;;  %v394_v5 = vld [vmem:[%s16280_s22 + $0x68] sm:$0xff]  ;;  %v391_v15 = vld [vmem:[%s16280_s22 + $0x50] sm:$0xff]  ;;  %vm10479_vm1 = vcmask 1041409   ;;  %vm10482_vm2 = vcmask 1042434   ;;  %vm10485_vm3 = vcmask 1043459  }
  0x79   : > { %15474 = vset.pattern.permute.xlu0 %v23681_v0  ;;  %v13851_v4 = vcombine.high %v389_v1, %v393_v2  ;;  %v13850_v6 = vcombine.low %v389_v1, %v393_v2  ;;  %v381_v7 = vld [vmem:[%s16280_s22] sm:$0xff]  ;;  %v13853_v9 = vcombine.high %v390_v3, %v394_v5  ;;  %v13852_v10 = vcombine.low %v390_v3, %v394_v5  ;;  %v382_v12 = vld [vmem:[%s16280_s22 + $0x8] sm:$0xff]  ;;  %v395_v16 = vld [vmem:[%s16280_s22 + $0x70] sm:$0xff]  ;;  %s13841_s21 = sshll.u32 %s16276_s1, 5  ;;  %s15137_s5 = sshll.u32 %s16154_s9, 9 }
  0x7a   : > { %v385_v8 = vld [vmem:[%s16280_s22 + $0x20] sm:$0xff]  ;;  %v386_v13 = vld [vmem:[%s16280_s22 + $0x28] sm:$0xff]  ;;  %v392_v17 = vld [vmem:[%s16280_s22 + $0x58] sm:$0xff]  ;;  %v13855_v21 = vcombine.high %v391_v15, %v395_v16  ;;  %v13854_v28 = vcombine.low %v391_v15, %v395_v16  ;;  %vm10488_vm4 = vcmask 1044484   ;;  %vm10491_vm5 = vcmask 1045509   ;;  %s376_s18 = scalar_lea.vmem [#allocation12], %s13841_s21  ;;  %s23625_s11 = scalar_lea.hbm %s23676_s8, %s15137_s5 }
  0x7b   : > { %v13843_v11 = vcombine.high %v381_v7, %v385_v8  ;;  %989 = vmatprep.subr.bf16.mxu0 %v13851_v4  ;;  %v13845_v14 = vcombine.high %v382_v12, %v386_v13  ;;  %1030 = vmatprep.subr.bf16.mxu1 %v13853_v9  ;;  %v13842_v18 = vcombine.low %v381_v7, %v385_v8  ;;  %v396_v19 = vld [vmem:[%s16280_s22 + $0x78] sm:$0xff]  ;;  %v383_v23 = vld [vmem:[%s16280_s22 + $0x10] sm:$0xff]  ;;  %v16313_v27 = vld [vmem:[#allocation6] sm:$0xf]  ;;  %vm10494_vm6 = vcmask 1046534   ;;  %s13713_s17 = sshll.u32 %s376_s18, 4  ;;  %s23620_s17 = int_to_ptr.vmem [resolvable:$true] %s13713_s17 }
  0x7c   : > { %990 = vmatpush1.bf16.msra.mxu0 %v13850_v6  ;;  %1031 = vmatpush1.bf16.msra.mxu1 %v13852_v10  ;;  %v13844_v20 = vcombine.low %v382_v12, %v386_v13  ;;  %v13857_v22 = vcombine.high %v392_v17, %v396_v19  ;;  %v387_v24 = vld [vmem:[%s16280_s22 + $0x30] sm:$0xff]  ;;  %v384_v25 = vld [vmem:[%s16280_s22 + $0x18] sm:$0xff]  ;;  %v13856_v29 = vcombine.low %v392_v17, %v396_v19  ;;  %v405_v32 = vld [vmem:[%s16280_s22 + $0xc0] sm:$0xff]  ;;  %vm10497_vm7 = vcmask 1047559   ;;  %s13700_s13 = scalar_lea.sflag [#allocation5], %s16276_s1  ;;  %s16001_s23 = scalar_lea.vmem %s23620_s17, 512 }
  0x7d   : > { %991 = vmatprep.subr.bf16.mxu0 %v13843_v11  ;;  %1032 = vmatprep.subr.bf16.mxu1 %v13845_v14  ;;  %v388_v26 = vld [vmem:[%s16280_s22 + $0x38] sm:$0xff]  ;;  %v13847_v30 = vcombine.high %v383_v23, %v387_v24  ;;  %v409_v33 = vld [vmem:[%s16280_s22 + $0xe0] sm:$0xff]  ;;  %v406_v34 = vld [vmem:[%s16280_s22 + $0xc8] sm:$0xff]  ;;  %v13846_v36 = vcombine.low %v383_v23, %v387_v24  ;;  %vm13639_vm8 = vcmask 523264   ;;  %p16002_p12 = scmp.ne.s32.totalorder %s23620_s17, %s16001_s23  ;;  %p25917_p2 = scmp.ne.s32.totalorder %s24405_s14, 0 }
  0x7e   : > { %v13849_v31 = vcombine.high %v384_v25, %v388_v26  ;;  %v410_v35 = vld [vmem:[%s16280_s22 + $0xe8] sm:$0xff]  ;;  %v13848_v37 = vcombine.low %v384_v25, %v388_v26  ;;  %v13871_v38 = vcombine.high %v405_v32, %v409_v33  ;;  %v397_v40 = vld [vmem:[%s16280_s22 + $0x80] sm:$0xff]  ;;  %v13870_v44 = vcombine.low %v405_v32, %v409_v33  ;;  %v407_v48 = vld [vmem:[%s16280_s22 + $0xd0] sm:$0xff]  ;;  %s16085_s9 = smov [#allocation12]  }
  0x7f   : > { %v13873_v39 = vcombine.high %v406_v34, %v410_v35  ;;  %v401_v41 = vld [vmem:[%s16280_s22 + $0xa0] sm:$0xff]  ;;  %v398_v42 = vld [vmem:[%s16280_s22 + $0x88] sm:$0xff]  ;;  %v13872_v45 = vcombine.low %v406_v34, %v410_v35  ;;  %v411_v49 = vld [vmem:[%s16280_s22 + $0xf0] sm:$0xff]  ;;  %p16003_p3 = pnand %p16002_p12, %p25917_p2  ;;  %s16005_s25 = sshll.u32 %s16085_s9, 4  ;;  %s16006_s25 = int_to_ptr.vmem [resolvable:$false] %s16005_s25 }
  0x80   : > { %992 = vmatpush1.bf16.msra.mxu0 %v13842_v18  ;;  %1033 = vmatpush1.bf16.msra.mxu1 %v13844_v20  ;;  %v402_v43 = vld [vmem:[%s16280_s22 + $0xa8] sm:$0xff]  ;;  %v13863_v46 = vcombine.high %v397_v40, %v401_v41  ;;  %v408_v50 = vld [vmem:[%s16280_s22 + $0xd8] sm:$0xff]  ;;  %v13862_v52 = vcombine.low %v397_v40, %v401_v41  ;;  %v13875_v54 = vcombine.high %v407_v48, %v411_v49  ;;  %v399_v56 = vld [vmem:[%s16280_s22 + $0x90] sm:$0xff]  ;;  %s16007_s26 = scalar_lea.vmem %s16006_s25, 1024  ;;  %p16008_p8 = scmp.lt.s32.totalorder %s23620_s17, %s16006_s25 }
  0x81   : > { %1071 = vmatprep.subr.bf16.mxu0 %v13855_v21  ;;  %1112 = vmatprep.subr.bf16.mxu1 %v13857_v22  ;;  %v13865_v47 = vcombine.high %v398_v42, %v402_v43  ;;  %v412_v51 = vld [vmem:[%s16280_s22 + $0xf8] sm:$0xff]  ;;  %v13864_v53 = vcombine.low %v398_v42, %v402_v43  ;;  %v403_v57 = vld [vmem:[%s16280_s22 + $0xb0] sm:$0xff]  ;;  %v13874_v60 = vcombine.low %v407_v48, %v411_v49  ;;  %v8705_v63 = vld [vmem:[%s23670_s2] sm:$0xff]  ;;  %p16004_p4 = pneg %p16003_p3  ;;  %p16009_p5 = scmp.lt.s32.totalorder %s16007_s26, %s16001_s23 }
  0x82   : > { %v13877_v55 = vcombine.high %v408_v50, %v412_v51  ;;  %v400_v58 = vld [vmem:[%s16280_s22 + $0x98] sm:$0xff]  ;;  %v13876_v61 = vcombine.low %v408_v50, %v412_v51  ;;  %v13867_v62 = vcombine.high %v399_v56, %v403_v57  ;;  %v421_v2 = vld [vmem:[%s16280_s22 + $0x140] sm:$0xff]  ;;  %8708 = vperm.xlu0 %15474, %v8705_v63   ;;  %v422_v4 = vld [vmem:[%s16280_s22 + $0x148] sm:$0xff]  ;;  %v13866_v6 = vcombine.low %v399_v56, %v403_v57 }
  0x83   : > { %13858 = vmatmul.mubr.msk.bf16.vlgmr.msra.gmra.mxu0 %vm973_vm0, %v16313_v27  ;;  %13859 = vmatmul.mubr.msk.bf16.vlgmr.msra.gmra.mxu1 %vm973_vm0, %v16313_v27  ;;  %v404_v59 = vld [vmem:[%s16280_s22 + $0xb8] sm:$0xff]  ;;  %v425_v3 = vld [vmem:[%s16280_s22 + $0x160] sm:$0xff]  ;;  %v426_v5 = vld [vmem:[%s16280_s22 + $0x168] sm:$0xff]  ;;  %p16010_p7 = por %p16009_p5, %p16008_p8 }
  0x84   : > { %1072 = vmatpush1.bf16.msra.mxu0 %v13854_v28  ;;  %1113 = vmatpush1.bf16.msra.mxu1 %v13856_v29  ;;  %v13869_v1 = vcombine.high %v400_v58, %v404_v59  ;;  %v8967_v7 = vld [vmem:[%s23671_s3] sm:$0xff]  ;;  %v13868_v8 = vcombine.low %v400_v58, %v404_v59  ;;  %v13891_v9 = vcombine.high %v421_v2, %v425_v3  ;;  %v414_v13 = vld [vmem:[%s16280_s22 + $0x108] sm:$0xff]  ;;  %v423_v19 = vld [vmem:[%s16280_s22 + $0x150] sm:$0xff] }
  0x85   : > { %1073 = vmatprep.subr.bf16.mxu0 %v13847_v30  ;;  %1114 = vmatprep.subr.bf16.mxu1 %v13849_v31  ;;  %v13893_v10 = vcombine.high %v422_v4, %v426_v5  ;;  %v413_v11 = vld [vmem:[%s16280_s22 + $0x100] sm:$0xff]  ;;  %v418_v14 = vld [vmem:[%s16280_s22 + $0x128] sm:$0xff]  ;;  %v13890_v15 = vcombine.low %v421_v2, %v425_v3  ;;  %v13892_v16 = vcombine.low %v422_v4, %v426_v5  ;;  %v427_v20 = vld [vmem:[%s16280_s22 + $0x170] sm:$0xff]  ;;  %p16011_p13 = pnand %p16010_p7, %p16004_p4 }
  0x86   : > { %1091 = vmatprep.mubr.bf16.mxu0 %v23681_v0  ;;  %1132 = vmatprep.mubr.bf16.mxu1 %v23681_v0  ;;  %v417_v12 = vld [vmem:[%s16280_s22 + $0x120] sm:$0xff]  ;;  %v13885_v18 = vcombine.high %v414_v13, %v418_v14  ;;  %v424_v21 = vld [vmem:[%s16280_s22 + $0x158] sm:$0xff]  ;;  %v13884_v24 = vcombine.low %v414_v13, %v418_v14  ;;  %v13895_v25 = vcombine.high %v423_v19, %v427_v20  ;;  %v415_v28 = vld [vmem:[%s16280_s22 + $0x110] sm:$0xff] }
  0x87   : > { %8970 = vperm.xlu0 %15474, %v8967_v7   ;;  %v13883_v17 = vcombine.high %v413_v11, %v417_v12  ;;  %v428_v22 = vld [vmem:[%s16280_s22 + $0x178] sm:$0xff]  ;;  %v13882_v23 = vcombine.low %v413_v11, %v417_v12  ;;  %v419_v29 = vld [vmem:[%s16280_s22 + $0x130] sm:$0xff]  ;;  %v13894_v32 = vcombine.low %v423_v19, %v427_v20  ;;  %v453_v5 = vld [vmem:[%s16280_s22 + $0x240] sm:$0xff] }
  0x88   : > { %1074 = vmatpush1.bf16.msra.mxu0 %v13846_v36  ;;  %1115 = vmatpush1.bf16.msra.mxu1 %v13848_v37  ;;  %v13897_v26 = vcombine.high %v424_v21, %v428_v22  ;;  %v416_v30 = vld [vmem:[%s16280_s22 + $0x118] sm:$0xff]  ;;  %v13896_v33 = vcombine.low %v424_v21, %v428_v22  ;;  %v13887_v34 = vcombine.high %v415_v28, %v419_v29  ;;  %v437_v36 = vld [vmem:[%s16280_s22 + $0x1c0] sm:$0xff]  ;;  %v454_v7 = vld [vmem:[%s16280_s22 + $0x248] sm:$0xff] }
  0x89   : > { %1233 = vmatprep.subr.bf16.mxu0 %v13871_v38  ;;  %1274 = vmatprep.subr.bf16.mxu1 %v13873_v39  ;;  %v420_v31 = vld [vmem:[%s16280_s22 + $0x138] sm:$0xff]  ;;  %v441_v37 = vld [vmem:[%s16280_s22 + $0x1e0] sm:$0xff]  ;;  %v438_v38 = vld [vmem:[%s16280_s22 + $0x1c8] sm:$0xff]  ;;  %v13886_v40 = vcombine.low %v415_v28, %v419_v29 }
  0x8a   : > { %v13889_v35 = vcombine.high %v416_v30, %v420_v31  ;;  %v442_v39 = vld [vmem:[%s16280_s22 + $0x1e8] sm:$0xff]  ;;  %v13888_v41 = vcombine.low %v416_v30, %v420_v31  ;;  %v13911_v42 = vcombine.high %v437_v36, %v441_v37  ;;  %v13910_v48 = vcombine.low %v437_v36, %v441_v37  ;;  %v436_v63 = vld [vmem:[%s16280_s22 + $0x1b8] sm:$0xff]  ;;  %v445_v13 = vld [vmem:[%s16280_s22 + $0x200] sm:$0xff] }
  0x8b   : > { %13860 = vmatmul.mubr.msk.bf16.vlgmr.msra.gmra.mxu0 %vm973_vm0, %v16313_v27  ;;  %13861 = vmatmul.mubr.msk.bf16.vlgmr.msra.gmra.mxu1 %vm973_vm0, %v16313_v27  ;;  %v13913_v43 = vcombine.high %v438_v38, %v442_v39  ;;  %v13912_v49 = vcombine.low %v438_v38, %v442_v39  ;;  %v449_v14 = vld [vmem:[%s16280_s22 + $0x220] sm:$0xff]  ;;  %v455_v20 = vld [vmem:[%s16280_s22 + $0x250] sm:$0xff]  ;;  %v456_v22 = vld [vmem:[%s16280_s22 + $0x258] sm:$0xff] }
  0x8c   : > { %1234 = vmatpush1.bf16.msra.mxu0 %v13870_v44  ;;  %1275 = vmatpush1.bf16.msra.mxu1 %v13872_v45  ;;  %v429_v44 = vld [vmem:[%s16280_s22 + $0x180] sm:$0xff]  ;;  %v13923_v19 = vcombine.high %v445_v13, %v449_v14  ;;  %v459_v21 = vld [vmem:[%s16280_s22 + $0x270] sm:$0xff]  ;;  %v448_v31 = vld [vmem:[%s16280_s22 + $0x218] sm:$0xff] }
  0x8d   : > { %1235 = vmatprep.subr.bf16.mxu0 %v13863_v46  ;;  %1276 = vmatprep.subr.bf16.mxu1 %v13865_v47  ;;  %v433_v45 = vld [vmem:[%s16280_s22 + $0x1a0] sm:$0xff]  ;;  %v430_v46 = vld [vmem:[%s16280_s22 + $0x188] sm:$0xff]  ;;  %v13935_v28 = vcombine.high %v455_v20, %v459_v21  ;;  %v447_v29 = vld [vmem:[%s16280_s22 + $0x210] sm:$0xff] }
  0x8e   : > { %1253 = vmatprep.mubr.bf16.mxu0 %v23681_v0  ;;  %1294 = vmatprep.mubr.bf16.mxu1 %v23681_v0  ;;  %v434_v47 = vld [vmem:[%s16280_s22 + $0x1a8] sm:$0xff]  ;;  %v13903_v50 = vcombine.high %v429_v44, %v433_v45  ;;  %v13902_v56 = vcombine.low %v429_v44, %v433_v45  ;;  %v451_v30 = vld [vmem:[%s16280_s22 + $0x230] sm:$0xff]  ;;  %v469_v37 = vld [vmem:[%s16280_s22 + $0x2c0] sm:$0xff] }
  0x8f   : > { %v13905_v51 = vcombine.high %v430_v46, %v434_v47  ;;  %v13904_v57 = vcombine.low %v430_v46, %v434_v47  ;;  %v13927_v36 = vcombine.high %v447_v29, %v451_v30  ;;  %v473_v38 = vld [vmem:[%s16280_s22 + $0x2e0] sm:$0xff]  ;;  %v470_v39 = vld [vmem:[%s16280_s22 + $0x2c8] sm:$0xff] }
  0x90   : > { %1236 = vmatpush1.bf16.msra.mxu0 %v13862_v52  ;;  %1277 = vmatpush1.bf16.msra.mxu1 %v13864_v53  ;;  %v439_v52 = vld [vmem:[%s16280_s22 + $0x1d0] sm:$0xff]  ;;  %v13951_v44 = vcombine.high %v469_v37, %v473_v38  ;;  %v461_v45 = vld [vmem:[%s16280_s22 + $0x280] sm:$0xff]  ;;  %v462_v47 = vld [vmem:[%s16280_s22 + $0x288] sm:$0xff] }
  0x91   : > { %1315 = vmatprep.subr.bf16.mxu0 %v13875_v54  ;;  %1356 = vmatprep.subr.bf16.mxu1 %v13877_v55  ;;  %v443_v53 = vld [vmem:[%s16280_s22 + $0x1f0] sm:$0xff]  ;;  %v440_v54 = vld [vmem:[%s16280_s22 + $0x1d8] sm:$0xff]  ;;  %v465_v46 = vld [vmem:[%s16280_s22 + $0x2a0] sm:$0xff] }
  0x92   : > { %v444_v55 = vld [vmem:[%s16280_s22 + $0x1f8] sm:$0xff]  ;;  %v13915_v58 = vcombine.high %v439_v52, %v443_v53 }
  0x93   : > { %13878 = vmatmul.mubr.msk.bf16.vlgmr.msra.gmra.mxu0 %vm973_vm0, %v16313_v27  ;;  %13879 = vmatmul.mubr.msk.bf16.vlgmr.msra.gmra.mxu1 %vm973_vm0, %v16313_v27  ;;  %v13917_v59 = vcombine.high %v440_v54, %v444_v55  ;;  %v13916_v2 = vcombine.low %v440_v54, %v444_v55  ;;  %v475_v54 = vld [vmem:[%s16280_s22 + $0x2f0] sm:$0xff]  ;;  %v472_v55 = vld [vmem:[%s16280_s22 + $0x2d8] sm:$0xff] }
  0x94   : > { %1316 = vmatpush1.bf16.msra.mxu0 %v13874_v60  ;;  %1357 = vmatpush1.bf16.msra.mxu1 %v13876_v61  ;;  %v431_v60 = vld [vmem:[%s16280_s22 + $0x190] sm:$0xff] }
  0x95   : > { %1317 = vmatprep.subr.bf16.mxu0 %v13867_v62  ;;  %1358 = vmatprep.subr.bf16.mxu1 %v13869_v1  ;;  %v435_v61 = vld [vmem:[%s16280_s22 + $0x1b0] sm:$0xff]  ;;  %v432_v62 = vld [vmem:[%s16280_s22 + $0x198] sm:$0xff]  ;;  %v13914_v1 = vcombine.low %v439_v52, %v443_v53  ;;  %v13943_v52 = vcombine.high %v461_v45, %v465_v46 }
  0x96   : > { %1335 = vmatprep.mubr.bf16.mxu0 %v23681_v0  ;;  %1376 = vmatprep.mubr.bf16.mxu1 %v23681_v0  ;;  %v13907_v3 = vcombine.high %v431_v60, %v435_v61  ;;  %v13909_v4 = vcombine.high %v432_v62, %v436_v63  ;;  %v471_v53 = vld [vmem:[%s16280_s22 + $0x2d0] sm:$0xff] }
  0x98   : > { %1318 = vmatpush1.bf16.msra.mxu0 %v13866_v6  ;;  %1359 = vmatpush1.bf16.msra.mxu1 %v13868_v8  ;;  %v457_v6 = vld [vmem:[%s16280_s22 + $0x260] sm:$0xff]  ;;  %v458_v8 = vld [vmem:[%s16280_s22 + $0x268] sm:$0xff] }
  0x99   : > { %1477 = vmatprep.subr.bf16.mxu0 %v13891_v9  ;;  %1518 = vmatprep.subr.bf16.mxu1 %v13893_v10  ;;  %v13906_v9 = vcombine.low %v431_v60, %v435_v61  ;;  %v13908_v10 = vcombine.low %v432_v62, %v436_v63  ;;  %v13931_v11 = vcombine.high %v453_v5, %v457_v6  ;;  %v463_v61 = vld [vmem:[%s16280_s22 + $0x290] sm:$0xff]  ;;  %v464_v63 = vld [vmem:[%s16280_s22 + $0x298] sm:$0xff] }
  0x9a   : > { %v13933_v12 = vcombine.high %v454_v7, %v458_v8  ;;  %v13955_v60 = vcombine.high %v471_v53, %v475_v54  ;;  %v467_v62 = vld [vmem:[%s16280_s22 + $0x2b0] sm:$0xff] }
  0x9b   : > { %13880 = vmatmul.mubr.msk.bf16.vlgmr.msra.gmra.mxu0 %vm973_vm0, %v16313_v27  ;;  %13881 = vmatmul.mubr.msk.bf16.vlgmr.msra.gmra.mxu1 %vm973_vm0, %v16313_v27 }
  0x9c   : > { %1478 = vmatpush1.bf16.msra.mxu0 %v13890_v15  ;;  %1519 = vmatpush1.bf16.msra.mxu1 %v13892_v16  ;;  %v446_v15 = vld [vmem:[%s16280_s22 + $0x208] sm:$0xff] }
  0x9d   : > { %1479 = vmatprep.subr.bf16.mxu0 %v13883_v17  ;;  %1520 = vmatprep.subr.bf16.mxu1 %v13885_v18  ;;  %v450_v16 = vld [vmem:[%s16280_s22 + $0x228] sm:$0xff]  ;;  %v13930_v17 = vcombine.low %v453_v5, %v457_v6  ;;  %v13932_v18 = vcombine.low %v454_v7, %v458_v8  ;;  %v13947_v5 = vcombine.high %v463_v61, %v467_v62  ;;  %v485_v6 = vld [vmem:[%s16280_s22 + $0x340] sm:$0xff] }
  0x9e   : > { %1497 = vmatprep.mubr.bf16.mxu0 %v23681_v0  ;;  %1538 = vmatprep.mubr.bf16.mxu1 %v23681_v0  ;;  %v489_v7 = vld [vmem:[%s16280_s22 + $0x360] sm:$0xff]  ;;  %v486_v8 = vld [vmem:[%s16280_s22 + $0x348] sm:$0xff] }
  0xa0   : > { %1480 = vmatpush1.bf16.msra.mxu0 %v13882_v23  ;;  %1521 = vmatpush1.bf16.msra.mxu1 %v13884_v24  ;;  %v13925_v23 = vcombine.high %v446_v15, %v450_v16  ;;  %v460_v24 = vld [vmem:[%s16280_s22 + $0x278] sm:$0xff] }
  0xa1   : > { %1559 = vmatprep.subr.bf16.mxu0 %v13895_v25  ;;  %1600 = vmatprep.subr.bf16.mxu1 %v13897_v26  ;;  %v13922_v25 = vcombine.low %v445_v13, %v449_v14  ;;  %v13924_v26 = vcombine.low %v446_v15, %v450_v16  ;;  %v13971_v13 = vcombine.high %v485_v6, %v489_v7  ;;  %v477_v14 = vld [vmem:[%s16280_s22 + $0x300] sm:$0xff]  ;;  %v478_v16 = vld [vmem:[%s16280_s22 + $0x308] sm:$0xff] }
  0xa2   : > { %v481_v15 = vld [vmem:[%s16280_s22 + $0x320] sm:$0xff] }
  0xa3   : > { %13898 = vmatmul.mubr.msk.bf16.vlgmr.msra.gmra.mxu0 %vm973_vm0, %v16313_v27  ;;  %13899 = vmatmul.mubr.msk.bf16.vlgmr.msra.gmra.mxu1 %vm973_vm0, %v16313_v27 }
  0xa4   : > { %1560 = vmatpush1.bf16.msra.mxu0 %v13894_v32  ;;  %1601 = vmatpush1.bf16.msra.mxu1 %v13896_v33  ;;  %v13937_v32 = vcombine.high %v456_v22, %v460_v24  ;;  %v452_v33 = vld [vmem:[%s16280_s22 + $0x238] sm:$0xff] }
  0xa5   : > { %1561 = vmatprep.subr.bf16.mxu0 %v13887_v34  ;;  %1602 = vmatprep.subr.bf16.mxu1 %v13889_v35  ;;  %v13934_v34 = vcombine.low %v455_v20, %v459_v21  ;;  %v13936_v35 = vcombine.low %v456_v22, %v460_v24  ;;  %v13963_v21 = vcombine.high %v477_v14, %v481_v15  ;;  %v487_v22 = vld [vmem:[%s16280_s22 + $0x350] sm:$0xff]  ;;  %v488_v24 = vld [vmem:[%s16280_s22 + $0x358] sm:$0xff] }
  0xa6   : > { %1579 = vmatprep.mubr.bf16.mxu0 %v23681_v0  ;;  %1620 = vmatprep.mubr.bf16.mxu1 %v23681_v0 }
  0xa8   : > { %1562 = vmatpush1.bf16.msra.mxu0 %v13886_v40  ;;  %1603 = vmatpush1.bf16.msra.mxu1 %v13888_v41  ;;  %v13929_v40 = vcombine.high %v448_v31, %v452_v33  ;;  %v474_v41 = vld [vmem:[%s16280_s22 + $0x2e8] sm:$0xff] }
  0xa9   : > { %1721 = vmatprep.subr.bf16.mxu0 %v13911_v42  ;;  %1762 = vmatprep.subr.bf16.mxu1 %v13913_v43  ;;  %v13926_v42 = vcombine.low %v447_v29, %v451_v30  ;;  %v13928_v43 = vcombine.low %v448_v31, %v452_v33  ;;  %v479_v31 = vld [vmem:[%s16280_s22 + $0x310] sm:$0xff]  ;;  %v480_v33 = vld [vmem:[%s16280_s22 + $0x318] sm:$0xff] }
  0xab   : > { %13900 = vmatmul.mubr.msk.bf16.vlgmr.msra.gmra.mxu0 %vm973_vm0, %v16313_v27  ;;  %13901 = vmatmul.mubr.msk.bf16.vlgmr.msra.gmra.mxu1 %vm973_vm0, %v16313_v27 }
  0xac   : > { %1722 = vmatpush1.bf16.msra.mxu0 %v13910_v48  ;;  %1763 = vmatpush1.bf16.msra.mxu1 %v13912_v49  ;;  %v13953_v48 = vcombine.high %v470_v39, %v474_v41  ;;  %v466_v49 = vld [vmem:[%s16280_s22 + $0x2a8] sm:$0xff] }
  0xad   : > { %1723 = vmatprep.subr.bf16.mxu0 %v13903_v50  ;;  %1764 = vmatprep.subr.bf16.mxu1 %v13905_v51  ;;  %v13950_v50 = vcombine.low %v469_v37, %v473_v38  ;;  %v13952_v51 = vcombine.low %v470_v39, %v474_v41  ;;  %v501_v39 = vld [vmem:[%s16280_s22 + $0x3c0] sm:$0xff]  ;;  %v502_v41 = vld [vmem:[%s16280_s22 + $0x3c8] sm:$0xff] }
  0xae   : > { %1741 = vmatprep.mubr.bf16.mxu0 %v23681_v0  ;;  %1782 = vmatprep.mubr.bf16.mxu1 %v23681_v0 }
  0xb0   : > { %1724 = vmatpush1.bf16.msra.mxu0 %v13902_v56  ;;  %1765 = vmatpush1.bf16.msra.mxu1 %v13904_v57  ;;  %v13945_v56 = vcombine.high %v462_v47, %v466_v49  ;;  %v476_v57 = vld [vmem:[%s16280_s22 + $0x2f8] sm:$0xff] }
  0xb1   : > { %1803 = vmatprep.subr.bf16.mxu0 %v13915_v58  ;;  %1844 = vmatprep.subr.bf16.mxu1 %v13917_v59  ;;  %v13942_v58 = vcombine.low %v461_v45, %v465_v46  ;;  %v13944_v59 = vcombine.low %v462_v47, %v466_v49  ;;  %v493_v47 = vld [vmem:[%s16280_s22 + $0x380] sm:$0xff]  ;;  %v494_v49 = vld [vmem:[%s16280_s22 + $0x388] sm:$0xff] }
  0xb3   : > { %13918 = vmatmul.mubr.msk.bf16.vlgmr.msra.gmra.mxu0 %vm973_vm0, %v16313_v27  ;;  %13919 = vmatmul.mubr.msk.bf16.vlgmr.msra.gmra.mxu1 %vm973_vm0, %v16313_v27 }
  0xb4   : > { %1804 = vmatpush1.bf16.msra.mxu0 %v13914_v1  ;;  %1845 = vmatpush1.bf16.msra.mxu1 %v13916_v2  ;;  %v13957_v1 = vcombine.high %v472_v55, %v476_v57  ;;  %v468_v2 = vld [vmem:[%s16280_s22 + $0x2b8] sm:$0xff] }
  0xb5   : > { %1805 = vmatprep.subr.bf16.mxu0 %v13907_v3  ;;  %1846 = vmatprep.subr.bf16.mxu1 %v13909_v4  ;;  %v13954_v3 = vcombine.low %v471_v53, %v475_v54  ;;  %v13956_v4 = vcombine.low %v472_v55, %v476_v57  ;;  %v503_v55 = vld [vmem:[%s16280_s22 + $0x3d0] sm:$0xff]  ;;  %v504_v57 = vld [vmem:[%s16280_s22 + $0x3d8] sm:$0xff] }
  0xb6   : > { %1823 = vmatprep.mubr.bf16.mxu0 %v23681_v0  ;;  %1864 = vmatprep.mubr.bf16.mxu1 %v23681_v0 }
  0xb8   : > { %1806 = vmatpush1.bf16.msra.mxu0 %v13906_v9  ;;  %1847 = vmatpush1.bf16.msra.mxu1 %v13908_v10  ;;  %v13949_v9 = vcombine.high %v464_v63, %v468_v2  ;;  %v490_v10 = vld [vmem:[%s16280_s22 + $0x368] sm:$0xff] }
  0xb9   : > { %1965 = vmatprep.subr.bf16.mxu0 %v13931_v11  ;;  %2006 = vmatprep.subr.bf16.mxu1 %v13933_v12  ;;  %v13946_v11 = vcombine.low %v463_v61, %v467_v62  ;;  %v13948_v12 = vcombine.low %v464_v63, %v468_v2  ;;  %v13972_v20 = vcombine.low %v486_v8, %v490_v10  ;;  %v495_v63 = vld [vmem:[%s16280_s22 + $0x390] sm:$0xff]  ;;  %v496_v2 = vld [vmem:[%s16280_s22 + $0x398] sm:$0xff] }
  0xbb   : > { %13920 = vmatmul.mubr.msk.bf16.vlgmr.msra.gmra.mxu0 %vm973_vm0, %v16313_v27  ;;  %13921 = vmatmul.mubr.msk.bf16.vlgmr.msra.gmra.mxu1 %vm973_vm0, %v16313_v27 }
  0xbc   : > { %1966 = vmatpush1.bf16.msra.mxu0 %v13930_v17  ;;  %2007 = vmatpush1.bf16.msra.mxu1 %v13932_v18  ;;  %v13973_v17 = vcombine.high %v486_v8, %v490_v10  ;;  %v482_v18 = vld [vmem:[%s16280_s22 + $0x328] sm:$0xff]  ;;  %v521_v8 = vld [vmem:[%s16280_s22 + $0x460] sm:$0xff] }
  0xbd   : > { %1967 = vmatprep.subr.bf16.mxu0 %v13923_v19  ;;  %2008 = vmatprep.subr.bf16.mxu1 %v13925_v23  ;;  %v13970_v19 = vcombine.low %v485_v6, %v489_v7  ;;  %v491_v23 = vld [vmem:[%s16280_s22 + $0x370] sm:$0xff]  ;;  %v13964_v29 = vcombine.low %v478_v16, %v482_v18  ;;  %v517_v7 = vld [vmem:[%s16280_s22 + $0x440] sm:$0xff] }
  0xbe   : > { %1985 = vmatprep.mubr.bf16.mxu0 %v23681_v0  ;;  %2026 = vmatprep.mubr.bf16.mxu1 %v23681_v0  ;;  %v13975_v30 = vcombine.high %v487_v22, %v491_v23 }
  0xc0   : > { %1968 = vmatpush1.bf16.msra.mxu0 %v13922_v25  ;;  %2009 = vmatpush1.bf16.msra.mxu1 %v13924_v26  ;;  %v13965_v25 = vcombine.high %v478_v16, %v482_v18  ;;  %v492_v26 = vld [vmem:[%s16280_s22 + $0x378] sm:$0xff]  ;;  %v509_v16 = vld [vmem:[%s16280_s22 + $0x400] sm:$0xff]  ;;  %v510_v18 = vld [vmem:[%s16280_s22 + $0x408] sm:$0xff] }
  0xc1   : > { %2047 = vmatprep.subr.bf16.mxu0 %v13935_v28  ;;  %2088 = vmatprep.subr.bf16.mxu1 %v13937_v32  ;;  %v13962_v28 = vcombine.low %v477_v14, %v481_v15  ;;  %v483_v32 = vld [vmem:[%s16280_s22 + $0x330] sm:$0xff]  ;;  %v13976_v37 = vcombine.low %v488_v24, %v492_v26  ;;  %v14011_v15 = vcombine.high %v517_v7, %v521_v8 }
  0xc2   : > { %v13967_v38 = vcombine.high %v479_v31, %v483_v32 }
  0xc3   : > { %13938 = vmatmul.mubr.msk.bf16.vlgmr.msra.gmra.mxu0 %vm973_vm0, %v16313_v27  ;;  %13939 = vmatmul.mubr.msk.bf16.vlgmr.msra.gmra.mxu1 %vm973_vm0, %v16313_v27 }
  0xc4   : > { %2048 = vmatpush1.bf16.msra.mxu0 %v13934_v34  ;;  %2089 = vmatpush1.bf16.msra.mxu1 %v13936_v35  ;;  %v13977_v34 = vcombine.high %v488_v24, %v492_v26  ;;  %v484_v35 = vld [vmem:[%s16280_s22 + $0x338] sm:$0xff]  ;;  %v519_v24 = vld [vmem:[%s16280_s22 + $0x450] sm:$0xff] }
  0xc5   : > { %2049 = vmatprep.subr.bf16.mxu0 %v13927_v36  ;;  %2090 = vmatprep.subr.bf16.mxu1 %v13929_v40  ;;  %v13974_v36 = vcombine.low %v487_v22, %v491_v23  ;;  %v505_v40 = vld [vmem:[%s16280_s22 + $0x3e0] sm:$0xff]  ;;  %v13968_v45 = vcombine.low %v480_v33, %v484_v35  ;;  %v520_v26 = vld [vmem:[%s16280_s22 + $0x458] sm:$0xff] }
  0xc6   : > { %2067 = vmatprep.mubr.bf16.mxu0 %v23681_v0  ;;  %2108 = vmatprep.mubr.bf16.mxu1 %v23681_v0  ;;  %v13991_v46 = vcombine.high %v501_v39, %v505_v40 }
  0xc8   : > { %2050 = vmatpush1.bf16.msra.mxu0 %v13926_v42  ;;  %2091 = vmatpush1.bf16.msra.mxu1 %v13928_v43  ;;  %v13969_v42 = vcombine.high %v480_v33, %v484_v35  ;;  %v506_v43 = vld [vmem:[%s16280_s22 + $0x3e8] sm:$0xff]  ;;  %v511_v33 = vld [vmem:[%s16280_s22 + $0x410] sm:$0xff]  ;;  %v512_v35 = vld [vmem:[%s16280_s22 + $0x418] sm:$0xff] }
  0xc9   : > { %2209 = vmatprep.subr.bf16.mxu0 %v13951_v44  ;;  %2250 = vmatprep.subr.bf16.mxu1 %v13953_v48  ;;  %v13966_v44 = vcombine.low %v479_v31, %v483_v32  ;;  %v497_v48 = vld [vmem:[%s16280_s22 + $0x3a0] sm:$0xff]  ;;  %v13992_v53 = vcombine.low %v502_v41, %v506_v43 }
  0xca   : > { %v13983_v54 = vcombine.high %v493_v47, %v497_v48 }
  0xcb   : > { %13940 = vmatmul.mubr.msk.bf16.vlgmr.msra.gmra.mxu0 %vm973_vm0, %v16313_v27  ;;  %13941 = vmatmul.mubr.msk.bf16.vlgmr.msra.gmra.mxu1 %vm973_vm0, %v16313_v27 }
  0xcc   : > { %2210 = vmatpush1.bf16.msra.mxu0 %v13950_v50  ;;  %2251 = vmatpush1.bf16.msra.mxu1 %v13952_v51  ;;  %v13993_v50 = vcombine.high %v502_v41, %v506_v43  ;;  %v498_v51 = vld [vmem:[%s16280_s22 + $0x3a8] sm:$0xff]  ;;  %v533_v41 = vld [vmem:[%s16280_s22 + $0x4c0] sm:$0xff] }
  0xcd   : > { %2211 = vmatprep.subr.bf16.mxu0 %v13943_v52  ;;  %2252 = vmatprep.subr.bf16.mxu1 %v13945_v56  ;;  %v13990_v52 = vcombine.low %v501_v39, %v505_v40  ;;  %v507_v56 = vld [vmem:[%s16280_s22 + $0x3f0] sm:$0xff]  ;;  %v13984_v61 = vcombine.low %v494_v49, %v498_v51  ;;  %v534_v43 = vld [vmem:[%s16280_s22 + $0x4c8] sm:$0xff] }
  0xce   : > { %2229 = vmatprep.mubr.bf16.mxu0 %v23681_v0  ;;  %2270 = vmatprep.mubr.bf16.mxu1 %v23681_v0  ;;  %v13995_v62 = vcombine.high %v503_v55, %v507_v56 }
  0xd0   : > { %2212 = vmatpush1.bf16.msra.mxu0 %v13942_v58  ;;  %2253 = vmatpush1.bf16.msra.mxu1 %v13944_v59  ;;  %v13985_v58 = vcombine.high %v494_v49, %v498_v51  ;;  %v508_v59 = vld [vmem:[%s16280_s22 + $0x3f8] sm:$0xff]  ;;  %v525_v49 = vld [vmem:[%s16280_s22 + $0x480] sm:$0xff]  ;;  %v526_v51 = vld [vmem:[%s16280_s22 + $0x488] sm:$0xff] }
  0xd1   : > { %2291 = vmatprep.subr.bf16.mxu0 %v13955_v60  ;;  %2332 = vmatprep.subr.bf16.mxu1 %v13957_v1  ;;  %v13982_v60 = vcombine.low %v493_v47, %v497_v48  ;;  %v499_v1 = vld [vmem:[%s16280_s22 + $0x3b0] sm:$0xff] }
  0xd2   : > { %v13987_v6 = vcombine.high %v495_v63, %v499_v1 }
  0xd3   : > { %13958 = vmatmul.mubr.msk.bf16.vlgmr.msra.gmra.mxu0 %vm973_vm0, %v16313_v27  ;;  %13959 = vmatmul.mubr.msk.bf16.vlgmr.msra.gmra.mxu1 %vm973_vm0, %v16313_v27 }
  0xd4   : > { %2292 = vmatpush1.bf16.msra.mxu0 %v13954_v3  ;;  %2333 = vmatpush1.bf16.msra.mxu1 %v13956_v4  ;;  %v13997_v3 = vcombine.high %v504_v57, %v508_v59  ;;  %v500_v4 = vld [vmem:[%s16280_s22 + $0x3b8] sm:$0xff] }
  0xd5   : > { %2293 = vmatprep.subr.bf16.mxu0 %v13947_v5  ;;  %2334 = vmatprep.subr.bf16.mxu1 %v13949_v9  ;;  %v13996_v5 = vcombine.low %v504_v57, %v508_v59  ;;  %v518_v9 = vld [vmem:[%s16280_s22 + $0x448] sm:$0xff]  ;;  %v13989_v10 = vcombine.high %v496_v2, %v500_v4  ;;  %v13988_v14 = vcombine.low %v496_v2, %v500_v4  ;;  %v535_v57 = vld [vmem:[%s16280_s22 + $0x4d0] sm:$0xff]  ;;  %v536_v59 = vld [vmem:[%s16280_s22 + $0x4d8] sm:$0xff] }
  0xd6   : > { %2311 = vmatprep.mubr.bf16.mxu0 %v23681_v0  ;;  %2352 = vmatprep.mubr.bf16.mxu1 %v23681_v0  ;;  %v527_v2 = vld [vmem:[%s16280_s22 + $0x490] sm:$0xff]  ;;  %v528_v4 = vld [vmem:[%s16280_s22 + $0x498] sm:$0xff] }
  0xd8   : > { %2294 = vmatpush1.bf16.msra.mxu0 %v13946_v11  ;;  %2335 = vmatpush1.bf16.msra.mxu1 %v13948_v12  ;;  %v522_v11 = vld [vmem:[%s16280_s22 + $0x468] sm:$0xff]  ;;  %v16521_v12 = vld [vmem:[#allocation6] sm:$0xf] }
  0xd9   : > { %2453 = vmatprep.subr.bf16.mxu0 %v13971_v13  ;;  %2494 = vmatprep.subr.bf16.mxu1 %v13973_v17  ;;  %v13986_v13 = vcombine.low %v495_v63, %v499_v1  ;;  %v513_v17 = vld [vmem:[%s16280_s22 + $0x420] sm:$0xff]  ;;  %v14012_v22 = vcombine.low %v518_v9, %v522_v11 }
  0xda   : > { %v14003_v23 = vcombine.high %v509_v16, %v513_v17 }
  0xdb   : > { %13960 = vmatmul.mubr.msk.bf16.vlgmr.msra.gmra.mxu0 %vm973_vm0, %v16313_v27  ;;  %13961 = vmatmul.mubr.msk.bf16.vlgmr.msra.gmra.mxu1 %vm973_vm0, %v16313_v27 }
  0xdc   : > { %2454 = vmatpush1.bf16.msra.mxu0 %v13970_v19  ;;  %2495 = vmatpush1.bf16.msra.mxu1 %v13972_v20  ;;  %v14013_v19 = vcombine.high %v518_v9, %v522_v11  ;;  %v514_v20 = vld [vmem:[%s16280_s22 + $0x428] sm:$0xff]  ;;  %v549_v9 = vld [vmem:[%s16280_s22 + $0x540] sm:$0xff] }
  0xdd   : > { %2455 = vmatprep.subr.bf16.mxu0 %v13963_v21  ;;  %2496 = vmatprep.subr.bf16.mxu1 %v13965_v25  ;;  %v14010_v21 = vcombine.low %v517_v7, %v521_v8  ;;  %v523_v25 = vld [vmem:[%s16280_s22 + $0x470] sm:$0xff]  ;;  %v14004_v31 = vcombine.low %v510_v18, %v514_v20  ;;  %v550_v11 = vld [vmem:[%s16280_s22 + $0x548] sm:$0xff] }
  0xde   : > { %2473 = vmatprep.mubr.bf16.mxu0 %v23681_v0  ;;  %2514 = vmatprep.mubr.bf16.mxu1 %v23681_v0  ;;  %v14015_v32 = vcombine.high %v519_v24, %v523_v25 }
  0xe0   : > { %2456 = vmatpush1.bf16.msra.mxu0 %v13962_v28  ;;  %2497 = vmatpush1.bf16.msra.mxu1 %v13964_v29  ;;  %v14005_v28 = vcombine.high %v510_v18, %v514_v20  ;;  %v524_v29 = vld [vmem:[%s16280_s22 + $0x478] sm:$0xff]  ;;  %v16590_v20 = vld [vmem:[%s16280_s22 + $0x508] sm:$0xff] }
  0xe1   : > { %2535 = vmatprep.subr.bf16.mxu0 %v13975_v30  ;;  %2576 = vmatprep.subr.bf16.mxu1 %v13977_v34  ;;  %v14002_v30 = vcombine.low %v509_v16, %v513_v17  ;;  %v515_v34 = vld [vmem:[%s16280_s22 + $0x430] sm:$0xff]  ;;  %v14016_v39 = vcombine.low %v520_v26, %v524_v29  ;;  %v16584_v16 = vld [vmem:[%s16280_s22 + $0x500] sm:$0xff] }
  0xe2   : > { %v14007_v40 = vcombine.high %v511_v33, %v515_v34 }
  0xe3   : > { %13978 = vmatmul.mubr.msk.bf16.vlgmr.msra.gmra.mxu0 %vm973_vm0, %v16313_v27  ;;  %13979 = vmatmul.mubr.msk.bf16.vlgmr.msra.gmra.mxu1 %vm973_vm0, %v16313_v27 }
  0xe4   : > { %2536 = vmatpush1.bf16.msra.mxu0 %v13974_v36  ;;  %2577 = vmatpush1.bf16.msra.mxu1 %v13976_v37  ;;  %v14017_v36 = vcombine.high %v520_v26, %v524_v29  ;;  %v516_v37 = vld [vmem:[%s16280_s22 + $0x438] sm:$0xff]  ;;  %v16610_v29 = vld [vmem:[%s16280_s22 + $0x510] sm:$0xff] }
  0xe5   : > { %2537 = vmatprep.subr.bf16.mxu0 %v13967_v38  ;;  %2578 = vmatprep.subr.bf16.mxu1 %v13969_v42  ;;  %v14014_v38 = vcombine.low %v519_v24, %v523_v25  ;;  %v537_v42 = vld [vmem:[%s16280_s22 + $0x4e0] sm:$0xff]  ;;  %v14008_v47 = vcombine.low %v512_v35, %v516_v37  ;;  %v16600_v24 = vld [vmem:[%s16280_s22 + $0x570] sm:$0xff]  ;;  %v16604_v25 = vld [vmem:[%s16280_s22 + $0x558] sm:$0xff] }
  0xe6   : > { %2555 = vmatprep.mubr.bf16.mxu0 %v23681_v0  ;;  %2596 = vmatprep.mubr.bf16.mxu1 %v23681_v0  ;;  %v14031_v48 = vcombine.high %v533_v41, %v537_v42  ;;  %v16607_v26 = vld [vmem:[%s16280_s22 + $0x578] sm:$0xff] }
  0xe8   : > { %2538 = vmatpush1.bf16.msra.mxu0 %v13966_v44  ;;  %2579 = vmatpush1.bf16.msra.mxu1 %v13968_v45  ;;  %v14009_v44 = vcombine.high %v512_v35, %v516_v37  ;;  %v538_v45 = vld [vmem:[%s16280_s22 + $0x4e8] sm:$0xff]  ;;  %v16624_v35 = vld [vmem:[%s16280_s22 + $0x5c0] sm:$0xff] }
  0xe9   : > { %2697 = vmatprep.subr.bf16.mxu0 %v13991_v46  ;;  %2738 = vmatprep.subr.bf16.mxu1 %v13993_v50  ;;  %v14006_v46 = vcombine.low %v511_v33, %v515_v34  ;;  %v529_v50 = vld [vmem:[%s16280_s22 + $0x4a0] sm:$0xff]  ;;  %v16621_v34 = vld [vmem:[%s16280_s22 + $0x538] sm:$0xff] }
  0xeb   : > { %13980 = vmatmul.mubr.msk.bf16.vlgmr.msra.gmra.mxu0 %vm973_vm0, %v16313_v27  ;;  %13981 = vmatmul.mubr.msk.bf16.vlgmr.msra.gmra.mxu1 %vm973_vm0, %v16313_v27  ;;  %v13994_v27 = vcombine.low %v503_v55, %v507_v56  ;;  %v14032_v55 = vcombine.low %v534_v43, %v538_v45  ;;  %v14023_v56 = vcombine.high %v525_v49, %v529_v50 }
  0xec   : > { %2698 = vmatpush1.bf16.msra.mxu0 %v13990_v52  ;;  %2739 = vmatpush1.bf16.msra.mxu1 %v13992_v53  ;;  %v14033_v52 = vcombine.high %v534_v43, %v538_v45  ;;  %v530_v53 = vld [vmem:[%s16280_s22 + $0x4a8] sm:$0xff] }
  0xed   : > { %2699 = vmatprep.subr.bf16.mxu0 %v13983_v54  ;;  %2740 = vmatprep.subr.bf16.mxu1 %v13985_v58  ;;  %v14030_v54 = vcombine.low %v533_v41, %v537_v42  ;;  %v539_v58 = vld [vmem:[%s16280_s22 + $0x4f0] sm:$0xff]  ;;  %v14024_v63 = vcombine.low %v526_v51, %v530_v53  ;;  %v16641_v41 = vld [vmem:[%s16280_s22 + $0x5a0] sm:$0xff]  ;;  %v16652_v45 = vld [vmem:[%s16280_s22 + $0x588] sm:$0xff] }
  0xee   : > { %2717 = vmatprep.mubr.bf16.mxu0 %v23681_v0  ;;  %2758 = vmatprep.mubr.bf16.mxu1 %v23681_v0  ;;  %v14035_v1 = vcombine.high %v535_v57, %v539_v58 }
  0xf0   : > { %2700 = vmatpush1.bf16.msra.mxu0 %v13982_v60  ;;  %2741 = vmatpush1.bf16.msra.mxu1 %v13984_v61  ;;  %v14025_v60 = vcombine.high %v526_v51, %v530_v53  ;;  %v540_v61 = vld [vmem:[%s16280_s22 + $0x4f8] sm:$0xff]  ;;  %v14057_v51 = vcombine.high %v16604_v25, %v16607_v26 }
  0xf1   : > { %2779 = vmatprep.subr.bf16.mxu0 %v13995_v62  ;;  %2820 = vmatprep.subr.bf16.mxu1 %v13997_v3  ;;  %v14022_v62 = vcombine.low %v525_v49, %v529_v50  ;;  %v531_v3 = vld [vmem:[%s16280_s22 + $0x4b0] sm:$0xff]  ;;  %v14036_v7 = vcombine.low %v536_v59, %v540_v61  ;;  %v14056_v50 = vcombine.low %v16604_v25, %v16607_v26  ;;  %v16675_v53 = vld [vmem:[%s16280_s22 + $0x5f8] sm:$0xff] }
  0xf2   : > { %v14027_v8 = vcombine.high %v527_v2, %v531_v3  ;;  %v16848_v25 = vld [vmem:[%s16280_s22 + $0x6f8] sm:$0xff]  ;;  %v16851_v26 = vld [vmem:[%s16280_s22 + $0x690] sm:$0xff] }
  0xf3   : > { %13998 = vmatmul.mubr.msk.bf16.vlgmr.msra.gmra.mxu0 %vm973_vm0, %v16521_v12  ;;  %13999 = vmatmul.mubr.msk.bf16.vlgmr.msra.gmra.mxu1 %vm973_vm0, %v16521_v12  ;;  %24419 = vst [vmem:[#allocation23_spill] sm:$0xff] %v16848_v25  ;;  %v16968_v25 = vld [vmem:[%s16280_s22 + $0x718] sm:$0xff] }
  0xf4   : > { %2780 = vmatpush1.bf16.msra.mxu0 %v13994_v27  ;;  %2821 = vmatpush1.bf16.msra.mxu1 %v13996_v5  ;;  %v14037_v27 = vcombine.high %v536_v59, %v540_v61  ;;  %v532_v5 = vld [vmem:[%s16280_s22 + $0x4b8] sm:$0xff]  ;;  %v16696_v61 = vld [vmem:[%s16280_s22 + $0x640] sm:$0xff] }
  0xf5   : > { %2781 = vmatprep.subr.bf16.mxu0 %v13987_v6  ;;  %2822 = vmatprep.subr.bf16.mxu1 %v13989_v10  ;;  %v14034_v6 = vcombine.low %v535_v57, %v539_v58  ;;  %v553_v10 = vld [vmem:[%s16280_s22 + $0x560] sm:$0xff]  ;;  %v14028_v17 = vcombine.low %v528_v4, %v532_v5  ;;  %v16690_v59 = vld [vmem:[%s16280_s22 + $0x598] sm:$0xff] }
  0xf6   : > { %2799 = vmatprep.mubr.bf16.mxu0 %v23681_v0  ;;  %2840 = vmatprep.mubr.bf16.mxu1 %v23681_v0  ;;  %v14051_v18 = vcombine.high %v549_v9, %v553_v10  ;;  %v16908_v58 = vld [vmem:[%s16280_s22 + $0x720] sm:$0xff] }
  0xf7   : > { %24427 = vst [vmem:[#allocation31_spill] sm:$0xff] %v16908_v58  ;;  %v17096_v58 = vld [vmem:[%s16280_s22 + $0x868] sm:$0xff] }
  0xf8   : > { %2782 = vmatpush1.bf16.msra.mxu0 %v13986_v13  ;;  %2823 = vmatpush1.bf16.msra.mxu1 %v13988_v14  ;;  %v14029_v13 = vcombine.high %v528_v4, %v532_v5  ;;  %v554_v14 = vld [vmem:[%s16280_s22 + $0x568] sm:$0xff]  ;;  %v16718_v5 = vld [vmem:[%s16280_s22 + $0x620] sm:$0xff]  ;;  %24459 = vst [vmem:[#allocation52_spill] sm:$0xff] %v17096_v58  ;;  %v17231_v58 = vld [vmem:[%s16280_s22 + $0x8f8] sm:$0xff] }
  0xf9   : > { %2941 = vmatprep.subr.bf16.mxu0 %v14011_v15  ;;  %2982 = vmatprep.subr.bf16.mxu1 %v14013_v19  ;;  %v14026_v15 = vcombine.low %v527_v2, %v531_v3  ;;  %v16587_v19 = vld [vmem:[%s16280_s22 + $0x520] sm:$0xff]  ;;  %v16709_v3 = vld [vmem:[%s16280_s22 + $0x648] sm:$0xff] }
  0xfa   : > { %v14043_v33 = vcombine.high %v16584_v16, %v16587_v19  ;;  %v14042_v42 = vcombine.low %v16584_v16, %v16587_v19  ;;  %v16712_v4 = vld [vmem:[%s16280_s22 + $0x668] sm:$0xff]  ;;  %v16750_v19 = vld [vmem:[%s16280_s22 + $0x658] sm:$0xff] }
  0xfb   : > { %14000 = vmatmul.mubr.msk.bf16.vlgmr.msra.gmra.mxu0 %vm973_vm0, %v16521_v12  ;;  %14001 = vmatmul.mubr.msk.bf16.vlgmr.msra.gmra.mxu1 %vm973_vm0, %v16521_v12  ;;  %v16801_v16 = vld [vmem:[%s16280_s22 + $0x6e8] sm:$0xff] }
  0xfc   : > { %2942 = vmatpush1.bf16.msra.mxu0 %v14010_v21  ;;  %2983 = vmatpush1.bf16.msra.mxu1 %v14012_v22  ;;  %v16593_v21 = vld [vmem:[%s16280_s22 + $0x528] sm:$0xff]  ;;  %v14053_v22 = vcombine.high %v550_v11, %v554_v14 }
  0xfd   : > { %2943 = vmatprep.subr.bf16.mxu0 %v14003_v23  ;;  %2984 = vmatprep.subr.bf16.mxu1 %v14005_v28  ;;  %v16597_v23 = vld [vmem:[%s16280_s22 + $0x550] sm:$0xff]  ;;  %v14050_v28 = vcombine.low %v549_v9, %v553_v10  ;;  %v14045_v37 = vcombine.high %v16590_v20, %v16593_v21  ;;  %v14044_v43 = vcombine.low %v16590_v20, %v16593_v21  ;;  %v16730_v10 = vld [vmem:[%s16280_s22 + $0x608] sm:$0xff]  ;;  %v16779_v20 = vld [vmem:[%s16280_s22 + $0x638] sm:$0xff] }
  0xfe   : > { %2961 = vmatprep.mubr.bf16.mxu0 %v23681_v0  ;;  %3002 = vmatprep.mubr.bf16.mxu1 %v23681_v0  ;;  %v14055_v49 = vcombine.high %v16597_v23, %v16600_v24  ;;  %v16798_v21 = vld [vmem:[%s16280_s22 + $0x6c8] sm:$0xff]  ;;  %v16827_v9 = vld [vmem:[%s16280_s22 + $0x6d0] sm:$0xff] }
  0xff   : > { %24416 = vst [vmem:[#allocation20_spill] sm:$0xff] %v16827_v9  ;;  %v16891_v2 = vld [vmem:[%s16280_s22 + $0x768] sm:$0xff]  ;;  %v16977_v9 = vld [vmem:[%s16280_s22 + $0x7e0] sm:$0xff] }
 0x100   : > { %2944 = vmatpush1.bf16.msra.mxu0 %v14002_v30  ;;  %2985 = vmatpush1.bf16.msra.mxu1 %v14004_v31  ;;  %v16613_v30 = vld [vmem:[%s16280_s22 + $0x530] sm:$0xff]  ;;  %v16616_v31 = vld [vmem:[%s16280_s22 + $0x518] sm:$0xff]  ;;  %24425 = vst [vmem:[#allocation29_spill] sm:$0xff] %v16891_v2  ;;  %24437 = vst [vmem:[#allocation38_spill] sm:$0xff] %v16977_v9 }
 0x101   : > { %3023 = vmatprep.subr.bf16.mxu0 %v14015_v32  ;;  %3064 = vmatprep.subr.bf16.mxu1 %v14017_v36  ;;  %v14052_v32 = vcombine.low %v550_v11, %v554_v14  ;;  %v16627_v36 = vld [vmem:[%s16280_s22 + $0x5e0] sm:$0xff]  ;;  %v14047_v57 = vcombine.high %v16610_v29, %v16613_v30  ;;  %v16733_v11 = vld [vmem:[%s16280_s22 + $0x628] sm:$0xff] }
 0x102   : > { %v16824_v14 = vld [vmem:[%s16280_s22 + $0x6a8] sm:$0xff]  ;;  %v17099_v9 = vld [vmem:[%s16280_s22 + $0x800] sm:$0xff] }
 0x103   : > { %14018 = vmatmul.mubr.msk.bf16.vlgmr.msra.gmra.mxu0 %vm973_vm0, %v16521_v12  ;;  %14019 = vmatmul.mubr.msk.bf16.vlgmr.msra.gmra.mxu1 %vm973_vm0, %v16521_v12  ;;  %24415 = vst [vmem:[#allocation19_spill] sm:$0xff] %v16824_v14  ;;  %v16949_v14 = vld [vmem:[%s16280_s22 + $0x778] sm:$0xff]  ;;  %v17015_v2 = vld [vmem:[%s16280_s22 + $0x788] sm:$0xff]  ;;  %24460 = vst [vmem:[#allocation53_spill] sm:$0xff] %v17099_v9 }
 0x104   : > { %3024 = vmatpush1.bf16.msra.mxu0 %v14014_v38  ;;  %3065 = vmatpush1.bf16.msra.mxu1 %v14016_v39  ;;  %v16632_v38 = vld [vmem:[%s16280_s22 + $0x5c8] sm:$0xff]  ;;  %24445 = vst [vmem:[#allocation43_spill] sm:$0xff] %v17015_v2  ;;  %v17141_v2 = vld [vmem:[%s16280_s22 + $0x878] sm:$0xff] }
 0x105   : > { %3025 = vmatprep.subr.bf16.mxu0 %v14007_v40  ;;  %3066 = vmatprep.subr.bf16.mxu1 %v14009_v44  ;;  %v16635_v39 = vld [vmem:[%s16280_s22 + $0x5e8] sm:$0xff]  ;;  %v16638_v40 = vld [vmem:[%s16280_s22 + $0x580] sm:$0xff]  ;;  %v14054_v44 = vcombine.low %v16597_v23, %v16600_v24  ;;  %v16830_v23 = vld [vmem:[%s16280_s22 + $0x6f0] sm:$0xff] }
 0x106   : > { %3043 = vmatprep.mubr.bf16.mxu0 %v23681_v0  ;;  %3084 = vmatprep.mubr.bf16.mxu1 %v23681_v0  ;;  %24417 = vst [vmem:[#allocation21_spill] sm:$0xff] %v16830_v23  ;;  %v16926_v24 = vld [vmem:[%s16280_s22 + $0x728] sm:$0xff]  ;;  %v16974_v23 = vld [vmem:[%s16280_s22 + $0x7c0] sm:$0xff]  ;;  %v17228_v9 = vld [vmem:[%s16280_s22 + $0x8d8] sm:$0xff] }
 0x107   : > { %24431 = vst [vmem:[#allocation33_spill] sm:$0xff] %v16926_v24  ;;  %v17061_v24 = vld [vmem:[%s16280_s22 + $0x7b8] sm:$0xff] }
 0x108   : > { %3026 = vmatpush1.bf16.msra.mxu0 %v14006_v46  ;;  %3067 = vmatpush1.bf16.msra.mxu1 %v14008_v47  ;;  %v16655_v46 = vld [vmem:[%s16280_s22 + $0x5a8] sm:$0xff]  ;;  %v16658_v47 = vld [vmem:[%s16280_s22 + $0x5d0] sm:$0xff]  ;;  %24452 = vst [vmem:[#allocation48_spill] sm:$0xff] %v17061_v24 }
 0x109   : > { %3185 = vmatprep.subr.bf16.mxu0 %v14031_v48  ;;  %3226 = vmatprep.subr.bf16.mxu1 %v14033_v52  ;;  %v16661_v48 = vld [vmem:[%s16280_s22 + $0x5f0] sm:$0xff]  ;;  %v16672_v52 = vld [vmem:[%s16280_s22 + $0x5d8] sm:$0xff]  ;;  %v17185_v24 = vld [vmem:[%s16280_s22 + $0x8c8] sm:$0xff] }
 0x10a   : > { %24474 = vst [vmem:[#allocation63_spill] sm:$0xff] %v17185_v24  ;;  %v17310_v24 = vld [vmem:[%s16280_s22 + $0x908] sm:$0xff] }
 0x10b   : > { %14020 = vmatmul.mubr.msk.bf16.vlgmr.msra.gmra.mxu0 %vm973_vm0, %v16521_v12  ;;  %14021 = vmatmul.mubr.msk.bf16.vlgmr.msra.gmra.mxu1 %vm973_vm0, %v16521_v12 }
 0x10c   : > { %3186 = vmatpush1.bf16.msra.mxu0 %v14030_v54  ;;  %3227 = vmatpush1.bf16.msra.mxu1 %v14032_v55  ;;  %v16678_v54 = vld [vmem:[%s16280_s22 + $0x590] sm:$0xff] }
 0x10d   : > { %3187 = vmatprep.subr.bf16.mxu0 %v14023_v56  ;;  %3228 = vmatprep.subr.bf16.mxu1 %v14025_v60  ;;  %v16681_v55 = vld [vmem:[%s16280_s22 + $0x5b0] sm:$0xff]  ;;  %v14046_v56 = vcombine.low %v16610_v29, %v16613_v30  ;;  %v16693_v60 = vld [vmem:[%s16280_s22 + $0x5b8] sm:$0xff]  ;;  %v16911_v29 = vld [vmem:[%s16280_s22 + $0x708] sm:$0xff]  ;;  %v24429_v30 = vcombine.low %v16616_v31, %v16621_v34 }
 0x10e   : > { %3205 = vmatprep.mubr.bf16.mxu0 %v23681_v0  ;;  %3246 = vmatprep.mubr.bf16.mxu1 %v23681_v0  ;;  %24428 = vst [vmem:[#allocation32_spill] sm:$0xff] %v16911_v29  ;;  %v24453_v29 = vcombine.low %v16638_v40, %v16641_v41 }
 0x110   : > { %3188 = vmatpush1.bf16.msra.mxu0 %v14022_v62  ;;  %3229 = vmatpush1.bf16.msra.mxu1 %v14024_v63  ;;  %v16699_v62 = vld [vmem:[%s16280_s22 + $0x660] sm:$0xff]  ;;  %v14049_v63 = vcombine.high %v16616_v31, %v16621_v34  ;;  %v16932_v31 = vld [vmem:[%s16280_s22 + $0x770] sm:$0xff]  ;;  %v24434_v34 = vcombine.high %v16632_v38, %v16635_v39 }
 0x111   : > { %3267 = vmatprep.subr.bf16.mxu0 %v14035_v1  ;;  %3308 = vmatprep.subr.bf16.mxu1 %v14037_v27  ;;  %v16715_v27 = vld [vmem:[%s16280_s22 + $0x600] sm:$0xff]  ;;  %24433 = vst [vmem:[#allocation35_spill] sm:$0xff] %v16932_v31  ;;  %v24438_v1 = vcombine.low %v16624_v35, %v16627_v36  ;;  %v24467_v31 = vcombine.low %v16658_v47, %v16661_v48 }
 0x113   : > { %14038 = vmatmul.mubr.msk.bf16.vlgmr.msra.gmra.mxu0 %vm973_vm0, %v16521_v12  ;;  %14039 = vmatmul.mubr.msk.bf16.vlgmr.msra.gmra.mxu1 %vm973_vm0, %v16521_v12 }
 0x114   : > { %3268 = vmatpush1.bf16.msra.mxu0 %v14034_v6  ;;  %3309 = vmatpush1.bf16.msra.mxu1 %v14036_v7  ;;  %v16873_v6 = vld [vmem:[%s16280_s22 + $0x740] sm:$0xff]  ;;  %v16888_v7 = vld [vmem:[%s16280_s22 + $0x748] sm:$0xff] }
 0x115   : > { %3269 = vmatprep.subr.bf16.mxu0 %v14027_v8  ;;  %3310 = vmatprep.subr.bf16.mxu1 %v14029_v13  ;;  %v16804_v13 = vld [vmem:[%s16280_s22 + $0x680] sm:$0xff]  ;;  %24424 = vst [vmem:[#allocation28_spill] sm:$0xff] %v16888_v7  ;;  %v17040_v7 = vld [vmem:[%s16280_s22 + $0x7f8] sm:$0xff] }
 0x116   : > { %3287 = vmatprep.mubr.bf16.mxu0 %v23681_v0  ;;  %3328 = vmatprep.mubr.bf16.mxu1 %v23681_v0  ;;  %v16807_v8 = vld [vmem:[%s16280_s22 + $0x6a0] sm:$0xff]  ;;  %24450 = vst [vmem:[#allocation46_spill] sm:$0xff] %v17040_v7  ;;  %v17161_v7 = vld [vmem:[%s16280_s22 + $0x818] sm:$0xff] }
 0x117   : > { %24413 = vst [vmem:[#allocation17_spill] sm:$0xff] %v16807_v8  ;;  %v16929_v8 = vld [vmem:[%s16280_s22 + $0x750] sm:$0xff]  ;;  %24468 = vst [vmem:[#allocation59_spill] sm:$0xff] %v17161_v7  ;;  %v17295_v7 = vld [vmem:[%s16280_s22 + $0x920] sm:$0xff] }
 0x118   : > { %3270 = vmatpush1.bf16.msra.mxu0 %v14026_v15  ;;  %3311 = vmatpush1.bf16.msra.mxu1 %v14028_v17  ;;  %v16744_v17 = vld [vmem:[%s16280_s22 + $0x650] sm:$0xff]  ;;  %v16782_v15 = vld [vmem:[%s16280_s22 + $0x6c0] sm:$0xff]  ;;  %24432 = vst [vmem:[#allocation34_spill] sm:$0xff] %v16929_v8  ;;  %v17058_v8 = vld [vmem:[%s16280_s22 + $0x798] sm:$0xff] }
 0x119   : > { %3429 = vmatprep.subr.bf16.mxu0 %v14051_v18  ;;  %3470 = vmatprep.subr.bf16.mxu1 %v14053_v22  ;;  %v16747_v18 = vld [vmem:[%s16280_s22 + $0x670] sm:$0xff]  ;;  %v16776_v22 = vld [vmem:[%s16280_s22 + $0x618] sm:$0xff]  ;;  %24451 = vst [vmem:[#allocation47_spill] sm:$0xff] %v17058_v8  ;;  %24488 = vst [vmem:[#allocation72_spill] sm:$0xff] %v17295_v7 }
 0x11a   : > { %v17213_v8 = vld [vmem:[%s16280_s22 + $0x8d0] sm:$0xff] }
 0x11b   : > { %14040 = vmatmul.mubr.msk.bf16.vlgmr.msra.gmra.mxu0 %vm973_vm0, %v16521_v12  ;;  %14041 = vmatmul.mubr.msk.bf16.vlgmr.msra.gmra.mxu1 %vm973_vm0, %v16521_v12  ;;  %v17445_v7 = vld [vmem:[%s16280_s22 + $0x9f0] sm:$0xff] }
 0x11c   : > { %3430 = vmatpush1.bf16.msra.mxu0 %v14050_v28  ;;  %3471 = vmatpush1.bf16.msra.mxu1 %v14052_v32  ;;  %v16759_v28 = vld [vmem:[%s16280_s22 + $0x678] sm:$0xff]  ;;  %v16762_v32 = vld [vmem:[%s16280_s22 + $0x610] sm:$0xff]  ;;  %24512 = vst [vmem:[#allocation88_spill] sm:$0xff] %v17445_v7  ;;  %v17528_v7 = vld [vmem:[%s16280_s22 + $0xa00] sm:$0xff] }
 0x11d   : > { %3431 = vmatprep.subr.bf16.mxu0 %v14043_v33  ;;  %3472 = vmatprep.subr.bf16.mxu1 %v14045_v37  ;;  %v16765_v33 = vld [vmem:[%s16280_s22 + $0x630] sm:$0xff]  ;;  %v16870_v37 = vld [vmem:[%s16280_s22 + $0x6b8] sm:$0xff]  ;;  %24523 = vst [vmem:[#allocation95_spill] sm:$0xff] %v17528_v7 }
 0x11e   : > { %3449 = vmatprep.mubr.bf16.mxu0 %v23681_v0  ;;  %3490 = vmatprep.mubr.bf16.mxu1 %v23681_v0  ;;  %24422 = vst [vmem:[#allocation26_spill] sm:$0xff] %v16870_v37  ;;  %v16991_v37 = vld [vmem:[%s16280_s22 + $0x7c8] sm:$0xff] }
 0x11f   : > { %24439 = vst [vmem:[#allocation39_spill] sm:$0xff] %v16991_v37  ;;  %v17122_v37 = vld [vmem:[%s16280_s22 + $0x850] sm:$0xff] }
 0x120   : > { %3432 = vmatpush1.bf16.msra.mxu0 %v14042_v42  ;;  %3473 = vmatpush1.bf16.msra.mxu1 %v14044_v43  ;;  %v16821_v43 = vld [vmem:[%s16280_s22 + $0x688] sm:$0xff]  ;;  %v16845_v42 = vld [vmem:[%s16280_s22 + $0x6d8] sm:$0xff]  ;;  %24463 = vst [vmem:[#allocation55_spill] sm:$0xff] %v17122_v37  ;;  %v17248_v37 = vld [vmem:[%s16280_s22 + $0x8b0] sm:$0xff] }
 0x121   : > { %3511 = vmatprep.subr.bf16.mxu0 %v14055_v49  ;;  %3552 = vmatprep.subr.bf16.mxu1 %v14057_v51  ;;  %v16785_v51 = vld [vmem:[%s16280_s22 + $0x6e0] sm:$0xff]  ;;  %24414 = vst [vmem:[#allocation18_spill] sm:$0xff] %v16821_v43  ;;  %24418 = vst [vmem:[#allocation22_spill] sm:$0xff] %v16845_v42  ;;  %v16946_v49 = vld [vmem:[%s16280_s22 + $0x758] sm:$0xff] }
 0x122   : > { %v16952_v43 = vld [vmem:[%s16280_s22 + $0x710] sm:$0xff]  ;;  %v16971_v42 = vld [vmem:[%s16280_s22 + $0x738] sm:$0xff]  ;;  %24479 = vst [vmem:[#allocation66_spill] sm:$0xff] %v17248_v37 }
 0x123   : > { %14058 = vmatmul.mubr.msk.bf16.vlgmr.msra.gmra.mxu0 %vm973_vm0, %v16521_v12  ;;  %14059 = vmatmul.mubr.msk.bf16.vlgmr.msra.gmra.mxu1 %vm973_vm0, %v16521_v12  ;;  %24435 = vst [vmem:[#allocation36_spill] sm:$0xff] %v16952_v43  ;;  %v17078_v43 = vld [vmem:[%s16280_s22 + $0x860] sm:$0xff]  ;;  %v17370_v37 = vld [vmem:[%s16280_s22 + $0x938] sm:$0xff] }
 0x124   : > { %3512 = vmatpush1.bf16.msra.mxu0 %v14054_v44  ;;  %3553 = vmatpush1.bf16.msra.mxu1 %v14056_v50  ;;  %v16854_v50 = vld [vmem:[%s16280_s22 + $0x6b0] sm:$0xff]  ;;  %v16867_v44 = vld [vmem:[%s16280_s22 + $0x698] sm:$0xff]  ;;  %24455 = vst [vmem:[#allocation50_spill] sm:$0xff] %v17078_v43  ;;  %v17207_v43 = vld [vmem:[%s16280_s22 + $0x888] sm:$0xff] }
 0x125   : > { %3513 = vmatprep.subr.bf16.mxu0 %v14047_v57  ;;  %24420 = vst [vmem:[#allocation24_spill] sm:$0xff] %v16854_v50  ;;  %3554 = vmatprep.subr.bf16.mxu1 %v14049_v63  ;;  %24421 = vst [vmem:[#allocation25_spill] sm:$0xff] %v16867_v44  ;;  %v16876_v63 = vld [vmem:[%s16280_s22 + $0x760] sm:$0xff]  ;;  %v16994_v44 = vld [vmem:[%s16280_s22 + $0x7e8] sm:$0xff] }
 0x126   : > { %3531 = vmatprep.mubr.bf16.mxu0 %v23681_v0  ;;  %24423 = vst [vmem:[#allocation27_spill] sm:$0xff] %v16876_v63  ;;  %3572 = vmatprep.mubr.bf16.mxu1 %v23681_v0  ;;  %v16905_v0 = vld [vmem:[%s16280_s22 + $0x700] sm:$0xff]  ;;  %24440 = vst [vmem:[#allocation40_spill] sm:$0xff] %v16994_v44  ;;  %v17043_v63 = vld [vmem:[%s16280_s22 + $0x790] sm:$0xff] }
 0x127   : > { %24426 = vst [vmem:[#allocation30_spill] sm:$0xff] %v16905_v0  ;;  %v16997_v50 = vld [vmem:[%s16280_s22 + $0x780] sm:$0xff]  ;;  %v17037_v0 = vld [vmem:[%s16280_s22 + $0x7d8] sm:$0xff]  ;;  %v17119_v44 = vld [vmem:[%s16280_s22 + $0x828] sm:$0xff] }
 0x128   : > { %3514 = vmatpush1.bf16.msra.mxu0 %v14046_v56  ;;  %3555 = vmatpush1.bf16.msra.mxu1 %v24429_v30  ;;  %v24430_v56 = vcombine.high %v16624_v35, %v16627_v36  ;;  %24441 = vst [vmem:[#allocation41_spill] sm:$0xff] %v16997_v50  ;;  %v17000_v35 = vld [vmem:[%s16280_s22 + $0x7a0] sm:$0xff]  ;;  %v24443_v36 = vcombine.low %v16632_v38, %v16635_v39  ;;  %v17018_v38 = vld [vmem:[%s16280_s22 + $0x7a8] sm:$0xff]  ;;  %v17021_v39 = vld [vmem:[%s16280_s22 + $0x7d0] sm:$0xff] }
 0x129   : > { %3714 = vmatprep.subr.bf16.mxu1 %v24434_v34  ;;  %v16955_v34 = vld [vmem:[%s16280_s22 + $0x730] sm:$0xff]  ;;  %24442 = vst [vmem:[#allocation42_spill] sm:$0xff] %v17000_v35  ;;  %24446 = vst [vmem:[#allocation44_spill] sm:$0xff] %v17018_v38  ;;  %v17116_v30 = vld [vmem:[%s16280_s22 + $0x808] sm:$0xff] }
 0x12a   : > { %3673 = vmatprep.subr.bf16.mxu0 %v24430_v56  ;;  %24436 = vst [vmem:[#allocation37_spill] sm:$0xff] %v16955_v34  ;;  %v24448_v56 = vmov 0   ;;  %24449 = vst [vmem:[#allocation45_spill] sm:$0xff] %v17037_v0  ;;  %v17075_v34 = vld [vmem:[%s16280_s22 + $0x840] sm:$0xff]  ;;  %v17138_v38 = vld [vmem:[%s16280_s22 + $0x858] sm:$0xff] }
 0x12b   : > { %14060 = vmatmul.mubr.msk.bf16.vlgmr.msra.gmra.mxu0 %vm973_vm0, %v16521_v12  ;;  %14061 = vmatmul.mubr.msk.bf16.vlgmr.msra.gmra.mxu1 %vm973_vm0, %v16521_v12  ;;  %24454 = vst [vmem:[#allocation49_spill] sm:$0xff] %v17075_v34  ;;  %v17144_v35 = vld [vmem:[%s16280_s22 + $0x810] sm:$0xff]  ;;  %v17164_v0 = vld [vmem:[%s16280_s22 + $0x838] sm:$0xff]  ;;  %v17210_v34 = vld [vmem:[%s16280_s22 + $0x8a8] sm:$0xff] }
 0x12c   : > { %3674 = vmatpush1.bf16.msra.mxu0 %v24438_v1  ;;  %3715 = vmatpush1.bf16.msra.mxu1 %v24443_v36  ;;  %v24444_v1 = vcombine.high %v16638_v40, %v16641_v41  ;;  %v17024_v36 = vld [vmem:[%s16280_s22 + $0x7f0] sm:$0xff]  ;;  %v17081_v40 = vld [vmem:[%s16280_s22 + $0x848] sm:$0xff]  ;;  %v24457_v41 = vcombine.low %v16652_v45, %v16655_v46  ;;  %24465 = vst [vmem:[#allocation57_spill] sm:$0xff] %v17144_v35  ;;  %24469 = vst [vmem:[#allocation60_spill] sm:$0xff] %v17164_v0 }
 0x12d   : > { %3693 = vmatprep.mubr.bf16.mxu0 %v24448_v56  ;;  %3734 = vmatprep.mubr.bf16.mxu1 %v24448_v56  ;;  %24456 = vst [vmem:[#allocation51_spill] sm:$0xff] %v17081_v40  ;;  %v17147_v50 = vld [vmem:[%s16280_s22 + $0x830] sm:$0xff]  ;;  %24477 = vst [vmem:[#allocation65_spill] sm:$0xff] %v17210_v34  ;;  %v24478_v40 = vcombine.low %v16678_v54, %v16681_v55  ;;  %v17266_v57 = vld [vmem:[%s16280_s22 + $0x8b8] sm:$0xff]  ;;  %v24492_v34 = vcombine.low %v16709_v3, %v16712_v4 }
 0x12e   : > { %3675 = vmatprep.subr.bf16.mxu0 %v24444_v1  ;;  %v24447_v1 = vcombine.high %v16652_v45, %v16655_v46  ;;  %v17102_v45 = vld [vmem:[%s16280_s22 + $0x820] sm:$0xff]  ;;  %v24462_v46 = vcombine.high %v16672_v52, %v16675_v53  ;;  %24466 = vst [vmem:[#allocation58_spill] sm:$0xff] %v17147_v50  ;;  %24483 = vst [vmem:[#allocation68_spill] sm:$0xff] %v17266_v57  ;;  %v17289_v0 = vld [vmem:[%s16280_s22 + $0x968] sm:$0xff] }
 0x12f   : > { %24461 = vst [vmem:[#allocation54_spill] sm:$0xff] %v17102_v45  ;;  %v17269_v50 = vld [vmem:[%s16280_s22 + $0x940] sm:$0xff]  ;;  %v17319_v35 = vld [vmem:[%s16280_s22 + $0x970] sm:$0xff]  ;;  %v17348_v45 = vld [vmem:[%s16280_s22 + $0x978] sm:$0xff] }
 0x130   : > { %3716 = vmatprep.subr.bf16.mxu1 %v24447_v1  ;;  %v17046_v1 = vld [vmem:[%s16280_s22 + $0x7b0] sm:$0xff]  ;;  %3676 = vmatpush1.bf16.msra.mxu0 %v24453_v29  ;;  %v24458_v29 = vcombine.high %v16658_v47, %v16661_v48  ;;  %v17170_v47 = vld [vmem:[%s16280_s22 + $0x8e0] sm:$0xff]  ;;  %v24472_v48 = vcombine.low %v16672_v52, %v16675_v53  ;;  %v17188_v52 = vld [vmem:[%s16280_s22 + $0x8e8] sm:$0xff]  ;;  %24484 = vst [vmem:[#allocation69_spill] sm:$0xff] %v17269_v50 }
 0x131   : > { %3717 = vmatpush1.bf16.msra.mxu1 %v24457_v41  ;;  %24471 = vst [vmem:[#allocation62_spill] sm:$0xff] %v17170_v47  ;;  %24475 = vst [vmem:[#allocation64_spill] sm:$0xff] %v17188_v52  ;;  %v17191_v53 = vld [vmem:[%s16280_s22 + $0x880] sm:$0xff]  ;;  %v17286_v41 = vld [vmem:[%s16280_s22 + $0x948] sm:$0xff] }
 0x132   : > { %3755 = vmatprep.subr.bf16.mxu0 %v24458_v29  ;;  %3796 = vmatprep.subr.bf16.mxu1 %v24462_v46  ;;  %v17125_v46 = vld [vmem:[%s16280_s22 + $0x870] sm:$0xff]  ;;  %v17313_v47 = vld [vmem:[%s16280_s22 + $0x928] sm:$0xff]  ;;  %24490 = vst [vmem:[#allocation74_spill] sm:$0xff] %v17319_v35  ;;  %v24491_v29 = vcombine.low %v16696_v61, %v16699_v62  ;;  %v17345_v52 = vld [vmem:[%s16280_s22 + $0x958] sm:$0xff] }
 0x133   : > { %24464 = vst [vmem:[#allocation56_spill] sm:$0xff] %v17125_v46  ;;  %14078 = vmatmul.mubr.msk.bf16.vlgmr.msra.gmra.mxu0 %vm973_vm0, %v16521_v12  ;;  %v17245_v46 = vld [vmem:[%s16280_s22 + $0x890] sm:$0xff]  ;;  %24494 = vst [vmem:[#allocation75_spill] sm:$0xff] %v17348_v45  ;;  %v17385_v50 = vld [vmem:[%s16280_s22 + $0x9e0] sm:$0xff] }
 0x134   : > { %14079 = vmatmul.mubr.msk.bf16.vlgmr.msra.gmra.mxu1 %vm973_vm0, %v16521_v12  ;;  %3756 = vmatpush1.bf16.msra.mxu0 %v24467_v31  ;;  %v17167_v12 = vld [vmem:[%s16280_s22 + $0x8c0] sm:$0xff]  ;;  %v24473_v31 = vcombine.high %v16678_v54, %v16681_v55  ;;  %v17251_v54 = vld [vmem:[%s16280_s22 + $0x898] sm:$0xff]  ;;  %v24481_v55 = vcombine.low %v16690_v59, %v16693_v60  ;;  %24498 = vst [vmem:[#allocation78_spill] sm:$0xff] %v17370_v37  ;;  %24500 = vst [vmem:[#allocation80_spill] sm:$0xff] %v17385_v50 }
 0x135   : > { %24470 = vst [vmem:[#allocation61_spill] sm:$0xff] %v17167_v12  ;;  %3797 = vmatpush1.bf16.msra.mxu1 %v24472_v48  ;;  %v17194_v48 = vld [vmem:[%s16280_s22 + $0x8a0] sm:$0xff]  ;;  %3775 = vmatprep.mubr.bf16.mxu0 %v24448_v56  ;;  %24480 = vst [vmem:[#allocation67_spill] sm:$0xff] %v17251_v54  ;;  %v17316_v12 = vld [vmem:[%s16280_s22 + $0x950] sm:$0xff]  ;;  %v24502_v54 = vcombine.low %v16715_v27, %v16718_v5 }
 0x136   : > { %3757 = vmatprep.subr.bf16.mxu0 %v24473_v31  ;;  %v24476_v31 = vcombine.high %v16690_v59, %v16693_v60  ;;  %3816 = vmatprep.mubr.bf16.mxu1 %v24448_v56  ;;  %v17272_v59 = vld [vmem:[%s16280_s22 + $0x960] sm:$0xff]  ;;  %v24486_v60 = vcombine.high %v16709_v3, %v16712_v4  ;;  %24489 = vst [vmem:[#allocation73_spill] sm:$0xff] %v17316_v12  ;;  %v17351_v3 = vld [vmem:[%s16280_s22 + $0x910] sm:$0xff]  ;;  %v17388_v57 = vld [vmem:[%s16280_s22 + $0x9c8] sm:$0xff] }
 0x137   : > { %24485 = vst [vmem:[#allocation70_spill] sm:$0xff] %v17272_v59  ;;  %v24495_v4 = vcombine.high %v16730_v10, %v16733_v11  ;;  %v17382_v59 = vld [vmem:[%s16280_s22 + $0x9c0] sm:$0xff]  ;;  %24501 = vst [vmem:[#allocation81_spill] sm:$0xff] %v17388_v57  ;;  %v17425_v35 = vld [vmem:[%s16280_s22 + $0x988] sm:$0xff] }
 0x138   : > { %3798 = vmatprep.subr.bf16.mxu1 %v24476_v31  ;;  %v17216_v31 = vld [vmem:[%s16280_s22 + $0x8f0] sm:$0xff]  ;;  %3758 = vmatpush1.bf16.msra.mxu0 %v24478_v40  ;;  %v24482_v40 = vcombine.high %v16696_v61, %v16699_v62  ;;  %v24493_v61 = vcombine.high %v16715_v27, %v16718_v5  ;;  %24499 = vst [vmem:[#allocation79_spill] sm:$0xff] %v17382_v59  ;;  %v17407_v27 = vld [vmem:[%s16280_s22 + $0x980] sm:$0xff]  ;;  %24508 = vst [vmem:[#allocation85_spill] sm:$0xff] %v17425_v35 }
 0x139   : > { %3799 = vmatpush1.bf16.msra.mxu1 %v24481_v55  ;;  %v17297_v55 = vld [vmem:[#allocation6] sm:$0xf]  ;;  %v17364_v62 = vld [vmem:[%s16280_s22 + $0x930] sm:$0xff]  ;;  %24504 = vst [vmem:[#allocation83_spill] sm:$0xff] %v17407_v27  ;;  %v17428_v12 = vld [vmem:[%s16280_s22 + $0x9a8] sm:$0xff] }
 0x13a   : > { %3917 = vmatprep.subr.bf16.mxu0 %v24482_v40  ;;  %3958 = vmatprep.subr.bf16.mxu1 %v24486_v60  ;;  %v17292_v60 = vld [vmem:[%s16280_s22 + $0x900] sm:$0xff]  ;;  %24496 = vst [vmem:[#allocation76_spill] sm:$0xff] %v17364_v62  ;;  %v24507_v40 = vcombine.high %v16744_v17, %v16747_v18  ;;  %24509 = vst [vmem:[#allocation86_spill] sm:$0xff] %v17428_v12  ;;  %v17461_v37 = vld [vmem:[%s16280_s22 + $0x9f8] sm:$0xff] }
 0x13b   : > { %24487 = vst [vmem:[#allocation71_spill] sm:$0xff] %v17292_v60  ;;  %14080 = vmatmul.mubr.msk.bf16.vlgmr.msra.gmra.mxu0 %vm973_vm0, %v17297_v55  ;;  %v17404_v60 = vld [vmem:[%s16280_s22 + $0x9e8] sm:$0xff]  ;;  %v17410_v5 = vld [vmem:[%s16280_s22 + $0x9a0] sm:$0xff]  ;;  %24513 = vst [vmem:[#allocation89_spill] sm:$0xff] %v17461_v37 }
 0x13c   : > { %14081 = vmatmul.mubr.msk.bf16.vlgmr.msra.gmra.mxu1 %vm973_vm0, %v17297_v55  ;;  %3918 = vmatpush1.bf16.msra.mxu0 %v24491_v29  ;;  %v17367_v29 = vld [vmem:[%s16280_s22 + $0x918] sm:$0xff]  ;;  %24503 = vst [vmem:[#allocation82_spill] sm:$0xff] %v17404_v60  ;;  %24505 = vst [vmem:[#allocation84_spill] sm:$0xff] %v17410_v5  ;;  %v17475_v60 = vld [vmem:[%s16280_s22 + $0x990] sm:$0xff] }
 0x13d   : > { %3959 = vmatpush1.bf16.msra.mxu1 %v24492_v34  ;;  %3919 = vmatprep.subr.bf16.mxu0 %v24493_v61  ;;  %24497 = vst [vmem:[#allocation77_spill] sm:$0xff] %v17367_v29  ;;  %v17442_v61 = vld [vmem:[%s16280_s22 + $0x9d0] sm:$0xff]  ;;  %24515 = vst [vmem:[#allocation90_spill] sm:$0xff] %v17475_v60  ;;  %v17481_v50 = vld [vmem:[%s16280_s22 + $0x998] sm:$0xff] }
 0x13e   : > { %3960 = vmatprep.subr.bf16.mxu1 %v24495_v4  ;;  %3937 = vmatprep.mubr.bf16.mxu0 %v24448_v56  ;;  %v17393_v4 = vpop.permute.xlu0 %8708  ;;  %24511 = vst [vmem:[#allocation87_spill] sm:$0xff] %v17442_v61  ;;  %v17478_v57 = vld [vmem:[%s16280_s22 + $0x9b0] sm:$0xff]  ;;  %v17494_v34 = vld [vmem:[%s16280_s22 + $0x9b8] sm:$0xff]  ;;  %v17497_v12 = vld [vmem:[%s16280_s22 + $0xa40] sm:$0xff] }
 0x13f   : > { %3978 = vmatprep.mubr.bf16.mxu1 %v24448_v56  ;;  %24516 = vst [vmem:[#allocation91_spill] sm:$0xff] %v17478_v57  ;;  %24519 = vst [vmem:[#allocation92_spill] sm:$0xff] %v17497_v12  ;;  %v17514_v35 = vld [vmem:[%s16280_s22 + $0xa48] sm:$0xff]  ;;  %v17531_v61 = vld [vmem:[%s16280_s22 + $0xa20] sm:$0xff] }
 0x140   : > { %3920 = vmatpush1.bf16.msra.mxu0 %v24502_v54  ;;  %v24506_v54 = vcombine.low %v16730_v10, %v16733_v11  ;;  %v24510_v10 = vcombine.high %v16750_v19, %v16759_v28  ;;  %v24518_v11 = vcombine.high %v16762_v32, %v16765_v33  ;;  %24524 = vst [vmem:[#allocation96_spill] sm:$0xff] %v17531_v61  ;;  %v17534_v62 = vld [vmem:[%s16280_s22 + $0xa08] sm:$0xff]  ;;  %v17554_v37 = vld [vmem:[%s16280_s22 + $0xa70] sm:$0xff] }
 0x141   : > { %3999 = vmatprep.subr.bf16.mxu0 %v24507_v40  ;;  %24525 = vst [vmem:[#allocation97_spill] sm:$0xff] %v17534_v62  ;;  %v17548_v60 = vld [vmem:[%s16280_s22 + $0xa28] sm:$0xff]  ;;  %24529 = vst [vmem:[#allocation100_spill] sm:$0xff] %v17554_v37  ;;  %v24531_v40 = vcombine.high %v16782_v15, %v16785_v51  ;;  %v17602_v57 = vld [vmem:[%s16280_s22 + $0xa10] sm:$0xff]  ;;  %v24538_v62 = vcombine.low %v16798_v21, %v16801_v16 }
 0x142   : > { %3961 = vmatpush1.bf16.msra.mxu1 %v24506_v54  ;;  %v17458_v54 = vld [vmem:[%s16280_s22 + $0x9d8] sm:$0xff]  ;;  %24527 = vst [vmem:[#allocation98_spill] sm:$0xff] %v17548_v60  ;;  %24536 = vst [vmem:[#allocation103_spill] sm:$0xff] %v17602_v57  ;;  %v17657_v57 = vld [vmem:[%s16280_s22 + $0xac8] sm:$0xff] }
 0x143   : > { %4040 = vmatprep.subr.bf16.mxu1 %v24510_v10  ;;  %v1011_v45 = vpop.f32.mrf.mxu0  ;;  %14098 = vmatmul.mubr.msk.bf16.vlgmr.msra.gmra.mxu0 %vm973_vm0, %v17297_v55  ;;  %v1052_v29 = vpop.f32.mrf.mxu1  ;;  %v24514_v10 = vcombine.low %v16744_v17, %v16747_v18  ;;  %v24517_v18 = vcombine.low %v16750_v19, %v16759_v28  ;;  %v17620_v37 = vld [vmem:[%s16280_s22 + $0xa38] sm:$0xff]  ;;  %v24555_v7 = vld [vmem:[#allocation22_spill] sm:$0xff] }
 0x144   : > { %v8711_v59 = vmul.f32 %v17393_v4, %v1011_v45  ;;  %v8713_v17 = vmul.f32 %v17393_v4, %v1052_v29  ;;  %v17500_v45 = vld [vmem:[%s16280_s22 + $0xa60] sm:$0xff]  ;;  %v17503_v28 = vpop.permute.xlu0 %8970  ;;  %4019 = vmatprep.mubr.bf16.mxu0 %v24448_v56  ;;  %24542 = vst [vmem:[#allocation105_spill] sm:$0xff] %v17620_v37 }
 0x145   : > { %14099 = vmatmul.mubr.msk.bf16.vlgmr.msra.gmra.mxu1 %vm973_vm0, %v17297_v55  ;;  %4000 = vmatpush1.bf16.msra.mxu0 %v24514_v10  ;;  %v1013_v10 = vpop.f32.mrf.mxu0  ;;  %24520 = vst [vmem:[#allocation93_spill] sm:$0xff] %v17500_v45  ;;  %v1054_v19 = vpop.f32.mrf.mxu1  ;;  %v17570_v45 = vld [vmem:[%s16280_s22 + $0xa78] sm:$0xff] }
 0x146   : > { %4041 = vmatpush1.bf16.msra.mxu1 %v24517_v18  ;;  %4001 = vmatprep.subr.bf16.mxu0 %v24518_v11  ;;  %v8712_v29 = vmul.f32 %v17393_v4, %v1013_v10  ;;  %v24521_v11 = vcombine.high %v16776_v22, %v16779_v20  ;;  %v17517_v10 = vld [vmem:[%s16280_s22 + $0xa68] sm:$0xff]  ;;  %v8714_v5 = vmul.f32 %v17393_v4, %v1054_v19  ;;  %v17567_v18 = vld [vmem:[%s16280_s22 + $0xa58] sm:$0xff] }
 0x147   : > { %24522 = vst [vmem:[#allocation94_spill] sm:$0xff] %v17517_v10  ;;  %v1015_v27 = vpop.f32.mrf.mxu0  ;;  %4060 = vmatprep.mubr.bf16.mxu1 %v24448_v56  ;;  %v24526_v19 = vcombine.low %v16762_v32, %v16765_v33  ;;  %v24530_v32 = vcombine.low %v16776_v22, %v16779_v20  ;;  %24532 = vst [vmem:[#allocation101_spill] sm:$0xff] %v17567_v18  ;;  %v24534_v20 = vcombine.high %v16798_v21, %v16801_v16  ;;  %v24543_v21 = vld [vmem:[#allocation18_spill] sm:$0xff]  ;;  %v17647_v18 = vld [vmem:[%s16280_s22 + $0xae0] sm:$0xff] }
 0x148   : > { %4042 = vmatprep.subr.bf16.mxu1 %v24521_v11  ;;  %v1056_v27 = vpop.f32.mrf.mxu1  ;;  %v8975_v11 = vadd.f32 %v17503_v28, %v8713_v17  ;;  %24533 = vst [vmem:[#allocation102_spill] sm:$0xff] %v17570_v45  ;;  %v8974_v22 = vadd.f32 %v17503_v28, %v8712_v29  ;;  %v17617_v29 = vld [vmem:[%s16280_s22 + $0xa18] sm:$0xff] }
 0x149   : > { %4002 = vmatpush1.bf16.msra.mxu0 %v24526_v19  ;;  %v17551_v27 = vld [vmem:[%s16280_s22 + $0xa50] sm:$0xff]  ;;  %v1016_v33 = vpop.f32.mrf.mxu0  ;;  %v8973_v19 = vadd.f32 %v17503_v28, %v8711_v59  ;;  %v8976_v59 = vadd.f32 %v17503_v28, %v8714_v5 }
 0x14a   : > { %24528 = vst [vmem:[#allocation99_spill] sm:$0xff] %v17551_v27  ;;  %4043 = vmatpush1.bf16.msra.mxu1 %v24530_v32  ;;  %4161 = vmatprep.subr.bf16.mxu0 %v24531_v40  ;;  %v1057_v12 = vpop.f32.mrf.mxu1  ;;  %v17605_v33 = vld [vmem:[%s16280_s22 + $0xa30] sm:$0xff]  ;;  %v9231_v60 = vmax.f32 %v8975_v11, 0.0  ;;  %v9230_v27 = vmax.f32 %v8974_v22, 0.0 }
 0x14b   : > { %4202 = vmatprep.subr.bf16.mxu1 %v24534_v20  ;;  %v1093_v32 = vpop.f32.mrf.mxu0  ;;  %v24535_v12 = vcombine.low %v16782_v15, %v16785_v51  ;;  %24537 = vst [vmem:[#allocation104_spill] sm:$0xff] %v17605_v33  ;;  %v9229_v40 = vmax.f32 %v8973_v19, 0.0  ;;  %v24539_v51 = vld [vmem:[#allocation17_spill] sm:$0xff]  ;;  %v9232_v16 = vmax.f32 %v8976_v59, 0.0 }
 0x14c   : > { %14100 = vmatmul.mubr.msk.bf16.vlgmr.msra.gmra.mxu0 %vm973_vm0, %v17297_v55  ;;  %v8715_v20 = vmul.f32 %v17393_v4, %v1093_v32  ;;  %v1134_v17 = vpop.f32.mrf.mxu1  ;;  %24541 = vst [vmem:[#allocation17_spill] sm:$0xff] %v17617_v29  ;;  %v9487_v33 = vpack.c.bf16 %v9231_v60, %v9231_v60 }
 0x14d   : > { %14101 = vmatmul.mubr.msk.bf16.vlgmr.msra.gmra.mxu1 %vm973_vm0, %v17297_v55  ;;  %4162 = vmatpush1.bf16.msra.mxu0 %v24535_v12  ;;  %v8717_v32 = vmul.f32 %v17393_v4, %v1134_v17  ;;  %v1095_v15 = vpop.f32.mrf.mxu0  ;;  %v24540_v12 = vcombine.high %v16804_v13, %v24539_v51 }
 0x14e   : > { %4203 = vmatpush1.bf16.msra.mxu1 %v24538_v62  ;;  %v8977_v17 = vadd.f32 %v17503_v28, %v8715_v20  ;;  %v8716_v11 = vmul.f32 %v17393_v4, %v1095_v15  ;;  %v1136_v19 = vpop.f32.mrf.mxu1  ;;  %v24544_v62 = vld [vmem:[#allocation19_spill] sm:$0xff]  ;;  %4181 = vmatprep.mubr.bf16.mxu0 %v24448_v56  ;;  %v17644_v20 = vld [vmem:[%s16280_s22 + $0xac0] sm:$0xff] }
 0x14f   : > { %4163 = vmatprep.subr.bf16.mxu0 %v24540_v12  ;;  %v24545_v61 = vcombine.high %v24543_v21, %v24544_v62  ;;  %v8979_v12 = vadd.f32 %v17503_v28, %v8717_v32  ;;  %v8718_v5 = vmul.f32 %v17393_v4, %v1136_v19  ;;  %v1097_v45 = vpop.f32.mrf.mxu0  ;;  %4222 = vmatprep.mubr.bf16.mxu1 %v24448_v56  ;;  %v17660_v19 = vld [vmem:[%s16280_s22 + $0xae8] sm:$0xff] }
 0x150   : > { %v9233_v59 = vmax.f32 %v8977_v17, 0.0  ;;  %v1138_v15 = vpop.f32.mrf.mxu1  ;;  %v24546_v32 = vcombine.low %v16804_v13, %v24539_v51  ;;  %24547 = vst [vmem:[#allocation18_spill] sm:$0xff] %v17644_v20  ;;  %24548 = vst [vmem:[#allocation19_spill] sm:$0xff] %v17647_v18  ;;  %v9485_v17 = vpack.c.bf16 %v9229_v40, %v9229_v40  ;;  %v24550_v51 = vld [vmem:[#allocation20_spill] sm:$0xff]  ;;  %v9488_v40 = vpack.c.bf16 %v9232_v16, %v9232_v16 }
 0x151   : > { %4204 = vmatprep.subr.bf16.mxu1 %v24545_v61  ;;  %v8978_v61 = vadd.f32 %v17503_v28, %v8716_v11  ;;  %v9235_v22 = vmax.f32 %v8979_v12, 0.0  ;;  %v8980_v11 = vadd.f32 %v17503_v28, %v8718_v5  ;;  %v24549_v15 = vcombine.low %v24543_v21, %v24544_v62  ;;  %v1098_v13 = vpop.f32.mrf.mxu0  ;;  %24553 = vst [vmem:[#allocation20_spill] sm:$0xff] %v17657_v57  ;;  %v24556_v5 = vld [vmem:[#allocation23_spill] sm:$0xff] }
 0x152   : > { %4164 = vmatpush1.bf16.msra.mxu0 %v24546_v32  ;;  %v24551_v32 = vld [vmem:[#allocation21_spill] sm:$0xff]  ;;  %v9489_v37 = vpack.c.bf16 %v9233_v59, %v9233_v59  ;;  %v9486_v12 = vpack.c.bf16 %v9230_v27, %v9230_v27  ;;  %v1139_v60 = vpop.f32.mrf.mxu1  ;;  %v24557_v10 = vcombine.high %v24555_v7, %v24556_v5  ;;  %v24594_v57 = vld [vmem:[#allocation35_spill] sm:$0xff] }
 0x153   : > { %4205 = vmatpush1.bf16.msra.mxu1 %v24549_v15  ;;  %v24552_v45 = vcombine.high %v24550_v51, %v24551_v32  ;;  %24554 = vst [vmem:[#allocation21_spill] sm:$0xff] %v17660_v19  ;;  %v9234_v29 = vmax.f32 %v8978_v61, 0.0  ;;  %v9491_v21 = vpack.c.bf16 %v9235_v22, %v9235_v22  ;;  %v9236_v62 = vmax.f32 %v8980_v11, 0.0  ;;  %v1255_v15 = vpop.f32.mrf.mxu0 }
 0x154   : > { %4284 = vmatprep.subr.bf16.mxu1 %v24557_v10  ;;  %v8719_v59 = vmul.f32 %v17393_v4, %v1255_v15  ;;  %v1296_v61 = vpop.f32.mrf.mxu1  ;;  %v24558_v10 = vcombine.low %v24550_v51, %v24551_v32  ;;  %v17687_v51 = vld [vmem:[%s16280_s22 + $0xa80] sm:$0xff] }
 0x155   : > { %4243 = vmatprep.subr.bf16.mxu0 %v24552_v45  ;;  %14118 = vmatmul.mubr.msk.bf16.vlgmr.msra.gmra.mxu0 %vm973_vm0, %v17297_v55  ;;  %v9490_v16 = vpack.c.bf16 %v9234_v29, %v9234_v29  ;;  %v9805_v11 = vmax.bf16 %v9491_v21, %v9489_v37  ;;  %v9492_v13 = vpack.c.bf16 %v9236_v62, %v9236_v62  ;;  %v1257_v15 = vpop.f32.mrf.mxu0  ;;  %v24560_v45 = vld [vmem:[#allocation24_spill] sm:$0xff] }
 0x156   : > { %14119 = vmatmul.mubr.msk.bf16.vlgmr.msra.gmra.mxu1 %vm973_vm0, %v17297_v55  ;;  %4244 = vmatpush1.bf16.msra.mxu0 %v24558_v10  ;;  %v8721_v60 = vmul.f32 %v17393_v4, %v1296_v61  ;;  %v24559_v29 = vcombine.low %v24555_v7, %v24556_v5  ;;  %v24561_v27 = vcombine.high %v16851_v26, %v24560_v45  ;;  %v17690_v32 = vld [vmem:[%s16280_s22 + $0xaa0] sm:$0xff]  ;;  %v1298_v61 = vpop.f32.mrf.mxu1  ;;  %v24564_v10 = vld [vmem:[#allocation25_spill] sm:$0xff]  ;;  %v24565_v7 = vld [vmem:[#allocation26_spill] sm:$0xff] }
 0x157   : > { %24562 = vst [vmem:[#allocation22_spill] sm:$0xff] %v17687_v51  ;;  %24563 = vst [vmem:[#allocation23_spill] sm:$0xff] %v17690_v32  ;;  %v9741_v37 = vmax.bf16 %v9487_v33, %v9485_v17  ;;  %v9742_v21 = vmax.bf16 %v9488_v40, %v9486_v12  ;;  %v8720_v62 = vmul.f32 %v17393_v4, %v1257_v15  ;;  %4263 = vmatprep.mubr.bf16.mxu0 %v24448_v56  ;;  %v1259_v17 = vpop.f32.mrf.mxu0  ;;  %v17705_v12 = vld [vmem:[%s16280_s22 + $0xaa8] sm:$0xff]  ;;  %v17708_v40 = vld [vmem:[%s16280_s22 + $0xad0] sm:$0xff] }
 0x158   : > { %4285 = vmatpush1.bf16.msra.mxu1 %v24559_v29  ;;  %4245 = vmatprep.subr.bf16.mxu0 %v24561_v27  ;;  %v24566_v5 = vcombine.high %v24564_v10, %v24565_v7  ;;  %v17698_v29 = vld [vmem:[%s16280_s22 + $0xa88] sm:$0xff]  ;;  %v9806_v27 = vmax.bf16 %v9492_v13, %v9490_v16  ;;  %v8981_v22 = vadd.f32 %v17503_v28, %v8719_v59  ;;  %v17711_v15 = vld [vmem:[%s16280_s22 + $0xaf0] sm:$0xff]  ;;  %v1300_v20 = vpop.f32.mrf.mxu1  ;;  %v17727_v17 = vld [vmem:[%s16280_s22 + $0xaf8] sm:$0xff] }
 0x159   : > { %24567 = vst [vmem:[#allocation24_spill] sm:$0xff] %v17698_v29  ;;  %v8983_v18 = vadd.f32 %v17503_v28, %v8721_v60  ;;  %v8722_v33 = vmul.f32 %v17393_v4, %v1298_v61  ;;  %4304 = vmatprep.mubr.bf16.mxu1 %v24448_v56  ;;  %24568 = vst [vmem:[#allocation25_spill] sm:$0xff] %v17705_v12  ;;  %v24571_v16 = vcombine.low %v16851_v26, %v24560_v45  ;;  %v17724_v61 = vld [vmem:[%s16280_s22 + $0xad8] sm:$0xff]  ;;  %v24577_v32 = vld [vmem:[#allocation28_spill] sm:$0xff] }
 0x15a   : > { %4286 = vmatprep.subr.bf16.mxu1 %v24566_v5  ;;  %24569 = vst [vmem:[#allocation26_spill] sm:$0xff] %v17708_v40  ;;  %24570 = vst [vmem:[#allocation106_spill] sm:$0xff] %v17711_v15  ;;  %v8982_v5 = vadd.f32 %v17503_v28, %v8720_v62  ;;  %v9869_v20 = vmax.bf16 %v9805_v11, %v9741_v37  ;;  %v9870_v62 = vmax.bf16 %v9806_v27, %v9742_v21  ;;  %v24575_v13 = vld [vmem:[#allocation27_spill] sm:$0xff]  ;;  %v1301_v60 = vpop.f32.mrf.mxu1  ;;  %v24578_v51 = vld [vmem:[#allocation29_spill] sm:$0xff] }
 0x15b   : > { %4246 = vmatpush1.bf16.msra.mxu0 %v24571_v16  ;;  %24572 = vst [vmem:[#allocation107_spill] sm:$0xff] %v17724_v61  ;;  %24573 = vst [vmem:[#allocation108_spill] sm:$0xff] %v17727_v17  ;;  %v8984_v26 = vadd.f32 %v17503_v28, %v8722_v33  ;;  %v24574_v45 = vcombine.low %v24564_v10, %v24565_v7  ;;  %v1260_v16 = vpop.f32.mrf.mxu0  ;;  %v24576_v59 = vcombine.high %v16873_v6, %v24575_v13  ;;  %v17748_v7 = vld [vmem:[%s16280_s22 + $0xa90] sm:$0xff]  ;;  %v17761_v21 = vld [vmem:[%s16280_s22 + $0xab8] sm:$0xff] }
 0x15c   : > { %v24579_v19 = vcombine.high %v24577_v32, %v24578_v51  ;;  %24580 = vst [vmem:[#allocation27_spill] sm:$0xff] %v17748_v7  ;;  %v17751_v27 = vld [vmem:[%s16280_s22 + $0xab0] sm:$0xff]  ;;  %v14482_v33 = vcombine.low %v9869_v20, %v9870_v62  ;;  %v9239_v60 = vmax.f32 %v8983_v18, 0.0  ;;  %v17758_v16 = vld [vmem:[%s16280_s22 + $0xa98] sm:$0xff]  ;;  %v9238_v11 = vmax.f32 %v8982_v5, 0.0  ;;  %v1378_v15 = vpop.f32.mrf.mxu1  ;;  %v17807_v17 = vld [vmem:[%s16280_s22 + $0xb68] sm:$0xff] }
 0x15d   : > { %4287 = vmatpush1.bf16.msra.mxu1 %v24574_v45  ;;  %4405 = vmatprep.subr.bf16.mxu0 %v24576_v59  ;;  %24581 = vst [vmem:[#allocation28_spill] sm:$0xff] %v17751_v27  ;;  %v9237_v59 = vmax.f32 %v8981_v22, 0.0  ;;  %v9240_v10 = vmax.f32 %v8984_v26, 0.0  ;;  %v24582_v18 = vcombine.low %v16873_v6, %v24575_v13  ;;  %v8725_v20 = vmul.f32 %v17393_v4, %v1378_v15  ;;  %v24584_v26 = vld [vmem:[#allocation30_spill] sm:$0xff]  ;;  %v17791_v6 = vld [vmem:[%s16280_s22 + $0xb40] sm:$0xff] }
 0x15e   : > { %4446 = vmatprep.subr.bf16.mxu1 %v24579_v19  ;;  %v1337_v19 = vpop.f32.mrf.mxu0  ;;  %14120 = vmatmul.mubr.msk.bf16.vlgmr.msra.gmra.mxu0 %vm973_vm0, %v17297_v55  ;;  %10125 = vst [vmem:[#allocation2 + $0xb0] sm:$0xff] %v14482_v33  ;;  %v24583_v5 = vcombine.low %v24577_v32, %v24578_v51  ;;  %v24587_v51 = vld [vmem:[#allocation32_spill] sm:$0xff]  ;;  %v24588_v32 = vld [vmem:[#allocation33_spill] sm:$0xff]  ;;  %v17798_v27 = vpack.c.bf16 %v9239_v60, %v9239_v60  ;;  %24590 = vst [vmem:[#allocation29_spill] sm:$0xff] %v17807_v17 }
 0x15f   : > { %v8723_v37 = vmul.f32 %v17393_v4, %v1337_v19  ;;  %4406 = vmatpush1.bf16.msra.mxu0 %v24582_v18  ;;  %v24585_v19 = vld [vmem:[#allocation31_spill] sm:$0xff]  ;;  %v1380_v18 = vpop.f32.mrf.mxu1  ;;  %4425 = vmatprep.mubr.bf16.mxu0 %v24448_v56  ;;  %v17794_v22 = vld [vmem:[%s16280_s22 + $0xb60] sm:$0xff]  ;;  %v17796_v13 = vpack.c.bf16 %v9237_v59, %v9237_v59  ;;  %v17811_v61 = vpack.c.bf16 %v9240_v10, %v9240_v10 }
 0x160   : > { %14121 = vmatmul.mubr.msk.bf16.vlgmr.msra.gmra.mxu1 %vm973_vm0, %v17297_v55  ;;  %v1339_v62 = vpop.f32.mrf.mxu0  ;;  %v24586_v45 = vcombine.high %v24584_v26, %v24585_v19  ;;  %v24592_v12 = vcombine.low %v24587_v51, %v24588_v32 }
 0x161   : > { %4447 = vmatpush1.bf16.msra.mxu1 %v24583_v5  ;;  %v8985_v33 = vadd.f32 %v17503_v28, %v8723_v37  ;;  %v8724_v15 = vmul.f32 %v17393_v4, %v1339_v62  ;;  %v24589_v5 = vcombine.high %v24587_v51, %v24588_v32  ;;  %v8987_v37 = vadd.f32 %v17503_v28, %v8725_v20  ;;  %v1382_v60 = vpop.f32.mrf.mxu1 }
 0x162   : > { %4407 = vmatprep.subr.bf16.mxu0 %v24586_v45  ;;  %v8726_v62 = vmul.f32 %v17393_v4, %v1380_v18  ;;  %v1341_v7 = vpop.f32.mrf.mxu0  ;;  %4466 = vmatprep.mubr.bf16.mxu1 %v24448_v56  ;;  %v17809_v45 = vpack.c.bf16 %v9238_v11, %v9238_v11  ;;  %v24591_v20 = vcombine.low %v24584_v26, %v24585_v19  ;;  %v24593_v11 = vld [vmem:[#allocation34_spill] sm:$0xff] }
 0x163   : > { %4448 = vmatprep.subr.bf16.mxu1 %v24589_v5  ;;  %v17804_v5 = vld [vmem:[%s16280_s22 + $0xb48] sm:$0xff]  ;;  %v9241_v40 = vmax.f32 %v8985_v33, 0.0  ;;  %v8986_v59 = vadd.f32 %v17503_v28, %v8724_v15  ;;  %v9243_v18 = vmax.f32 %v8987_v37, 0.0  ;;  %v24595_v10 = vcombine.high %v24593_v11, %v24594_v57  ;;  %v1383_v37 = vpop.f32.mrf.mxu1 }
 0x164   : > { %4408 = vmatpush1.bf16.msra.mxu0 %v24591_v20  ;;  %v8988_v7 = vadd.f32 %v17503_v28, %v8726_v62  ;;  %v1342_v29 = vpop.f32.mrf.mxu0  ;;  %v24596_v51 = vcombine.high %v16946_v49, %v16949_v14  ;;  %v9743_v32 = vmax.bf16 %v17798_v27, %v17796_v13  ;;  %v9744_v37 = vmax.bf16 %v17811_v61, %v17809_v45  ;;  %v17866_v33 = vld [vmem:[%s16280_s22 + $0xb28] sm:$0xff] }
 0x165   : > { %4449 = vmatpush1.bf16.msra.mxu1 %v24592_v12  ;;  %4487 = vmatprep.subr.bf16.mxu0 %v24595_v10  ;;  %v9497_v19 = vpack.c.bf16 %v9241_v40, %v9241_v40  ;;  %v9242_v15 = vmax.f32 %v8986_v59, 0.0  ;;  %v9499_v62 = vpack.c.bf16 %v9243_v18, %v9243_v18  ;;  %v17842_v59 = vld [vmem:[%s16280_s22 + $0xb00] sm:$0xff]  ;;  %v1540_v18 = vpop.f32.mrf.mxu1  ;;  %v24601_v61 = vcombine.low %v16946_v49, %v16949_v14 }
 0x166   : > { %4528 = vmatprep.subr.bf16.mxu1 %v24596_v51  ;;  %v9244_v60 = vmax.f32 %v8988_v7, 0.0  ;;  %v1499_v20 = vpop.f32.mrf.mxu0  ;;  %24597 = vst [vmem:[#allocation30_spill] sm:$0xff] %v17842_v59  ;;  %v17845_v10 = vld [vmem:[%s16280_s22 + $0xb20] sm:$0xff]  ;;  %v24599_v7 = vcombine.low %v24593_v11, %v24594_v57  ;;  %v17856_v51 = vld [vmem:[%s16280_s22 + $0xb08] sm:$0xff]  ;;  %v8729_v40 = vmul.f32 %v17393_v4, %v1540_v18  ;;  %24605 = vst [vmem:[#allocation33_spill] sm:$0xff] %v17866_v33 }
 0x167   : > { %14138 = vmatmul.mubr.msk.bf16.vlgmr.msra.gmra.mxu0 %vm973_vm0, %v17297_v55  ;;  %24598 = vst [vmem:[#allocation31_spill] sm:$0xff] %v17845_v10  ;;  %v9498_v27 = vpack.c.bf16 %v9242_v15, %v9242_v15  ;;  %v8727_v13 = vmul.f32 %v17393_v4, %v1499_v20  ;;  %24600 = vst [vmem:[#allocation32_spill] sm:$0xff] %v17856_v51  ;;  %v9807_v12 = vmax.bf16 %v9499_v62, %v9497_v19  ;;  %v24602_v15 = vld [vmem:[#allocation36_spill] sm:$0xff]  ;;  %v24603_v20 = vld [vmem:[#allocation37_spill] sm:$0xff] }
 0x168   : > { %14139 = vmatmul.mubr.msk.bf16.vlgmr.msra.gmra.mxu1 %vm973_vm0, %v17297_v55  ;;  %4488 = vmatpush1.bf16.msra.mxu0 %v24599_v7  ;;  %v9500_v29 = vpack.c.bf16 %v9244_v60, %v9244_v60  ;;  %v1501_v45 = vpop.f32.mrf.mxu0  ;;  %v24604_v26 = vcombine.high %v24602_v15, %v24603_v20  ;;  %v17869_v57 = vld [vmem:[%s16280_s22 + $0xb50] sm:$0xff]  ;;  %v1542_v60 = vpop.f32.mrf.mxu1  ;;  %v24606_v14 = vcombine.high %v16968_v25, %v16971_v42 }
 0x169   : > { %4529 = vmatpush1.bf16.msra.mxu1 %v24601_v61  ;;  %v17872_v11 = vld [vmem:[%s16280_s22 + $0xb70] sm:$0xff]  ;;  %v8989_v19 = vadd.f32 %v17503_v28, %v8727_v13  ;;  %v8728_v62 = vmul.f32 %v17393_v4, %v1501_v45  ;;  %4507 = vmatprep.mubr.bf16.mxu0 %v24448_v56  ;;  %v8991_v18 = vadd.f32 %v17503_v28, %v8729_v40  ;;  %v17888_v45 = vld [vmem:[%s16280_s22 + $0xb58] sm:$0xff] }
 0x16a   : > { %4489 = vmatprep.subr.bf16.mxu0 %v24604_v26  ;;  %4530 = vmatprep.subr.bf16.mxu1 %v24606_v14  ;;  %v9808_v26 = vmax.bf16 %v9500_v29, %v9498_v27  ;;  %v8730_v7 = vmul.f32 %v17393_v4, %v1542_v60  ;;  %v1503_v13 = vpop.f32.mrf.mxu0  ;;  %24607 = vst [vmem:[#allocation34_spill] sm:$0xff] %v17888_v45  ;;  %v17891_v14 = vld [vmem:[%s16280_s22 + $0xb78] sm:$0xff]  ;;  %v1544_v49 = vpop.f32.mrf.mxu1  ;;  %v17907_v61 = vld [vmem:[%s16280_s22 + $0xb30] sm:$0xff]  ;;  %v17995_v45 = vld [vmem:[%s16280_s22 + $0xba0] sm:$0xff] }
 0x16b   : > { %4548 = vmatprep.mubr.bf16.mxu1 %v24448_v56  ;;  %24608 = vst [vmem:[#allocation35_spill] sm:$0xff] %v17891_v14  ;;  %v8990_v17 = vadd.f32 %v17503_v28, %v8728_v62  ;;  %v24609_v29 = vcombine.low %v24602_v15, %v24603_v20  ;;  %v17904_v13 = vld [vmem:[%s16280_s22 + $0xb10] sm:$0xff]  ;;  %24611 = vst [vmem:[#allocation37_spill] sm:$0xff] %v17907_v61  ;;  %v9871_v62 = vmax.bf16 %v9807_v12, %v9743_v32  ;;  %v17917_v27 = vld [vmem:[%s16280_s22 + $0xb18] sm:$0xff] }
 0x16c   : > { %24610 = vst [vmem:[#allocation36_spill] sm:$0xff] %v17904_v13  ;;  %v9872_v10 = vmax.bf16 %v9808_v26, %v9744_v37  ;;  %v9245_v49 = vmax.f32 %v8989_v19, 0.0  ;;  %v8992_v59 = vadd.f32 %v17503_v28, %v8730_v7  ;;  %v24612_v15 = vcombine.low %v16968_v25, %v16971_v42  ;;  %v1504_v20 = vpop.f32.mrf.mxu0  ;;  %v17920_v60 = vld [vmem:[%s16280_s22 + $0xb38] sm:$0xff]  ;;  %v1545_v51 = vpop.f32.mrf.mxu1  ;;  %v24618_v32 = vld [vmem:[#allocation40_spill] sm:$0xff] }
 0x16d   : > { %4490 = vmatpush1.bf16.msra.mxu0 %v24609_v29  ;;  %v24613_v29 = vld [vmem:[#allocation38_spill] sm:$0xff]  ;;  %24616 = vst [vmem:[#allocation109_spill] sm:$0xff] %v17920_v60  ;;  %v9247_v33 = vmax.f32 %v8991_v18, 0.0  ;;  %v24617_v12 = vld [vmem:[#allocation39_spill] sm:$0xff]  ;;  %v9246_v7 = vmax.f32 %v8990_v17, 0.0  ;;  %v24628_v19 = vld [vmem:[#allocation44_spill] sm:$0xff] }
 0x16e   : > { %4531 = vmatpush1.bf16.msra.mxu1 %v24612_v15  ;;  %v24614_v40 = vcombine.high %v16974_v23, %v24613_v29  ;;  %24615 = vst [vmem:[#allocation38_spill] sm:$0xff] %v17917_v27  ;;  %v24619_v37 = vcombine.high %v24617_v12, %v24618_v32  ;;  %v14483_v26 = vcombine.low %v9871_v62, %v9872_v10  ;;  %v1581_v15 = vpop.f32.mrf.mxu0  ;;  %v1622_v20 = vpop.f32.mrf.mxu1  ;;  %v17976_v17 = vld [vmem:[%s16280_s22 + $0xbe8] sm:$0xff]  ;;  %24634 = vst [vmem:[#allocation44_spill] sm:$0xff] %v17995_v45  ;;  %v18066_v45 = vld [vmem:[%s16280_s22 + $0xbd8] sm:$0xff] }
 0x16f   : > { %v8731_v18 = vmul.f32 %v17393_v4, %v1581_v15  ;;  %v24620_v10 = vcombine.low %v16974_v23, %v24613_v29  ;;  %v17945_v62 = vpack.c.bf16 %v9245_v49, %v9245_v49  ;;  %v24621_v15 = vcombine.low %v24617_v12, %v24618_v32  ;;  %v24622_v23 = vld [vmem:[#allocation41_spill] sm:$0xff]  ;;  %v24623_v29 = vld [vmem:[#allocation42_spill] sm:$0xff] }
 0x170   : > { %4649 = vmatprep.subr.bf16.mxu0 %v24614_v40  ;;  %4690 = vmatprep.subr.bf16.mxu1 %v24619_v37  ;;  %v9248_v40 = vmax.f32 %v8992_v59, 0.0  ;;  %10126 = vst [vmem:[#allocation2] sm:$0xff] %v14483_v26  ;;  %v8733_v37 = vmul.f32 %v17393_v4, %v1622_v20  ;;  %v1583_v51 = vpop.f32.mrf.mxu0  ;;  %v17957_v59 = vld [vmem:[%s16280_s22 + $0xbc0] sm:$0xff]  ;;  %v17962_v49 = vld [vmem:[#allocation2 + $0xb0] sm:$0x11]  ;;  %v17964_v42 = vpack.c.bf16 %v9247_v33, %v9247_v33  ;;  %v1624_v32 = vpop.f32.mrf.mxu1  ;;  %24631 = vst [vmem:[#allocation42_spill] sm:$0xff] %v17976_v17 }
 0x171   : > { %14140 = vmatmul.mubr.msk.bf16.vlgmr.msra.gmra.mxu0 %vm973_vm0, %v17297_v55  ;;  %14141 = vmatmul.mubr.msk.bf16.vlgmr.msra.gmra.mxu1 %vm973_vm0, %v17297_v55  ;;  %24625 = vst [vmem:[#allocation39_spill] sm:$0xff] %v17957_v59  ;;  %v17960_v26 = vld [vmem:[%s16280_s22 + $0xbe0] sm:$0xff]  ;;  %v8993_v20 = vadd.f32 %v17503_v28, %v8731_v18  ;;  %v8732_v12 = vmul.f32 %v17393_v4, %v1583_v51 }
 0x172   : > { %4650 = vmatpush1.bf16.msra.mxu0 %v24620_v10  ;;  %4691 = vmatpush1.bf16.msra.mxu1 %v24621_v15  ;;  %v24624_v10 = vcombine.high %v24622_v23, %v24623_v29  ;;  %24626 = vst [vmem:[#allocation40_spill] sm:$0xff] %v17960_v26  ;;  %v24627_v15 = vld [vmem:[#allocation43_spill] sm:$0xff]  ;;  %v17978_v60 = vpack.c.bf16 %v9246_v7, %v9246_v7  ;;  %v1585_v27 = vpop.f32.mrf.mxu0  ;;  %v1626_v13 = vpop.f32.mrf.mxu1 }
 0x173   : > { %v24629_v25 = vcombine.high %v24627_v15, %v24628_v19  ;;  %4669 = vmatprep.mubr.bf16.mxu0 %v24448_v56  ;;  %v17980_v33 = vpack.c.bf16 %v9248_v40, %v9248_v40  ;;  %v8995_v18 = vadd.f32 %v17503_v28, %v8733_v37  ;;  %v8734_v51 = vmul.f32 %v17393_v4, %v1624_v32  ;;  %v17992_v40 = vld [vmem:[%s16280_s22 + $0xb80] sm:$0xff] }
 0x174   : > { %4651 = vmatprep.subr.bf16.mxu0 %v24624_v10  ;;  %v17973_v10 = vld [vmem:[%s16280_s22 + $0xbc8] sm:$0xff]  ;;  %4710 = vmatprep.mubr.bf16.mxu1 %v24448_v56  ;;  %v9249_v61 = vmax.f32 %v8993_v20, 0.0  ;;  %v24632_v14 = vcombine.low %v24622_v23, %v24623_v29  ;;  %24633 = vst [vmem:[#allocation43_spill] sm:$0xff] %v17992_v40  ;;  %v24635_v13 = vcombine.low %v24627_v15, %v24628_v19  ;;  %v1627_v19 = vpop.f32.mrf.mxu1 }
 0x175   : > { %4692 = vmatprep.subr.bf16.mxu1 %v24629_v25  ;;  %24630 = vst [vmem:[#allocation41_spill] sm:$0xff] %v17973_v10  ;;  %v8994_v25 = vadd.f32 %v17503_v28, %v8732_v12  ;;  %v9251_v37 = vmax.f32 %v8995_v18, 0.0  ;;  %v8996_v20 = vadd.f32 %v17503_v28, %v8734_v51  ;;  %v1586_v12 = vpop.f32.mrf.mxu0  ;;  %v9745_v32 = vmax.bf16 %v17964_v42, %v17945_v62  ;;  %v24637_v15 = vld [vmem:[#allocation45_spill] sm:$0xff]  ;;  %v18095_v10 = vld [vmem:[%s16280_s22 + $0xb98] sm:$0xff] }
 0x176   : > { %4652 = vmatpush1.bf16.msra.mxu0 %v24632_v14  ;;  %4693 = vmatpush1.bf16.msra.mxu1 %v24635_v13  ;;  %v24636_v14 = vcombine.high %v17021_v39, %v17024_v36  ;;  %v9505_v18 = vpack.c.bf16 %v9249_v61, %v9249_v61  ;;  %v24638_v13 = vld [vmem:[#allocation46_spill] sm:$0xff]  ;;  %v9746_v7 = vmax.bf16 %v17980_v33, %v17978_v60  ;;  %v18024_v42 = vld [vmem:[%s16280_s22 + $0xb88] sm:$0xff] }
 0x177   : > { %v9250_v51 = vmax.f32 %v8994_v25, 0.0  ;;  %v24639_v12 = vcombine.high %v24637_v15, %v24638_v13  ;;  %v9507_v23 = vpack.c.bf16 %v9251_v37, %v9251_v37  ;;  %v9252_v27 = vmax.f32 %v8996_v20, 0.0  ;;  %v1743_v26 = vpop.f32.mrf.mxu0  ;;  %24640 = vst [vmem:[#allocation45_spill] sm:$0xff] %v18024_v42  ;;  %v18027_v62 = vld [vmem:[%s16280_s22 + $0xba8] sm:$0xff] }
 0x178   : > { %4731 = vmatprep.subr.bf16.mxu0 %v24636_v14  ;;  %24641 = vst [vmem:[#allocation46_spill] sm:$0xff] %v18027_v62  ;;  %v8735_v19 = vmul.f32 %v17393_v4, %v1743_v26  ;;  %v24642_v60 = vcombine.low %v17021_v39, %v17024_v36  ;;  %v24644_v29 = vcombine.high %v17043_v63, %v17046_v1  ;;  %v18045_v14 = vld [vmem:[%s16280_s22 + $0xbd0] sm:$0xff] }
 0x179   : > { %4772 = vmatprep.subr.bf16.mxu1 %v24639_v12  ;;  %14158 = vmatmul.mubr.msk.bf16.vlgmr.msra.gmra.mxu0 %vm973_vm0, %v17297_v55  ;;  %v9506_v25 = vpack.c.bf16 %v9250_v51, %v9250_v51  ;;  %v1784_v12 = vpop.f32.mrf.mxu1  ;;  %v9809_v37 = vmax.bf16 %v9507_v23, %v9505_v18  ;;  %v9508_v20 = vpack.c.bf16 %v9252_v27, %v9252_v27  ;;  %v1745_v26 = vpop.f32.mrf.mxu0  ;;  %v18048_v39 = vld [vmem:[%s16280_s22 + $0xbf0] sm:$0xff] }
 0x17a   : > { %14159 = vmatmul.mubr.msk.bf16.vlgmr.msra.gmra.mxu1 %vm973_vm0, %v17297_v55  ;;  %4732 = vmatpush1.bf16.msra.mxu0 %v24642_v60  ;;  %v8737_v61 = vmul.f32 %v17393_v4, %v1784_v12  ;;  %v24643_v51 = vcombine.low %v24637_v15, %v24638_v13  ;;  %v18050_v36 = vld [vmem:[#allocation2 + $0xb0] sm:$0x22]  ;;  %v8997_v27 = vadd.f32 %v17503_v28, %v8735_v19  ;;  %v24645_v15 = vld [vmem:[#allocation47_spill] sm:$0xff]  ;;  %v24646_v13 = vld [vmem:[#allocation48_spill] sm:$0xff] }
 0x17b   : > { %4733 = vmatprep.subr.bf16.mxu0 %v24644_v29  ;;  %v8736_v23 = vmul.f32 %v17393_v4, %v1745_v26  ;;  %v1786_v18 = vpop.f32.mrf.mxu1  ;;  %v24647_v12 = vcombine.high %v24645_v15, %v24646_v13  ;;  %4751 = vmatprep.mubr.bf16.mxu0 %v24448_v56  ;;  %v9810_v60 = vmax.bf16 %v9508_v20, %v9506_v25  ;;  %v1747_v19 = vpop.f32.mrf.mxu0  ;;  %v18078_v20 = vld [vmem:[%s16280_s22 + $0xb90] sm:$0xff] }
 0x17c   : > { %4773 = vmatpush1.bf16.msra.mxu1 %v24643_v51  ;;  %v8999_v51 = vadd.f32 %v17503_v28, %v8737_v61  ;;  %v8738_v33 = vmul.f32 %v17393_v4, %v1786_v18  ;;  %4792 = vmatprep.mubr.bf16.mxu1 %v24448_v56  ;;  %v24649_v61 = vcombine.low %v17043_v63, %v17046_v1  ;;  %v18081_v18 = vld [vmem:[%s16280_s22 + $0xbb0] sm:$0xff]  ;;  %v18098_v19 = vld [vmem:[%s16280_s22 + $0xbb8] sm:$0xff] }
 0x17d   : > { %4774 = vmatprep.subr.bf16.mxu1 %v24647_v12  ;;  %v18069_v12 = vld [vmem:[%s16280_s22 + $0xbf8] sm:$0xff]  ;;  %v8998_v40 = vadd.f32 %v17503_v28, %v8736_v23  ;;  %v1788_v29 = vpop.f32.mrf.mxu1  ;;  %24650 = vst [vmem:[#allocation48_spill] sm:$0xff] %v18078_v20  ;;  %24651 = vst [vmem:[#allocation110_spill] sm:$0xff] %v18081_v18  ;;  %v9873_v23 = vmax.bf16 %v9809_v37, %v9745_v32  ;;  %v9874_v62 = vmax.bf16 %v9810_v60, %v9746_v7  ;;  %v1748_v1 = vpop.f32.mrf.mxu0  ;;  %v24654_v25 = vld [vmem:[#allocation50_spill] sm:$0xff] }
 0x17e   : > { %24648 = vst [vmem:[#allocation47_spill] sm:$0xff] %v18069_v12  ;;  %4734 = vmatpush1.bf16.msra.mxu0 %v24649_v61  ;;  %v9253_v29 = vmax.f32 %v8997_v27, 0.0  ;;  %v9000_v42 = vadd.f32 %v17503_v28, %v8738_v33  ;;  %v24652_v63 = vcombine.low %v24645_v15, %v24646_v13  ;;  %v24653_v61 = vld [vmem:[#allocation49_spill] sm:$0xff]  ;;  %24657 = vst [vmem:[#allocation50_spill] sm:$0xff] %v18098_v19  ;;  %v9255_v59 = vmax.f32 %v8999_v51, 0.0  ;;  %v24658_v32 = vld [vmem:[#allocation51_spill] sm:$0xff] }
 0x17f   : > { %v24655_v17 = vcombine.high %v24653_v61, %v24654_v25  ;;  %24656 = vst [vmem:[#allocation49_spill] sm:$0xff] %v18095_v10  ;;  %v1789_v26 = vpop.f32.mrf.mxu1  ;;  %v24659_v7 = vld [vmem:[#allocation52_spill] sm:$0xff]  ;;  %v9254_v13 = vmax.f32 %v8998_v40, 0.0  ;;  %v18154_v40 = vld [vmem:[%s16280_s22 + $0xc68] sm:$0xff]  ;;  %v18273_v20 = vld [vmem:[%s16280_s22 + $0xc18] sm:$0xff] }
 0x180   : > { %4775 = vmatpush1.bf16.msra.mxu1 %v24652_v63  ;;  %v24660_v37 = vcombine.high %v24658_v32, %v24659_v7  ;;  %v9256_v60 = vmax.f32 %v9000_v42, 0.0  ;;  %v1825_v63 = vpop.f32.mrf.mxu0  ;;  %v18135_v42 = vld [vmem:[%s16280_s22 + $0xc40] sm:$0xff]  ;;  %v18142_v51 = vpack.c.bf16 %v9255_v59, %v9255_v59 }
 0x181   : > { %4893 = vmatprep.subr.bf16.mxu0 %v24655_v17  ;;  %v14484_v17 = vcombine.low %v9873_v23, %v9874_v62  ;;  %14160 = vmatmul.mubr.msk.bf16.vlgmr.msra.gmra.mxu0 %vm973_vm0, %v17297_v55  ;;  %v8739_v26 = vmul.f32 %v17393_v4, %v1825_v63  ;;  %v1866_v1 = vpop.f32.mrf.mxu1  ;;  %v24661_v62 = vcombine.low %v24653_v61, %v24654_v25  ;;  %v24663_v25 = vld [vmem:[#allocation53_spill] sm:$0xff]  ;;  %v24664_v61 = vld [vmem:[#allocation54_spill] sm:$0xff]  ;;  %v18173_v18 = vld [vmem:[%s16280_s22 + $0xc20] sm:$0xff] }
 0x182   : > { %4934 = vmatprep.subr.bf16.mxu1 %v24660_v37  ;;  %v18123_v23 = vpack.c.bf16 %v9253_v29, %v9253_v29  ;;  %v8741_v37 = vmul.f32 %v17393_v4, %v1866_v1  ;;  %v1827_v63 = vpop.f32.mrf.mxu0  ;;  %24666 = vst [vmem:[#allocation51_spill] sm:$0xff] %v18135_v42  ;;  %v18140_v29 = vld [vmem:[#allocation2] sm:$0x11]  ;;  %4913 = vmatprep.mubr.bf16.mxu0 %v24448_v56  ;;  %24670 = vst [vmem:[#allocation54_spill] sm:$0xff] %v18154_v40  ;;  %v24684_v40 = vld [vmem:[#allocation58_spill] sm:$0xff] }
 0x183   : > { %14161 = vmatmul.mubr.msk.bf16.vlgmr.msra.gmra.mxu1 %vm973_vm0, %v17297_v55  ;;  %4894 = vmatpush1.bf16.msra.mxu0 %v24661_v62  ;;  %10127 = vst [vmem:[#allocation2 + $0xd8] sm:$0xff] %v14484_v17  ;;  %v24662_v55 = vcombine.low %v24658_v32, %v24659_v7  ;;  %v24665_v62 = vcombine.high %v24663_v25, %v24664_v61  ;;  %v18138_v17 = vld [vmem:[%s16280_s22 + $0xc60] sm:$0xff]  ;;  %v1868_v7 = vpop.f32.mrf.mxu1  ;;  %24673 = vst [vmem:[#allocation112_spill] sm:$0xff] %v18173_v18  ;;  %v18244_v18 = vld [vmem:[%s16280_s22 + $0xc58] sm:$0xff] }
 0x184   : > { %24667 = vst [vmem:[#allocation52_spill] sm:$0xff] %v18138_v17  ;;  %v9001_v1 = vadd.f32 %v17503_v28, %v8739_v26  ;;  %v8740_v32 = vmul.f32 %v17393_v4, %v1827_v63  ;;  %v18156_v27 = vpack.c.bf16 %v9254_v13, %v9254_v13  ;;  %v18158_v59 = vpack.c.bf16 %v9256_v60, %v9256_v60  ;;  %v1829_v33 = vpop.f32.mrf.mxu0  ;;  %v18170_v60 = vld [vmem:[%s16280_s22 + $0xc00] sm:$0xff] }
 0x185   : > { %4935 = vmatpush1.bf16.msra.mxu1 %v24662_v55  ;;  %4895 = vmatprep.subr.bf16.mxu0 %v24665_v62  ;;  %v24668_v55 = vcombine.high %v17116_v30, %v17119_v44  ;;  %v18151_v62 = vld [vmem:[%s16280_s22 + $0xc48] sm:$0xff]  ;;  %v9003_v26 = vadd.f32 %v17503_v28, %v8741_v37  ;;  %v8742_v63 = vmul.f32 %v17393_v4, %v1868_v7  ;;  %v1870_v19 = vpop.f32.mrf.mxu1  ;;  %v18197_v13 = vld [vmem:[#allocation6] sm:$0xf] }
 0x186   : > { %24669 = vst [vmem:[#allocation53_spill] sm:$0xff] %v18151_v62  ;;  %4954 = vmatprep.mubr.bf16.mxu1 %v24448_v56  ;;  %v9257_v15 = vmax.f32 %v9001_v1, 0.0  ;;  %v24671_v10 = vcombine.low %v24663_v25, %v24664_v61  ;;  %24672 = vst [vmem:[#allocation111_spill] sm:$0xff] %v18170_v60  ;;  %v24674_v19 = vcombine.low %v17116_v30, %v17119_v44  ;;  %v24675_v25 = vld [vmem:[#allocation55_spill] sm:$0xff] }
 0x187   : > { %4936 = vmatprep.subr.bf16.mxu1 %v24668_v55  ;;  %v9002_v55 = vadd.f32 %v17503_v28, %v8740_v32  ;;  %v9259_v37 = vmax.f32 %v9003_v26, 0.0  ;;  %v9004_v1 = vadd.f32 %v17503_v28, %v8742_v63  ;;  %v1830_v32 = vpop.f32.mrf.mxu0  ;;  %v9747_v26 = vmax.bf16 %v18142_v51, %v18123_v23  ;;  %v1871_v44 = vpop.f32.mrf.mxu1  ;;  %v18204_v51 = vld [vmem:[%s16280_s22 + $0xc08] sm:$0xff] }
 0x188   : > { %4896 = vmatpush1.bf16.msra.mxu0 %v24671_v10  ;;  %v24676_v10 = vld [vmem:[#allocation56_spill] sm:$0xff]  ;;  %v9513_v63 = vpack.c.bf16 %v9257_v15, %v9257_v15  ;;  %v24678_v30 = vcombine.high %v17138_v38, %v17141_v2  ;;  %v9748_v32 = vmax.bf16 %v18158_v59, %v18156_v27  ;;  %24679 = vst [vmem:[#allocation55_spill] sm:$0xff] %v18204_v51  ;;  %v18207_v23 = vld [vmem:[%s16280_s22 + $0xc28] sm:$0xff] }
 0x189   : > { %4937 = vmatpush1.bf16.msra.mxu1 %v24674_v19  ;;  %v24677_v61 = vcombine.high %v24675_v25, %v24676_v10  ;;  %v9258_v33 = vmax.f32 %v9002_v55, 0.0  ;;  %v9260_v7 = vmax.f32 %v9004_v1, 0.0  ;;  %v1987_v17 = vpop.f32.mrf.mxu0  ;;  %24680 = vst [vmem:[#allocation56_spill] sm:$0xff] %v18207_v23  ;;  %v2028_v59 = vpop.f32.mrf.mxu1  ;;  %v24683_v19 = vld [vmem:[#allocation57_spill] sm:$0xff] }
 0x18a   : > { %5016 = vmatprep.subr.bf16.mxu1 %v24678_v30  ;;  %v8743_v27 = vmul.f32 %v17393_v4, %v1987_v17  ;;  %v8745_v15 = vmul.f32 %v17393_v4, %v2028_v59  ;;  %v24685_v62 = vcombine.high %v24683_v19, %v24684_v40  ;;  %v24686_v59 = vld [vmem:[#allocation59_spill] sm:$0xff] }
 0x18b   : > { %4975 = vmatprep.subr.bf16.mxu0 %v24677_v61  ;;  %v9515_v61 = vpack.c.bf16 %v9259_v37, %v9259_v37  ;;  %14178 = vmatmul.mubr.msk.bf16.vlgmr.msra.gmra.mxu0 %vm973_vm0, %v18197_v13  ;;  %v9514_v55 = vpack.c.bf16 %v9258_v33, %v9258_v33  ;;  %v24681_v37 = vcombine.low %v24675_v25, %v24676_v10  ;;  %v1989_v17 = vpop.f32.mrf.mxu0  ;;  %v18225_v25 = vld [vmem:[%s16280_s22 + $0xc50] sm:$0xff] }
 0x18c   : > { %14179 = vmatmul.mubr.msk.bf16.vlgmr.msra.gmra.mxu1 %vm973_vm0, %v18197_v13  ;;  %v9516_v30 = vpack.c.bf16 %v9260_v7, %v9260_v7  ;;  %v24682_v33 = vcombine.low %v17138_v38, %v17141_v2  ;;  %v18228_v10 = vld [vmem:[%s16280_s22 + $0xc70] sm:$0xff]  ;;  %v8744_v7 = vmul.f32 %v17393_v4, %v1989_v17  ;;  %4995 = vmatprep.mubr.bf16.mxu0 %v24448_v56 }
 0x18d   : > { %4976 = vmatpush1.bf16.msra.mxu0 %v24681_v37  ;;  %v9811_v44 = vmax.bf16 %v9515_v61, %v9513_v63  ;;  %v9005_v63 = vadd.f32 %v17503_v28, %v8743_v27  ;;  %v2030_v61 = vpop.f32.mrf.mxu1  ;;  %v24687_v37 = vld [vmem:[#allocation60_spill] sm:$0xff]  ;;  %v1991_v27 = vpop.f32.mrf.mxu0  ;;  %5036 = vmatprep.mubr.bf16.mxu1 %v24448_v56  ;;  %24696 = vst [vmem:[#allocation59_spill] sm:$0xff] %v18273_v20 }
 0x18e   : > { %5017 = vmatpush1.bf16.msra.mxu1 %v24682_v33  ;;  %4977 = vmatprep.subr.bf16.mxu0 %v24685_v62  ;;  %v24688_v2 = vcombine.high %v24686_v59, %v24687_v37  ;;  %v9812_v62 = vmax.bf16 %v9516_v30, %v9514_v55  ;;  %v9007_v33 = vadd.f32 %v17503_v28, %v8745_v15  ;;  %v18256_v30 = vld [vmem:[%s16280_s22 + $0xc10] sm:$0xff]  ;;  %v18276_v27 = vld [vmem:[%s16280_s22 + $0xc38] sm:$0xff] }
 0x18f   : > { %v8746_v1 = vmul.f32 %v17393_v4, %v2030_v61  ;;  %v9006_v60 = vadd.f32 %v17503_v28, %v8744_v7  ;;  %v2032_v38 = vpop.f32.mrf.mxu1  ;;  %v24689_v15 = vcombine.low %v24683_v19, %v24684_v40  ;;  %24690 = vst [vmem:[#allocation57_spill] sm:$0xff] %v18256_v30  ;;  %v18259_v61 = vld [vmem:[%s16280_s22 + $0xc30] sm:$0xff]  ;;  %v9875_v7 = vmax.bf16 %v9811_v44, %v9747_v26  ;;  %v1992_v19 = vpop.f32.mrf.mxu0  ;;  %v24698_v26 = vld [vmem:[#allocation63_spill] sm:$0xff] }
 0x190   : > { %5018 = vmatprep.subr.bf16.mxu1 %v24688_v2  ;;  %v18247_v2 = vld [vmem:[%s16280_s22 + $0xc78] sm:$0xff]  ;;  %24691 = vst [vmem:[#allocation58_spill] sm:$0xff] %v18259_v61  ;;  %v9876_v23 = vmax.bf16 %v9812_v62, %v9748_v32  ;;  %v9261_v38 = vmax.f32 %v9005_v63, 0.0  ;;  %v24692_v40 = vcombine.low %v24686_v59, %v24687_v37  ;;  %v24694_v55 = vld [vmem:[#allocation62_spill] sm:$0xff]  ;;  %24697 = vst [vmem:[#allocation60_spill] sm:$0xff] %v18276_v27  ;;  %v9263_v12 = vmax.f32 %v9007_v33, 0.0 }
 0x191   : > { %4978 = vmatpush1.bf16.msra.mxu0 %v24689_v15  ;;  %v9008_v51 = vadd.f32 %v17503_v28, %v8746_v1  ;;  %v24693_v15 = vld [vmem:[#allocation61_spill] sm:$0xff]  ;;  %v2033_v17 = vpop.f32.mrf.mxu1  ;;  %v24699_v32 = vld [vmem:[#allocation64_spill] sm:$0xff]  ;;  %v9262_v37 = vmax.f32 %v9006_v60, 0.0 }
 0x192   : > { %5019 = vmatpush1.bf16.msra.mxu1 %v24692_v40  ;;  %v24695_v42 = vcombine.high %v24693_v15, %v24694_v55  ;;  %v24700_v44 = vcombine.high %v24698_v26, %v24699_v32  ;;  %v2069_v40 = vpop.f32.mrf.mxu0  ;;  %v24706_v60 = vld [vmem:[#allocation65_spill] sm:$0xff] }
 0x193   : > { %v9264_v62 = vmax.f32 %v9008_v51, 0.0  ;;  %v8747_v17 = vmul.f32 %v17393_v4, %v2069_v40  ;;  %v2110_v19 = vpop.f32.mrf.mxu1  ;;  %v24702_v40 = vcombine.low %v24698_v26, %v24699_v32  ;;  %v24704_v26 = vcombine.low %v17962_v49, %v17962_v49  ;;  %v18334_v63 = vld [vmem:[%s16280_s22 + $0xcc8] sm:$0xff] }
 0x194   : > { %5137 = vmatprep.subr.bf16.mxu0 %v24695_v42  ;;  %5178 = vmatprep.subr.bf16.mxu1 %v24700_v44  ;;  %v14485_v42 = vcombine.low %v9875_v7, %v9876_v23  ;;  %v24701_v23 = vcombine.low %v24693_v15, %v24694_v55  ;;  %v18301_v7 = vpack.c.bf16 %v9261_v38, %v9261_v38  ;;  %v2071_v33 = vpop.f32.mrf.mxu0  ;;  %v18316_v38 = vld [vmem:[%s16280_s22 + $0xce0] sm:$0xff] }
 0x195   : > { %14180 = vmatmul.mubr.msk.bf16.vlgmr.msra.gmra.mxu0 %vm973_vm0, %v18197_v13  ;;  %14181 = vmatmul.mubr.msk.bf16.vlgmr.msra.gmra.mxu1 %vm973_vm0, %v18197_v13  ;;  %v8749_v44 = vmul.f32 %v17393_v4, %v2110_v19  ;;  %v24703_v55 = vcombine.high %v17191_v53, %v17194_v48  ;;  %v18323_v32 = vunpack.c.l.b16 %v24704_v26  ;;  %v18325_v19 = vpack.c.bf16 %v9263_v12, %v9263_v12  ;;  %v2112_v51 = vpop.f32.mrf.mxu1  ;;  %v18337_v26 = vld [vmem:[%s16280_s22 + $0xce8] sm:$0xff] }
 0x196   : > { %5138 = vmatpush1.bf16.msra.mxu0 %v24701_v23  ;;  %10128 = vst [vmem:[#allocation2 + $0x18] sm:$0xff] %v14485_v42  ;;  %5179 = vmatpush1.bf16.msra.mxu1 %v24702_v40  ;;  %v18313_v23 = vld [vmem:[%s16280_s22 + $0xcc0] sm:$0xff]  ;;  %v18318_v42 = vld [vmem:[#allocation2 + $0xd8] sm:$0x11]  ;;  %v9009_v40 = vadd.f32 %v17503_v28, %v8747_v17  ;;  %v24707_v15 = vcombine.high %v17207_v43, %v24706_v60  ;;  %24708 = vst [vmem:[#allocation62_spill] sm:$0xff] %v18334_v63  ;;  %v2073_v27 = vpop.f32.mrf.mxu0 }
 0x197   : > { %5139 = vmatprep.subr.bf16.mxu0 %v24703_v55  ;;  %24705 = vst [vmem:[#allocation61_spill] sm:$0xff] %v18323_v32  ;;  %v8748_v55 = vmul.f32 %v17393_v4, %v2071_v33  ;;  %5157 = vmatprep.mubr.bf16.mxu0 %v24448_v56  ;;  %24709 = vst [vmem:[#allocation63_spill] sm:$0xff] %v18337_v26  ;;  %v24710_v12 = vcombine.high %v17962_v49, %v17962_v49  ;;  %v2114_v30 = vpop.f32.mrf.mxu1  ;;  %v18437_v32 = vld [vmem:[%s16280_s22 + $0xcd8] sm:$0xff] }
 0x198   : > { %5180 = vmatprep.subr.bf16.mxu1 %v24707_v15  ;;  %v18344_v17 = vpack.c.bf16 %v9262_v37, %v9262_v37  ;;  %v18346_v33 = vpack.c.bf16 %v9264_v62, %v9264_v62  ;;  %v9011_v59 = vadd.f32 %v17503_v28, %v8749_v44  ;;  %v8750_v15 = vmul.f32 %v17393_v4, %v2112_v51  ;;  %v18358_v62 = vld [vmem:[%s16280_s22 + $0xc80] sm:$0xff]  ;;  %v18468_v26 = vld [vmem:[%s16280_s22 + $0xc98] sm:$0xff] }
 0x199   : > { %v18342_v1 = vunpack.c.l.b16 %v24710_v12  ;;  %5198 = vmatprep.mubr.bf16.mxu1 %v24448_v56  ;;  %v9265_v20 = vmax.f32 %v9009_v40, 0.0  ;;  %v9010_v61 = vadd.f32 %v17503_v28, %v8748_v55  ;;  %v24712_v49 = vcombine.low %v17191_v53, %v17194_v48  ;;  %24713 = vst [vmem:[#allocation65_spill] sm:$0xff] %v18358_v62  ;;  %v18361_v12 = vld [vmem:[%s16280_s22 + $0xca0] sm:$0xff]  ;;  %v2074_v40 = vpop.f32.mrf.mxu0  ;;  %v18471_v63 = vld [vmem:[%s16280_s22 + $0xcb8] sm:$0xff] }
 0x19a   : > { %24714 = vst [vmem:[#allocation113_spill] sm:$0xff] %v18361_v12  ;;  %v9267_v51 = vmax.f32 %v9011_v59, 0.0  ;;  %v9012_v44 = vadd.f32 %v17503_v28, %v8750_v15  ;;  %v24715_v30 = vcombine.low %v17207_v43, %v24706_v60  ;;  %v24716_v53 = vcombine.high %v17213_v8, %v17216_v31  ;;  %v2115_v43 = vpop.f32.mrf.mxu1  ;;  %v18440_v12 = vld [vmem:[%s16280_s22 + $0xcf8] sm:$0xff] }
 0x19b   : > { %24711 = vst [vmem:[#allocation64_spill] sm:$0xff] %v18342_v1  ;;  %5140 = vmatpush1.bf16.msra.mxu0 %v24712_v49  ;;  %v9749_v59 = vmax.bf16 %v18325_v19, %v18301_v7  ;;  %v9521_v15 = vpack.c.bf16 %v9265_v20, %v9265_v20  ;;  %v9266_v49 = vmax.f32 %v9010_v61, 0.0  ;;  %v24717_v60 = vcombine.high %v17228_v9, %v17231_v58  ;;  %v2231_v37 = vpop.f32.mrf.mxu0  ;;  %v18390_v61 = vld [vmem:[%s16280_s22 + $0xc88] sm:$0xff] }
 0x19c   : > { %5181 = vmatpush1.bf16.msra.mxu1 %v24715_v30  ;;  %5219 = vmatprep.subr.bf16.mxu0 %v24716_v53  ;;  %v9750_v40 = vmax.bf16 %v18346_v33, %v18344_v17  ;;  %v9523_v53 = vpack.c.bf16 %v9267_v51, %v9267_v51  ;;  %v9268_v48 = vmax.f32 %v9012_v44, 0.0  ;;  %24718 = vst [vmem:[#allocation114_spill] sm:$0xff] %v18390_v61  ;;  %v18393_v7 = vld [vmem:[%s16280_s22 + $0xca8] sm:$0xff]  ;;  %v18419_v33 = vld [vmem:[%s16280_s22 + $0xcf0] sm:$0xff] }
 0x19d   : > { %5260 = vmatprep.subr.bf16.mxu1 %v24717_v60  ;;  %24719 = vst [vmem:[#allocation115_spill] sm:$0xff] %v18393_v7  ;;  %v9522_v19 = vpack.c.bf16 %v9266_v49, %v9266_v49  ;;  %v8751_v43 = vmul.f32 %v17393_v4, %v2231_v37  ;;  %v2272_v60 = vpop.f32.mrf.mxu1  ;;  %v24720_v17 = vcombine.low %v17213_v8, %v17216_v31  ;;  %v2233_v30 = vpop.f32.mrf.mxu0  ;;  %v24724_v8 = vld [vmem:[#allocation66_spill] sm:$0xff] }
 0x19e   : > { %14198 = vmatmul.mubr.msk.bf16.vlgmr.msra.gmra.mxu0 %vm973_vm0, %v18197_v13  ;;  %v24721_v51 = vcombine.high %v18140_v29, %v18140_v29  ;;  %v9813_v20 = vmax.bf16 %v9523_v53, %v9521_v15  ;;  %v9524_v49 = vpack.c.bf16 %v9268_v48, %v9268_v48  ;;  %v8753_v37 = vmul.f32 %v17393_v4, %v2272_v60  ;;  %v24733_v61 = vld [vmem:[#allocation70_spill] sm:$0xff] }
 0x19f   : > { %14199 = vmatmul.mubr.msk.bf16.vlgmr.msra.gmra.mxu1 %vm973_vm0, %v18197_v13  ;;  %5220 = vmatpush1.bf16.msra.mxu0 %v24720_v17  ;;  %v24723_v55 = vcombine.low %v17228_v9, %v17231_v58  ;;  %v24725_v31 = vcombine.high %v17245_v46, %v24724_v8  ;;  %v18416_v17 = vld [vmem:[%s16280_s22 + $0xcd0] sm:$0xff]  ;;  %v9013_v48 = vadd.f32 %v17503_v28, %v8751_v43  ;;  %v2274_v60 = vpop.f32.mrf.mxu1  ;;  %v24726_v58 = vld [vmem:[#allocation67_spill] sm:$0xff]  ;;  %v24727_v9 = vld [vmem:[#allocation68_spill] sm:$0xff] }
 0x1a0   : > { %v18406_v44 = vunpack.c.l.b16 %v24721_v51  ;;  %v8752_v53 = vmul.f32 %v17393_v4, %v2233_v30  ;;  %5239 = vmatprep.mubr.bf16.mxu0 %v24448_v56  ;;  %v9814_v27 = vmax.bf16 %v9524_v49, %v9522_v19  ;;  %v9015_v15 = vadd.f32 %v17503_v28, %v8753_v37  ;;  %v2235_v30 = vpop.f32.mrf.mxu0  ;;  %5280 = vmatprep.mubr.bf16.mxu1 %v24448_v56  ;;  %v18449_v37 = vld [vmem:[%s16280_s22 + $0xc90] sm:$0xff]  ;;  %v24732_v49 = vld [vmem:[#allocation69_spill] sm:$0xff] }
 0x1a1   : > { %5261 = vmatpush1.bf16.msra.mxu1 %v24723_v55  ;;  %5221 = vmatprep.subr.bf16.mxu0 %v24725_v31  ;;  %v24728_v55 = vcombine.high %v24726_v58, %v24727_v9  ;;  %v10499_v31 = vrot.slane %v18342_v1, 1  ;;  %v8754_v43 = vmul.f32 %v17393_v4, %v2274_v60  ;;  %v2276_v1 = vpop.f32.mrf.mxu1  ;;  %v24729_v19 = vcombine.low %v17245_v46, %v24724_v8  ;;  %v18452_v60 = vld [vmem:[%s16280_s22 + $0xcb0] sm:$0xff] }
 0x1a2   : > { %24722 = vst [vmem:[#allocation116_spill] sm:$0xff] %v18406_v44  ;;  %v9014_v51 = vadd.f32 %v17503_v28, %v8752_v53  ;;  %24730 = vst [vmem:[#allocation66_spill] sm:$0xff] %v18452_v60  ;;  %v14551_v30 = vcombine.high %v18318_v42, %v18318_v42  ;;  %v9877_v53 = vmax.bf16 %v9813_v20, %v9749_v59  ;;  %v9269_v7 = vmax.f32 %v9013_v48, 0.0 }
 0x1a3   : > { %5262 = vmatprep.subr.bf16.mxu1 %v24728_v55  ;;  %5222 = vmatpush1.bf16.msra.mxu0 %v24729_v19  ;;  %v18458_v55 = vsel %vm10479_vm1, %v18406_v44, %v10499_v31  ;;  %v9878_v1 = vmax.bf16 %v9814_v27, %v9750_v40  ;;  %v9016_v46 = vadd.f32 %v17503_v28, %v8754_v43  ;;  %v2236_v19 = vpop.f32.mrf.mxu0  ;;  %v9271_v31 = vmax.f32 %v9015_v15, 0.0  ;;  %v2277_v44 = vpop.f32.mrf.mxu1  ;;  %v18534_v40 = vld [vmem:[%s16280_s22 + $0xd48] sm:$0xff] }
 0x1a4   : > { %v24731_v8 = vcombine.low %v24726_v58, %v24727_v9  ;;  %v24734_v62 = vcombine.high %v24732_v49, %v24733_v61  ;;  %24735 = vst [vmem:[#allocation67_spill] sm:$0xff] %v18468_v26  ;;  %24736 = vst [vmem:[#allocation68_spill] sm:$0xff] %v18471_v63  ;;  %v24737_v27 = vcombine.high %v17286_v41, %v17289_v0  ;;  %v9270_v48 = vmax.f32 %v9014_v51, 0.0  ;;  %v18513_v51 = vld [vmem:[%s16280_s22 + $0xd40] sm:$0xff] }
 0x1a5   : > { %v9272_v58 = vmax.f32 %v9016_v46, 0.0  ;;  %v2313_v9 = vpop.f32.mrf.mxu0  ;;  %v2354_v43 = vpop.f32.mrf.mxu1  ;;  %v24739_v46 = vcombine.low %v18050_v36, %v18050_v36  ;;  %v18501_v19 = vpack.c.bf16 %v9269_v7, %v9269_v7  ;;  %24745 = vst [vmem:[#allocation70_spill] sm:$0xff] %v18513_v51  ;;  %v18516_v7 = vld [vmem:[%s16280_s22 + $0xd60] sm:$0xff]  ;;  %24750 = vst [vmem:[#allocation117_spill] sm:$0xff] %v18534_v40  ;;  %v18664_v40 = vld [vmem:[%s16280_s22 + $0xd38] sm:$0xff] }
 0x1a6   : > { %5263 = vmatpush1.bf16.msra.mxu1 %v24731_v8  ;;  %5381 = vmatprep.subr.bf16.mxu0 %v24734_v62  ;;  %v14486_v62 = vcombine.low %v9877_v53, %v9878_v1  ;;  %v8755_v15 = vmul.f32 %v17393_v4, %v2313_v9  ;;  %v24738_v53 = vcombine.low %v24732_v49, %v24733_v61  ;;  %v24742_v9 = vld [vmem:[#allocation71_spill] sm:$0xff] }
 0x1a7   : > { %5422 = vmatprep.subr.bf16.mxu1 %v24737_v27  ;;  %14200 = vmatmul.mubr.msk.bf16.vlgmr.msra.gmra.mxu0 %vm973_vm0, %v18197_v13  ;;  %v18499_v8 = vunpack.c.l.b16 %v24739_v46  ;;  %v8757_v27 = vmul.f32 %v17393_v4, %v2354_v43  ;;  %v24741_v61 = vcombine.low %v17286_v41, %v17289_v0  ;;  %v2315_v49 = vpop.f32.mrf.mxu0  ;;  %24746 = vst [vmem:[#allocation71_spill] sm:$0xff] %v18516_v7  ;;  %v2356_v44 = vpop.f32.mrf.mxu1 }
 0x1a8   : > { %5382 = vmatpush1.bf16.msra.mxu0 %v24738_v53  ;;  %10129 = vst [vmem:[#allocation2 + $0x50] sm:$0xff] %v14486_v62  ;;  %v24743_v53 = vld [vmem:[#allocation72_spill] sm:$0xff]  ;;  %v18518_v62 = vld [vmem:[#allocation2 + $0x18] sm:$0x11]  ;;  %v24747_v43 = vcombine.low %v18140_v29, %v18140_v29  ;;  %v18525_v41 = vpack.c.bf16 %v9271_v31, %v9271_v31  ;;  %v24749_v46 = vcombine.high %v17310_v24, %v17313_v47  ;;  %v18537_v29 = vld [vmem:[%s16280_s22 + $0xd68] sm:$0xff] }
 0x1a9   : > { %14201 = vmatmul.mubr.msk.bf16.vlgmr.msra.gmra.mxu1 %vm973_vm0, %v18197_v13  ;;  %24740 = vst [vmem:[#allocation69_spill] sm:$0xff] %v18499_v8  ;;  %v24744_v1 = vcombine.high %v24742_v9, %v24743_v53  ;;  %5401 = vmatprep.mubr.bf16.mxu0 %v24448_v56  ;;  %24751 = vst [vmem:[#allocation118_spill] sm:$0xff] %v18537_v29  ;;  %v18541_v31 = vpack.c.bf16 %v9270_v48, %v9270_v48  ;;  %v2317_v20 = vpop.f32.mrf.mxu0  ;;  %v2358_v26 = vpop.f32.mrf.mxu1 }
 0x1aa   : > { %5423 = vmatpush1.bf16.msra.mxu1 %v24741_v61  ;;  %v18523_v0 = vunpack.c.l.b16 %v24747_v43  ;;  %v9017_v61 = vadd.f32 %v17503_v28, %v8755_v15  ;;  %v18539_v43 = vunpack.c.l.b16 %v14551_v30  ;;  %v18543_v15 = vpack.c.bf16 %v9272_v58, %v9272_v58  ;;  %5442 = vmatprep.mubr.bf16.mxu1 %v24448_v56  ;;  %v18555_v58 = vld [vmem:[%s16280_s22 + $0xd00] sm:$0xff] }
 0x1ab   : > { %5383 = vmatprep.subr.bf16.mxu0 %v24744_v1  ;;  %v8756_v1 = vmul.f32 %v17393_v4, %v2315_v49  ;;  %5424 = vmatprep.subr.bf16.mxu1 %v24749_v46  ;;  %v9019_v49 = vadd.f32 %v17503_v28, %v8757_v27  ;;  %v8758_v59 = vmul.f32 %v17393_v4, %v2356_v44  ;;  %v18558_v27 = vld [vmem:[%s16280_s22 + $0xd20] sm:$0xff] }
 0x1ac   : > { %24748 = vst [vmem:[#allocation72_spill] sm:$0xff] %v18523_v0  ;;  %24752 = vst [vmem:[#allocation119_spill] sm:$0xff] %v18539_v43  ;;  %v9273_v46 = vmax.f32 %v9017_v61, 0.0  ;;  %v24753_v30 = vcombine.low %v24742_v9, %v24743_v53  ;;  %v24756_v26 = vcombine.low %v17310_v24, %v17313_v47  ;;  %v24757_v9 = vld [vmem:[#allocation73_spill] sm:$0xff]  ;;  %v24758_v53 = vld [vmem:[#allocation74_spill] sm:$0xff]  ;;  %v2359_v24 = vpop.f32.mrf.mxu1 }
 0x1ad   : > { %v9018_v63 = vadd.f32 %v17503_v28, %v8756_v1  ;;  %24754 = vst [vmem:[#allocation120_spill] sm:$0xff] %v18555_v58  ;;  %24755 = vst [vmem:[#allocation121_spill] sm:$0xff] %v18558_v27  ;;  %v9275_v44 = vmax.f32 %v9019_v49, 0.0  ;;  %v9020_v61 = vadd.f32 %v17503_v28, %v8758_v59  ;;  %v2318_v1 = vpop.f32.mrf.mxu0  ;;  %v9751_v59 = vmax.bf16 %v18525_v41, %v18501_v19  ;;  %v24760_v47 = vld [vmem:[#allocation75_spill] sm:$0xff]  ;;  %v18587_v19 = vld [vmem:[%s16280_s22 + $0xd08] sm:$0xff] }
 0x1ae   : > { %5384 = vmatpush1.bf16.msra.mxu0 %v24753_v30  ;;  %5425 = vmatpush1.bf16.msra.mxu1 %v24756_v26  ;;  %v24759_v30 = vcombine.high %v24757_v9, %v24758_v53  ;;  %v9529_v49 = vpack.c.bf16 %v9273_v46, %v9273_v46  ;;  %v24761_v26 = vcombine.high %v17345_v52, %v24760_v47  ;;  %v18590_v41 = vld [vmem:[%s16280_s22 + $0xd28] sm:$0xff]  ;;  %v24766_v1 = vld [vmem:[#allocation76_spill] sm:$0xff]  ;;  %v18633_v27 = vld [vmem:[%s16280_s22 + $0xd78] sm:$0xff] }
 0x1af   : > { %v9274_v60 = vmax.f32 %v9018_v63, 0.0  ;;  %v9531_v48 = vpack.c.bf16 %v9275_v44, %v9275_v44  ;;  %v9276_v7 = vmax.f32 %v9020_v61, 0.0  ;;  %v2475_v51 = vpop.f32.mrf.mxu0  ;;  %24762 = vst [vmem:[#allocation73_spill] sm:$0xff] %v18587_v19  ;;  %24763 = vst [vmem:[#allocation74_spill] sm:$0xff] %v18590_v41  ;;  %v10501_v44 = vrot.slane %v18539_v43, 7  ;;  %v18630_v43 = vld [vmem:[%s16280_s22 + $0xd58] sm:$0xff] }
 0x1b0   : > { %5463 = vmatprep.subr.bf16.mxu0 %v24759_v30  ;;  %5504 = vmatprep.subr.bf16.mxu1 %v24761_v26  ;;  %v9752_v30 = vmax.bf16 %v18543_v15, %v18541_v31  ;;  %v8759_v24 = vmul.f32 %v17393_v4, %v2475_v51  ;;  %v2516_v26 = vpop.f32.mrf.mxu1  ;;  %v24764_v31 = vcombine.low %v24757_v9, %v24758_v53  ;;  %v18609_v9 = vld [vmem:[%s16280_s22 + $0xd50] sm:$0xff]  ;;  %v24778_v41 = vld [vmem:[#allocation80_spill] sm:$0xff]  ;;  %v18661_v58 = vld [vmem:[%s16280_s22 + $0xd18] sm:$0xff] }
 0x1b1   : > { %14218 = vmatmul.mubr.msk.bf16.vlgmr.msra.gmra.mxu0 %vm973_vm0, %v18197_v13  ;;  %v9530_v46 = vpack.c.bf16 %v9274_v60, %v9274_v60  ;;  %14219 = vmatmul.mubr.msk.bf16.vlgmr.msra.gmra.mxu1 %vm973_vm0, %v18197_v13  ;;  %v9815_v61 = vmax.bf16 %v9531_v48, %v9529_v49  ;;  %v9532_v63 = vpack.c.bf16 %v9276_v7, %v9276_v7  ;;  %v2477_v51 = vpop.f32.mrf.mxu0  ;;  %v18612_v53 = vld [vmem:[%s16280_s22 + $0xd70] sm:$0xff] }
 0x1b2   : > { %5464 = vmatpush1.bf16.msra.mxu0 %v24764_v31  ;;  %v8761_v20 = vmul.f32 %v17393_v4, %v2516_v26  ;;  %v24765_v60 = vcombine.low %v17345_v52, %v24760_v47  ;;  %v24767_v29 = vcombine.high %v17351_v3, %v24766_v1  ;;  %v9021_v7 = vadd.f32 %v17503_v28, %v8759_v24  ;;  %v2518_v26 = vpop.f32.mrf.mxu1  ;;  %v24768_v52 = vld [vmem:[#allocation77_spill] sm:$0xff]  ;;  %v24769_v47 = vld [vmem:[#allocation78_spill] sm:$0xff] }
 0x1b3   : > { %v8760_v49 = vmul.f32 %v17393_v4, %v2477_v51  ;;  %v24770_v31 = vcombine.high %v24768_v52, %v24769_v47  ;;  %5483 = vmatprep.mubr.bf16.mxu0 %v24448_v56  ;;  %v9816_v15 = vmax.bf16 %v9532_v63, %v9530_v46  ;;  %v8762_v24 = vmul.f32 %v17393_v4, %v2518_v26  ;;  %v2479_v51 = vpop.f32.mrf.mxu0  ;;  %v18642_v46 = vld [vmem:[%s16280_s22 + $0xd10] sm:$0xff]  ;;  %v24777_v63 = vld [vmem:[#allocation79_spill] sm:$0xff] }
 0x1b4   : > { %5505 = vmatpush1.bf16.msra.mxu1 %v24765_v60  ;;  %5465 = vmatprep.subr.bf16.mxu0 %v24767_v29  ;;  %v9023_v48 = vadd.f32 %v17503_v28, %v8761_v20  ;;  %24771 = vst [vmem:[#allocation75_spill] sm:$0xff] %v18630_v43  ;;  %24772 = vst [vmem:[#allocation76_spill] sm:$0xff] %v18633_v27  ;;  %v2520_v60 = vpop.f32.mrf.mxu1  ;;  %v24773_v20 = vcombine.low %v17351_v3, %v24766_v1  ;;  %v18645_v26 = vld [vmem:[%s16280_s22 + $0xd30] sm:$0xff]  ;;  %v9277_v0 = vmax.f32 %v9021_v7, 0.0 }
 0x1b5   : > { %5506 = vmatprep.subr.bf16.mxu1 %v24770_v31  ;;  %5524 = vmatprep.mubr.bf16.mxu1 %v24448_v56  ;;  %v9022_v29 = vadd.f32 %v17503_v28, %v8760_v49  ;;  %24774 = vst [vmem:[#allocation77_spill] sm:$0xff] %v18642_v46  ;;  %24775 = vst [vmem:[#allocation78_spill] sm:$0xff] %v18645_v26  ;;  %v14553_v51 = vcombine.high %v18518_v62, %v18518_v62 }
 0x1b6   : > { %5466 = vmatpush1.bf16.msra.mxu0 %v24773_v20  ;;  %v18651_v31 = vsel %vm10482_vm2, %v10501_v44, %v18458_v55  ;;  %v9879_v49 = vmax.bf16 %v9815_v61, %v9751_v59  ;;  %v9880_v60 = vmax.bf16 %v9816_v15, %v9752_v30  ;;  %v9024_v3 = vadd.f32 %v17503_v28, %v8762_v24  ;;  %v2480_v20 = vpop.f32.mrf.mxu0  ;;  %v2521_v44 = vpop.f32.mrf.mxu1  ;;  %v24782_v59 = vld [vmem:[#allocation81_spill] sm:$0xff]  ;;  %v24783_v30 = vld [vmem:[#allocation82_spill] sm:$0xff] }
 0x1b7   : > { %v24776_v1 = vcombine.low %v24768_v52, %v24769_v47  ;;  %v24779_v19 = vcombine.high %v24777_v63, %v24778_v41  ;;  %24780 = vst [vmem:[#allocation79_spill] sm:$0xff] %v18661_v58  ;;  %24781 = vst [vmem:[#allocation80_spill] sm:$0xff] %v18664_v40  ;;  %v9279_v55 = vmax.f32 %v9023_v48, 0.0  ;;  %v24784_v15 = vcombine.high %v24782_v59, %v24783_v30  ;;  %v24796_v61 = vld [vmem:[#allocation85_spill] sm:$0xff] }
 0x1b8   : > { %v9278_v47 = vmax.f32 %v9022_v29, 0.0  ;;  %v9280_v24 = vmax.f32 %v9024_v3, 0.0  ;;  %v2598_v44 = vpop.f32.mrf.mxu1  ;;  %v24786_v3 = vcombine.high %v18050_v36, %v18050_v36  ;;  %v24790_v29 = vld [vmem:[#allocation84_spill] sm:$0xff]  ;;  %v24797_v36 = vld [vmem:[#allocation86_spill] sm:$0xff]  ;;  %v18727_v40 = vld [vmem:[%s16280_s22 + $0xdc8] sm:$0xff] }
 0x1b9   : > { %5507 = vmatpush1.bf16.msra.mxu1 %v24776_v1  ;;  %5625 = vmatprep.subr.bf16.mxu0 %v24779_v19  ;;  %v14487_v19 = vcombine.low %v9879_v49, %v9880_v60  ;;  %v2557_v1 = vpop.f32.mrf.mxu0  ;;  %v24785_v49 = vcombine.low %v24777_v63, %v24778_v41  ;;  %v8765_v48 = vmul.f32 %v17393_v4, %v2598_v44 }
 0x1ba   : > { %5666 = vmatprep.subr.bf16.mxu1 %v24784_v15  ;;  %14220 = vmatmul.mubr.msk.bf16.vlgmr.msra.gmra.mxu0 %vm973_vm0, %v18197_v13  ;;  %v8763_v20 = vmul.f32 %v17393_v4, %v2557_v1  ;;  %v18692_v15 = vunpack.c.l.b16 %v24786_v3  ;;  %v18694_v1 = vpack.c.bf16 %v9277_v0, %v9277_v0  ;;  %v24788_v41 = vcombine.low %v24782_v59, %v24783_v30  ;;  %v18706_v3 = vld [vmem:[%s16280_s22 + $0xdc0] sm:$0xff]  ;;  %v2600_v7 = vpop.f32.mrf.mxu1 }
 0x1bb   : > { %5626 = vmatpush1.bf16.msra.mxu0 %v24785_v49  ;;  %10130 = vst [vmem:[#allocation2 + $0x68] sm:$0xff] %v14487_v19  ;;  %v2559_v63 = vpop.f32.mrf.mxu0  ;;  %v24789_v49 = vld [vmem:[#allocation83_spill] sm:$0xff]  ;;  %24792 = vst [vmem:[#allocation82_spill] sm:$0xff] %v18706_v3  ;;  %v18709_v0 = vld [vmem:[%s16280_s22 + $0xde0] sm:$0xff]  ;;  %v24794_v44 = vcombine.low %v18318_v42, %v18318_v42  ;;  %v18718_v30 = vpack.c.bf16 %v9279_v55, %v9279_v55  ;;  %v24798_v52 = vcombine.high %v24796_v61, %v24797_v36 }
 0x1bc   : > { %14221 = vmatmul.mubr.msk.bf16.vlgmr.msra.gmra.mxu1 %vm973_vm0, %v18197_v13  ;;  %24787 = vst [vmem:[#allocation81_spill] sm:$0xff] %v18692_v15  ;;  %v24791_v60 = vcombine.high %v24789_v49, %v24790_v29  ;;  %24793 = vst [vmem:[#allocation83_spill] sm:$0xff] %v18709_v0  ;;  %v18711_v19 = vld [vmem:[#allocation2 + $0x50] sm:$0x11]  ;;  %5645 = vmatprep.mubr.bf16.mxu0 %v24448_v56  ;;  %v18730_v42 = vld [vmem:[%s16280_s22 + $0xde8] sm:$0xff]  ;;  %v18734_v55 = vpack.c.bf16 %v9278_v47, %v9278_v47  ;;  %v2602_v27 = vpop.f32.mrf.mxu1 }
 0x1bd   : > { %5667 = vmatpush1.bf16.msra.mxu1 %v24788_v41  ;;  %v18716_v59 = vunpack.c.l.b16 %v24794_v44  ;;  %v9025_v41 = vadd.f32 %v17503_v28, %v8763_v20  ;;  %24799 = vst [vmem:[#allocation85_spill] sm:$0xff] %v18727_v40  ;;  %24800 = vst [vmem:[#allocation86_spill] sm:$0xff] %v18730_v42  ;;  %v18732_v44 = vunpack.c.l.b16 %v14553_v51  ;;  %v18736_v20 = vpack.c.bf16 %v9280_v24, %v9280_v24  ;;  %v2561_v26 = vpop.f32.mrf.mxu0  ;;  %v18748_v24 = vld [vmem:[%s16280_s22 + $0xd80] sm:$0xff]  ;;  %v24815_v42 = vld [vmem:[#allocation91_spill] sm:$0xff] }
 0x1be   : > { %5627 = vmatprep.subr.bf16.mxu0 %v24791_v60  ;;  %v8764_v60 = vmul.f32 %v17393_v4, %v2559_v63  ;;  %5668 = vmatprep.subr.bf16.mxu1 %v24798_v52  ;;  %v9027_v63 = vadd.f32 %v17503_v28, %v8765_v48  ;;  %v8766_v58 = vmul.f32 %v17393_v4, %v2600_v7  ;;  %v18751_v48 = vld [vmem:[%s16280_s22 + $0xda0] sm:$0xff] }
 0x1bf   : > { %24795 = vst [vmem:[#allocation84_spill] sm:$0xff] %v18716_v59  ;;  %24801 = vst [vmem:[#allocation122_spill] sm:$0xff] %v18732_v44  ;;  %5686 = vmatprep.mubr.bf16.mxu1 %v24448_v56  ;;  %v9281_v52 = vmax.f32 %v9025_v41, 0.0  ;;  %v24802_v51 = vcombine.low %v24789_v49, %v24790_v29  ;;  %v24804_v27 = vcombine.low %v24796_v61, %v24797_v36  ;;  %v24805_v29 = vld [vmem:[#allocation87_spill] sm:$0xff]  ;;  %v24806_v49 = vld [vmem:[#allocation88_spill] sm:$0xff]  ;;  %v2603_v61 = vpop.f32.mrf.mxu1 }
 0x1c0   : > { %v9026_v46 = vadd.f32 %v17503_v28, %v8764_v60  ;;  %24803 = vst [vmem:[#allocation123_spill] sm:$0xff] %v18751_v48  ;;  %v9283_v7 = vmax.f32 %v9027_v63, 0.0  ;;  %v9028_v41 = vadd.f32 %v17503_v28, %v8766_v58  ;;  %v2562_v60 = vpop.f32.mrf.mxu0  ;;  %v9753_v58 = vmax.bf16 %v18718_v30, %v18694_v1  ;;  %v24808_v36 = vld [vmem:[#allocation89_spill] sm:$0xff]  ;;  %v18857_v48 = vld [vmem:[%s16280_s22 + $0xdb8] sm:$0xff] }
 0x1c1   : > { %5628 = vmatpush1.bf16.msra.mxu0 %v24802_v51  ;;  %5669 = vmatpush1.bf16.msra.mxu1 %v24804_v27  ;;  %v24807_v51 = vcombine.high %v24805_v29, %v24806_v49  ;;  %v9537_v63 = vpack.c.bf16 %v9281_v52, %v9281_v52  ;;  %v24809_v27 = vcombine.high %v17458_v54, %v24808_v36  ;;  %v18780_v1 = vld [vmem:[%s16280_s22 + $0xd88] sm:$0xff]  ;;  %v24814_v60 = vld [vmem:[#allocation90_spill] sm:$0xff] }
 0x1c2   : > { %v9282_v43 = vmax.f32 %v9026_v46, 0.0  ;;  %v9539_v47 = vpack.c.bf16 %v9283_v7, %v9283_v7  ;;  %v9284_v0 = vmax.f32 %v9028_v41, 0.0  ;;  %v2719_v3 = vpop.f32.mrf.mxu0  ;;  %24810 = vst [vmem:[#allocation87_spill] sm:$0xff] %v18780_v1  ;;  %v18783_v30 = vld [vmem:[%s16280_s22 + $0xda8] sm:$0xff]  ;;  %v10503_v7 = vrot.slane %v18732_v44, 6  ;;  %v18854_v1 = vld [vmem:[%s16280_s22 + $0xd98] sm:$0xff] }
 0x1c3   : > { %5707 = vmatprep.subr.bf16.mxu0 %v24807_v51  ;;  %5748 = vmatprep.subr.bf16.mxu1 %v24809_v27  ;;  %v9754_v51 = vmax.bf16 %v18736_v20, %v18734_v55  ;;  %24811 = vst [vmem:[#allocation88_spill] sm:$0xff] %v18783_v30  ;;  %v8767_v61 = vmul.f32 %v17393_v4, %v2719_v3  ;;  %v2760_v27 = vpop.f32.mrf.mxu1  ;;  %v18826_v20 = vld [vmem:[%s16280_s22 + $0xdf8] sm:$0xff]  ;;  %v24824_v59 = vld [vmem:[#allocation93_spill] sm:$0xff] }
 0x1c4   : > { %14238 = vmatmul.mubr.msk.bf16.vlgmr.msra.gmra.mxu0 %vm973_vm0, %v18197_v13  ;;  %v9538_v52 = vpack.c.bf16 %v9282_v43, %v9282_v43  ;;  %14239 = vmatmul.mubr.msk.bf16.vlgmr.msra.gmra.mxu1 %vm973_vm0, %v18197_v13  ;;  %v24812_v55 = vcombine.low %v24805_v29, %v24806_v49  ;;  %v9817_v41 = vmax.bf16 %v9539_v47, %v9537_v63  ;;  %v2721_v3 = vpop.f32.mrf.mxu0  ;;  %v18802_v29 = vld [vmem:[%s16280_s22 + $0xdd0] sm:$0xff]  ;;  %v18823_v47 = vld [vmem:[%s16280_s22 + $0xdd8] sm:$0xff] }
 0x1c5   : > { %v9540_v46 = vpack.c.bf16 %v9284_v0, %v9284_v0  ;;  %v8769_v26 = vmul.f32 %v17393_v4, %v2760_v27  ;;  %v24813_v43 = vcombine.low %v17458_v54, %v24808_v36  ;;  %v24816_v40 = vcombine.high %v24814_v60, %v24815_v42  ;;  %v18805_v49 = vld [vmem:[%s16280_s22 + $0xdf0] sm:$0xff]  ;;  %v2762_v27 = vpop.f32.mrf.mxu1  ;;  %5727 = vmatprep.mubr.bf16.mxu0 %v24448_v56 }
 0x1c6   : > { %5708 = vmatpush1.bf16.msra.mxu0 %v24812_v55  ;;  %v9029_v0 = vadd.f32 %v17503_v28, %v8767_v61  ;;  %v8768_v63 = vmul.f32 %v17393_v4, %v2721_v3  ;;  %v24817_v54 = vcombine.high %v17481_v50, %v17494_v34  ;;  %v8770_v61 = vmul.f32 %v17393_v4, %v2762_v27  ;;  %v2723_v3 = vpop.f32.mrf.mxu0  ;;  %v18838_v27 = vld [vmem:[%s16280_s22 + $0xdb0] sm:$0xff] }
 0x1c7   : > { %5749 = vmatpush1.bf16.msra.mxu1 %v24813_v43  ;;  %5709 = vmatprep.subr.bf16.mxu0 %v24816_v40  ;;  %v9818_v55 = vmax.bf16 %v9540_v46, %v9538_v52  ;;  %v9031_v43 = vadd.f32 %v17503_v28, %v8769_v26  ;;  %24818 = vst [vmem:[#allocation89_spill] sm:$0xff] %v18826_v20  ;;  %v2764_v36 = vpop.f32.mrf.mxu1  ;;  %v18835_v52 = vld [vmem:[%s16280_s22 + $0xd90] sm:$0xff]  ;;  %24821 = vst [vmem:[#allocation91_spill] sm:$0xff] %v18838_v27  ;;  %v24823_v46 = vld [vmem:[#allocation92_spill] sm:$0xff] }
 0x1c8   : > { %5750 = vmatprep.subr.bf16.mxu1 %v24817_v54  ;;  %5768 = vmatprep.mubr.bf16.mxu1 %v24448_v56  ;;  %v9030_v40 = vadd.f32 %v17503_v28, %v8768_v63  ;;  %v24819_v26 = vcombine.low %v24814_v60, %v24815_v42  ;;  %24820 = vst [vmem:[#allocation90_spill] sm:$0xff] %v18835_v52  ;;  %v9285_v44 = vmax.f32 %v9029_v0, 0.0  ;;  %24826 = vst [vmem:[#allocation92_spill] sm:$0xff] %v18854_v1 }
 0x1c9   : > { %v14555_v3 = vcombine.high %v18711_v19, %v18711_v19  ;;  %v18844_v54 = vsel %vm10485_vm3, %v10503_v7, %v18651_v31  ;;  %v9881_v63 = vmax.bf16 %v9817_v41, %v9753_v58  ;;  %v9882_v36 = vmax.bf16 %v9818_v55, %v9754_v51  ;;  %24827 = vst [vmem:[#allocation93_spill] sm:$0xff] %v18857_v48  ;;  %v2765_v7 = vpop.f32.mrf.mxu1  ;;  %v24828_v58 = vld [vmem:[#allocation94_spill] sm:$0xff] }
 0x1ca   : > { %5710 = vmatpush1.bf16.msra.mxu0 %v24819_v26  ;;  %v9032_v42 = vadd.f32 %v17503_v28, %v8770_v61  ;;  %v24822_v60 = vcombine.low %v17481_v50, %v17494_v34  ;;  %v2724_v26 = vpop.f32.mrf.mxu0  ;;  %v24825_v30 = vcombine.high %v24823_v46, %v24824_v59  ;;  %v9287_v31 = vmax.f32 %v9031_v43, 0.0  ;;  %v24839_v50 = vld [vmem:[#allocation97_spill] sm:$0xff] }
 0x1cb   : > { %v24829_v51 = vcombine.high %v17514_v35, %v24828_v58  ;;  %v9286_v0 = vmax.f32 %v9030_v40, 0.0  ;;  %v2842_v26 = vpop.f32.mrf.mxu1  ;;  %v24835_v40 = vld [vmem:[#allocation96_spill] sm:$0xff]  ;;  %v18919_v34 = vld [vmem:[%s16280_s22 + $0xe68] sm:$0xff] }
 0x1cc   : > { %5751 = vmatpush1.bf16.msra.mxu1 %v24822_v60  ;;  %5869 = vmatprep.subr.bf16.mxu0 %v24825_v30  ;;  %v14488_v30 = vcombine.low %v9881_v63, %v9882_v36  ;;  %v9288_v55 = vmax.f32 %v9032_v42, 0.0  ;;  %v2801_v61 = vpop.f32.mrf.mxu0  ;;  %v24830_v63 = vcombine.low %v24823_v46, %v24824_v59  ;;  %v24831_v42 = vcombine.low %v18518_v62, %v18518_v62  ;;  %v18916_v62 = vld [vmem:[%s16280_s22 + $0xe48] sm:$0xff] }
 0x1cd   : > { %5910 = vmatprep.subr.bf16.mxu1 %v24829_v51  ;;  %14240 = vmatmul.mubr.msk.bf16.vlgmr.msra.gmra.mxu0 %vm973_vm0, %v18197_v13  ;;  %v8771_v60 = vmul.f32 %v17393_v4, %v2801_v61  ;;  %v18887_v51 = vpack.c.bf16 %v9285_v44, %v9285_v44  ;;  %v8773_v61 = vmul.f32 %v17393_v4, %v2842_v26  ;;  %v18902_v44 = vld [vmem:[%s16280_s22 + $0xe60] sm:$0xff]  ;;  %v18921_v26 = vunpack.c.l.b16 %v14555_v3 }
 0x1ce   : > { %5870 = vmatpush1.bf16.msra.mxu0 %v24830_v63  ;;  %v18885_v7 = vunpack.c.l.b16 %v24831_v42  ;;  %10131 = vst [vmem:[#allocation2 + $0x30] sm:$0xff] %v14488_v30  ;;  %v24833_v59 = vcombine.low %v17514_v35, %v24828_v58  ;;  %v2803_v46 = vpop.f32.mrf.mxu0  ;;  %v24834_v63 = vld [vmem:[#allocation95_spill] sm:$0xff]  ;;  %v18899_v42 = vld [vmem:[%s16280_s22 + $0xe40] sm:$0xff]  ;;  %24838 = vst [vmem:[#allocation96_spill] sm:$0xff] %v18902_v44  ;;  %v18907_v43 = vpack.c.bf16 %v9287_v31, %v9287_v31  ;;  %5889 = vmatprep.mubr.bf16.mxu0 %v24448_v56 }
 0x1cf   : > { %14241 = vmatmul.mubr.msk.bf16.vlgmr.msra.gmra.mxu1 %vm973_vm0, %v18197_v13  ;;  %v24836_v36 = vcombine.high %v24834_v63, %v24835_v40  ;;  %24837 = vst [vmem:[#allocation95_spill] sm:$0xff] %v18899_v42  ;;  %v18904_v30 = vld [vmem:[#allocation2 + $0x68] sm:$0x11]  ;;  %v9033_v35 = vadd.f32 %v17503_v28, %v8771_v60  ;;  %v8772_v58 = vmul.f32 %v17393_v4, %v2803_v46  ;;  %24842 = vst [vmem:[#allocation97_spill] sm:$0xff] %v18916_v62  ;;  %v19046_v62 = vld [vmem:[%s16280_s22 + $0xe38] sm:$0xff] }
 0x1d0   : > { %24832 = vst [vmem:[#allocation94_spill] sm:$0xff] %v18885_v7  ;;  %5911 = vmatpush1.bf16.msra.mxu1 %v24833_v59  ;;  %v2844_v59 = vpop.f32.mrf.mxu1  ;;  %24844 = vst [vmem:[#allocation124_spill] sm:$0xff] %v18921_v26  ;;  %v18923_v31 = vpack.c.bf16 %v9286_v0, %v9286_v0  ;;  %v18925_v60 = vpack.c.bf16 %v9288_v55, %v9288_v55  ;;  %v9035_v46 = vadd.f32 %v17503_v28, %v8773_v61  ;;  %v2805_v48 = vpop.f32.mrf.mxu0  ;;  %v18937_v55 = vld [vmem:[%s16280_s22 + $0xe00] sm:$0xff] }
 0x1d1   : > { %5871 = vmatprep.subr.bf16.mxu0 %v24836_v36  ;;  %v24840_v36 = vld [vmem:[#allocation98_spill] sm:$0xff]  ;;  %v8774_v15 = vmul.f32 %v17393_v4, %v2844_v59  ;;  %5930 = vmatprep.mubr.bf16.mxu1 %v24448_v56  ;;  %v9034_v1 = vadd.f32 %v17503_v28, %v8772_v58  ;;  %v24845_v3 = vcombine.low %v24834_v63, %v24835_v40  ;;  %v18940_v61 = vld [vmem:[%s16280_s22 + $0xe20] sm:$0xff]  ;;  %v24849_v40 = vld [vmem:[#allocation99_spill] sm:$0xff] }
 0x1d2   : > { %v24841_v41 = vcombine.high %v24839_v50, %v24840_v36  ;;  %24843 = vst [vmem:[#allocation98_spill] sm:$0xff] %v18919_v34  ;;  %v2846_v27 = vpop.f32.mrf.mxu1  ;;  %24846 = vst [vmem:[#allocation125_spill] sm:$0xff] %v18937_v55  ;;  %v9291_v59 = vmax.f32 %v9035_v46, 0.0  ;;  %v2806_v58 = vpop.f32.mrf.mxu0  ;;  %v24850_v63 = vld [vmem:[#allocation100_spill] sm:$0xff]  ;;  %v9756_v20 = vmax.bf16 %v18925_v60, %v18923_v31  ;;  %v19043_v55 = vld [vmem:[%s16280_s22 + $0xe18] sm:$0xff] }
 0x1d3   : > { %5872 = vmatpush1.bf16.msra.mxu0 %v24845_v3  ;;  %24847 = vst [vmem:[#allocation126_spill] sm:$0xff] %v18940_v61  ;;  %v24848_v27 = vcombine.low %v24839_v50, %v24840_v36  ;;  %v24851_v3 = vcombine.high %v24849_v40, %v24850_v63  ;;  %v9290_v52 = vmax.f32 %v9034_v1, 0.0  ;;  %v24852_v36 = vld [vmem:[#allocation101_spill] sm:$0xff]  ;;  %v24857_v31 = vcombine.low %v24849_v40, %v24850_v63  ;;  %v18991_v40 = vld [vmem:[%s16280_s22 + $0xe50] sm:$0xff]  ;;  %v19015_v61 = vld [vmem:[%s16280_s22 + $0xe78] sm:$0xff] }
 0x1d4   : > { %5912 = vmatprep.subr.bf16.mxu1 %v24841_v41  ;;  %v9289_v41 = vmax.f32 %v9033_v35, 0.0  ;;  %v9036_v35 = vadd.f32 %v17503_v28, %v8774_v15  ;;  %v9755_v15 = vmax.bf16 %v18907_v43, %v18887_v51  ;;  %v2847_v50 = vpop.f32.mrf.mxu1  ;;  %v9547_v0 = vpack.c.bf16 %v9291_v59, %v9291_v59  ;;  %v2963_v42 = vpop.f32.mrf.mxu0  ;;  %v18969_v43 = vld [vmem:[%s16280_s22 + $0xe08] sm:$0xff]  ;;  %v18994_v63 = vld [vmem:[%s16280_s22 + $0xe70] sm:$0xff] }
 0x1d5   : > { %5913 = vmatpush1.bf16.msra.mxu1 %v24848_v27  ;;  %5951 = vmatprep.subr.bf16.mxu0 %v24851_v3  ;;  %v24853_v27 = vld [vmem:[#allocation102_spill] sm:$0xff]  ;;  %24855 = vst [vmem:[#allocation99_spill] sm:$0xff] %v18969_v43  ;;  %v18972_v51 = vld [vmem:[%s16280_s22 + $0xe28] sm:$0xff]  ;;  %v8775_v50 = vmul.f32 %v17393_v4, %v2963_v42  ;;  %v10505_v59 = vrot.slane %v18921_v26, 5  ;;  %v24859_v3 = vld [vmem:[#allocation103_spill] sm:$0xff] }
 0x1d6   : > { %v9545_v46 = vpack.c.bf16 %v9289_v41, %v9289_v41  ;;  %v24854_v58 = vcombine.high %v24852_v36, %v24853_v27  ;;  %v9292_v44 = vmax.f32 %v9036_v35, 0.0  ;;  %14258 = vmatmul.mubr.msk.bf16.vlgmr.msra.gmra.mxu0 %vm973_vm0, %v18197_v13  ;;  %24856 = vst [vmem:[#allocation100_spill] sm:$0xff] %v18972_v51  ;;  %v9546_v41 = vpack.c.bf16 %v9290_v52, %v9290_v52  ;;  %v2965_v42 = vpop.f32.mrf.mxu0  ;;  %v19012_v26 = vld [vmem:[%s16280_s22 + $0xe58] sm:$0xff] }
 0x1d7   : > { %5952 = vmatpush1.bf16.msra.mxu0 %v24857_v31  ;;  %v24858_v52 = vcombine.low %v24852_v36, %v24853_v27  ;;  %24862 = vst [vmem:[#allocation101_spill] sm:$0xff] %v18994_v63  ;;  %v24863_v36 = vld [vmem:[#allocation17_spill] sm:$0xff]  ;;  %5971 = vmatprep.mubr.bf16.mxu0 %v24448_v56  ;;  %24866 = vst [vmem:[#allocation102_spill] sm:$0xff] %v19012_v26  ;;  %v24873_v51 = vld [vmem:[#allocation19_spill] sm:$0xff] }
 0x1d8   : > { %5992 = vmatprep.subr.bf16.mxu1 %v24854_v58  ;;  %v3004_v58 = vpop.f32.mrf.mxu1  ;;  %14259 = vmatmul.mubr.msk.bf16.vlgmr.msra.gmra.mxu1 %vm973_vm0, %v18197_v13  ;;  %v9819_v35 = vmax.bf16 %v9547_v0, %v9545_v46  ;;  %v9548_v1 = vpack.c.bf16 %v9292_v44, %v9292_v44  ;;  %v24860_v13 = vld [vmem:[#allocation104_spill] sm:$0xff]  ;;  %v9037_v44 = vadd.f32 %v17503_v28, %v8775_v50  ;;  %v24864_v27 = vld [vmem:[#allocation105_spill] sm:$0xff] }
 0x1d9   : > { %v8777_v48 = vmul.f32 %v17393_v4, %v3004_v58  ;;  %5993 = vmatpush1.bf16.msra.mxu1 %v24858_v52  ;;  %v24861_v34 = vcombine.high %v24859_v3, %v24860_v13  ;;  %v8776_v46 = vmul.f32 %v17393_v4, %v2965_v42  ;;  %v24865_v31 = vcombine.high %v24863_v36, %v24864_v27  ;;  %v2967_v42 = vpop.f32.mrf.mxu0 }
 0x1da   : > { %v3006_v58 = vpop.f32.mrf.mxu1  ;;  %v9820_v60 = vmax.bf16 %v9548_v1, %v9546_v41  ;;  %6012 = vmatprep.mubr.bf16.mxu1 %v24448_v56  ;;  %24867 = vst [vmem:[#allocation103_spill] sm:$0xff] %v19015_v61  ;;  %v19024_v41 = vld [vmem:[%s16280_s22 + $0xe10] sm:$0xff]  ;;  %v14557_v42 = vcombine.high %v18904_v30, %v18904_v30  ;;  %v9293_v7 = vmax.f32 %v9037_v44, 0.0  ;;  %24875 = vst [vmem:[#allocation105_spill] sm:$0xff] %v19043_v55 }
 0x1db   : > { %5953 = vmatprep.subr.bf16.mxu0 %v24861_v34  ;;  %5994 = vmatprep.subr.bf16.mxu1 %v24865_v31  ;;  %v9039_v0 = vadd.f32 %v17503_v28, %v8777_v48  ;;  %v8778_v50 = vmul.f32 %v17393_v4, %v3006_v58  ;;  %v9038_v34 = vadd.f32 %v17503_v28, %v8776_v46  ;;  %v19027_v58 = vld [vmem:[%s16280_s22 + $0xe30] sm:$0xff] }
 0x1dc   : > { %v3008_v52 = vpop.f32.mrf.mxu1  ;;  %v24868_v48 = vcombine.low %v24859_v3, %v24860_v13  ;;  %24869 = vst [vmem:[#allocation104_spill] sm:$0xff] %v19024_v41  ;;  %24870 = vst [vmem:[#allocation17_spill] sm:$0xff] %v19027_v58  ;;  %v19033_v31 = vsel %vm10488_vm4, %v10505_v59, %v18844_v54  ;;  %v9883_v46 = vmax.bf16 %v9819_v35, %v9755_v15  ;;  %v24872_v1 = vld [vmem:[#allocation18_spill] sm:$0xff]  ;;  %v24877_v15 = vld [vmem:[#allocation20_spill] sm:$0xff] }
 0x1dd   : > { %v9884_v52 = vmax.bf16 %v9820_v60, %v9756_v20  ;;  %v9040_v3 = vadd.f32 %v17503_v28, %v8778_v50  ;;  %v24871_v13 = vcombine.low %v24863_v36, %v24864_v27  ;;  %v24874_v43 = vcombine.high %v24872_v1, %v24873_v51  ;;  %24876 = vst [vmem:[#allocation18_spill] sm:$0xff] %v19046_v62  ;;  %v24878_v20 = vld [vmem:[#allocation21_spill] sm:$0xff]  ;;  %v24889_v36 = vld [vmem:[#allocation24_spill] sm:$0xff] }
 0x1de   : > { %5954 = vmatpush1.bf16.msra.mxu0 %v24868_v48  ;;  %v2968_v48 = vpop.f32.mrf.mxu0  ;;  %v9295_v54 = vmax.f32 %v9039_v0, 0.0  ;;  %v3009_v59 = vpop.f32.mrf.mxu1  ;;  %v24879_v60 = vcombine.high %v24877_v15, %v24878_v20  ;;  %v9294_v27 = vmax.f32 %v9038_v34, 0.0  ;;  %v24880_v34 = vcombine.low %v24872_v1, %v24873_v51  ;;  %v19110_v62 = vld [vmem:[%s16280_s22 + $0xee8] sm:$0xff] }
 0x1df   : > { %5995 = vmatpush1.bf16.msra.mxu1 %v24871_v13  ;;  %6113 = vmatprep.subr.bf16.mxu0 %v24874_v43  ;;  %v14489_v43 = vcombine.low %v9883_v46, %v9884_v52  ;;  %v9296_v50 = vmax.f32 %v9040_v3, 0.0  ;;  %v19057_v48 = vld [vmem:[#allocation6] sm:$0xf]  ;;  %v24881_v3 = vcombine.low %v18711_v19, %v18711_v19  ;;  %v24883_v51 = vcombine.low %v24877_v15, %v24878_v20  ;;  %v24885_v46 = vld [vmem:[#allocation23_spill] sm:$0xff]  ;;  %v19107_v19 = vld [vmem:[%s16280_s22 + $0xec8] sm:$0xff] }
 0x1e0   : > { %6154 = vmatprep.subr.bf16.mxu1 %v24879_v60  ;;  %v3045_v13 = vpop.f32.mrf.mxu0  ;;  %v3086_v60 = vpop.f32.mrf.mxu1  ;;  %v19098_v35 = vpack.c.bf16 %v9295_v54, %v9295_v54  ;;  %24893 = vst [vmem:[#allocation23_spill] sm:$0xff] %v19110_v62  ;;  %v19114_v54 = vpack.c.bf16 %v9294_v27, %v9294_v27  ;;  %v24908_v62 = vld [vmem:[#allocation28_spill] sm:$0xff] }
 0x1e1   : > { %14260 = vmatmul.mubr.msk.bf16.vlgmr.msra.gmra.mxu0 %vm973_vm0, %v19057_v48  ;;  %v8779_v59 = vmul.f32 %v17393_v4, %v3045_v13  ;;  %v19076_v0 = vunpack.c.l.b16 %v24881_v3  ;;  %10132 = vst [vmem:[#allocation2 + $0x48] sm:$0xff] %v14489_v43  ;;  %v19078_v13 = vpack.c.bf16 %v9293_v7, %v9293_v7  ;;  %v8781_v44 = vmul.f32 %v17393_v4, %v3086_v60  ;;  %v19090_v3 = vld [vmem:[%s16280_s22 + $0xec0] sm:$0xff]  ;;  %v19095_v43 = vld [vmem:[#allocation2 + $0x30] sm:$0x11] }
 0x1e2   : > { %14261 = vmatmul.mubr.msk.bf16.vlgmr.msra.gmra.mxu1 %vm973_vm0, %v19057_v48  ;;  %6114 = vmatpush1.bf16.msra.mxu0 %v24880_v34  ;;  %v3047_v1 = vpop.f32.mrf.mxu0  ;;  %v24884_v34 = vld [vmem:[#allocation22_spill] sm:$0xff]  ;;  %24887 = vst [vmem:[#allocation20_spill] sm:$0xff] %v19090_v3  ;;  %v19093_v7 = vld [vmem:[%s16280_s22 + $0xee0] sm:$0xff]  ;;  %v19112_v60 = vunpack.c.l.b16 %v14557_v42 }
 0x1e3   : > { %24882 = vst [vmem:[#allocation19_spill] sm:$0xff] %v19076_v0  ;;  %6155 = vmatpush1.bf16.msra.mxu1 %v24883_v51  ;;  %v24886_v52 = vcombine.high %v24884_v34, %v24885_v46  ;;  %24888 = vst [vmem:[#allocation21_spill] sm:$0xff] %v19093_v7  ;;  %v9041_v15 = vadd.f32 %v17503_v28, %v8779_v59  ;;  %v8780_v20 = vmul.f32 %v17393_v4, %v3047_v1  ;;  %v3088_v51 = vpop.f32.mrf.mxu1 }
 0x1e4   : > { %6133 = vmatprep.mubr.bf16.mxu0 %v24448_v56  ;;  %24892 = vst [vmem:[#allocation22_spill] sm:$0xff] %v19107_v19  ;;  %24894 = vst [vmem:[#allocation24_spill] sm:$0xff] %v19112_v60  ;;  %v19116_v59 = vpack.c.bf16 %v9296_v50, %v9296_v50  ;;  %v9043_v1 = vadd.f32 %v17503_v28, %v8781_v44  ;;  %v8782_v8 = vmul.f32 %v17393_v4, %v3088_v51  ;;  %v3049_v55 = vpop.f32.mrf.mxu0  ;;  %v19128_v50 = vld [vmem:[%s16280_s22 + $0xe80] sm:$0xff] }
 0x1e5   : > { %6115 = vmatprep.subr.bf16.mxu0 %v24886_v52  ;;  %v24890_v52 = vld [vmem:[#allocation25_spill] sm:$0xff]  ;;  %6174 = vmatprep.mubr.bf16.mxu1 %v24448_v56  ;;  %v9042_v41 = vadd.f32 %v17503_v28, %v8780_v20  ;;  %v3090_v61 = vpop.f32.mrf.mxu1  ;;  %v24895_v42 = vcombine.low %v24884_v34, %v24885_v46  ;;  %v19131_v44 = vld [vmem:[%s16280_s22 + $0xea0] sm:$0xff]  ;;  %v24897_v46 = vld [vmem:[#allocation26_spill] sm:$0xff] }
 0x1e6   : > { %v24891_v58 = vcombine.high %v24889_v36, %v24890_v52  ;;  %v9299_v51 = vmax.f32 %v9043_v1, 0.0  ;;  %v24896_v61 = vcombine.low %v24889_v36, %v24890_v52  ;;  %v3050_v20 = vpop.f32.mrf.mxu0  ;;  %v24898_v34 = vld [vmem:[#allocation106_spill] sm:$0xff]  ;;  %v24900_v52 = vld [vmem:[#allocation107_spill] sm:$0xff]  ;;  %v9758_v63 = vmax.bf16 %v19116_v59, %v19114_v54 }
 0x1e7   : > { %6116 = vmatpush1.bf16.msra.mxu0 %v24895_v42  ;;  %v24899_v42 = vcombine.high %v24897_v46, %v24898_v34  ;;  %v9298_v26 = vmax.f32 %v9042_v41, 0.0  ;;  %v3091_v36 = vpop.f32.mrf.mxu1  ;;  %v24905_v54 = vcombine.low %v24897_v46, %v24898_v34  ;;  %v19182_v46 = vld [vmem:[%s16280_s22 + $0xed0] sm:$0xff]  ;;  %v19207_v59 = vld [vmem:[%s16280_s22 + $0xed8] sm:$0xff] }
 0x1e8   : > { %6156 = vmatprep.subr.bf16.mxu1 %v24891_v58  ;;  %v9297_v58 = vmax.f32 %v9041_v15, 0.0  ;;  %v9044_v15 = vadd.f32 %v17503_v28, %v8782_v8  ;;  %v9757_v8 = vmax.bf16 %v19098_v35, %v19078_v13  ;;  %v9555_v27 = vpack.c.bf16 %v9299_v51, %v9299_v51  ;;  %v3207_v3 = vpop.f32.mrf.mxu0  ;;  %v19160_v35 = vld [vmem:[%s16280_s22 + $0xe88] sm:$0xff]  ;;  %v19185_v34 = vld [vmem:[%s16280_s22 + $0xef0] sm:$0xff] }
 0x1e9   : > { %6157 = vmatpush1.bf16.msra.mxu1 %v24896_v61  ;;  %6195 = vmatprep.subr.bf16.mxu0 %v24899_v42  ;;  %v24901_v61 = vld [vmem:[#allocation108_spill] sm:$0xff]  ;;  %24903 = vst [vmem:[#allocation25_spill] sm:$0xff] %v19160_v35  ;;  %v19163_v13 = vld [vmem:[%s16280_s22 + $0xea8] sm:$0xff]  ;;  %v8783_v36 = vmul.f32 %v17393_v4, %v3207_v3  ;;  %v10507_v51 = vrot.slane %v19112_v60, 4  ;;  %v24907_v42 = vld [vmem:[#allocation27_spill] sm:$0xff] }
 0x1ea   : > { %v9553_v1 = vpack.c.bf16 %v9297_v58, %v9297_v58  ;;  %v24902_v20 = vcombine.high %v24900_v52, %v24901_v61  ;;  %v9300_v7 = vmax.f32 %v9044_v15, 0.0  ;;  %14278 = vmatmul.mubr.msk.bf16.vlgmr.msra.gmra.mxu0 %vm973_vm0, %v19057_v48  ;;  %24904 = vst [vmem:[#allocation26_spill] sm:$0xff] %v19163_v13  ;;  %v9554_v58 = vpack.c.bf16 %v9298_v26, %v9298_v26  ;;  %v3209_v3 = vpop.f32.mrf.mxu0  ;;  %v19210_v60 = vld [vmem:[%s16280_s22 + $0xef8] sm:$0xff] }
 0x1eb   : > { %6196 = vmatpush1.bf16.msra.mxu0 %v24905_v54  ;;  %v24906_v26 = vcombine.low %v24900_v52, %v24901_v61  ;;  %v24909_v19 = vcombine.high %v24907_v42, %v24908_v62  ;;  %v24910_v52 = vcombine.high %v17758_v16, %v17761_v21  ;;  %6215 = vmatprep.mubr.bf16.mxu0 %v24448_v56  ;;  %v19238_v13 = vld [vmem:[%s16280_s22 + $0xe98] sm:$0xff] }
 0x1ec   : > { %6236 = vmatprep.subr.bf16.mxu1 %v24902_v20  ;;  %v3248_v20 = vpop.f32.mrf.mxu1  ;;  %14279 = vmatmul.mubr.msk.bf16.vlgmr.msra.gmra.mxu1 %vm973_vm0, %v19057_v48  ;;  %v9821_v15 = vmax.bf16 %v9555_v27, %v9553_v1  ;;  %v9556_v41 = vpack.c.bf16 %v9300_v7, %v9300_v7  ;;  %v9045_v7 = vadd.f32 %v17503_v28, %v8783_v36  ;;  %v3211_v27 = vpop.f32.mrf.mxu0  ;;  %v19241_v35 = vld [vmem:[%s16280_s22 + $0xeb8] sm:$0xff] }
 0x1ed   : > { %v8785_v55 = vmul.f32 %v17393_v4, %v3248_v20  ;;  %6237 = vmatpush1.bf16.msra.mxu1 %v24906_v26  ;;  %6197 = vmatprep.subr.bf16.mxu0 %v24909_v19  ;;  %v8784_v1 = vmul.f32 %v17393_v4, %v3209_v3  ;;  %v24911_v61 = vcombine.low %v18904_v30, %v18904_v30  ;;  %v19222_v27 = vld [vmem:[%s16280_s22 + $0xeb0] sm:$0xff] }
 0x1ee   : > { %v3250_v20 = vpop.f32.mrf.mxu1  ;;  %6238 = vmatprep.subr.bf16.mxu1 %v24910_v52  ;;  %v9822_v36 = vmax.bf16 %v9556_v41, %v9554_v58  ;;  %6256 = vmatprep.mubr.bf16.mxu1 %v24448_v56  ;;  %v19219_v58 = vld [vmem:[%s16280_s22 + $0xe90] sm:$0xff]  ;;  %24915 = vst [vmem:[#allocation108_spill] sm:$0xff] %v19222_v27  ;;  %v19228_v19 = vsel %vm10491_vm5, %v10507_v51, %v19033_v31  ;;  %v9301_v52 = vmax.f32 %v9045_v7, 0.0  ;;  %24918 = vst [vmem:[#allocation27_spill] sm:$0xff] %v19238_v13 }
 0x1ef   : > { %v19199_v54 = vunpack.c.l.b16 %v24911_v61  ;;  %v9047_v26 = vadd.f32 %v17503_v28, %v8785_v55  ;;  %v8786_v3 = vmul.f32 %v17393_v4, %v3250_v20  ;;  %v9046_v30 = vadd.f32 %v17503_v28, %v8784_v1  ;;  %24914 = vst [vmem:[#allocation107_spill] sm:$0xff] %v19219_v58  ;;  %24919 = vst [vmem:[#allocation28_spill] sm:$0xff] %v19241_v35  ;;  %v19430_v58 = vld [vmem:[%s16280_s22 + $0xf38] sm:$0xff] }
 0x1f0   : > { %v3252_v61 = vpop.f32.mrf.mxu1  ;;  %v24913_v55 = vcombine.low %v24907_v42, %v24908_v62  ;;  %v14559_v20 = vcombine.high %v19095_v43, %v19095_v43  ;;  %v9885_v1 = vmax.bf16 %v9821_v15, %v9757_v8  ;;  %v24916_v42 = vcombine.low %v17758_v16, %v17761_v21  ;;  %v24929_v21 = vld [vmem:[#allocation32_spill] sm:$0xff]  ;;  %v19299_v16 = vld [vmem:[%s16280_s22 + $0xf68] sm:$0xff] }
 0x1f1   : > { %24912 = vst [vmem:[#allocation106_spill] sm:$0xff] %v19199_v54  ;;  %v9886_v61 = vmax.bf16 %v9822_v36, %v9758_v63  ;;  %v9048_v62 = vadd.f32 %v17503_v28, %v8786_v3  ;;  %v24917_v41 = vcombine.high %v17791_v6, %v17794_v22  ;;  %v9303_v31 = vmax.f32 %v9047_v26, 0.0  ;;  %v24920_v63 = vld [vmem:[#allocation29_spill] sm:$0xff]  ;;  %24933 = vst [vmem:[#allocation32_spill] sm:$0xff] %v19299_v16  ;;  %v19396_v54 = vld [vmem:[%s16280_s22 + $0xf58] sm:$0xff] }
 0x1f2   : > { %6198 = vmatpush1.bf16.msra.mxu0 %v24913_v55  ;;  %6239 = vmatpush1.bf16.msra.mxu1 %v24916_v42  ;;  %v3212_v55 = vpop.f32.mrf.mxu0  ;;  %v3253_v51 = vpop.f32.mrf.mxu1  ;;  %v24921_v8 = vcombine.high %v17804_v5, %v24920_v63  ;;  %v9302_v36 = vmax.f32 %v9046_v30, 0.0  ;;  %v24948_v16 = vld [vmem:[#allocation37_spill] sm:$0xff] }
 0x1f3   : > { %6357 = vmatprep.subr.bf16.mxu0 %v24917_v41  ;;  %v14490_v7 = vcombine.low %v9885_v1, %v9886_v61  ;;  %v9304_v3 = vmax.f32 %v9048_v62, 0.0  ;;  %v24922_v1 = vcombine.low %v17791_v6, %v17794_v22  ;;  %v19267_v51 = vpack.c.bf16 %v9301_v52, %v9301_v52  ;;  %v24924_v6 = vld [vmem:[#allocation30_spill] sm:$0xff]  ;;  %v19279_v62 = vld [vmem:[%s16280_s22 + $0xf40] sm:$0xff]  ;;  %v19296_v61 = vld [vmem:[%s16280_s22 + $0xf48] sm:$0xff]  ;;  %24955 = vst [vmem:[#allocation37_spill] sm:$0xff] %v19396_v54 }
 0x1f4   : > { %6398 = vmatprep.subr.bf16.mxu1 %v24921_v8  ;;  %v3289_v41 = vpop.f32.mrf.mxu0  ;;  %v3330_v55 = vpop.f32.mrf.mxu1  ;;  %24927 = vst [vmem:[#allocation29_spill] sm:$0xff] %v19279_v62  ;;  %v19282_v52 = vld [vmem:[%s16280_s22 + $0xf60] sm:$0xff]  ;;  %v19287_v26 = vpack.c.bf16 %v9303_v31, %v9303_v31  ;;  %v19303_v31 = vpack.c.bf16 %v9302_v36, %v9302_v36 }
 0x1f5   : > { %14280 = vmatmul.mubr.msk.bf16.vlgmr.msra.gmra.mxu0 %vm973_vm0, %v19057_v48  ;;  %v8787_v42 = vmul.f32 %v17393_v4, %v3289_v41  ;;  %14281 = vmatmul.mubr.msk.bf16.vlgmr.msra.gmra.mxu1 %vm973_vm0, %v19057_v48  ;;  %10133 = vst [vmem:[#allocation2 + $0x80] sm:$0xff] %v14490_v7  ;;  %v8789_v8 = vmul.f32 %v17393_v4, %v3330_v55  ;;  %24928 = vst [vmem:[#allocation30_spill] sm:$0xff] %v19282_v52  ;;  %v19284_v7 = vld [vmem:[#allocation2 + $0x48] sm:$0x11]  ;;  %v19301_v55 = vunpack.c.l.b16 %v14559_v20 }
 0x1f6   : > { %6358 = vmatpush1.bf16.msra.mxu0 %v24922_v1  ;;  %v24923_v41 = vcombine.low %v17804_v5, %v24920_v63  ;;  %v3291_v22 = vpop.f32.mrf.mxu0  ;;  %v24925_v1 = vld [vmem:[#allocation31_spill] sm:$0xff]  ;;  %6377 = vmatprep.mubr.bf16.mxu0 %v24448_v56 }
 0x1f7   : > { %v24926_v30 = vcombine.high %v24924_v6, %v24925_v1  ;;  %v9049_v5 = vadd.f32 %v17503_v28, %v8787_v42  ;;  %v8788_v63 = vmul.f32 %v17393_v4, %v3291_v22  ;;  %24932 = vst [vmem:[#allocation31_spill] sm:$0xff] %v19296_v61  ;;  %v19305_v42 = vpack.c.bf16 %v9304_v3, %v9304_v3  ;;  %v19317_v3 = vld [vmem:[%s16280_s22 + $0xf00] sm:$0xff] }
 0x1f8   : > { %6399 = vmatpush1.bf16.msra.mxu1 %v24923_v41  ;;  %v3332_v41 = vpop.f32.mrf.mxu1  ;;  %v9051_v22 = vadd.f32 %v17503_v28, %v8789_v8  ;;  %v3293_v35 = vpop.f32.mrf.mxu0  ;;  %6418 = vmatprep.mubr.bf16.mxu1 %v24448_v56  ;;  %v24935_v20 = vcombine.low %v24924_v6, %v24925_v1  ;;  %24936 = vst [vmem:[#allocation127_spill] sm:$0xff] %v19317_v3  ;;  %v19320_v8 = vld [vmem:[%s16280_s22 + $0xf20] sm:$0xff]  ;;  %v19427_v3 = vld [vmem:[%s16280_s22 + $0xf18] sm:$0xff] }
 0x1f9   : > { %6359 = vmatprep.subr.bf16.mxu0 %v24926_v30  ;;  %v24930_v30 = vld [vmem:[#allocation33_spill] sm:$0xff]  ;;  %v8790_v0 = vmul.f32 %v17393_v4, %v3332_v41  ;;  %v9050_v13 = vadd.f32 %v17503_v28, %v8788_v63  ;;  %24937 = vst [vmem:[#allocation128_spill] sm:$0xff] %v19320_v8  ;;  %v24939_v6 = vcombine.high %v17869_v57, %v17872_v11  ;;  %v19399_v8 = vld [vmem:[%s16280_s22 + $0xf78] sm:$0xff] }
 0x1fa   : > { %v24931_v15 = vcombine.high %v24929_v21, %v24930_v30  ;;  %24934 = vst [vmem:[#allocation33_spill] sm:$0xff] %v19301_v55  ;;  %v3334_v27 = vpop.f32.mrf.mxu1  ;;  %6360 = vmatpush1.bf16.msra.mxu0 %v24935_v20  ;;  %v9307_v41 = vmax.f32 %v9051_v22, 0.0  ;;  %v3294_v63 = vpop.f32.mrf.mxu0  ;;  %v9760_v35 = vmax.bf16 %v19305_v42, %v19303_v31  ;;  %v24945_v31 = vcombine.low %v17869_v57, %v17872_v11  ;;  %v19371_v57 = vld [vmem:[%s16280_s22 + $0xf50] sm:$0xff] }
 0x1fb   : > { %v24938_v27 = vcombine.low %v24929_v21, %v24930_v30  ;;  %6439 = vmatprep.subr.bf16.mxu0 %v24939_v6  ;;  %v9306_v36 = vmax.f32 %v9050_v13, 0.0  ;;  %v24940_v30 = vld [vmem:[#allocation34_spill] sm:$0xff]  ;;  %v24947_v6 = vld [vmem:[#allocation36_spill] sm:$0xff] }
 0x1fc   : > { %6400 = vmatprep.subr.bf16.mxu1 %v24931_v15  ;;  %v9305_v15 = vmax.f32 %v9049_v5, 0.0  ;;  %v9052_v5 = vadd.f32 %v17503_v28, %v8790_v0  ;;  %v9759_v0 = vmax.bf16 %v19287_v26, %v19267_v51  ;;  %v3335_v21 = vpop.f32.mrf.mxu1  ;;  %v9563_v1 = vpack.c.bf16 %v9307_v41, %v9307_v41  ;;  %v3451_v62 = vpop.f32.mrf.mxu0  ;;  %v19349_v26 = vld [vmem:[%s16280_s22 + $0xf08] sm:$0xff]  ;;  %v19374_v11 = vld [vmem:[%s16280_s22 + $0xf70] sm:$0xff] }
 0x1fd   : > { %6401 = vmatpush1.bf16.msra.mxu1 %v24938_v27  ;;  %v24941_v27 = vld [vmem:[#allocation35_spill] sm:$0xff]  ;;  %14298 = vmatmul.mubr.msk.bf16.vlgmr.msra.gmra.mxu0 %vm973_vm0, %v19057_v48  ;;  %24943 = vst [vmem:[#allocation34_spill] sm:$0xff] %v19349_v26  ;;  %v19352_v51 = vld [vmem:[%s16280_s22 + $0xf28] sm:$0xff]  ;;  %v8791_v21 = vmul.f32 %v17393_v4, %v3451_v62  ;;  %v10509_v41 = vrot.slane %v19301_v55, 3  ;;  %v24949_v61 = vcombine.high %v24947_v6, %v24948_v16 }
 0x1fe   : > { %v9561_v22 = vpack.c.bf16 %v9305_v15, %v9305_v15  ;;  %v24942_v63 = vcombine.high %v24940_v30, %v24941_v27  ;;  %v9308_v52 = vmax.f32 %v9052_v5, 0.0  ;;  %24944 = vst [vmem:[#allocation35_spill] sm:$0xff] %v19352_v51  ;;  %v9562_v15 = vpack.c.bf16 %v9306_v36, %v9306_v36  ;;  %6440 = vmatpush1.bf16.msra.mxu0 %v24945_v31  ;;  %v3453_v36 = vpop.f32.mrf.mxu0  ;;  %v24962_v51 = vld [vmem:[#allocation40_spill] sm:$0xff] }
 0x1ff   : > { %v24946_v62 = vcombine.low %v24940_v30, %v24941_v27  ;;  %6441 = vmatprep.subr.bf16.mxu0 %v24949_v61  ;;  %v24950_v30 = vld [vmem:[#allocation38_spill] sm:$0xff]  ;;  %v24951_v27 = vld [vmem:[#allocation109_spill] sm:$0xff]  ;;  %6459 = vmatprep.mubr.bf16.mxu0 %v24448_v56  ;;  %v19417_v61 = vsel %vm10494_vm6, %v10509_v41, %v19228_v19  ;;  %24965 = vst [vmem:[#allocation40_spill] sm:$0xff] %v19430_v58 }
 0x200   : > { %6480 = vmatprep.subr.bf16.mxu1 %v24942_v63  ;;  %v3492_v63 = vpop.f32.mrf.mxu1  ;;  %14299 = vmatmul.mubr.msk.bf16.vlgmr.msra.gmra.mxu1 %vm973_vm0, %v19057_v48  ;;  %v9823_v5 = vmax.bf16 %v9563_v1, %v9561_v22  ;;  %v9564_v13 = vpack.c.bf16 %v9308_v52, %v9308_v52  ;;  %v9053_v52 = vadd.f32 %v17503_v28, %v8791_v21  ;;  %v3455_v55 = vpop.f32.mrf.mxu0  ;;  %v19489_v58 = vld [vmem:[%s16280_s22 + $0xfc8] sm:$0xff] }
 0x201   : > { %v8793_v20 = vmul.f32 %v17393_v4, %v3492_v63  ;;  %6481 = vmatpush1.bf16.msra.mxu1 %v24946_v62  ;;  %v8792_v22 = vmul.f32 %v17393_v4, %v3453_v36  ;;  %v24952_v31 = vcombine.high %v24950_v30, %v24951_v27  ;;  %v24953_v62 = vcombine.low %v19095_v43, %v19095_v43  ;;  %v24961_v55 = vld [vmem:[#allocation39_spill] sm:$0xff] }
 0x202   : > { %v3494_v63 = vpop.f32.mrf.mxu1  ;;  %v9824_v21 = vmax.bf16 %v9564_v13, %v9562_v15  ;;  %6500 = vmatprep.mubr.bf16.mxu1 %v24448_v56  ;;  %24956 = vst [vmem:[#allocation38_spill] sm:$0xff] %v19399_v8  ;;  %v19408_v13 = vld [vmem:[%s16280_s22 + $0xf10] sm:$0xff]  ;;  %v24963_v26 = vcombine.high %v24961_v55, %v24962_v51  ;;  %24964 = vst [vmem:[#allocation39_spill] sm:$0xff] %v19427_v3 }
 0x203   : > { %6482 = vmatprep.subr.bf16.mxu1 %v24952_v31  ;;  %v19388_v1 = vunpack.c.l.b16 %v24953_v62  ;;  %v9055_v36 = vadd.f32 %v17503_v28, %v8793_v20  ;;  %v8794_v42 = vmul.f32 %v17393_v4, %v3494_v63  ;;  %v9054_v43 = vadd.f32 %v17503_v28, %v8792_v22  ;;  %24958 = vst [vmem:[#allocation109_spill] sm:$0xff] %v19408_v13  ;;  %v19411_v15 = vld [vmem:[%s16280_s22 + $0xf30] sm:$0xff] }
 0x204   : > { %v3496_v62 = vpop.f32.mrf.mxu1  ;;  %v24957_v20 = vcombine.low %v24947_v6, %v24948_v16  ;;  %24959 = vst [vmem:[#allocation129_spill] sm:$0xff] %v19411_v15  ;;  %v14561_v63 = vcombine.high %v19284_v7, %v19284_v7  ;;  %v9887_v22 = vmax.bf16 %v9823_v5, %v9759_v0  ;;  %v9309_v31 = vmax.f32 %v9053_v52, 0.0  ;;  %v24966_v0 = vld [vmem:[#allocation41_spill] sm:$0xff] }
 0x205   : > { %24954 = vst [vmem:[#allocation36_spill] sm:$0xff] %v19388_v1  ;;  %v9888_v62 = vmax.bf16 %v9824_v21, %v9760_v35  ;;  %v9056_v16 = vadd.f32 %v17503_v28, %v8794_v42  ;;  %v24960_v6 = vcombine.low %v24950_v30, %v24951_v27  ;;  %v9311_v19 = vmax.f32 %v9055_v36, 0.0  ;;  %v24967_v35 = vld [vmem:[#allocation42_spill] sm:$0xff]  ;;  %v24978_v42 = vld [vmem:[#allocation45_spill] sm:$0xff] }
 0x206   : > { %6442 = vmatpush1.bf16.msra.mxu0 %v24957_v20  ;;  %v3456_v20 = vpop.f32.mrf.mxu0  ;;  %v3497_v41 = vpop.f32.mrf.mxu1  ;;  %v24968_v5 = vcombine.high %v24966_v0, %v24967_v35  ;;  %v9310_v27 = vmax.f32 %v9054_v43, 0.0  ;;  %v24970_v36 = vcombine.low %v24966_v0, %v24967_v35 }
 0x207   : > { %6483 = vmatpush1.bf16.msra.mxu1 %v24960_v6  ;;  %6601 = vmatprep.subr.bf16.mxu0 %v24963_v26  ;;  %v14491_v26 = vcombine.low %v9887_v22, %v9888_v62  ;;  %v9312_v21 = vmax.f32 %v9056_v16, 0.0  ;;  %v24969_v22 = vcombine.low %v24961_v55, %v24962_v51  ;;  %v24971_v55 = vld [vmem:[#allocation43_spill] sm:$0xff]  ;;  %v19468_v16 = vld [vmem:[%s16280_s22 + $0xfc0] sm:$0xff]  ;;  %v19480_v35 = vpack.c.bf16 %v9311_v19, %v9311_v19  ;;  %v24979_v62 = vld [vmem:[#allocation46_spill] sm:$0xff] }
 0x208   : > { %6642 = vmatprep.subr.bf16.mxu1 %v24968_v5  ;;  %v3533_v6 = vpop.f32.mrf.mxu0  ;;  %v3574_v41 = vpop.f32.mrf.mxu1  ;;  %v19456_v5 = vpack.c.bf16 %v9309_v31, %v9309_v31  ;;  %24974 = vst [vmem:[#allocation41_spill] sm:$0xff] %v19468_v16  ;;  %v19471_v31 = vld [vmem:[%s16280_s22 + $0xfe0] sm:$0xff]  ;;  %v24980_v30 = vcombine.high %v24978_v42, %v24979_v62  ;;  %v19496_v19 = vpack.c.bf16 %v9310_v27, %v9310_v27 }
 0x209   : > { %14300 = vmatmul.mubr.msk.bf16.vlgmr.msra.gmra.mxu0 %vm973_vm0, %v19057_v48  ;;  %v8795_v20 = vmul.f32 %v17393_v4, %v3533_v6  ;;  %10134 = vst [vmem:[#allocation2 + $0x88] sm:$0xff] %v14491_v26  ;;  %v8797_v6 = vmul.f32 %v17393_v4, %v3574_v41  ;;  %24975 = vst [vmem:[#allocation42_spill] sm:$0xff] %v19471_v31  ;;  %v19473_v26 = vld [vmem:[#allocation2 + $0x80] sm:$0x11]  ;;  %v24976_v41 = vcombine.low %v19284_v7, %v19284_v7  ;;  %v19492_v7 = vld [vmem:[%s16280_s22 + $0xfe8] sm:$0xff] }
 0x20a   : > { %14301 = vmatmul.mubr.msk.bf16.vlgmr.msra.gmra.mxu1 %vm973_vm0, %v19057_v48  ;;  %6602 = vmatpush1.bf16.msra.mxu0 %v24969_v22  ;;  %v3535_v51 = vpop.f32.mrf.mxu0  ;;  %v24972_v22 = vld [vmem:[#allocation44_spill] sm:$0xff]  ;;  %v3576_v52 = vpop.f32.mrf.mxu1  ;;  %24982 = vst [vmem:[#allocation45_spill] sm:$0xff] %v19492_v7  ;;  %v19567_v7 = vld [vmem:[%s16280_s22 + $0xff0] sm:$0xff] }
 0x20b   : > { %6643 = vmatpush1.bf16.msra.mxu1 %v24970_v36  ;;  %v24973_v43 = vcombine.high %v24971_v55, %v24972_v22  ;;  %v19478_v0 = vunpack.c.l.b16 %v24976_v41  ;;  %v9057_v36 = vadd.f32 %v17503_v28, %v8795_v20  ;;  %6621 = vmatprep.mubr.bf16.mxu0 %v24448_v56  ;;  %24981 = vst [vmem:[#allocation44_spill] sm:$0xff] %v19489_v58  ;;  %v19494_v41 = vunpack.c.l.b16 %v14561_v63  ;;  %v19510_v27 = vld [vmem:[%s16280_s22 + $0xf80] sm:$0xff] }
 0x20c   : > { %6644 = vmatprep.subr.bf16.mxu1 %v24980_v30  ;;  %v19498_v20 = vpack.c.bf16 %v9312_v21, %v9312_v21  ;;  %v8798_v3 = vmul.f32 %v17393_v4, %v3576_v52  ;;  %v3537_v15 = vpop.f32.mrf.mxu0  ;;  %6662 = vmatprep.mubr.bf16.mxu1 %v24448_v56  ;;  %v3578_v8 = vpop.f32.mrf.mxu1  ;;  %v24984_v54 = vcombine.low %v24971_v55, %v24972_v22  ;;  %v19513_v21 = vld [vmem:[%s16280_s22 + $0xfa0] sm:$0xff] }
 0x20d   : > { %6603 = vmatprep.subr.bf16.mxu0 %v24973_v43  ;;  %24977 = vst [vmem:[#allocation43_spill] sm:$0xff] %v19478_v0  ;;  %v8796_v43 = vmul.f32 %v17393_v4, %v3535_v51  ;;  %24983 = vst [vmem:[#allocation46_spill] sm:$0xff] %v19494_v41  ;;  %v9059_v51 = vadd.f32 %v17503_v28, %v8797_v6  ;;  %v9313_v30 = vmax.f32 %v9057_v36, 0.0  ;;  %v19564_v15 = vld [vmem:[%s16280_s22 + $0xfd0] sm:$0xff] }
 0x20e   : > { %6604 = vmatpush1.bf16.msra.mxu0 %v24984_v54  ;;  %24985 = vst [vmem:[#allocation130_spill] sm:$0xff] %v19510_v27  ;;  %24986 = vst [vmem:[#allocation131_spill] sm:$0xff] %v19513_v21  ;;  %v9060_v6 = vadd.f32 %v17503_v28, %v8798_v3  ;;  %v24987_v8 = vcombine.low %v24978_v42, %v24979_v62  ;;  %v3538_v36 = vpop.f32.mrf.mxu0  ;;  %v24988_v54 = vcombine.high %v18045_v14, %v18048_v39  ;;  %v3579_v42 = vpop.f32.mrf.mxu1  ;;  %v24989_v62 = vld [vmem:[#allocation47_spill] sm:$0xff] }
 0x20f   : > { %v9058_v13 = vadd.f32 %v17503_v28, %v8796_v43  ;;  %v9315_v52 = vmax.f32 %v9059_v51, 0.0  ;;  %v9761_v43 = vmax.bf16 %v19480_v35, %v19456_v5  ;;  %v9569_v3 = vpack.c.bf16 %v9313_v30, %v9313_v30 }
 0x210   : > { %6645 = vmatpush1.bf16.msra.mxu1 %v24987_v8  ;;  %6683 = vmatprep.subr.bf16.mxu0 %v24988_v54  ;;  %v24990_v8 = vcombine.high %v18066_v45, %v24989_v62  ;;  %v9762_v54 = vmax.bf16 %v19498_v20, %v19496_v19  ;;  %v9316_v55 = vmax.f32 %v9060_v6, 0.0  ;;  %v3695_v63 = vpop.f32.mrf.mxu0  ;;  %v3736_v30 = vpop.f32.mrf.mxu1  ;;  %v24991_v19 = vcombine.low %v18045_v14, %v18048_v39  ;;  %v19548_v20 = vld [vmem:[%s16280_s22 + $0xf88] sm:$0xff]  ;;  %v24995_v14 = vld [vmem:[#allocation48_spill] sm:$0xff]  ;;  %v24996_v39 = vld [vmem:[#allocation110_spill] sm:$0xff] }
 0x211   : > { %v9314_v51 = vmax.f32 %v9058_v13, 0.0  ;;  %v9571_v22 = vpack.c.bf16 %v9315_v52, %v9315_v52  ;;  %14318 = vmatmul.mubr.msk.bf16.vlgmr.msra.gmra.mxu0 %vm973_vm0, %v19057_v48  ;;  %v8799_v35 = vmul.f32 %v17393_v4, %v3695_v63  ;;  %24992 = vst [vmem:[#allocation47_spill] sm:$0xff] %v19548_v20  ;;  %v19551_v52 = vld [vmem:[%s16280_s22 + $0xfa8] sm:$0xff]  ;;  %v14563_v6 = vcombine.high %v19473_v26, %v19473_v26  ;;  %v19613_v20 = vld [vmem:[%s16280_s22 + $0xfb0] sm:$0xff] }
 0x212   : > { %6724 = vmatprep.subr.bf16.mxu1 %v24990_v8  ;;  %6684 = vmatpush1.bf16.msra.mxu0 %v24991_v19  ;;  %24993 = vst [vmem:[#allocation132_spill] sm:$0xff] %v19551_v52  ;;  %v9572_v8 = vpack.c.bf16 %v9316_v55, %v9316_v55  ;;  %v8801_v63 = vmul.f32 %v17393_v4, %v3736_v30  ;;  %v3697_v36 = vpop.f32.mrf.mxu0  ;;  %24998 = vst [vmem:[#allocation48_spill] sm:$0xff] %v19564_v15  ;;  %v25000_v30 = vld [vmem:[#allocation49_spill] sm:$0xff]  ;;  %v25109_v15 = vld [vmem:[#allocation74_spill] sm:$0xff] }
 0x213   : > { %v9570_v5 = vpack.c.bf16 %v9314_v51, %v9314_v51  ;;  %14319 = vmatmul.mubr.msk.bf16.vlgmr.msra.gmra.mxu1 %vm973_vm0, %v19057_v48  ;;  %v9825_v42 = vmax.bf16 %v9571_v22, %v9569_v3  ;;  %v24994_v13 = vcombine.low %v18066_v45, %v24989_v62  ;;  %v24997_v19 = vcombine.high %v24995_v14, %v24996_v39  ;;  %v3738_v3 = vpop.f32.mrf.mxu1  ;;  %v25001_v51 = vld [vmem:[#allocation50_spill] sm:$0xff]  ;;  %v19584_v1 = vld [vmem:[#allocation2 + $0x88] sm:$0x11] }
 0x214   : > { %24999 = vst [vmem:[#allocation110_spill] sm:$0xff] %v19567_v7  ;;  %v9061_v22 = vadd.f32 %v17503_v28, %v8799_v35  ;;  %v8800_v55 = vmul.f32 %v17393_v4, %v3697_v36  ;;  %v25002_v45 = vcombine.high %v25000_v30, %v25001_v51  ;;  %6703 = vmatprep.mubr.bf16.mxu0 %v24448_v56  ;;  %v3699_v36 = vpop.f32.mrf.mxu0 }
 0x215   : > { %6725 = vmatpush1.bf16.msra.mxu1 %v24994_v13  ;;  %6685 = vmatprep.subr.bf16.mxu0 %v24997_v19  ;;  %v10511_v13 = vrot.slane %v19494_v41, 2  ;;  %v9826_v19 = vmax.bf16 %v9572_v8, %v9570_v5  ;;  %v9063_v58 = vadd.f32 %v17503_v28, %v8801_v63  ;;  %v8802_v35 = vmul.f32 %v17393_v4, %v3738_v3  ;;  %v3740_v62 = vpop.f32.mrf.mxu1  ;;  %v19595_v3 = vld [vmem:[%s16280_s22 + $0xfd8] sm:$0xff]  ;;  %v25009_v8 = vld [vmem:[#allocation52_spill] sm:$0xff]  ;;  %v19610_v63 = vld [vmem:[%s16280_s22 + $0xf90] sm:$0xff] }
 0x216   : > { %6726 = vmatprep.subr.bf16.mxu1 %v25002_v45  ;;  %6744 = vmatprep.mubr.bf16.mxu1 %v24448_v56  ;;  %v9062_v31 = vadd.f32 %v17503_v28, %v8800_v55  ;;  %v25003_v5 = vcombine.low %v24995_v14, %v24996_v39  ;;  %25004 = vst [vmem:[#allocation49_spill] sm:$0xff] %v19595_v3  ;;  %v19598_v36 = vld [vmem:[%s16280_s22 + $0xff8] sm:$0xff]  ;;  %v19600_v45 = vunpack.c.l.b16 %v14563_v6  ;;  %v9317_v21 = vmax.f32 %v9061_v22, 0.0  ;;  %v3700_v39 = vpop.f32.mrf.mxu0  ;;  %v25026_v22 = vld [vmem:[#allocation56_spill] sm:$0xff] }
 0x217   : > { %25005 = vst [vmem:[#allocation50_spill] sm:$0xff] %v19598_v36  ;;  %v9889_v41 = vmax.bf16 %v9825_v42, %v9761_v43  ;;  %v9890_v55 = vmax.bf16 %v9826_v19, %v9762_v54  ;;  %v9064_v62 = vadd.f32 %v17503_v28, %v8802_v35  ;;  %v25007_v14 = vcombine.low %v25000_v30, %v25001_v51  ;;  %v3741_v27 = vpop.f32.mrf.mxu1  ;;  %v25013_v43 = vld [vmem:[#allocation53_spill] sm:$0xff]  ;;  %v25014_v54 = vld [vmem:[#allocation54_spill] sm:$0xff] }
 0x218   : > { %6686 = vmatpush1.bf16.msra.mxu0 %v25003_v5  ;;  %25006 = vst [vmem:[#allocation133_spill] sm:$0xff] %v19600_v45  ;;  %v25008_v5 = vld [vmem:[#allocation51_spill] sm:$0xff]  ;;  %25012 = vst [vmem:[#allocation52_spill] sm:$0xff] %v19613_v20  ;;  %v9319_v6 = vmax.f32 %v9063_v58, 0.0  ;;  %v25015_v42 = vcombine.high %v25013_v43, %v25014_v54  ;;  %v14565_v51 = vcombine.high %v19584_v1, %v19584_v1  ;;  %v9318_v19 = vmax.f32 %v9062_v31, 0.0 }
 0x219   : > { %6727 = vmatpush1.bf16.msra.mxu1 %v25007_v14  ;;  %v25010_v52 = vcombine.high %v25008_v5, %v25009_v8  ;;  %25011 = vst [vmem:[#allocation51_spill] sm:$0xff] %v19610_v63  ;;  %v19624_v30 = vsel %vm10497_vm7, %v10511_v13, %v19417_v61  ;;  %v9320_v35 = vmax.f32 %v9064_v62, 0.0  ;;  %v3777_v14 = vpop.f32.mrf.mxu0  ;;  %v3818_v39 = vpop.f32.mrf.mxu1  ;;  %v25016_v61 = vcombine.low %v25008_v5, %v25009_v8 }
 0x21a   : > { %6886 = vmatprep.subr.bf16.mxu1 %v25015_v42  ;;  %v8803_v27 = vmul.f32 %v17393_v4, %v3777_v14  ;;  %v25017_v13 = vcombine.low %v19473_v26, %v19473_v26  ;;  %v19645_v62 = vpack.c.bf16 %v9317_v21, %v9317_v21  ;;  %v8805_v42 = vmul.f32 %v17393_v4, %v3818_v39  ;;  %v25020_v14 = vld [vmem:[#allocation111_spill] sm:$0xff] }
 0x21b   : > { %6845 = vmatprep.subr.bf16.mxu0 %v25010_v52  ;;  %v14492_v52 = vcombine.low %v9889_v41, %v9890_v55  ;;  %14320 = vmatmul.mubr.msk.bf16.vlgmr.msra.gmra.mxu0 %vm973_vm0, %v19057_v48  ;;  %v25019_v8 = vcombine.low %v25013_v43, %v25014_v54  ;;  %v3779_v5 = vpop.f32.mrf.mxu0  ;;  %v19657_v26 = vld [vmem:[%s16280_s22 + $0xf98] sm:$0xff]  ;;  %v10527_v21 = vrot.slane %v19600_v45, 1  ;;  %v3820_v54 = vpop.f32.mrf.mxu1  ;;  %v19673_v41 = vld [vmem:[#allocation2] sm:$0x22]  ;;  %v19675_v20 = vpack.c.bf16 %v9318_v19, %v9318_v19 }
 0x21c   : > { %14321 = vmatmul.mubr.msk.bf16.vlgmr.msra.gmra.mxu1 %vm973_vm0, %v19057_v48  ;;  %6846 = vmatpush1.bf16.msra.mxu0 %v25016_v61  ;;  %v19643_v55 = vunpack.c.l.b16 %v25017_v13  ;;  %v25021_v61 = vld [vmem:[#allocation112_spill] sm:$0xff]  ;;  %25023 = vst [vmem:[#allocation54_spill] sm:$0xff] %v19657_v26  ;;  %v19660_v13 = vld [vmem:[%s16280_s22 + $0xfb8] sm:$0xff]  ;;  %v9065_v39 = vadd.f32 %v17503_v28, %v8803_v27  ;;  %v8804_v43 = vmul.f32 %v17393_v4, %v3779_v5 }
 0x21d   : > { %10135 = vst [vmem:[#allocation2 + $0xe8] sm:$0xff] %v14492_v52  ;;  %6887 = vmatpush1.bf16.msra.mxu1 %v25019_v8  ;;  %v25022_v58 = vcombine.high %v25020_v14, %v25021_v61  ;;  %25024 = vst [vmem:[#allocation111_spill] sm:$0xff] %v19660_v13  ;;  %v19663_v52 = vpack.c.bf16 %v9319_v6, %v9319_v6  ;;  %v25025_v8 = vld [vmem:[#allocation55_spill] sm:$0xff]  ;;  %6865 = vmatprep.mubr.bf16.mxu0 %v24448_v56  ;;  %v3781_v5 = vpop.f32.mrf.mxu0  ;;  %v3822_v36 = vpop.f32.mrf.mxu1 }
 0x21e   : > { %25018 = vst [vmem:[#allocation53_spill] sm:$0xff] %v19643_v55  ;;  %v25027_v31 = vcombine.high %v25025_v8, %v25026_v22  ;;  %v19677_v45 = vpack.c.bf16 %v9320_v35, %v9320_v35  ;;  %v9067_v6 = vadd.f32 %v17503_v28, %v8805_v42  ;;  %v8806_v27 = vmul.f32 %v17393_v4, %v3820_v54  ;;  %v25035_v35 = vld [vmem:[#allocation57_spill] sm:$0xff] }
 0x21f   : > { %6847 = vmatprep.subr.bf16.mxu0 %v25022_v58  ;;  %v19671_v58 = vunpack.c.l.b16 %v14565_v51  ;;  %6906 = vmatprep.mubr.bf16.mxu1 %v24448_v56  ;;  %v9321_v63 = vmax.f32 %v9065_v39, 0.0  ;;  %v25029_v51 = vcombine.low %v25020_v14, %v25021_v61  ;;  %v25030_v5 = vcombine.low %v25025_v8, %v25026_v22  ;;  %v3782_v39 = vpop.f32.mrf.mxu0  ;;  %v19699_v61 = vld [vmem:[#allocation2 + $0xd8] sm:$0x22]  ;;  %v3823_v22 = vpop.f32.mrf.mxu1 }
 0x220   : > { %6888 = vmatprep.subr.bf16.mxu1 %v25027_v31  ;;  %v9066_v31 = vadd.f32 %v17503_v28, %v8804_v43  ;;  %v9323_v42 = vmax.f32 %v9067_v6, 0.0  ;;  %v9068_v54 = vadd.f32 %v17503_v28, %v8806_v27  ;;  %v25031_v36 = vcombine.high %v18225_v25, %v18228_v10  ;;  %v19754_v43 = vld [vmem:[#allocation2 + $0x68] sm:$0x22] }
 0x221   : > { %25028 = vst [vmem:[#allocation112_spill] sm:$0xff] %v19671_v58  ;;  %6848 = vmatpush1.bf16.msra.mxu0 %v25029_v51  ;;  %6889 = vmatpush1.bf16.msra.mxu1 %v25030_v5  ;;  %v14564_v14 = vcombine.low %v19584_v1, %v19584_v1  ;;  %v9763_v6 = vmax.bf16 %v19663_v52, %v19645_v62  ;;  %v3939_v19 = vpop.f32.mrf.mxu0 }
 0x222   : > { %6927 = vmatprep.subr.bf16.mxu0 %v25031_v36  ;;  %v9577_v27 = vpack.c.bf16 %v9321_v63, %v9321_v63  ;;  %v9322_v51 = vmax.f32 %v9066_v31, 0.0  ;;  %v25032_v8 = vcombine.high %v18244_v18, %v18247_v2  ;;  %v19710_v5 = vsel %vm10479_vm1, %v19671_v58, %v10527_v21  ;;  %v3980_v31 = vpop.f32.mrf.mxu1  ;;  %v25036_v63 = vld [vmem:[#allocation58_spill] sm:$0xff] }
 0x223   : > { %v9764_v1 = vmax.bf16 %v19677_v45, %v19675_v20  ;;  %v9579_v39 = vpack.c.bf16 %v9323_v42, %v9323_v42  ;;  %v9324_v36 = vmax.f32 %v9068_v54, 0.0  ;;  %v8807_v52 = vmul.f32 %v17393_v4, %v3939_v19  ;;  %v19725_v45 = vld [vmem:[#allocation2 + $0x18] sm:$0x22] }
 0x224   : > { %6968 = vmatprep.subr.bf16.mxu1 %v25032_v8  ;;  %14338 = vmatmul.mubr.msk.bf16.vlgmr.msra.gmra.mxu0 %vm973_vm0, %v19057_v48  ;;  %v9578_v62 = vpack.c.bf16 %v9322_v51, %v9322_v51  ;;  %v25033_v21 = vcombine.low %v18225_v25, %v18228_v10  ;;  %v8809_v51 = vmul.f32 %v17393_v4, %v3980_v31  ;;  %v3941_v8 = vpop.f32.mrf.mxu0  ;;  %v19736_v10 = vld [vmem:[#allocation2 + $0xe8] sm:$0x11]  ;;  %v25039_v31 = vld [vmem:[#allocation60_spill] sm:$0xff] }
 0x225   : > { %14339 = vmatmul.mubr.msk.bf16.vlgmr.msra.gmra.mxu1 %vm973_vm0, %v19057_v48  ;;  %v9827_v54 = vmax.bf16 %v9579_v39, %v9577_v27  ;;  %v9580_v22 = vpack.c.bf16 %v9324_v36, %v9324_v36  ;;  %v25034_v19 = vcombine.low %v18244_v18, %v18247_v2  ;;  %v25037_v25 = vcombine.high %v25035_v35, %v25036_v63  ;;  %v3982_v39 = vpop.f32.mrf.mxu1  ;;  %v25038_v36 = vld [vmem:[#allocation59_spill] sm:$0xff] }
 0x226   : > { %6928 = vmatpush1.bf16.msra.mxu0 %v25033_v21  ;;  %v9069_v20 = vadd.f32 %v17503_v28, %v8807_v52  ;;  %v8808_v27 = vmul.f32 %v17393_v4, %v3941_v8  ;;  %v25040_v42 = vcombine.high %v25038_v36, %v25039_v31  ;;  %6947 = vmatprep.mubr.bf16.mxu0 %v24448_v56  ;;  %v19745_v18 = vunpack.c.l.b16 %v14564_v14  ;;  %v3943_v52 = vpop.f32.mrf.mxu0  ;;  %v19752_v8 = vld [vmem:[#allocation2 + $0x50] sm:$0x22] }
 0x227   : > { %6969 = vmatpush1.bf16.msra.mxu1 %v25034_v19  ;;  %6929 = vmatprep.subr.bf16.mxu0 %v25037_v25  ;;  %v9828_v19 = vmax.bf16 %v9580_v22, %v9578_v62  ;;  %v9071_v25 = vadd.f32 %v17503_v28, %v8809_v51  ;;  %v8810_v21 = vmul.f32 %v17393_v4, %v3982_v39  ;;  %v3984_v13 = vpop.f32.mrf.mxu1  ;;  %v25046_v51 = vld [vmem:[#allocation63_spill] sm:$0xff] }
 0x228   : > { %6970 = vmatprep.subr.bf16.mxu1 %v25040_v42  ;;  %25041 = vst [vmem:[#allocation55_spill] sm:$0xff] %v19745_v18  ;;  %6988 = vmatprep.mubr.bf16.mxu1 %v24448_v56  ;;  %v9891_v14 = vmax.bf16 %v9827_v54, %v9763_v6  ;;  %v9070_v58 = vadd.f32 %v17503_v28, %v8808_v27  ;;  %v9325_v52 = vmax.f32 %v9069_v20, 0.0  ;;  %v3944_v13 = vpop.f32.mrf.mxu0 }
 0x229   : > { %v25042_v62 = vcombine.low %v25035_v35, %v25036_v63  ;;  %v14567_v22 = vcombine.high %v19736_v10, %v19736_v10  ;;  %v9892_v39 = vmax.bf16 %v9828_v19, %v9764_v1  ;;  %v9327_v2 = vmax.f32 %v9071_v25, 0.0  ;;  %v19773_v63 = vld [vmem:[#allocation2 + $0x30] sm:$0x22]  ;;  %v3985_v27 = vpop.f32.mrf.mxu1 }
 0x22a   : > { %v9072_v26 = vadd.f32 %v17503_v28, %v8810_v21  ;;  %v25043_v6 = vcombine.low %v25038_v36, %v25039_v31  ;;  %v25044_v35 = vcombine.high %v18313_v23, %v18316_v38  ;;  %v9326_v54 = vmax.f32 %v9070_v58, 0.0  ;;  %v4021_v25 = vpop.f32.mrf.mxu0  ;;  %v25056_v36 = vld [vmem:[#allocation114_spill] sm:$0xff] }
 0x22b   : > { %6930 = vmatpush1.bf16.msra.mxu0 %v25042_v62  ;;  %v25045_v62 = vld [vmem:[#allocation62_spill] sm:$0xff]  ;;  %v14493_v31 = vcombine.low %v9891_v14, %v9892_v39  ;;  %v19786_v58 = vunpack.c.l.b16 %v14567_v22  ;;  %v8811_v13 = vmul.f32 %v17393_v4, %v4021_v25  ;;  %v25049_v27 = vcombine.low %v18313_v23, %v18316_v38 }
 0x22c   : > { %6971 = vmatpush1.bf16.msra.mxu1 %v25043_v6  ;;  %7089 = vmatprep.subr.bf16.mxu0 %v25044_v35  ;;  %v25047_v1 = vcombine.high %v25045_v62, %v25046_v51  ;;  %v9328_v19 = vmax.f32 %v9072_v26, 0.0  ;;  %v4062_v35 = vpop.f32.mrf.mxu1  ;;  %v14566_v26 = vcombine.low %v19736_v10, %v19736_v10  ;;  %v25050_v22 = vcombine.low %v19673_v41, %v19673_v41  ;;  %v4023_v38 = vpop.f32.mrf.mxu0  ;;  %v25053_v10 = vld [vmem:[#allocation65_spill] sm:$0xff] }
 0x22d   : > { %25048 = vst [vmem:[#allocation56_spill] sm:$0xff] %v19786_v58  ;;  %10136 = vst [vmem:[#allocation2 + $0xb8] sm:$0xff] %v14493_v31  ;;  %v19807_v25 = vpack.c.bf16 %v9327_v2, %v9327_v2  ;;  %v25052_v23 = vcombine.low %v25045_v62, %v25046_v51  ;;  %v8812_v2 = vmul.f32 %v17393_v4, %v4023_v38  ;;  %v10529_v38 = vrot.slane %v19786_v58, 7  ;;  %v19836_v6 = vld [vmem:[#allocation2 + $0x48] sm:$0x22] }
 0x22e   : > { %7130 = vmatprep.subr.bf16.mxu1 %v25047_v1  ;;  %14340 = vmatmul.mubr.msk.bf16.vlgmr.msra.gmra.mxu0 %vm973_vm0, %v19057_v48  ;;  %v19803_v39 = vunpack.c.l.b16 %v25050_v22  ;;  %v19805_v1 = vpack.c.bf16 %v9325_v52, %v9325_v52  ;;  %v19817_v22 = vpack.c.bf16 %v9326_v54, %v9326_v54  ;;  %v9073_v52 = vadd.f32 %v17503_v28, %v8811_v13  ;;  %v4064_v31 = vpop.f32.mrf.mxu1 }
 0x22f   : > { %14341 = vmatmul.mubr.msk.bf16.vlgmr.msra.gmra.mxu1 %vm973_vm0, %v19057_v48  ;;  %7090 = vmatpush1.bf16.msra.mxu0 %v25049_v27  ;;  %v8813_v48 = vmul.f32 %v17393_v4, %v4062_v35  ;;  %v25054_v27 = vld [vmem:[#allocation113_spill] sm:$0xff]  ;;  %v25057_v35 = vld [vmem:[#allocation115_spill] sm:$0xff]  ;;  %v25059_v51 = vcombine.high %v19673_v41, %v19673_v41  ;;  %v8814_v13 = vmul.f32 %v17393_v4, %v4064_v31 }
 0x230   : > { %25051 = vst [vmem:[#allocation57_spill] sm:$0xff] %v19803_v39  ;;  %7131 = vmatpush1.bf16.msra.mxu1 %v25052_v23  ;;  %v25055_v14 = vcombine.high %v25053_v10, %v25054_v27  ;;  %v25058_v21 = vcombine.high %v25056_v36, %v25057_v35  ;;  %7109 = vmatprep.mubr.bf16.mxu0 %v24448_v56  ;;  %v4025_v23 = vpop.f32.mrf.mxu0  ;;  %v4066_v42 = vpop.f32.mrf.mxu1 }
 0x231   : > { %v19828_v62 = vunpack.c.l.b16 %v25059_v51  ;;  %v9075_v54 = vadd.f32 %v17503_v28, %v8813_v48  ;;  %7150 = vmatprep.mubr.bf16.mxu1 %v24448_v56  ;;  %v9074_v20 = vadd.f32 %v17503_v28, %v8812_v2  ;;  %v25061_v41 = vcombine.low %v25053_v10, %v25054_v27 }
 0x232   : > { %7091 = vmatprep.subr.bf16.mxu0 %v25055_v14  ;;  %7132 = vmatprep.subr.bf16.mxu1 %v25058_v21  ;;  %v19830_v14 = vpack.c.bf16 %v9328_v19, %v9328_v19  ;;  %v9329_v21 = vmax.f32 %v9073_v52, 0.0  ;;  %v19842_v19 = vunpack.c.l.b16 %v14566_v26  ;;  %v25063_v48 = vcombine.low %v19699_v61, %v19699_v61  ;;  %v4026_v2 = vpop.f32.mrf.mxu0 }
 0x233   : > { %25060 = vst [vmem:[#allocation58_spill] sm:$0xff] %v19828_v62  ;;  %7092 = vmatpush1.bf16.msra.mxu0 %v25061_v41  ;;  %v9331_v51 = vmax.f32 %v9075_v54, 0.0  ;;  %v9076_v23 = vadd.f32 %v17503_v28, %v8814_v13  ;;  %v25065_v52 = vcombine.low %v25056_v36, %v25057_v35  ;;  %v25066_v42 = vcombine.high %v18416_v17, %v18419_v33  ;;  %v4067_v36 = vpop.f32.mrf.mxu1 }
 0x234   : > { %25062 = vst [vmem:[#allocation59_spill] sm:$0xff] %v19842_v19  ;;  %v19847_v31 = vunpack.c.l.b16 %v25063_v48  ;;  %v25067_v10 = vcombine.high %v19699_v61, %v19699_v61  ;;  %v9765_v54 = vmax.bf16 %v19807_v25, %v19805_v1  ;;  %v9585_v13 = vpack.c.bf16 %v9329_v21, %v9329_v21  ;;  %v19880_v1 = vld [vmem:[#allocation2 + $0x80] sm:$0x22]  ;;  %v25072_v48 = vld [vmem:[#allocation66_spill] sm:$0xff] }
 0x235   : > { %7133 = vmatpush1.bf16.msra.mxu1 %v25065_v52  ;;  %7171 = vmatprep.subr.bf16.mxu0 %v25066_v42  ;;  %v9330_v41 = vmax.f32 %v9074_v20, 0.0  ;;  %v25069_v35 = vcombine.high %v18437_v32, %v18440_v12  ;;  %v9766_v52 = vmax.bf16 %v19830_v14, %v19817_v22  ;;  %v9587_v2 = vpack.c.bf16 %v9331_v51, %v9331_v51  ;;  %v4183_v42 = vpop.f32.mrf.mxu0  ;;  %v4224_v36 = vpop.f32.mrf.mxu1  ;;  %v19889_v51 = vld [vmem:[#allocation2 + $0x88] sm:$0x22] }
 0x236   : > { %25064 = vst [vmem:[#allocation60_spill] sm:$0xff] %v19847_v31  ;;  %v19861_v27 = vunpack.c.l.b16 %v25067_v10  ;;  %v9332_v61 = vmax.f32 %v9076_v23, 0.0  ;;  %v19872_v10 = vld [vmem:[#allocation6] sm:$0xf]  ;;  %v19878_v20 = vsel %vm10482_vm2, %v10529_v38, %v19710_v5  ;;  %v8815_v21 = vmul.f32 %v17393_v4, %v4183_v42  ;;  %v19901_v14 = vld [vmem:[#allocation2 + $0xe8] sm:$0x22] }
 0x237   : > { %7212 = vmatprep.subr.bf16.mxu1 %v25069_v35  ;;  %14358 = vmatmul.mubr.msk.bf16.vlgmr.msra.gmra.mxu0 %vm973_vm0, %v19872_v10  ;;  %v9586_v25 = vpack.c.bf16 %v9330_v41, %v9330_v41  ;;  %v25070_v22 = vcombine.low %v18416_v17, %v18419_v33  ;;  %v9829_v38 = vmax.bf16 %v9587_v2, %v9585_v13  ;;  %v4185_v42 = vpop.f32.mrf.mxu0  ;;  %v10168_v17 = vld [vmem:[#allocation2 + $0xb8] sm:$0x11]  ;;  %v4226_v13 = vpop.f32.mrf.mxu1 }
 0x238   : > { %25068 = vst [vmem:[#allocation62_spill] sm:$0xff] %v19861_v27  ;;  %14359 = vmatmul.mubr.msk.bf16.vlgmr.msra.gmra.mxu1 %vm973_vm0, %v19872_v10  ;;  %v9588_v23 = vpack.c.bf16 %v9332_v61, %v9332_v61  ;;  %v8817_v41 = vmul.f32 %v17393_v4, %v4224_v36  ;;  %v25071_v35 = vcombine.low %v18437_v32, %v18440_v12  ;;  %v25074_v2 = vld [vmem:[#allocation67_spill] sm:$0xff]  ;;  %v25075_v61 = vld [vmem:[#allocation68_spill] sm:$0xff] }
 0x239   : > { %7172 = vmatpush1.bf16.msra.mxu0 %v25070_v22  ;;  %v25073_v33 = vcombine.high %v18449_v37, %v25072_v48  ;;  %v8816_v5 = vmul.f32 %v17393_v4, %v4185_v42  ;;  %v25076_v36 = vcombine.high %v25074_v2, %v25075_v61  ;;  %7191 = vmatprep.mubr.bf16.mxu0 %v24448_v56  ;;  %v4187_v58 = vpop.f32.mrf.mxu0  ;;  %v4228_v3 = vpop.f32.mrf.mxu1 }
 0x23a   : > { %7213 = vmatpush1.bf16.msra.mxu1 %v25071_v35  ;;  %v25077_v35 = vcombine.low %v19725_v45, %v19725_v45  ;;  %v9830_v22 = vmax.bf16 %v9588_v23, %v9586_v25  ;;  %v9077_v42 = vadd.f32 %v17503_v28, %v8815_v21  ;;  %v9079_v26 = vadd.f32 %v17503_v28, %v8817_v41  ;;  %v25108_v21 = vld [vmem:[#allocation73_spill] sm:$0xff] }
 0x23b   : > { %7173 = vmatprep.subr.bf16.mxu0 %v25073_v33  ;;  %7214 = vmatprep.subr.bf16.mxu1 %v25076_v36  ;;  %v8818_v36 = vmul.f32 %v17393_v4, %v4226_v13  ;;  %v25079_v32 = vcombine.low %v18449_v37, %v25072_v48  ;;  %v14569_v12 = vcombine.high %v10168_v17, %v10168_v17  ;;  %v4188_v3 = vpop.f32.mrf.mxu0  ;;  %v25081_v13 = vld [vmem:[#allocation70_spill] sm:$0xff]  ;;  %v25082_v37 = vld [vmem:[#allocation71_spill] sm:$0xff] }
 0x23c   : > { %v19915_v33 = vunpack.c.l.b16 %v25077_v35  ;;  %7232 = vmatprep.mubr.bf16.mxu1 %v24448_v56  ;;  %v9893_v23 = vmax.bf16 %v9829_v38, %v9765_v54  ;;  %v9894_v41 = vmax.bf16 %v9830_v22, %v9766_v52  ;;  %v25080_v58 = vcombine.low %v25074_v2, %v25075_v61  ;;  %v4229_v52 = vpop.f32.mrf.mxu1  ;;  %v25086_v38 = vld [vmem:[#allocation117_spill] sm:$0xff]  ;;  %v25087_v22 = vld [vmem:[#allocation118_spill] sm:$0xff] }
 0x23d   : > { %7174 = vmatpush1.bf16.msra.mxu0 %v25079_v32  ;;  %v25083_v48 = vcombine.high %v25081_v13, %v25082_v37  ;;  %v14568_v32 = vcombine.low %v10168_v17, %v10168_v17  ;;  %v25084_v35 = vcombine.high %v19725_v45, %v19725_v45  ;;  %v9078_v25 = vadd.f32 %v17503_v28, %v8816_v5 }
 0x23e   : > { %25078 = vst [vmem:[#allocation63_spill] sm:$0xff] %v19915_v33  ;;  %7215 = vmatpush1.bf16.msra.mxu1 %v25080_v58  ;;  %v9080_v54 = vadd.f32 %v17503_v28, %v8818_v36  ;;  %v25088_v2 = vcombine.high %v25086_v38, %v25087_v22  ;;  %v25089_v17 = vcombine.low %v19752_v8, %v19752_v8  ;;  %v9335_v3 = vmax.f32 %v9079_v26, 0.0 }
 0x23f   : > { %7333 = vmatprep.subr.bf16.mxu0 %v25083_v48  ;;  %v19939_v7 = vunpack.c.l.b16 %v25084_v35  ;;  %v14494_v45 = vcombine.low %v9893_v23, %v9894_v41  ;;  %v9333_v35 = vmax.f32 %v9077_v42, 0.0  ;;  %v4265_v48 = vpop.f32.mrf.mxu0  ;;  %v25091_v5 = vcombine.high %v19752_v8, %v19752_v8 }
 0x240   : > { %7374 = vmatprep.subr.bf16.mxu1 %v25088_v2  ;;  %v19951_v58 = vunpack.c.l.b16 %v25089_v17  ;;  %14360 = vmatmul.mubr.msk.bf16.vlgmr.msra.gmra.mxu0 %vm973_vm0, %v19872_v10  ;;  %v8819_v52 = vmul.f32 %v17393_v4, %v4265_v48  ;;  %v4306_v2 = vpop.f32.mrf.mxu1  ;;  %v25093_v23 = vcombine.low %v25081_v13, %v25082_v37  ;;  %v19966_v26 = vunpack.c.l.b16 %v14569_v12  ;;  %v25100_v12 = vld [vmem:[#allocation120_spill] sm:$0xff]  ;;  %v25101_v37 = vld [vmem:[#allocation121_spill] sm:$0xff] }
 0x241   : > { %25085 = vst [vmem:[#allocation65_spill] sm:$0xff] %v19939_v7  ;;  %v19958_v36 = vunpack.c.l.b16 %v25091_v5  ;;  %14361 = vmatmul.mubr.msk.bf16.vlgmr.msra.gmra.mxu1 %vm973_vm0, %v19872_v10  ;;  %v25095_v42 = vcombine.low %v19754_v43, %v19754_v43  ;;  %v25097_v8 = vcombine.high %v19754_v43, %v19754_v43  ;;  %10137 = vst [vmem:[#allocation2 + $0x60] sm:$0xff] %v14494_v45  ;;  %v4267_v13 = vpop.f32.mrf.mxu0  ;;  %v19985_v61 = vunpack.c.l.b16 %v14568_v32 }
 0x242   : > { %25090 = vst [vmem:[#allocation113_spill] sm:$0xff] %v19951_v58  ;;  %7334 = vmatpush1.bf16.msra.mxu0 %v25093_v23  ;;  %25094 = vst [vmem:[#allocation115_spill] sm:$0xff] %v19966_v26  ;;  %v8821_v48 = vmul.f32 %v17393_v4, %v4306_v2  ;;  %v25099_v5 = vcombine.low %v25086_v38, %v25087_v22  ;;  %v25102_v23 = vcombine.high %v25100_v12, %v25101_v37  ;;  %v4308_v32 = vpop.f32.mrf.mxu1 }
 0x243   : > { %25092 = vst [vmem:[#allocation114_spill] sm:$0xff] %v19958_v36  ;;  %v19971_v41 = vunpack.c.l.b16 %v25095_v42  ;;  %v19976_v17 = vunpack.c.l.b16 %v25097_v8  ;;  %25103 = vst [vmem:[#allocation68_spill] sm:$0xff] %v19985_v61  ;;  %v19987_v42 = vld [vmem:[#allocation2 + $0xb8] sm:$0x22]  ;;  %v25104_v43 = vcombine.low %v19773_v63, %v19773_v63  ;;  %v25106_v45 = vcombine.high %v19773_v63, %v19773_v63  ;;  %7353 = vmatprep.mubr.bf16.mxu0 %v24448_v56 }
 0x244   : > { %7375 = vmatpush1.bf16.msra.mxu1 %v25099_v5  ;;  %7335 = vmatprep.subr.bf16.mxu0 %v25102_v23  ;;  %v9334_v38 = vmax.f32 %v9078_v25, 0.0  ;;  %v9336_v22 = vmax.f32 %v9080_v54, 0.0  ;;  %v9081_v5 = vadd.f32 %v17503_v28, %v8819_v52  ;;  %v8820_v23 = vmul.f32 %v17393_v4, %v4267_v13  ;;  %v4269_v54 = vpop.f32.mrf.mxu0 }
 0x245   : > { %25096 = vst [vmem:[#allocation66_spill] sm:$0xff] %v19971_v41  ;;  %25098 = vst [vmem:[#allocation67_spill] sm:$0xff] %v19976_v17  ;;  %v19992_v8 = vunpack.c.l.b16 %v25104_v43  ;;  %v19997_v2 = vunpack.c.l.b16 %v25106_v45  ;;  %v25110_v0 = vcombine.high %v25108_v21, %v25109_v15  ;;  %v20005_v43 = vpack.c.bf16 %v9333_v35, %v9333_v35  ;;  %7394 = vmatprep.mubr.bf16.mxu1 %v24448_v56  ;;  %v4310_v45 = vpop.f32.mrf.mxu1 }
 0x246   : > { %v20007_v19 = vpack.c.bf16 %v9335_v3, %v9335_v3  ;;  %v9083_v63 = vadd.f32 %v17503_v28, %v8821_v48  ;;  %v8822_v25 = vmul.f32 %v17393_v4, %v4308_v32  ;;  %v9337_v52 = vmax.f32 %v9081_v5, 0.0  ;;  %v4270_v5 = vpop.f32.mrf.mxu0 }
 0x247   : > { %25105 = vst [vmem:[#allocation70_spill] sm:$0xff] %v19992_v8  ;;  %25107 = vst [vmem:[#allocation71_spill] sm:$0xff] %v19997_v2  ;;  %7376 = vmatprep.subr.bf16.mxu1 %v25110_v0  ;;  %v9082_v13 = vadd.f32 %v17503_v28, %v8820_v23  ;;  %v25111_v0 = vcombine.low %v25100_v12, %v25101_v37  ;;  %v10531_v35 = vrot.slane %v19966_v26, 6  ;;  %v25114_v26 = vld [vmem:[#allocation75_spill] sm:$0xff] }
 0x248   : > { %v9339_v18 = vmax.f32 %v9083_v63, 0.0  ;;  %v9084_v48 = vadd.f32 %v17503_v28, %v8822_v25  ;;  %v25112_v32 = vcombine.low %v25108_v21, %v25109_v15  ;;  %v25113_v23 = vcombine.high %v18609_v9, %v18612_v53  ;;  %v4311_v63 = vpop.f32.mrf.mxu1  ;;  %v25115_v25 = vld [vmem:[#allocation76_spill] sm:$0xff]  ;;  %v4427_v5 = vpop.f32.mrf.mxu0 }
 0x249   : > { %7336 = vmatpush1.bf16.msra.mxu0 %v25111_v0  ;;  %v9590_v54 = vpack.c.bf16 %v9334_v38, %v9334_v38  ;;  %v9592_v45 = vpack.c.bf16 %v9336_v22, %v9336_v22  ;;  %v9593_v0 = vpack.c.bf16 %v9337_v52, %v9337_v52  ;;  %v9338_v3 = vmax.f32 %v9082_v13, 0.0 }
 0x24a   : > { %7377 = vmatpush1.bf16.msra.mxu1 %v25112_v32  ;;  %7415 = vmatprep.subr.bf16.mxu0 %v25113_v23  ;;  %v25116_v55 = vcombine.high %v25114_v26, %v25115_v25  ;;  %v9767_v15 = vmax.bf16 %v20007_v19, %v20005_v43  ;;  %v9595_v21 = vpack.c.bf16 %v9339_v18, %v9339_v18  ;;  %v9340_v32 = vmax.f32 %v9084_v48, 0.0  ;;  %v4468_v13 = vpop.f32.mrf.mxu1 }
 0x24b   : > { %v14713_v38 = vcombine.high %v19987_v42, %v19987_v42  ;;  %v9594_v22 = vpack.c.bf16 %v9338_v3, %v9338_v3  ;;  %v8823_v52 = vmul.f32 %v17393_v4, %v4427_v5  ;;  %v20045_v18 = vsel %vm10485_vm3, %v10531_v35, %v19878_v20  ;;  %v4429_v5 = vpop.f32.mrf.mxu0  ;;  %v10169_v20 = vld [vmem:[#allocation2 + $0x60] sm:$0x11] }
 0x24c   : > { %7456 = vmatprep.subr.bf16.mxu1 %v25116_v55  ;;  %14378 = vmatmul.mubr.msk.bf16.vlgmr.msra.gmra.mxu0 %vm973_vm0, %v19872_v10  ;;  %v25117_v55 = vcombine.low %v18609_v9, %v18612_v53  ;;  %v25118_v19 = vcombine.low %v19836_v6, %v19836_v6  ;;  %v9831_v3 = vmax.bf16 %v9595_v21, %v9593_v0  ;;  %v25121_v9 = vld [vmem:[#allocation77_spill] sm:$0xff]  ;;  %v25122_v53 = vld [vmem:[#allocation78_spill] sm:$0xff]  ;;  %v4470_v21 = vpop.f32.mrf.mxu1 }
 0x24d   : > { %14379 = vmatmul.mubr.msk.bf16.vlgmr.msra.gmra.mxu1 %vm973_vm0, %v19872_v10  ;;  %v9596_v48 = vpack.c.bf16 %v9340_v32, %v9340_v32  ;;  %v8825_v23 = vmul.f32 %v17393_v4, %v4468_v13  ;;  %v25120_v63 = vcombine.low %v25114_v26, %v25115_v25  ;;  %v25124_v35 = vcombine.high %v19836_v6, %v19836_v6  ;;  %v25126_v32 = vld [vmem:[#allocation79_spill] sm:$0xff]  ;;  %v25127_v13 = vld [vmem:[#allocation80_spill] sm:$0xff] }
 0x24e   : > { %7416 = vmatpush1.bf16.msra.mxu0 %v25117_v55  ;;  %v20050_v43 = vunpack.c.l.b16 %v25118_v19  ;;  %v25123_v55 = vcombine.high %v25121_v9, %v25122_v53  ;;  %v9768_v19 = vmax.bf16 %v9592_v45, %v9590_v54  ;;  %v8824_v0 = vmul.f32 %v17393_v4, %v4429_v5  ;;  %7435 = vmatprep.mubr.bf16.mxu0 %v24448_v56 }
 0x24f   : > { %7457 = vmatpush1.bf16.msra.mxu1 %v25120_v63  ;;  %v20062_v37 = vunpack.c.l.b16 %v25124_v35  ;;  %v25128_v12 = vcombine.high %v25126_v32, %v25127_v13  ;;  %v25129_v26 = vcombine.low %v19880_v1, %v19880_v1  ;;  %v25131_v6 = vcombine.high %v19880_v1, %v19880_v1  ;;  %7476 = vmatprep.mubr.bf16.mxu1 %v24448_v56  ;;  %v4472_v35 = vpop.f32.mrf.mxu1 }
 0x250   : > { %25119 = vst [vmem:[#allocation117_spill] sm:$0xff] %v20050_v43  ;;  %7417 = vmatprep.subr.bf16.mxu0 %v25123_v55  ;;  %v9832_v54 = vmax.bf16 %v9596_v48, %v9594_v22  ;;  %v9085_v45 = vadd.f32 %v17503_v28, %v8823_v52  ;;  %v9087_v5 = vadd.f32 %v17503_v28, %v8825_v23  ;;  %v25141_v35 = vld [vmem:[#allocation82_spill] sm:$0xff] }
 0x251   : > { %25125 = vst [vmem:[#allocation118_spill] sm:$0xff] %v20062_v37  ;;  %7458 = vmatprep.subr.bf16.mxu1 %v25128_v12  ;;  %v20072_v25 = vunpack.c.l.b16 %v25129_v26  ;;  %v20077_v63 = vunpack.c.l.b16 %v25131_v6  ;;  %v8826_v55 = vmul.f32 %v17393_v4, %v4470_v21  ;;  %v4431_v12 = vpop.f32.mrf.mxu0  ;;  %v25133_v26 = vcombine.low %v25121_v9, %v25122_v53 }
 0x252   : > { %v14571_v61 = vcombine.high %v10169_v20, %v10169_v20  ;;  %v25134_v1 = vcombine.low %v19889_v51, %v19889_v51  ;;  %v25136_v22 = vcombine.high %v19889_v51, %v19889_v51  ;;  %v25138_v48 = vcombine.low %v19901_v14, %v19901_v14 }
 0x253   : > { %25130 = vst [vmem:[#allocation120_spill] sm:$0xff] %v20072_v25  ;;  %25132 = vst [vmem:[#allocation121_spill] sm:$0xff] %v20077_v63  ;;  %7418 = vmatpush1.bf16.msra.mxu0 %v25133_v26  ;;  %v9895_v21 = vmax.bf16 %v9831_v3, %v9767_v15  ;;  %v9896_v12 = vmax.bf16 %v9832_v54, %v9768_v19  ;;  %v25140_v9 = vcombine.low %v25126_v32, %v25127_v13  ;;  %v4432_v53 = vpop.f32.mrf.mxu0  ;;  %v25142_v26 = vld [vmem:[#allocation83_spill] sm:$0xff]  ;;  %v4473_v3 = vpop.f32.mrf.mxu1  ;;  %v25146_v19 = vld [vmem:[#allocation85_spill] sm:$0xff] }
 0x254   : > { %v20089_v6 = vunpack.c.l.b16 %v25134_v1  ;;  %v20094_v52 = vunpack.c.l.b16 %v25136_v22  ;;  %v20099_v23 = vunpack.c.l.b16 %v25138_v48  ;;  %v25143_v1 = vcombine.high %v25141_v35, %v25142_v26  ;;  %v25147_v54 = vld [vmem:[#allocation86_spill] sm:$0xff] }
 0x255   : > { %7459 = vmatpush1.bf16.msra.mxu1 %v25140_v9  ;;  %v14570_v16 = vcombine.low %v10169_v20, %v10169_v20  ;;  %v25144_v51 = vcombine.high %v19901_v14, %v19901_v14  ;;  %v9086_v48 = vadd.f32 %v17503_v28, %v8824_v0  ;;  %v9088_v15 = vadd.f32 %v17503_v28, %v8826_v55  ;;  %v4550_v3 = vpop.f32.mrf.mxu1 }
 0x256   : > { %25135 = vst [vmem:[#allocation73_spill] sm:$0xff] %v20089_v6  ;;  %25137 = vst [vmem:[#allocation74_spill] sm:$0xff] %v20094_v52  ;;  %7577 = vmatprep.subr.bf16.mxu0 %v25143_v1  ;;  %v25148_v32 = vcombine.high %v25146_v19, %v25147_v54  ;;  %v25149_v13 = vcombine.low %v19987_v42, %v19987_v42  ;;  %v20122_v20 = vunpack.c.l.b16 %v14713_v38  ;;  %v9341_v14 = vmax.f32 %v9085_v45, 0.0 }
 0x257   : > { %25139 = vst [vmem:[#allocation75_spill] sm:$0xff] %v20099_v23  ;;  %v20110_v22 = vunpack.c.l.b16 %v25144_v51  ;;  %v14495_v53 = vcombine.low %v9895_v21, %v9896_v12  ;;  %v9343_v1 = vmax.f32 %v9087_v5, 0.0  ;;  %v4509_v51 = vpop.f32.mrf.mxu0  ;;  %14380 = vmatmul.mubr.msk.bf16.vlgmr.msra.gmra.mxu0 %vm973_vm0, %v19872_v10  ;;  %v25152_v42 = vcombine.low %v25141_v35, %v25142_v26 }
 0x258   : > { %7618 = vmatprep.subr.bf16.mxu1 %v25148_v32  ;;  %v20120_v9 = vunpack.c.l.b16 %v25149_v13  ;;  %25151 = vst [vmem:[#allocation78_spill] sm:$0xff] %v20122_v20  ;;  %v8827_v55 = vmul.f32 %v17393_v4, %v4509_v51  ;;  %14381 = vmatmul.mubr.msk.bf16.vlgmr.msra.gmra.mxu1 %vm973_vm0, %v19872_v10  ;;  %v20133_v38 = vunpack.c.l.b16 %v14571_v61  ;;  %v8829_v21 = vmul.f32 %v17393_v4, %v4550_v3  ;;  %v25155_v13 = vld [vmem:[#allocation123_spill] sm:$0xff]  ;;  %v10762_v61 = vld [vmem:[#allocation2 + $0x60] sm:$0x22] }
 0x259   : > { %25145 = vst [vmem:[#allocation76_spill] sm:$0xff] %v20110_v22  ;;  %7578 = vmatpush1.bf16.msra.mxu0 %v25152_v42  ;;  %10138 = vst [vmem:[#allocation2 + $0xf0] sm:$0xff] %v14495_v53  ;;  %v25154_v12 = vcombine.low %v25146_v19, %v25147_v54  ;;  %v4511_v32 = vpop.f32.mrf.mxu0  ;;  %v25156_v51 = vcombine.high %v18748_v24, %v25155_v13  ;;  %v20144_v35 = vunpack.c.l.b16 %v14570_v16  ;;  %v9342_v5 = vmax.f32 %v9086_v48, 0.0  ;;  %v4552_v19 = vpop.f32.mrf.mxu1  ;;  %v25158_v54 = vld [vmem:[#allocation87_spill] sm:$0xff] }
 0x25a   : > { %25150 = vst [vmem:[#allocation77_spill] sm:$0xff] %v20120_v9  ;;  %25153 = vst [vmem:[#allocation79_spill] sm:$0xff] %v20133_v38  ;;  %v9344_v53 = vmax.f32 %v9088_v15, 0.0  ;;  %v9089_v3 = vadd.f32 %v17503_v28, %v8827_v55  ;;  %v8828_v45 = vmul.f32 %v17393_v4, %v4511_v32  ;;  %7597 = vmatprep.mubr.bf16.mxu0 %v24448_v56  ;;  %7638 = vmatprep.mubr.bf16.mxu1 %v24448_v56 }
 0x25b   : > { %7619 = vmatpush1.bf16.msra.mxu1 %v25154_v12  ;;  %7579 = vmatprep.subr.bf16.mxu0 %v25156_v51  ;;  %25157 = vst [vmem:[#allocation80_spill] sm:$0xff] %v20144_v35  ;;  %v25159_v12 = vld [vmem:[#allocation88_spill] sm:$0xff]  ;;  %v20154_v16 = vpack.c.bf16 %v9341_v14, %v9341_v14  ;;  %v20156_v51 = vpack.c.bf16 %v9343_v1, %v9343_v1  ;;  %v4513_v15 = vpop.f32.mrf.mxu0  ;;  %v4554_v42 = vpop.f32.mrf.mxu1  ;;  %v10533_v14 = vrot.slane %v20133_v38, 5 }
 0x25c   : > { %v25160_v0 = vcombine.high %v25158_v54, %v25159_v12  ;;  %v9091_v26 = vadd.f32 %v17503_v28, %v8829_v21  ;;  %v8830_v48 = vmul.f32 %v17393_v4, %v4552_v19  ;;  %v9345_v55 = vmax.f32 %v9089_v3, 0.0 }
 0x25d   : > { %v9090_v32 = vadd.f32 %v17503_v28, %v8828_v45  ;;  %v14714_v9 = vcombine.low %v10762_v61, %v10762_v61  ;;  %v25162_v21 = vcombine.low %v25158_v54, %v25159_v12  ;;  %v4514_v19 = vpop.f32.mrf.mxu0  ;;  %v25163_v3 = vcombine.high %v18802_v29, %v18805_v49  ;;  %v4555_v38 = vpop.f32.mrf.mxu1 }
 0x25e   : > { %7620 = vmatprep.subr.bf16.mxu1 %v25160_v0  ;;  %v25161_v0 = vcombine.low %v18748_v24, %v25155_v13  ;;  %v9347_v1 = vmax.f32 %v9091_v26, 0.0  ;;  %v9092_v31 = vadd.f32 %v17503_v28, %v8830_v48  ;;  %v14715_v42 = vcombine.high %v10762_v61, %v10762_v61  ;;  %v25164_v26 = vld [vmem:[#allocation89_spill] sm:$0xff] }
 0x25f   : > { %7621 = vmatpush1.bf16.msra.mxu1 %v25162_v21  ;;  %v9598_v24 = vpack.c.bf16 %v9342_v5, %v9342_v5  ;;  %v9600_v13 = vpack.c.bf16 %v9344_v53, %v9344_v53  ;;  %v9601_v15 = vpack.c.bf16 %v9345_v55, %v9345_v55  ;;  %v25165_v48 = vcombine.high %v18823_v47, %v25164_v26  ;;  %v4671_v19 = vpop.f32.mrf.mxu0  ;;  %v4712_v55 = vpop.f32.mrf.mxu1 }
 0x260   : > { %7580 = vmatpush1.bf16.msra.mxu0 %v25161_v0  ;;  %v9346_v0 = vmax.f32 %v9090_v32, 0.0  ;;  %v9769_v54 = vmax.bf16 %v20156_v51, %v20154_v16  ;;  %v9603_v12 = vpack.c.bf16 %v9347_v1, %v9347_v1  ;;  %v9348_v21 = vmax.f32 %v9092_v31, 0.0 }
 0x261   : > { %7659 = vmatprep.subr.bf16.mxu0 %v25163_v3  ;;  %7700 = vmatprep.subr.bf16.mxu1 %v25165_v48  ;;  %v8831_v53 = vmul.f32 %v17393_v4, %v4671_v19  ;;  %v25166_v38 = vcombine.low %v18802_v29, %v18805_v49  ;;  %v20190_v31 = vsel %vm10488_vm4, %v10533_v14, %v20045_v18  ;;  %v20192_v16 = vunpack.c.l.b16 %v14714_v9  ;;  %v25169_v48 = vld [vmem:[#allocation90_spill] sm:$0xff]  ;;  %v25170_v19 = vld [vmem:[#allocation91_spill] sm:$0xff] }
 0x262   : > { %v9602_v5 = vpack.c.bf16 %v9346_v0, %v9346_v0  ;;  %14399 = vmatmul.mubr.msk.bf16.vlgmr.msra.gmra.mxu1 %vm973_vm0, %v19872_v10  ;;  %v9833_v51 = vmax.bf16 %v9603_v12, %v9601_v15  ;;  %v9604_v32 = vpack.c.bf16 %v9348_v21, %v9348_v21  ;;  %v8833_v1 = vmul.f32 %v17393_v4, %v4712_v55  ;;  %v4673_v0 = vpop.f32.mrf.mxu0  ;;  %v10170_v29 = vld [vmem:[#allocation2 + $0xf0] sm:$0x11]  ;;  %v4714_v15 = vpop.f32.mrf.mxu1  ;;  %v25173_v12 = vld [vmem:[#allocation92_spill] sm:$0xff]  ;;  %v25174_v21 = vld [vmem:[#allocation93_spill] sm:$0xff] }
 0x263   : > { %14398 = vmatmul.mubr.msk.bf16.vlgmr.msra.gmra.mxu0 %vm973_vm0, %v19872_v10  ;;  %25167 = vst [vmem:[#allocation82_spill] sm:$0xff] %v20192_v16  ;;  %v25168_v3 = vcombine.low %v18823_v47, %v25164_v26  ;;  %v25171_v61 = vcombine.high %v25169_v48, %v25170_v19  ;;  %v20201_v49 = vunpack.c.l.b16 %v14715_v42  ;;  %v9770_v18 = vmax.bf16 %v9600_v13, %v9598_v24 }
 0x264   : > { %7660 = vmatpush1.bf16.msra.mxu0 %v25166_v38  ;;  %v9093_v9 = vadd.f32 %v17503_v28, %v8831_v53  ;;  %v8832_v14 = vmul.f32 %v17393_v4, %v4673_v0  ;;  %v25175_v55 = vcombine.high %v25173_v12, %v25174_v21  ;;  %7679 = vmatprep.mubr.bf16.mxu0 %v24448_v56  ;;  %v11087_v47 = vrot.slane %v19828_v62, 2  ;;  %v4675_v38 = vpop.f32.mrf.mxu0  ;;  %v4716_v13 = vpop.f32.mrf.mxu1 }
 0x265   : > { %7701 = vmatpush1.bf16.msra.mxu1 %v25168_v3  ;;  %7661 = vmatprep.subr.bf16.mxu0 %v25171_v61  ;;  %25172 = vst [vmem:[#allocation83_spill] sm:$0xff] %v20201_v49  ;;  %v9834_v26 = vmax.bf16 %v9604_v32, %v9602_v5  ;;  %v9095_v61 = vadd.f32 %v17503_v28, %v8833_v1  ;;  %v11089_v24 = vrot.slane %v19861_v27, 1  ;;  %v25178_v13 = vld [vmem:[#allocation95_spill] sm:$0xff]  ;;  %v25179_v27 = vld [vmem:[#allocation96_spill] sm:$0xff] }
 0x266   : > { %7702 = vmatprep.subr.bf16.mxu1 %v25175_v55  ;;  %v8834_v42 = vmul.f32 %v17393_v4, %v4714_v15  ;;  %7720 = vmatprep.mubr.bf16.mxu1 %v24448_v56  ;;  %v25176_v53 = vcombine.low %v25169_v48, %v25170_v19  ;;  %v14572_v3 = vcombine.low %v10170_v29, %v10170_v29  ;;  %v4676_v45 = vpop.f32.mrf.mxu0  ;;  %v9349_v19 = vmax.f32 %v9093_v9, 0.0  ;;  %v25181_v55 = vld [vmem:[#allocation97_spill] sm:$0xff] }
 0x267   : > { %v14573_v0 = vcombine.high %v10170_v29, %v10170_v29  ;;  %v9897_v32 = vmax.bf16 %v9833_v51, %v9769_v54  ;;  %v9898_v1 = vmax.bf16 %v9834_v26, %v9770_v18  ;;  %v9094_v15 = vadd.f32 %v17503_v28, %v8832_v14  ;;  %v25182_v54 = vld [vmem:[#allocation98_spill] sm:$0xff]  ;;  %v25184_v18 = vld [vmem:[#allocation81_spill] sm:$0xff] }
 0x268   : > { %7662 = vmatpush1.bf16.msra.mxu0 %v25176_v53  ;;  %v25177_v38 = vcombine.low %v25173_v12, %v25174_v21  ;;  %v25180_v62 = vcombine.high %v25178_v13, %v25179_v27  ;;  %v9096_v29 = vadd.f32 %v17503_v28, %v8834_v42  ;;  %v4717_v53 = vpop.f32.mrf.mxu1  ;;  %v25183_v51 = vcombine.high %v25181_v55, %v25182_v54 }
 0x269   : > { %v25185_v14 = vrot.slane %v25184_v18, 3  ;;  %v14496_v21 = vcombine.low %v9897_v32, %v9898_v1  ;;  %v9351_v26 = vmax.f32 %v9095_v61, 0.0  ;;  %v9350_v1 = vmax.f32 %v9094_v15, 0.0 }
 0x26a   : > { %7703 = vmatpush1.bf16.msra.mxu1 %v25177_v38  ;;  %7821 = vmatprep.subr.bf16.mxu0 %v25180_v62  ;;  %v4753_v38 = vpop.f32.mrf.mxu0  ;;  %v20237_v62 = vunpack.c.l.b16 %v14573_v0  ;;  %v4794_v53 = vpop.f32.mrf.mxu1  ;;  %v20260_v32 = vpack.c.bf16 %v9349_v19, %v9349_v19 }
 0x26b   : > { %7862 = vmatprep.subr.bf16.mxu1 %v25183_v51  ;;  %v11088_v12 = vsel %vm10479_vm1, %v11087_v47, %v25185_v14  ;;  %14400 = vmatmul.mubr.msk.bf16.vlgmr.msra.gmra.mxu0 %vm973_vm0, %v19872_v10  ;;  %v8835_v42 = vmul.f32 %v17393_v4, %v4753_v38  ;;  %v25187_v47 = vcombine.low %v25178_v13, %v25179_v27  ;;  %v25190_v38 = vld [vmem:[#allocation126_spill] sm:$0xff]  ;;  %v20257_v13 = vunpack.c.l.b16 %v14572_v3 }
 0x26c   : > { %25186 = vst [vmem:[#allocation85_spill] sm:$0xff] %v20237_v62  ;;  %v11090_v9 = vsel %vm10482_vm2, %v11089_v24, %v11088_v12  ;;  %10139 = vst [vmem:[#allocation2 + $0x8] sm:$0xff] %v14496_v21  ;;  %v8837_v24 = vmul.f32 %v17393_v4, %v4794_v53  ;;  %v25188_v51 = vcombine.low %v25181_v55, %v25182_v54  ;;  %v4755_v14 = vpop.f32.mrf.mxu0  ;;  %v25189_v12 = vld [vmem:[#allocation125_spill] sm:$0xff]  ;;  %v9352_v21 = vmax.f32 %v9096_v29, 0.0  ;;  %v4796_v0 = vpop.f32.mrf.mxu1  ;;  %v25193_v55 = vld [vmem:[#allocation99_spill] sm:$0xff] }
 0x26d   : > { %14401 = vmatmul.mubr.msk.bf16.vlgmr.msra.gmra.mxu1 %vm973_vm0, %v19872_v10  ;;  %7822 = vmatpush1.bf16.msra.mxu0 %v25187_v47  ;;  %v11091_v61 = vsel %vm10485_vm3, %v19939_v7, %v11090_v9  ;;  %v25191_v27 = vcombine.high %v25189_v12, %v25190_v38  ;;  %25192 = vst [vmem:[#allocation86_spill] sm:$0xff] %v20257_v13  ;;  %v10763_v9 = vld [vmem:[#allocation2 + $0xf0] sm:$0x22]  ;;  %v25194_v54 = vld [vmem:[#allocation100_spill] sm:$0xff]  ;;  %v10535_v29 = vrot.slane %v20237_v62, 4 }
 0x26e   : > { %7863 = vmatpush1.bf16.msra.mxu1 %v25188_v51  ;;  %v9097_v15 = vadd.f32 %v17503_v28, %v8835_v42  ;;  %v8836_v53 = vmul.f32 %v17393_v4, %v4755_v14  ;;  %v25195_v51 = vcombine.high %v25193_v55, %v25194_v54  ;;  %7841 = vmatprep.mubr.bf16.mxu0 %v24448_v56  ;;  %v4757_v19 = vpop.f32.mrf.mxu0  ;;  %v4798_v45 = vpop.f32.mrf.mxu1 }
 0x26f   : > { %7823 = vmatprep.subr.bf16.mxu0 %v25191_v27  ;;  %v20268_v27 = vpack.c.bf16 %v9351_v26, %v9351_v26  ;;  %v9099_v3 = vadd.f32 %v17503_v28, %v8837_v24  ;;  %v8838_v47 = vmul.f32 %v17393_v4, %v4796_v0  ;;  %7882 = vmatprep.mubr.bf16.mxu1 %v24448_v56  ;;  %v25200_v26 = vld [vmem:[#allocation102_spill] sm:$0xff] }
 0x270   : > { %7864 = vmatprep.subr.bf16.mxu1 %v25195_v51  ;;  %v9353_v42 = vmax.f32 %v9097_v15, 0.0  ;;  %v9098_v14 = vadd.f32 %v17503_v28, %v8836_v53  ;;  %v25196_v51 = vcombine.low %v25189_v12, %v25190_v38  ;;  %v14716_v48 = vcombine.low %v10763_v9, %v10763_v9  ;;  %v4758_v7 = vpop.f32.mrf.mxu0  ;;  %v25198_v15 = vld [vmem:[#allocation101_spill] sm:$0xff]  ;;  %v4799_v18 = vpop.f32.mrf.mxu1 }
 0x271   : > { %v9606_v5 = vpack.c.bf16 %v9350_v1, %v9350_v1  ;;  %v9355_v24 = vmax.f32 %v9099_v3, 0.0  ;;  %v9100_v0 = vadd.f32 %v17503_v28, %v8838_v47  ;;  %v25197_v19 = vcombine.low %v25193_v55, %v25194_v54  ;;  %v25201_v1 = vld [vmem:[#allocation103_spill] sm:$0xff] }
 0x272   : > { %7824 = vmatpush1.bf16.msra.mxu0 %v25196_v51  ;;  %v25199_v53 = vcombine.high %v18991_v40, %v25198_v15  ;;  %v9608_v12 = vpack.c.bf16 %v9352_v21, %v9352_v21  ;;  %v9609_v38 = vpack.c.bf16 %v9353_v42, %v9353_v42  ;;  %v9354_v51 = vmax.f32 %v9098_v14, 0.0  ;;  %v4956_v14 = vpop.f32.mrf.mxu1 }
 0x273   : > { %7865 = vmatpush1.bf16.msra.mxu1 %v25197_v19  ;;  %v25202_v3 = vcombine.high %v25200_v26, %v25201_v1  ;;  %v14717_v47 = vcombine.high %v10763_v9, %v10763_v9  ;;  %v9771_v55 = vmax.bf16 %v20268_v27, %v20260_v32  ;;  %v9611_v54 = vpack.c.bf16 %v9355_v24, %v9355_v24  ;;  %v4915_v19 = vpop.f32.mrf.mxu0 }
 0x274   : > { %7903 = vmatprep.subr.bf16.mxu0 %v25199_v53  ;;  %v9356_v7 = vmax.f32 %v9100_v0, 0.0  ;;  %v20296_v21 = vsel %vm10491_vm5, %v10535_v29, %v20190_v31  ;;  %v9610_v42 = vpack.c.bf16 %v9354_v51, %v9354_v51  ;;  %v8839_v18 = vmul.f32 %v17393_v4, %v4915_v19  ;;  %v25207_v19 = vld [vmem:[#allocation17_spill] sm:$0xff] }
 0x275   : > { %7944 = vmatprep.subr.bf16.mxu1 %v25202_v3  ;;  %14418 = vmatmul.mubr.msk.bf16.vlgmr.msra.gmra.mxu0 %vm973_vm0, %v19872_v10  ;;  %v25203_v32 = vcombine.low %v18991_v40, %v25198_v15  ;;  %v25204_v27 = vrot.slane %v19958_v36, 7  ;;  %v9835_v0 = vmax.bf16 %v9611_v54, %v9609_v38  ;;  %v8841_v29 = vmul.f32 %v17393_v4, %v4956_v14  ;;  %v4917_v51 = vpop.f32.mrf.mxu0  ;;  %v25206_v3 = vld [vmem:[#allocation104_spill] sm:$0xff]  ;;  %v10171_v40 = vld [vmem:[#allocation2 + $0x8] sm:$0x11]  ;;  %v25211_v54 = vld [vmem:[#allocation18_spill] sm:$0xff] }
 0x276   : > { %14419 = vmatmul.mubr.msk.bf16.vlgmr.msra.gmra.mxu1 %vm973_vm0, %v19872_v10  ;;  %v9612_v31 = vpack.c.bf16 %v9356_v7, %v9356_v7  ;;  %v25205_v53 = vcombine.low %v25200_v26, %v25201_v1  ;;  %v25208_v45 = vcombine.high %v25206_v3, %v25207_v19  ;;  %v20315_v15 = vunpack.c.l.b16 %v14716_v48  ;;  %v25210_v38 = vld [vmem:[#allocation105_spill] sm:$0xff]  ;;  %7923 = vmatprep.mubr.bf16.mxu0 %v24448_v56 }
 0x277   : > { %7904 = vmatpush1.bf16.msra.mxu0 %v25203_v32  ;;  %v11093_v24 = vsel %vm10488_vm4, %v25204_v27, %v11091_v61  ;;  %v9772_v32 = vmax.bf16 %v9608_v12, %v9606_v5  ;;  %v8840_v9 = vmul.f32 %v17393_v4, %v4917_v51  ;;  %v4958_v61 = vpop.f32.mrf.mxu1  ;;  %v25212_v7 = vcombine.high %v25210_v38, %v25211_v54  ;;  %v4919_v27 = vpop.f32.mrf.mxu0 }
 0x278   : > { %7945 = vmatpush1.bf16.msra.mxu1 %v25205_v53  ;;  %7905 = vmatprep.subr.bf16.mxu0 %v25208_v45  ;;  %25209 = vst [vmem:[#allocation123_spill] sm:$0xff] %v20315_v15  ;;  %v20322_v26 = vunpack.c.l.b16 %v14717_v47  ;;  %v25214_v1 = vrot.slane %v19976_v17, 6  ;;  %v9836_v45 = vmax.bf16 %v9612_v31, %v9610_v42  ;;  %v9101_v48 = vadd.f32 %v17503_v28, %v8839_v18  ;;  %v25218_v27 = vld [vmem:[#allocation20_spill] sm:$0xff] }
 0x279   : > { %7946 = vmatprep.subr.bf16.mxu1 %v25212_v7  ;;  %v9103_v5 = vadd.f32 %v17503_v28, %v8841_v29  ;;  %v8842_v12 = vmul.f32 %v17393_v4, %v4958_v61  ;;  %7964 = vmatprep.mubr.bf16.mxu1 %v24448_v56  ;;  %v4960_v53 = vpop.f32.mrf.mxu1  ;;  %v25215_v51 = vcombine.low %v25206_v3, %v25207_v19  ;;  %v25216_v17 = vrot.slane %v19997_v2, 5  ;;  %v25219_v3 = vld [vmem:[#allocation21_spill] sm:$0xff] }
 0x27a   : > { %25213 = vst [vmem:[#allocation87_spill] sm:$0xff] %v20322_v26  ;;  %v11095_v14 = vsel %vm10491_vm5, %v25214_v1, %v11093_v24  ;;  %v14574_v47 = vcombine.low %v10171_v40, %v10171_v40  ;;  %v14575_v7 = vcombine.high %v10171_v40, %v10171_v40  ;;  %v9899_v24 = vmax.bf16 %v9835_v0, %v9771_v55  ;;  %v4920_v1 = vpop.f32.mrf.mxu0 }
 0x27b   : > { %7906 = vmatpush1.bf16.msra.mxu0 %v25215_v51  ;;  %v11097_v42 = vsel %vm10494_vm6, %v25216_v17, %v11095_v14  ;;  %v9900_v31 = vmax.bf16 %v9836_v45, %v9772_v32  ;;  %v9102_v29 = vadd.f32 %v17503_v28, %v8840_v9  ;;  %v25217_v61 = vcombine.low %v25210_v38, %v25211_v54  ;;  %v4961_v17 = vpop.f32.mrf.mxu1  ;;  %v25221_v14 = vld [vmem:[#allocation22_spill] sm:$0xff]  ;;  %v25222_v51 = vld [vmem:[#allocation23_spill] sm:$0xff] }
 0x27c   : > { %v25220_v19 = vcombine.high %v25218_v27, %v25219_v3  ;;  %v9104_v53 = vadd.f32 %v17503_v28, %v8842_v12  ;;  %v25223_v55 = vcombine.high %v25221_v14, %v25222_v51  ;;  %v25224_v9 = vrot.slane %v20062_v37, 4  ;;  %v4997_v1 = vpop.f32.mrf.mxu0  ;;  %v20359_v12 = vld [vmem:[#allocation2 + $0x8] sm:$0x22] }
 0x27d   : > { %7947 = vmatpush1.bf16.msra.mxu1 %v25217_v61  ;;  %v11114_v32 = vrot.slane %v20077_v63, 3  ;;  %v14497_v54 = vcombine.low %v9899_v24, %v9900_v31  ;;  %v9357_v45 = vmax.f32 %v9101_v48, 0.0  ;;  %v9359_v61 = vmax.f32 %v9103_v5, 0.0  ;;  %v25231_v24 = vld [vmem:[#allocation26_spill] sm:$0xff] }
 0x27e   : > { %8065 = vmatprep.subr.bf16.mxu0 %v25220_v19  ;;  %8106 = vmatprep.subr.bf16.mxu1 %v25223_v55  ;;  %v20353_v0 = vsel %vm10497_vm7, %v25224_v9, %v11097_v42  ;;  %v8843_v17 = vmul.f32 %v17393_v4, %v4997_v1  ;;  %v5038_v55 = vpop.f32.mrf.mxu1  ;;  %v25225_v42 = vcombine.low %v25218_v27, %v25219_v3  ;;  %v20368_v48 = vunpack.c.l.b16 %v14575_v7  ;;  %v4999_v40 = vpop.f32.mrf.mxu0 }
 0x27f   : > { %14420 = vmatmul.mubr.msk.bf16.vlgmr.msra.gmra.mxu0 %vm973_vm0, %v19872_v10  ;;  %10140 = vst [vmem:[#allocation2 + $0x78] sm:$0xff] %v14497_v54  ;;  %v9358_v31 = vmax.f32 %v9102_v29, 0.0  ;;  %v8845_v9 = vmul.f32 %v17393_v4, %v5038_v55  ;;  %v25227_v1 = vcombine.low %v25221_v14, %v25222_v51  ;;  %v25228_v18 = vcombine.high %v19128_v50, %v19131_v44  ;;  %v25230_v55 = vld [vmem:[#allocation25_spill] sm:$0xff] }
 0x280   : > { %14421 = vmatmul.mubr.msk.bf16.vlgmr.msra.gmra.mxu1 %vm973_vm0, %v19872_v10  ;;  %8066 = vmatpush1.bf16.msra.mxu0 %v25225_v42  ;;  %25226 = vst [vmem:[#allocation88_spill] sm:$0xff] %v20368_v48  ;;  %v20379_v27 = vunpack.c.l.b16 %v14574_v47  ;;  %v9360_v3 = vmax.f32 %v9104_v53, 0.0  ;;  %v9105_v42 = vadd.f32 %v17503_v28, %v8843_v17  ;;  %v8844_v29 = vmul.f32 %v17393_v4, %v4999_v40  ;;  %v5040_v54 = vpop.f32.mrf.mxu1 }
 0x281   : > { %8107 = vmatpush1.bf16.msra.mxu1 %v25227_v1  ;;  %8067 = vmatprep.subr.bf16.mxu0 %v25228_v18  ;;  %v25232_v5 = vcombine.high %v25230_v55, %v25231_v24  ;;  %v14718_v14 = vcombine.low %v20359_v12, %v20359_v12  ;;  %v9613_v18 = vpack.c.bf16 %v9357_v45, %v9357_v45  ;;  %v5001_v1 = vpop.f32.mrf.mxu0  ;;  %v10537_v19 = vrot.slane %v20368_v48, 3 }
 0x282   : > { %25229 = vst [vmem:[#allocation89_spill] sm:$0xff] %v20379_v27  ;;  %8085 = vmatprep.mubr.bf16.mxu0 %v24448_v56  ;;  %v9615_v47 = vpack.c.bf16 %v9359_v61, %v9359_v61  ;;  %v9107_v51 = vadd.f32 %v17503_v28, %v8845_v9  ;;  %v8846_v53 = vmul.f32 %v17393_v4, %v5040_v54  ;;  %v9361_v40 = vmax.f32 %v9105_v42, 0.0  ;;  %v5042_v7 = vpop.f32.mrf.mxu1 }
 0x283   : > { %8108 = vmatprep.subr.bf16.mxu1 %v25232_v5  ;;  %8126 = vmatprep.mubr.bf16.mxu1 %v24448_v56  ;;  %v9106_v17 = vadd.f32 %v17503_v28, %v8844_v29  ;;  %v25233_v5 = vcombine.low %v19128_v50, %v19131_v44  ;;  %v9614_v61 = vpack.c.bf16 %v9358_v31, %v9358_v31  ;;  %v5002_v42 = vpop.f32.mrf.mxu0 }
 0x284   : > { %v9363_v38 = vmax.f32 %v9107_v51, 0.0  ;;  %v9108_v9 = vadd.f32 %v17503_v28, %v8846_v53  ;;  %v25234_v54 = vcombine.low %v25230_v55, %v25231_v24  ;;  %v25235_v7 = vcombine.high %v19182_v46, %v19185_v34 }
 0x285   : > { %8068 = vmatpush1.bf16.msra.mxu0 %v25233_v5  ;;  %v14719_v50 = vcombine.high %v20359_v12, %v20359_v12  ;;  %v9616_v44 = vpack.c.bf16 %v9360_v3, %v9360_v3  ;;  %v9617_v29 = vpack.c.bf16 %v9361_v40, %v9361_v40  ;;  %v9362_v1 = vmax.f32 %v9106_v17, 0.0  ;;  %v5043_v5 = vpop.f32.mrf.mxu1 }
 0x286   : > { %8109 = vmatpush1.bf16.msra.mxu1 %v25234_v54  ;;  %8147 = vmatprep.subr.bf16.mxu0 %v25235_v7  ;;  %v25236_v31 = vcombine.high %v19207_v59, %v19210_v60  ;;  %v20411_v51 = vunpack.c.l.b16 %v14718_v14  ;;  %v9773_v24 = vmax.bf16 %v9615_v47, %v9613_v18  ;;  %v9619_v55 = vpack.c.bf16 %v9363_v38, %v9363_v38  ;;  %v5159_v54 = vpop.f32.mrf.mxu0  ;;  %v25240_v5 = vld [vmem:[#allocation107_spill] sm:$0xff] }
 0x287   : > { %v9364_v53 = vmax.f32 %v9108_v9, 0.0  ;;  %v9618_v12 = vpack.c.bf16 %v9362_v1, %v9362_v1  ;;  %v8847_v3 = vmul.f32 %v17393_v4, %v5159_v54  ;;  %v5200_v40 = vpop.f32.mrf.mxu1  ;;  %v25238_v14 = vcombine.low %v19182_v46, %v19185_v34  ;;  %v20434_v46 = vld [vmem:[#allocation2 + $0x78] sm:$0x11] }
 0x288   : > { %8188 = vmatprep.subr.bf16.mxu1 %v25236_v31  ;;  %25237 = vst [vmem:[#allocation90_spill] sm:$0xff] %v20411_v51  ;;  %14438 = vmatmul.mubr.msk.bf16.vlgmr.msra.gmra.mxu0 %vm973_vm0, %v19872_v10  ;;  %v20424_v38 = vsel %vm10494_vm6, %v10537_v19, %v20296_v21  ;;  %v9837_v47 = vmax.bf16 %v9619_v55, %v9617_v29  ;;  %v5161_v1 = vpop.f32.mrf.mxu0  ;;  %v25241_v31 = vld [vmem:[#allocation108_spill] sm:$0xff]  ;;  %v20436_v34 = vunpack.c.l.b16 %v14719_v50 }
 0x289   : > { %14439 = vmatmul.mubr.msk.bf16.vlgmr.msra.gmra.mxu1 %vm973_vm0, %v19872_v10  ;;  %8148 = vmatpush1.bf16.msra.mxu0 %v25238_v14  ;;  %v9620_v17 = vpack.c.bf16 %v9364_v53, %v9364_v53  ;;  %v8849_v9 = vmul.f32 %v17393_v4, %v5200_v40  ;;  %v25239_v7 = vcombine.low %v19207_v59, %v19210_v60  ;;  %v5202_v55 = vpop.f32.mrf.mxu1  ;;  %v25244_v53 = vld [vmem:[#allocation27_spill] sm:$0xff]  ;;  %v25245_v40 = vld [vmem:[#allocation28_spill] sm:$0xff] }
 0x28a   : > { %v25242_v54 = vcombine.high %v25240_v5, %v25241_v31  ;;  %25243 = vst [vmem:[#allocation91_spill] sm:$0xff] %v20436_v34  ;;  %v9774_v21 = vmax.bf16 %v9616_v44, %v9614_v61  ;;  %v9109_v19 = vadd.f32 %v17503_v28, %v8847_v3  ;;  %v8848_v29 = vmul.f32 %v17393_v4, %v5161_v1  ;;  %v25255_v60 = vld [vmem:[#allocation32_spill] sm:$0xff] }
 0x28b   : > { %8189 = vmatpush1.bf16.msra.mxu1 %v25239_v7  ;;  %v25246_v14 = vcombine.high %v25244_v53, %v25245_v40  ;;  %8167 = vmatprep.mubr.bf16.mxu0 %v24448_v56  ;;  %v9838_v59 = vmax.bf16 %v9620_v17, %v9618_v12  ;;  %v9111_v7 = vadd.f32 %v17503_v28, %v8849_v9  ;;  %v25247_v61 = vrot.slane %v20094_v52, 2 }
 0x28c   : > { %8149 = vmatprep.subr.bf16.mxu0 %v25242_v54  ;;  %v8850_v50 = vmul.f32 %v17393_v4, %v5202_v55  ;;  %v5163_v54 = vpop.f32.mrf.mxu0  ;;  %8208 = vmatprep.mubr.bf16.mxu1 %v24448_v56  ;;  %v9901_v3 = vmax.bf16 %v9837_v47, %v9773_v24  ;;  %v9110_v1 = vadd.f32 %v17503_v28, %v8848_v29  ;;  %v25249_v9 = vrot.slane %v20110_v22, 1  ;;  %v25251_v29 = vld [vmem:[#allocation29_spill] sm:$0xff] }
 0x28d   : > { %8190 = vmatprep.subr.bf16.mxu1 %v25246_v14  ;;  %v11116_v44 = vsel %vm10479_vm1, %v25247_v61, %v11114_v32  ;;  %v5204_v14 = vpop.f32.mrf.mxu1  ;;  %v25248_v12 = vcombine.low %v25240_v5, %v25241_v31  ;;  %v14577_v17 = vcombine.high %v20434_v46, %v20434_v46  ;;  %v9902_v54 = vmax.bf16 %v9838_v59, %v9774_v21  ;;  %v25252_v5 = vld [vmem:[#allocation30_spill] sm:$0xff]  ;;  %v20469_v61 = vld [vmem:[#allocation2 + $0x78] sm:$0x22] }
 0x28e   : > { %v11118_v55 = vsel %vm10482_vm2, %v25249_v9, %v11116_v44  ;;  %v9365_v18 = vmax.f32 %v9109_v19, 0.0  ;;  %v9367_v45 = vmax.f32 %v9111_v7, 0.0  ;;  %v9112_v32 = vadd.f32 %v17503_v28, %v8850_v50  ;;  %v5164_v47 = vpop.f32.mrf.mxu0 }
 0x28f   : > { %8150 = vmatpush1.bf16.msra.mxu0 %v25248_v12  ;;  %v25250_v24 = vcombine.low %v25244_v53, %v25245_v40  ;;  %v25253_v31 = vcombine.high %v25251_v29, %v25252_v5  ;;  %v5205_v14 = vpop.f32.mrf.mxu1  ;;  %v25254_v12 = vld [vmem:[#allocation31_spill] sm:$0xff]  ;;  %v20474_v21 = vunpack.c.l.b16 %v14577_v17  ;;  %v11119_v19 = vsel %vm10485_vm3, %v20122_v20, %v11118_v55 }
 0x290   : > { %v25256_v44 = vcombine.high %v25254_v12, %v25255_v60  ;;  %v11124_v53 = vrot.slane %v20436_v34, 5  ;;  %v14498_v59 = vcombine.low %v9901_v3, %v9902_v54  ;;  %v9366_v7 = vmax.f32 %v9110_v1, 0.0  ;;  %v5241_v9 = vpop.f32.mrf.mxu0 }
 0x291   : > { %8191 = vmatpush1.bf16.msra.mxu1 %v25250_v24  ;;  %8309 = vmatprep.subr.bf16.mxu0 %v25253_v31  ;;  %25257 = vst [vmem:[#allocation92_spill] sm:$0xff] %v20474_v21  ;;  %v9368_v50 = vmax.f32 %v9112_v32, 0.0  ;;  %v25258_v24 = vrot.slane %v20201_v49, 7  ;;  %v8851_v17 = vmul.f32 %v17393_v4, %v5241_v9  ;;  %v5282_v31 = vpop.f32.mrf.mxu1  ;;  %v25259_v55 = vcombine.low %v25251_v29, %v25252_v5  ;;  %v25263_v9 = vld [vmem:[#allocation128_spill] sm:$0xff] }
 0x292   : > { %8350 = vmatprep.subr.bf16.mxu1 %v25256_v44  ;;  %14440 = vmatmul.mubr.msk.bf16.vlgmr.msra.gmra.mxu0 %vm973_vm0, %v19872_v10  ;;  %v14721_v3 = vcombine.high %v20469_v61, %v20469_v61  ;;  %v25260_v1 = vrot.slane %v20322_v26, 6  ;;  %10141 = vst [vmem:[#allocation2 + $0x38] sm:$0xff] %v14498_v59  ;;  %v20497_v14 = vpack.c.bf16 %v9365_v18, %v9365_v18  ;;  %v5243_v5 = vpop.f32.mrf.mxu0 }
 0x293   : > { %v11121_v47 = vsel %vm10488_vm4, %v25258_v24, %v11119_v19  ;;  %8310 = vmatpush1.bf16.msra.mxu0 %v25259_v55  ;;  %v20499_v44 = vpack.c.bf16 %v9367_v45, %v9367_v45  ;;  %v25261_v29 = vcombine.low %v25254_v12, %v25255_v60  ;;  %v25262_v19 = vld [vmem:[#allocation127_spill] sm:$0xff]  ;;  %v9113_v55 = vadd.f32 %v17503_v28, %v8851_v17  ;;  %v5284_v59 = vpop.f32.mrf.mxu1  ;;  %v25265_v45 = vld [vmem:[#allocation34_spill] sm:$0xff] }
 0x294   : > { %14441 = vmatmul.mubr.msk.bf16.vlgmr.msra.gmra.mxu1 %vm973_vm0, %v19872_v10  ;;  %v11123_v54 = vsel %vm10491_vm5, %v25260_v1, %v11121_v47  ;;  %v8853_v10 = vmul.f32 %v17393_v4, %v5282_v31  ;;  %v25264_v24 = vcombine.high %v25262_v19, %v25263_v9  ;;  %v8852_v18 = vmul.f32 %v17393_v4, %v5243_v5  ;;  %v25266_v1 = vld [vmem:[#allocation35_spill] sm:$0xff]  ;;  %v5245_v5 = vpop.f32.mrf.mxu0 }
 0x295   : > { %8351 = vmatpush1.bf16.msra.mxu1 %v25261_v29  ;;  %v25267_v32 = vcombine.high %v25265_v45, %v25266_v1  ;;  %8329 = vmatprep.mubr.bf16.mxu0 %v24448_v56  ;;  %v10539_v60 = vrot.slane %v20474_v21, 2  ;;  %v20516_v12 = vunpack.c.l.b16 %v14721_v3  ;;  %v20518_v31 = vpack.c.bf16 %v9366_v7, %v9366_v7  ;;  %v5286_v40 = vpop.f32.mrf.mxu1  ;;  %v25273_v5 = vld [vmem:[#allocation38_spill] sm:$0xff] }
 0x296   : > { %8311 = vmatprep.subr.bf16.mxu0 %v25264_v24  ;;  %v20520_v29 = vpack.c.bf16 %v9368_v50, %v9368_v50  ;;  %v9115_v24 = vadd.f32 %v17503_v28, %v8853_v10  ;;  %v8854_v17 = vmul.f32 %v17393_v4, %v5284_v59  ;;  %8370 = vmatprep.mubr.bf16.mxu1 %v24448_v56  ;;  %v9369_v47 = vmax.f32 %v9113_v55, 0.0  ;;  %v5246_v55 = vpop.f32.mrf.mxu0 }
 0x297   : > { %8352 = vmatprep.subr.bf16.mxu1 %v25267_v32  ;;  %25268 = vst [vmem:[#allocation93_spill] sm:$0xff] %v20516_v12  ;;  %v9114_v32 = vadd.f32 %v17503_v28, %v8852_v18  ;;  %v25269_v42 = vcombine.low %v25262_v19, %v25263_v9  ;;  %v14576_v7 = vcombine.low %v20434_v46, %v20434_v46  ;;  %v11126_v19 = vrot.slane %v20516_v12, 4 }
 0x298   : > { %v9371_v3 = vmax.f32 %v9115_v24, 0.0  ;;  %v9116_v10 = vadd.f32 %v17503_v28, %v8854_v17  ;;  %v25270_v59 = vcombine.low %v25265_v45, %v25266_v1  ;;  %v25271_v40 = vcombine.high %v19371_v57, %v19374_v11  ;;  %v5287_v24 = vpop.f32.mrf.mxu1  ;;  %v25272_v17 = vld [vmem:[#allocation37_spill] sm:$0xff]  ;;  %v5403_v50 = vpop.f32.mrf.mxu0 }
 0x299   : > { %8312 = vmatpush1.bf16.msra.mxu0 %v25269_v42  ;;  %v9775_v46 = vmax.bf16 %v20499_v44, %v20497_v14  ;;  %v9625_v9 = vpack.c.bf16 %v9369_v47, %v9369_v47  ;;  %v9370_v18 = vmax.f32 %v9114_v32, 0.0  ;;  %v25274_v45 = vcombine.high %v25272_v17, %v25273_v5  ;;  %v20553_v42 = vld [vmem:[#allocation6] sm:$0xf] }
 0x29a   : > { %8353 = vmatpush1.bf16.msra.mxu1 %v25270_v59  ;;  %8391 = vmatprep.subr.bf16.mxu0 %v25271_v40  ;;  %v20549_v1 = vsel %vm10497_vm7, %v10539_v60, %v20424_v38  ;;  %v9776_v59 = vmax.bf16 %v20520_v29, %v20518_v31  ;;  %v9627_v55 = vpack.c.bf16 %v9371_v3, %v9371_v3  ;;  %v9372_v40 = vmax.f32 %v9116_v10, 0.0  ;;  %v5444_v32 = vpop.f32.mrf.mxu1  ;;  %v25277_v10 = vld [vmem:[#allocation109_spill] sm:$0xff] }
 0x29b   : > { %8432 = vmatprep.subr.bf16.mxu1 %v25274_v45  ;;  %v11125_v14 = vsel %vm10494_vm6, %v11124_v53, %v11123_v54  ;;  %v9626_v44 = vpack.c.bf16 %v9370_v18, %v9370_v18  ;;  %v8855_v47 = vmul.f32 %v17393_v4, %v5403_v50  ;;  %v25275_v38 = vcombine.low %v19371_v57, %v19374_v11  ;;  %v5405_v50 = vpop.f32.mrf.mxu0  ;;  %v25278_v18 = vld [vmem:[#allocation129_spill] sm:$0xff] }
 0x29c   : > { %14458 = vmatmul.mubr.msk.bf16.vlgmr.msra.gmra.mxu0 %vm973_vm0, %v20553_v42  ;;  %v20565_v60 = vsel %vm10497_vm7, %v11126_v19, %v11125_v14  ;;  %v9839_v29 = vmax.bf16 %v9627_v55, %v9625_v9  ;;  %v9628_v3 = vpack.c.bf16 %v9372_v40, %v9372_v40  ;;  %v8857_v53 = vmul.f32 %v17393_v4, %v5444_v32  ;;  %v5446_v45 = vpop.f32.mrf.mxu1  ;;  %v25280_v9 = vld [vmem:[#allocation39_spill] sm:$0xff]  ;;  %v25281_v55 = vld [vmem:[#allocation40_spill] sm:$0xff] }
 0x29d   : > { %14459 = vmatmul.mubr.msk.bf16.vlgmr.msra.gmra.mxu1 %vm973_vm0, %v20553_v42  ;;  %8392 = vmatpush1.bf16.msra.mxu0 %v25275_v38  ;;  %v25276_v54 = vcombine.low %v25272_v17, %v25273_v5  ;;  %v25279_v24 = vcombine.high %v25277_v10, %v25278_v18  ;;  %v9117_v11 = vadd.f32 %v17503_v28, %v8855_v47  ;;  %v20582_v17 = vunpack.c.l.b16 %v14576_v7  ;;  %v5407_v47 = vpop.f32.mrf.mxu0 }
 0x29e   : > { %v8856_v19 = vmul.f32 %v17393_v4, %v5405_v50  ;;  %v25282_v40 = vcombine.high %v25280_v9, %v25281_v55  ;;  %8411 = vmatprep.mubr.bf16.mxu0 %v24448_v56  ;;  %v9840_v14 = vmax.bf16 %v9628_v3, %v9626_v44  ;;  %v9119_v32 = vadd.f32 %v17503_v28, %v8857_v53  ;;  %v5448_v7 = vpop.f32.mrf.mxu1  ;;  %v25285_v44 = vld [vmem:[#allocation61_spill] sm:$0xff]  ;;  %v25287_v53 = vld [vmem:[#allocation72_spill] sm:$0xff] }
 0x29f   : > { %8433 = vmatpush1.bf16.msra.mxu1 %v25276_v54  ;;  %8393 = vmatprep.subr.bf16.mxu0 %v25279_v24  ;;  %25283 = vst [vmem:[#allocation95_spill] sm:$0xff] %v20582_v17  ;;  %v8858_v38 = vmul.f32 %v17393_v4, %v5446_v45  ;;  %v9903_v50 = vmax.bf16 %v9839_v29, %v9775_v46  ;;  %v9373_v24 = vmax.f32 %v9117_v11, 0.0  ;;  %v25286_v3 = vrot.slane %v25285_v44, 1  ;;  %v5408_v29 = vpop.f32.mrf.mxu0  ;;  %v25289_v11 = vld [vmem:[#allocation41_spill] sm:$0xff]  ;;  %v25301_v44 = vld [vmem:[#allocation55_spill] sm:$0xff] }
 0x2a0   : > { %8434 = vmatprep.subr.bf16.mxu1 %v25282_v40  ;;  %8452 = vmatprep.mubr.bf16.mxu1 %v24448_v56  ;;  %v9118_v40 = vadd.f32 %v17503_v28, %v8856_v19  ;;  %v25284_v57 = vcombine.low %v25277_v10, %v25278_v18  ;;  %v9904_v47 = vmax.bf16 %v9840_v14, %v9776_v59  ;;  %v9375_v31 = vmax.f32 %v9119_v32, 0.0  ;;  %v25290_v19 = vld [vmem:[#allocation42_spill] sm:$0xff]  ;;  %v25292_v10 = vld [vmem:[#allocation84_spill] sm:$0xff]  ;;  %v5449_v59 = vpop.f32.mrf.mxu1  ;;  %v25295_v32 = vld [vmem:[#allocation45_spill] sm:$0xff] }
 0x2a1   : > { %v10480_v45 = vsel %vm10479_vm1, %v25287_v53, %v25286_v3  ;;  %v9120_v5 = vadd.f32 %v17503_v28, %v8858_v38  ;;  %v25288_v46 = vcombine.low %v25280_v9, %v25281_v55  ;;  %v25291_v7 = vcombine.high %v25289_v11, %v25290_v19  ;;  %v25294_v14 = vld [vmem:[#allocation44_spill] sm:$0xff]  ;;  %v25297_v53 = vld [vmem:[#allocation94_spill] sm:$0xff] }
 0x2a2   : > { %8394 = vmatpush1.bf16.msra.mxu0 %v25284_v57  ;;  %v25293_v18 = vrot.slane %v25292_v10, 7  ;;  %v20609_v54 = vpack.c.bf16 %v9373_v24, %v9373_v24  ;;  %v9374_v3 = vmax.f32 %v9118_v40, 0.0  ;;  %v25296_v38 = vcombine.high %v25294_v14, %v25295_v32  ;;  %v25302_v40 = vld [vmem:[#allocation19_spill] sm:$0xff] }
 0x2a3   : > { %8435 = vmatpush1.bf16.msra.mxu1 %v25288_v46  ;;  %8553 = vmatprep.subr.bf16.mxu0 %v25291_v7  ;;  %v25298_v9 = vrot.slane %v25297_v53, 6  ;;  %v25299_v46 = vld [vmem:[#allocation53_spill] sm:$0xff]  ;;  %v14499_v10 = vcombine.low %v9903_v50, %v9904_v47  ;;  %v20621_v12 = vpack.c.bf16 %v9375_v31, %v9375_v31  ;;  %v9376_v24 = vmax.f32 %v9120_v5, 0.0  ;;  %v25305_v50 = vld [vmem:[#allocation59_spill] sm:$0xff] }
 0x2a4   : > { %v10483_v57 = vsel %vm10482_vm2, %v25293_v18, %v10480_v45  ;;  %8594 = vmatprep.subr.bf16.mxu1 %v25296_v38  ;;  %v25300_v29 = vrot.slane %v25299_v46, 1  ;;  %v5485_v45 = vpop.f32.mrf.mxu0  ;;  %v25303_v18 = vrot.slane %v25302_v40, 5  ;;  %v20628_v38 = vpack.c.bf16 %v9374_v3, %v9374_v3  ;;  %v25308_v40 = vld [vmem:[#allocation130_spill] sm:$0xff]  ;;  %v25309_v53 = vld [vmem:[#allocation131_spill] sm:$0xff] }
 0x2a5   : > { %v10486_v55 = vsel %vm10485_vm3, %v25298_v9, %v10483_v57  ;;  %14460 = vmatmul.mubr.msk.bf16.vlgmr.msra.gmra.mxu0 %vm973_vm0, %v20553_v42  ;;  %v8859_v57 = vmul.f32 %v17393_v4, %v5485_v45  ;;  %v5526_v9 = vpop.f32.mrf.mxu1  ;;  %v25304_v31 = vcombine.low %v25289_v11, %v25290_v19  ;;  %v10525_v5 = vrot.slane %v20582_v17, 2  ;;  %10142 = vst [vmem:[#allocation2 + $0x58] sm:$0xff] %v14499_v10 }
 0x2a6   : > { %v10514_v7 = vsel %vm10479_vm1, %v25301_v44, %v25300_v29  ;;  %v10489_v59 = vsel %vm10488_vm4, %v25303_v18, %v10486_v55  ;;  %14461 = vmatmul.mubr.msk.bf16.vlgmr.msra.gmra.mxu1 %vm973_vm0, %v20553_v42  ;;  %v25306_v47 = vrot.slane %v25305_v50, 7  ;;  %v20640_v55 = vpack.c.bf16 %v9376_v24, %v9376_v24  ;;  %v5487_v18 = vpop.f32.mrf.mxu0  ;;  %v25314_v44 = vld [vmem:[#allocation132_spill] sm:$0xff]  ;;  %8573 = vmatprep.mubr.bf16.mxu0 %v24448_v56 }
 0x2a7   : > { %8554 = vmatpush1.bf16.msra.mxu0 %v25304_v31  ;;  %v8861_v3 = vmul.f32 %v17393_v4, %v5526_v9  ;;  %v25307_v45 = vcombine.low %v25294_v14, %v25295_v32  ;;  %v25310_v11 = vcombine.high %v25308_v40, %v25309_v53  ;;  %v25311_v31 = vld [vmem:[#allocation106_spill] sm:$0xff]  ;;  %v9121_v10 = vadd.f32 %v17503_v28, %v8859_v57  ;;  %v5528_v9 = vpop.f32.mrf.mxu1 }
 0x2a8   : > { %v10516_v29 = vsel %vm10482_vm2, %v25306_v47, %v10514_v7  ;;  %v25312_v50 = vrot.slane %v25311_v31, 4  ;;  %v8860_v24 = vmul.f32 %v17393_v4, %v5487_v18  ;;  %v25313_v47 = vld [vmem:[#allocation47_spill] sm:$0xff]  ;;  %v25316_v32 = vcombine.low %v20469_v61, %v20469_v61  ;;  %v5489_v17 = vpop.f32.mrf.mxu0  ;;  %8614 = vmatprep.mubr.bf16.mxu1 %v24448_v56 }
 0x2a9   : > { %8595 = vmatpush1.bf16.msra.mxu1 %v25307_v45  ;;  %8555 = vmatprep.subr.bf16.mxu0 %v25310_v11  ;;  %v25315_v14 = vcombine.high %v25313_v47, %v25314_v44  ;;  %v25318_v11 = vld [vmem:[#allocation36_spill] sm:$0xff]  ;;  %v9777_v57 = vmax.bf16 %v20621_v12, %v20609_v54  ;;  %v8862_v18 = vmul.f32 %v17393_v4, %v5528_v9 }
 0x2aa   : > { %v10492_v7 = vsel %vm10491_vm5, %v25312_v50, %v10489_v59  ;;  %v20662_v45 = vunpack.c.l.b16 %v25316_v32  ;;  %v25319_v19 = vrot.slane %v25318_v11, 3  ;;  %v9123_v50 = vadd.f32 %v17503_v28, %v8861_v3  ;;  %v25323_v54 = vld [vmem:[#allocation68_spill] sm:$0xff] }
 0x2ab   : > { %8596 = vmatprep.subr.bf16.mxu1 %v25315_v14  ;;  %v25320_v14 = vld [vmem:[#allocation43_spill] sm:$0xff]  ;;  %v9778_v32 = vmax.bf16 %v20640_v55, %v20628_v38  ;;  %v9377_v11 = vmax.f32 %v9121_v10, 0.0  ;;  %v25322_v12 = vcombine.low %v25308_v40, %v25309_v53  ;;  %v25324_v17 = vrot.slane %v25323_v54, 6  ;;  %v5490_v38 = vpop.f32.mrf.mxu0  ;;  %v25326_v55 = vld [vmem:[#allocation48_spill] sm:$0xff]  ;;  %v25327_v10 = vld [vmem:[#allocation110_spill] sm:$0xff] }
 0x2ac   : > { %25317 = vst [vmem:[#allocation96_spill] sm:$0xff] %v20662_v45  ;;  %v10495_v59 = vsel %vm10494_vm6, %v25319_v19, %v10492_v7  ;;  %v25321_v31 = vrot.slane %v25320_v14, 2  ;;  %v9122_v19 = vadd.f32 %v17503_v28, %v8860_v24  ;;  %v5530_v7 = vpop.f32.mrf.mxu1  ;;  %v9379_v9 = vmax.f32 %v9123_v50, 0.0  ;;  %v25330_v40 = vld [vmem:[#allocation69_spill] sm:$0xff] }
 0x2ad   : > { %8556 = vmatpush1.bf16.msra.mxu0 %v25322_v12  ;;  %v10518_v3 = vsel %vm10485_vm3, %v25324_v17, %v10516_v29  ;;  %v9124_v14 = vadd.f32 %v17503_v28, %v8862_v18  ;;  %v25328_v24 = vcombine.high %v25326_v55, %v25327_v10  ;;  %v25331_v7 = vrot.slane %v25330_v40, 3 }
 0x2ae   : > { %v20675_v61 = vsel %vm10497_vm7, %v25321_v31, %v10495_v59  ;;  %v25325_v31 = vcombine.low %v25313_v47, %v25314_v44  ;;  %v25329_v59 = vrot.slane %v20144_v35, 5  ;;  %v25332_v29 = vrot.slane %v19803_v39, 2  ;;  %v5531_v17 = vpop.f32.mrf.mxu1  ;;  %v25333_v44 = vld [vmem:[#allocation49_spill] sm:$0xff]  ;;  %v25334_v47 = vld [vmem:[#allocation50_spill] sm:$0xff]  ;;  %v25337_v35 = vld [vmem:[#allocation60_spill] sm:$0xff]  ;;  %v5647_v39 = vpop.f32.mrf.mxu0 }
 0x2af   : > { %8635 = vmatprep.subr.bf16.mxu0 %v25328_v24  ;;  %v9633_v18 = vpack.c.bf16 %v9377_v11, %v9377_v11  ;;  %v9378_v12 = vmax.f32 %v9122_v19, 0.0  ;;  %v25336_v38 = vrot.slane %v20257_v13, 4  ;;  %v25338_v54 = vrot.slane %v25337_v35, 1 }
 0x2b0   : > { %8597 = vmatpush1.bf16.msra.mxu1 %v25325_v31  ;;  %v10520_v53 = vsel %vm10488_vm4, %v25329_v59, %v10518_v3  ;;  %v11074_v50 = vsel %vm10479_vm1, %v25332_v29, %v25331_v7  ;;  %v25335_v31 = vcombine.high %v25333_v44, %v25334_v47  ;;  %v9635_v59 = vpack.c.bf16 %v9379_v9, %v9379_v9  ;;  %v5688_v17 = vpop.f32.mrf.mxu1 }
 0x2b1   : > { %v10522_v24 = vsel %vm10491_vm5, %v25336_v38, %v10520_v53  ;;  %v11076_v3 = vsel %vm10482_vm2, %v25338_v54, %v11074_v50  ;;  %v9380_v40 = vmax.f32 %v9124_v14, 0.0  ;;  %14478 = vmatmul.mubr.msk.bf16.vlgmr.msra.gmra.mxu0 %vm973_vm0, %v20553_v42  ;;  %v25339_v11 = vrot.slane %v20379_v27, 3 }
 0x2b2   : > { %8676 = vmatprep.subr.bf16.mxu1 %v25335_v31  ;;  %v11077_v7 = vsel %vm10485_vm3, %v19915_v33, %v11076_v3  ;;  %v9634_v29 = vpack.c.bf16 %v9378_v12, %v9378_v12  ;;  %v8863_v53 = vmul.f32 %v17393_v4, %v5647_v39  ;;  %v25340_v14 = vcombine.low %v25326_v55, %v25327_v10  ;;  %v5649_v12 = vpop.f32.mrf.mxu0  ;;  %v25343_v3 = vld [vmem:[#allocation52_spill] sm:$0xff]  ;;  %v15475_v55 = vld [vmem:[%s23672_s4 + $0xf8] sm:$0xff]   ;;  %v25345_v10 = vld [vmem:[#allocation77_spill] sm:$0xff] }
 0x2b3   : > { %v10524_v19 = vsel %vm10494_vm6, %v25339_v11, %v10522_v24  ;;  %14479 = vmatmul.mubr.msk.bf16.vlgmr.msra.gmra.mxu1 %vm973_vm0, %v20553_v42  ;;  %v9841_v50 = vmax.bf16 %v9635_v59, %v9633_v18  ;;  %v9636_v31 = vpack.c.bf16 %v9380_v40, %v9380_v40  ;;  %v8865_v38 = vmul.f32 %v17393_v4, %v5688_v17  ;;  %v25342_v24 = vld [vmem:[#allocation51_spill] sm:$0xff]  ;;  %v5690_v59 = vpop.f32.mrf.mxu1 }
 0x2b4   : > { %8636 = vmatpush1.bf16.msra.mxu0 %v25340_v14  ;;  %v20725_v9 = vsel %vm10497_vm7, %v10525_v5, %v10524_v19  ;;  %v25341_v39 = vcombine.low %v25333_v44, %v25334_v47  ;;  %v25344_v11 = vcombine.high %v25342_v24, %v25343_v3  ;;  %v9125_v18 = vadd.f32 %v17503_v28, %v8863_v53  ;;  %v25346_v19 = vld [vmem:[#allocation54_spill] sm:$0xff]  ;;  %v25347_v17 = vld [vmem:[#allocation111_spill] sm:$0xff]  ;;  %v5651_v54 = vpop.f32.mrf.mxu0 }
 0x2b5   : > { %v8864_v40 = vmul.f32 %v17393_v4, %v5649_v12  ;;  %v25348_v44 = vcombine.high %v25346_v19, %v25347_v17  ;;  %8655 = vmatprep.mubr.bf16.mxu0 %v24448_v56  ;;  %v15476_v47 = vld [vmem:[%s23672_s4 + $0x1f8] sm:$0xff]   ;;  %v9842_v53 = vmax.bf16 %v9636_v31, %v9634_v29  ;;  %v9127_v12 = vadd.f32 %v17503_v28, %v8865_v38  ;;  %v5692_v14 = vpop.f32.mrf.mxu1  ;;  %v20766_v54 = vld [vmem:[#allocation2 + $0xb0] sm:$0x44] }
 0x2b6   : > { %8677 = vmatpush1.bf16.msra.mxu1 %v25341_v39  ;;  %8637 = vmatprep.subr.bf16.mxu0 %v25344_v11  ;;  %v25349_v39 = vrot.slane %v19951_v58, 7  ;;  %v8866_v5 = vmul.f32 %v17393_v4, %v5690_v59  ;;  %v9905_v27 = vmax.bf16 %v9841_v50, %v9777_v57  ;;  %v9381_v33 = vmax.f32 %v9125_v18, 0.0 }
 0x2b7   : > { %8678 = vmatprep.subr.bf16.mxu1 %v25348_v44  ;;  %8696 = vmatprep.mubr.bf16.mxu1 %v24448_v56  ;;  %v9126_v13 = vadd.f32 %v17503_v28, %v8864_v40  ;;  %v25350_v58 = vcombine.low %v25342_v24, %v25343_v3  ;;  %v25351_v29 = vrot.slane %v19971_v41, 6  ;;  %v9906_v31 = vmax.bf16 %v9842_v53, %v9778_v32  ;;  %v5652_v24 = vpop.f32.mrf.mxu0 }
 0x2b8   : > { %v11079_v11 = vsel %vm10488_vm4, %v25349_v39, %v11077_v7  ;;  %v15477_v7 = vld [vmem:[%s23672_s4 + $0xb8] sm:$0xff]   ;;  %v9383_v57 = vmax.f32 %v9127_v12, 0.0  ;;  %v9128_v50 = vadd.f32 %v17503_v28, %v8866_v5  ;;  %v25352_v38 = vcombine.low %v25346_v19, %v25347_v17  ;;  %v5693_v5 = vpop.f32.mrf.mxu1  ;;  %v15543_v19 = vld [vmem:[%s23672_s4 + $0xf0] sm:$0xff]  }
 0x2b9   : > { %8638 = vmatpush1.bf16.msra.mxu0 %v25350_v58  ;;  %v11081_v56 = vsel %vm10491_vm5, %v25351_v29, %v11079_v11  ;;  %v15510_v58 = vld [vmem:[%s23672_s4 + $0x1b8] sm:$0xff]   ;;  %v25353_v3 = vrot.slane %v20072_v25, 3  ;;  %v25354_v18 = vrot.slane %v20089_v6, 2  ;;  %v20780_v32 = vpack.c.bf16 %v9381_v33, %v9381_v33  ;;  %v5729_v12 = vpop.f32.mrf.mxu0 }
 0x2ba   : > { %8679 = vmatpush1.bf16.msra.mxu1 %v25352_v38  ;;  %15138 = vmatprep.subr.bf16.mxu0 %v15475_v55  ;;  %v9382_v59 = vmax.f32 %v9126_v13, 0.0  ;;  %v25355_v55 = vrot.slane %v19992_v8, 5  ;;  %v25356_v14 = vrot.slane %v20099_v23, 1  ;;  %v14500_v11 = vcombine.low %v9905_v27, %v9906_v31  ;;  %v15544_v13 = vld [vmem:[%s23672_s4 + $0x1f0] sm:$0xff]   ;;  %v5770_v38 = vpop.f32.mrf.mxu1  ;;  %v20905_v27 = vld [vmem:[#allocation2 + $0x68] sm:$0x44] }
 0x2bb   : > { %v11102_v40 = vsel %vm10479_vm1, %v25354_v18, %v25353_v3  ;;  %15166 = vmatprep.subr.bf16.mxu1 %v15476_v47  ;;  %v20791_v53 = vpack.c.bf16 %v9383_v57, %v9383_v57  ;;  %v9384_v33 = vmax.f32 %v9128_v50, 0.0  ;;  %v14834_v47 = vcombine.low %v20766_v54, %v20766_v54  ;;  %v15545_v31 = vld [vmem:[%s23672_s4 + $0xb0] sm:$0xff]  }
 0x2bc   : > { %v11083_v17 = vsel %vm10494_vm6, %v25355_v55, %v11081_v56  ;;  %v11104_v39 = vsel %vm10482_vm2, %v25356_v14, %v11102_v40  ;;  %14480 = vmatmul.mubr.msk.bf16.vlgmr.msra.gmra.mxu0 %vm973_vm0, %v20553_v42  ;;  %v20800_v29 = vpack.c.bf16 %v9382_v59, %v9382_v59  ;;  %v8867_v56 = vmul.f32 %v17393_v4, %v5729_v12  ;;  %v15546_v18 = vld [vmem:[%s23672_s4 + $0x1b0] sm:$0xff]   ;;  %v15547_v40 = vld [vmem:[%s23672_s4 + $0xe8] sm:$0xff]   ;;  %v5772_v14 = vpop.f32.mrf.mxu1 }
 0x2bd   : > { %14481 = vmatmul.mubr.msk.bf16.vlgmr.msra.gmra.mxu1 %vm973_vm0, %v20553_v42  ;;  %15139 = vmatpush3.bf16.msra.mxu0 %v15477_v7  ;;  %v11105_v57 = vsel %vm10485_vm3, %v25345_v10, %v11104_v39  ;;  %10143 = vst [vmem:[#allocation2 + $0x40] sm:$0xff] %v14500_v11  ;;  %v20811_v50 = vpack.c.bf16 %v9384_v33, %v9384_v33  ;;  %v5731_v7 = vpop.f32.mrf.mxu0  ;;  %v25358_v59 = vrot.slane %v20192_v16, 7  ;;  %v15548_v39 = vld [vmem:[%s23672_s4 + $0x1e8] sm:$0xff]   ;;  %v25360_v11 = vrot.slane %v20315_v15, 6  ;;  %v15555_v42 = vld [vmem:[%s23672_s4 + $0xd8] sm:$0xff]   ;;  %v15570_v10 = vld [vmem:[%s23672_s4 + $0x180] sm:$0xff]  }
 0x2be   : > { %v8869_v24 = vmul.f32 %v17393_v4, %v5770_v38  ;;  %v25357_v3 = vpack.c.b16 %v20549_v1, %v19624_v30  ;;  %15167 = vmatpush3.bf16.msra.mxu1 %v15510_v58  ;;  %v9129_v55 = vadd.f32 %v17503_v28, %v8867_v56  ;;  %v25359_v30 = vpack.c.b16 %v20565_v60, %v20353_v0 }
 0x2bf   : > { %v11107_v5 = vsel %vm10488_vm4, %v25358_v59, %v11105_v57  ;;  %v8868_v58 = vmul.f32 %v17393_v4, %v5731_v7  ;;  %15140 = vmatprep.subr.bf16.mxu0 %v15543_v19  ;;  %v8870_v56 = vmul.f32 %v17393_v4, %v5772_v14  ;;  %v5733_v0 = vpop.f32.mrf.mxu0  ;;  %15168 = vmatprep.subr.bf16.mxu1 %v15544_v13  ;;  %v25361_v60 = vrot.slane %v20050_v43, 4  ;;  %v5774_v59 = vpop.f32.mrf.mxu1 }
 0x2c0   : > { %10733 = vmatprep.mubr.bf16.mxu0 %v25357_v3  ;;  %11320 = vmatprep.mubr.bf16.mxu1 %v25359_v30  ;;  %v11109_v33 = vsel %vm10491_vm5, %v25360_v11, %v11107_v5  ;;  %v9131_v12 = vadd.f32 %v17503_v28, %v8869_v24  ;;  %v25362_v19 = vrot.slane %v20411_v51, 5  ;;  %v9385_v3 = vmax.f32 %v9129_v55, 0.0  ;;  %v15549_v24 = vld [vmem:[%s23672_s4 + $0xa8] sm:$0xff]   ;;  %v20873_v0 = vld [vmem:[#allocation2 + $0xd8] sm:$0x44] }
 0x2c1   : > { %v20844_v38 = vsel %vm10497_vm7, %v25361_v60, %v11083_v17  ;;  %v9130_v7 = vadd.f32 %v17503_v28, %v8868_v58  ;;  %15141 = vmatpush3.bf16.msra.mxu0 %v15545_v31  ;;  %v25363_v13 = vrot.slane %v20662_v45, 4  ;;  %v20858_v17 = vld [vmem:[#allocation2] sm:$0x44]  ;;  %v20860_v30 = vunpack.c.l.b16 %v14834_v47  ;;  %v5734_v11 = vpop.f32.mrf.mxu0  ;;  %v5775_v60 = vpop.f32.mrf.mxu1 }
 0x2c2   : > { %v11111_v57 = vsel %vm10494_vm6, %v25362_v19, %v11109_v33  ;;  %v9779_v55 = vmax.bf16 %v20791_v53, %v20780_v32  ;;  %v9780_v58 = vmax.bf16 %v20811_v50, %v20800_v29  ;;  %v9387_v31 = vmax.f32 %v9131_v12, 0.0  ;;  %15169 = vmatpush3.bf16.msra.mxu1 %v15546_v18  ;;  %15142 = vmatprep.subr.bf16.mxu0 %v15547_v40  ;;  %v15550_v33 = vld [vmem:[%s23672_s4 + $0x1a8] sm:$0xff]   ;;  %v15551_v47 = vld [vmem:[%s23672_s4 + $0xe0] sm:$0xff]   ;;  %v20882_v19 = vld [vmem:[#allocation2 + $0x18] sm:$0x44] }
 0x2c3   : > { %v20856_v5 = vsel %vm10497_vm7, %v25363_v13, %v11111_v57  ;;  %25364 = vst [vmem:[#allocation97_spill] sm:$0xff] %v20860_v30  ;;  %v9132_v14 = vadd.f32 %v17503_v28, %v8870_v56  ;;  %v9641_v32 = vpack.c.bf16 %v9385_v3, %v9385_v3  ;;  %v9386_v53 = vmax.f32 %v9130_v7, 0.0  ;;  %15170 = vmatprep.subr.bf16.mxu1 %v15548_v39  ;;  %v15552_v29 = vld [vmem:[%s23672_s4 + $0x1e0] sm:$0xff]   ;;  %v5891_v56 = vpop.f32.mrf.mxu0  ;;  %v5932_v59 = vpop.f32.mrf.mxu1 }
 0x2c4   : > { %v9643_v40 = vpack.c.bf16 %v9387_v31, %v9387_v31  ;;  %v8871_v7 = vmul.f32 %v17393_v4, %v5891_v56  ;;  %v15553_v13 = vld [vmem:[%s23672_s4 + $0xa0] sm:$0xff]   ;;  %v20892_v31 = vld [vmem:[#allocation2 + $0x50] sm:$0x44] }
 0x2c5   : > { %v9388_v12 = vmax.f32 %v9132_v14, 0.0  ;;  %v9642_v3 = vpack.c.bf16 %v9386_v53, %v9386_v53  ;;  %15143 = vmatpush3.bf16.msra.mxu0 %v15549_v24  ;;  %v8873_v53 = vmul.f32 %v17393_v4, %v5932_v59  ;;  %v5893_v56 = vpop.f32.mrf.mxu0  ;;  %v15554_v24 = vld [vmem:[%s23672_s4 + $0x1a0] sm:$0xff]   ;;  %v20919_v14 = vld [vmem:[#allocation2 + $0x30] sm:$0x44]  ;;  %v15557_v59 = vld [vmem:[%s23672_s4 + $0x98] sm:$0xff]  }
 0x2c6   : > { %v9843_v60 = vmax.bf16 %v9643_v40, %v9641_v32  ;;  %15171 = vmatpush3.bf16.msra.mxu1 %v15550_v33  ;;  %15144 = vmatprep.subr.bf16.mxu0 %v15551_v47  ;;  %v9133_v32 = vadd.f32 %v17503_v28, %v8871_v7  ;;  %v8872_v40 = vmul.f32 %v17393_v4, %v5893_v56  ;;  %v15556_v33 = vld [vmem:[%s23672_s4 + $0x1d8] sm:$0xff]   ;;  %v20940_v47 = vld [vmem:[#allocation2 + $0x80] sm:$0x44]  ;;  %v21553_v52 = vld [vmem:[#allocation2 + $0x40] sm:$0x11] }
 0x2c7   : > { %v9644_v1 = vpack.c.bf16 %v9388_v12, %v9388_v12  ;;  %v5934_v12 = vpop.f32.mrf.mxu1  ;;  %15172 = vmatprep.subr.bf16.mxu1 %v15552_v29  ;;  %v9135_v11 = vadd.f32 %v17503_v28, %v8873_v53  ;;  %v5895_v7 = vpop.f32.mrf.mxu0  ;;  %v20938_v29 = vld [vmem:[#allocation2 + $0x48] sm:$0x44] }
 0x2c8   : > { %v8874_v50 = vmul.f32 %v17393_v4, %v5934_v12  ;;  %v9389_v56 = vmax.f32 %v9133_v32, 0.0  ;;  %v9134_v39 = vadd.f32 %v17503_v28, %v8872_v40  ;;  %v9907_v12 = vmax.bf16 %v9843_v60, %v9779_v55  ;;  %v15559_v40 = vld [vmem:[%s23672_s4 + $0xd0] sm:$0xff]  }
 0x2c9   : > { %v9844_v44 = vmax.bf16 %v9644_v1, %v9642_v3  ;;  %v5936_v57 = vpop.f32.mrf.mxu1  ;;  %15145 = vmatpush3.bf16.msra.mxu0 %v15553_v13  ;;  %v15558_v1 = vld [vmem:[%s23672_s4 + $0x198] sm:$0xff]   ;;  %v9391_v7 = vmax.f32 %v9135_v11, 0.0  ;;  %v5896_v13 = vpop.f32.mrf.mxu0  ;;  %v25369_v55 = vcombine.high %v20858_v17, %v20858_v17 }
 0x2ca   : > { %v9136_v57 = vadd.f32 %v17503_v28, %v8874_v50  ;;  %15173 = vmatpush3.bf16.msra.mxu1 %v15554_v24  ;;  %15146 = vmatprep.subr.bf16.mxu0 %v15555_v42  ;;  %v9390_v3 = vmax.f32 %v9134_v39, 0.0  ;;  %v20951_v11 = vpack.c.bf16 %v9389_v56, %v9389_v56  ;;  %v15561_v13 = vld [vmem:[%s23672_s4 + $0x90] sm:$0xff]   ;;  %v25367_v42 = vcombine.low %v20858_v17, %v20858_v17 }
 0x2cb   : > { %v9908_v32 = vmax.bf16 %v9844_v44, %v9780_v58  ;;  %v5937_v18 = vpop.f32.mrf.mxu1  ;;  %15174 = vmatprep.subr.bf16.mxu1 %v15556_v33  ;;  %v15560_v44 = vld [vmem:[%s23672_s4 + $0x1d0] sm:$0xff]   ;;  %v20953_v60 = vpack.c.bf16 %v9391_v7, %v9391_v7  ;;  %v5973_v39 = vpop.f32.mrf.mxu0  ;;  %v21002_v53 = vunpack.c.l.b16 %v25369_v55 }
 0x2cc   : > { %v9392_v18 = vmax.f32 %v9136_v57, 0.0  ;;  %v8875_v24 = vmul.f32 %v17393_v4, %v5973_v39  ;;  %v15562_v39 = vld [vmem:[%s23672_s4 + $0x190] sm:$0xff]   ;;  %v20991_v58 = vunpack.c.l.b16 %v25367_v42 }
 0x2cd   : > { %v14501_v50 = vcombine.low %v9907_v12, %v9908_v32  ;;  %v6014_v33 = vpop.f32.mrf.mxu1  ;;  %15147 = vmatpush3.bf16.msra.mxu0 %v15557_v59  ;;  %v20965_v32 = vpack.c.bf16 %v9390_v3, %v9390_v3  ;;  %v5975_v57 = vpop.f32.mrf.mxu0  ;;  %v15563_v12 = vld [vmem:[%s23672_s4 + $0xc8] sm:$0xff]   ;;  %25370 = vst [vmem:[#allocation126_spill] sm:$0xff] %v21002_v53 }
 0x2ce   : > { %v20967_v7 = vpack.c.bf16 %v9392_v18, %v9392_v18  ;;  %v8877_v59 = vmul.f32 %v17393_v4, %v6014_v33  ;;  %15175 = vmatpush3.bf16.msra.mxu1 %v15558_v1  ;;  %15148 = vmatprep.subr.bf16.mxu0 %v15559_v40  ;;  %v9137_v18 = vadd.f32 %v17503_v28, %v8875_v24  ;;  %v15564_v40 = vld [vmem:[%s23672_s4 + $0x1c8] sm:$0xff]  }
 0x2cf   : > { %10144 = vst [vmem:[#allocation2 + $0xc8] sm:$0xff] %v14501_v50  ;;  %v25365_v50 = vcombine.high %v20766_v54, %v20766_v54  ;;  %v8876_v33 = vmul.f32 %v17393_v4, %v5975_v57  ;;  %v6016_v1 = vpop.f32.mrf.mxu1  ;;  %15176 = vmatprep.subr.bf16.mxu1 %v15560_v44  ;;  %25368 = vst [vmem:[#allocation125_spill] sm:$0xff] %v20991_v58  ;;  %v9781_v54 = vmax.bf16 %v20953_v60, %v20951_v11  ;;  %v5977_v44 = vpop.f32.mrf.mxu0  ;;  %v15565_v11 = vld [vmem:[%s23672_s4 + $0x88] sm:$0xff]  }
 0x2d0   : > { %v9139_v24 = vadd.f32 %v17503_v28, %v8877_v59  ;;  %v8878_v57 = vmul.f32 %v17393_v4, %v6016_v1  ;;  %v9393_v56 = vmax.f32 %v9137_v18, 0.0  ;;  %v25371_v60 = vcombine.low %v20873_v0, %v20873_v0  ;;  %v15566_v44 = vld [vmem:[%s23672_s4 + $0x188] sm:$0xff]  }
 0x2d1   : > { %v20979_v3 = vunpack.c.l.b16 %v25365_v50  ;;  %v20997_v50 = vld [vmem:[#allocation2 + $0x88] sm:$0x44]  ;;  %v9138_v45 = vadd.f32 %v17503_v28, %v8876_v33  ;;  %v6018_v42 = vpop.f32.mrf.mxu1  ;;  %15149 = vmatpush3.bf16.msra.mxu0 %v15561_v13  ;;  %v25373_v1 = vcombine.high %v20873_v0, %v20873_v0  ;;  %v9782_v55 = vmax.bf16 %v20967_v7, %v20965_v32  ;;  %v5978_v33 = vpop.f32.mrf.mxu0 }
 0x2d2   : > { %v21011_v59 = vunpack.c.l.b16 %v25371_v60  ;;  %v9395_v18 = vmax.f32 %v9139_v24, 0.0  ;;  %v9140_v13 = vadd.f32 %v17503_v28, %v8878_v57  ;;  %15177 = vmatpush3.bf16.msra.mxu1 %v15562_v39  ;;  %15150 = vmatprep.subr.bf16.mxu0 %v15563_v12  ;;  %v15567_v42 = vld [vmem:[%s23672_s4 + $0xc0] sm:$0xff]   ;;  %v25375_v0 = vcombine.low %v20882_v19, %v20882_v19 }
 0x2d3   : > { %25366 = vst [vmem:[#allocation98_spill] sm:$0xff] %v20979_v3  ;;  %v21016_v17 = vunpack.c.l.b16 %v25373_v1  ;;  %v9649_v32 = vpack.c.bf16 %v9393_v56, %v9393_v56  ;;  %v9394_v7 = vmax.f32 %v9138_v45, 0.0  ;;  %v6019_v24 = vpop.f32.mrf.mxu1  ;;  %15178 = vmatprep.subr.bf16.mxu1 %v15564_v40  ;;  %v15568_v12 = vld [vmem:[%s23672_s4 + $0x1c0] sm:$0xff]   ;;  %v14852_v39 = vcombine.low %v20997_v50, %v20997_v50  ;;  %v6135_v51 = vpop.f32.mrf.mxu0 }
 0x2d4   : > { %25372 = vst [vmem:[#allocation99_spill] sm:$0xff] %v21011_v59  ;;  %v21030_v60 = vunpack.c.l.b16 %v25375_v0  ;;  %v9651_v1 = vpack.c.bf16 %v9395_v18, %v9395_v18  ;;  %v9396_v33 = vmax.f32 %v9140_v13, 0.0  ;;  %v25377_v0 = vcombine.high %v20882_v19, %v20882_v19  ;;  %v15569_v18 = vld [vmem:[%s23672_s4 + $0x80] sm:$0xff]  }
 0x2d5   : > { %25374 = vst [vmem:[#allocation100_spill] sm:$0xff] %v21016_v17  ;;  %v25379_v45 = vcombine.low %v20892_v31, %v20892_v31  ;;  %v9650_v24 = vpack.c.bf16 %v9394_v7, %v9394_v7  ;;  %v8879_v15 = vmul.f32 %v17393_v4, %v6135_v51  ;;  %v6176_v16 = vpop.f32.mrf.mxu1  ;;  %15151 = vmatpush3.bf16.msra.mxu0 %v15565_v11  ;;  %v6137_v11 = vpop.f32.mrf.mxu0 }
 0x2d6   : > { %25376 = vst [vmem:[#allocation101_spill] sm:$0xff] %v21030_v60  ;;  %v21042_v56 = vunpack.c.l.b16 %v25377_v0  ;;  %v25381_v13 = vcombine.high %v20892_v31, %v20892_v31  ;;  %v25383_v0 = vcombine.low %v20905_v27, %v20905_v27  ;;  %v9652_v7 = vpack.c.bf16 %v9396_v33, %v9396_v33  ;;  %15179 = vmatpush3.bf16.msra.mxu1 %v15566_v44 }
 0x2d7   : > { %v21047_v40 = vunpack.c.l.b16 %v25379_v45  ;;  %v9845_v45 = vmax.bf16 %v9651_v1, %v9649_v32  ;;  %v8881_v51 = vmul.f32 %v17393_v4, %v6176_v16  ;;  %15152 = vmatprep.subr.bf16.mxu0 %v15567_v42  ;;  %v25385_v31 = vcombine.high %v20905_v27, %v20905_v27  ;;  %v6178_v32 = vpop.f32.mrf.mxu1  ;;  %15180 = vmatprep.subr.bf16.mxu1 %v15568_v12 }
 0x2d8   : > { %25378 = vst [vmem:[#allocation102_spill] sm:$0xff] %v21042_v56  ;;  %v21056_v19 = vunpack.c.l.b16 %v25381_v13  ;;  %v21061_v57 = vunpack.c.l.b16 %v25383_v0  ;;  %v9141_v43 = vadd.f32 %v17503_v28, %v8879_v15  ;;  %v8880_v0 = vmul.f32 %v17393_v4, %v6137_v11  ;;  %v6139_v15 = vpop.f32.mrf.mxu0 }
 0x2d9   : > { %25380 = vst [vmem:[#allocation103_spill] sm:$0xff] %v21047_v40  ;;  %v21070_v13 = vunpack.c.l.b16 %v25385_v31  ;;  %v25387_v16 = vcombine.low %v20919_v14, %v20919_v14  ;;  %v25389_v42 = vcombine.high %v20919_v14, %v20919_v14  ;;  %v9846_v33 = vmax.bf16 %v9652_v7, %v9650_v24  ;;  %v6180_v6 = vpop.f32.mrf.mxu1  ;;  %15153 = vmatpush3.bf16.msra.mxu0 %v15569_v18 }
 0x2da   : > { %25382 = vst [vmem:[#allocation104_spill] sm:$0xff] %v21056_v19  ;;  %25384 = vst [vmem:[#allocation17_spill] sm:$0xff] %v21061_v57  ;;  %v9143_v27 = vadd.f32 %v17503_v28, %v8881_v51  ;;  %v8882_v31 = vmul.f32 %v17393_v4, %v6178_v32  ;;  %v25391_v11 = vcombine.low %v20938_v29, %v20938_v29  ;;  %v9397_v8 = vmax.f32 %v9141_v43, 0.0 }
 0x2db   : > { %25386 = vst [vmem:[#allocation105_spill] sm:$0xff] %v21070_v13  ;;  %v21077_v44 = vunpack.c.l.b16 %v25387_v16  ;;  %v21082_v1 = vunpack.c.l.b16 %v25389_v42  ;;  %v9909_v23 = vmax.bf16 %v9845_v45, %v9781_v54  ;;  %v9142_v16 = vadd.f32 %v17503_v28, %v8880_v0  ;;  %15181 = vmatpush3.bf16.msra.mxu1 %v15570_v10  ;;  %v6140_v42 = vpop.f32.mrf.mxu0  ;;  %v6181_v54 = vpop.f32.mrf.mxu1 }
 0x2dc   : > { %v21089_v12 = vunpack.c.l.b16 %v25391_v11  ;;  %v25393_v14 = vcombine.high %v20938_v29, %v20938_v29  ;;  %v9910_v7 = vmax.bf16 %v9846_v33, %v9782_v55  ;;  %v9399_v51 = vmax.f32 %v9143_v27, 0.0 }
 0x2dd   : > { %25388 = vst [vmem:[#allocation18_spill] sm:$0xff] %v21077_v44  ;;  %25390 = vst [vmem:[#allocation20_spill] sm:$0xff] %v21082_v1  ;;  %v9144_v32 = vadd.f32 %v17503_v28, %v8882_v31  ;;  %v11660_v15 = vrot.slane %v20991_v58, 4  ;;  %v21099_v11 = vpack.c.bf16 %v9397_v8, %v9397_v8  ;;  %v9398_v43 = vmax.f32 %v9142_v16, 0.0  ;;  %v6217_v33 = vpop.f32.mrf.mxu0  ;;  %v6258_v31 = vpop.f32.mrf.mxu1 }
 0x2de   : > { %25392 = vst [vmem:[#allocation21_spill] sm:$0xff] %v21089_v12  ;;  %v21095_v24 = vunpack.c.l.b16 %v25393_v14  ;;  %v25395_v6 = vcombine.low %v20940_v47, %v20940_v47  ;;  %v11662_v29 = vrot.slane %v21011_v59, 3  ;;  %v14502_v45 = vcombine.low %v9909_v23, %v9910_v7  ;;  %v11349_v59 = vld [vmem:[#allocation2 + $0x60] sm:$0x44] }
 0x2df   : > { %v21107_v55 = vpack.c.bf16 %v9399_v51, %v9399_v51  ;;  %v9400_v0 = vmax.f32 %v9144_v32, 0.0  ;;  %v25397_v10 = vpack.c.b16 %v20725_v9, %v20675_v61  ;;  %v11664_v8 = vrot.slane %v21030_v60, 2  ;;  %v6219_v42 = vpop.f32.mrf.mxu0  ;;  %v21242_v60 = vld [vmem:[#allocation2 + $0x18] sm:$0x88] }
 0x2e0   : > { %25394 = vst [vmem:[#allocation22_spill] sm:$0xff] %v21095_v24  ;;  %v21104_v18 = vunpack.c.l.b16 %v25395_v6  ;;  %v8883_v27 = vmul.f32 %v17393_v4, %v6217_v33  ;;  %v25398_v16 = vpack.c.b16 %v20856_v5, %v20844_v38  ;;  %v25399_v23 = vcombine.high %v20940_v47, %v20940_v47  ;;  %10145 = vst [vmem:[#allocation2 + $0xe0] sm:$0xff] %v14502_v45  ;;  %v6260_v6 = vpop.f32.mrf.mxu1 }
 0x2e1   : > { %10734 = vmatmul.mubr.bf16.vlgmr.msra.gmra.mxu0 %v25397_v10  ;;  %v21122_v7 = vunpack.c.l.b16 %v14852_v39  ;;  %v11666_v51 = vrot.slane %v21047_v40, 1  ;;  %v9654_v61 = vpack.c.bf16 %v9398_v43, %v9398_v43  ;;  %v9656_v9 = vpack.c.bf16 %v9400_v0, %v9400_v0 }
 0x2e2   : > { %25396 = vst [vmem:[#allocation23_spill] sm:$0xff] %v21104_v18  ;;  %11321 = vmatmul.mubr.bf16.vlgmr.msra.gmra.mxu1 %v25398_v16  ;;  %v21120_v14 = vunpack.c.l.b16 %v25399_v23  ;;  %v8885_v32 = vmul.f32 %v17393_v4, %v6258_v31  ;;  %v25402_v54 = vrot.slane %v20860_v30, 5  ;;  %v9145_v5 = vadd.f32 %v17503_v28, %v8883_v27  ;;  %v21141_v31 = vld [vmem:[#allocation2 + $0xe8] sm:$0x44] }
 0x2e3   : > { %25401 = vst [vmem:[#allocation26_spill] sm:$0xff] %v21122_v7  ;;  %v8884_v47 = vmul.f32 %v17393_v4, %v6219_v42  ;;  %v25403_v39 = vcombine.high %v20997_v50, %v20997_v50  ;;  %v9783_v45 = vmax.bf16 %v21107_v55, %v21099_v11  ;;  %v8886_v10 = vmul.f32 %v17393_v4, %v6260_v6  ;;  %v6262_v50 = vpop.f32.mrf.mxu1 }
 0x2e4   : > { %25400 = vst [vmem:[#allocation25_spill] sm:$0xff] %v21120_v14  ;;  %v11661_v38 = vsel %vm10479_vm1, %v11660_v15, %v25402_v54  ;;  %v9147_v0 = vadd.f32 %v17503_v28, %v8885_v32  ;;  %v6221_v15 = vpop.f32.mrf.mxu0  ;;  %v9401_v16 = vmax.f32 %v9145_v5, 0.0  ;;  %v9784_v54 = vmax.bf16 %v9656_v9, %v9654_v61 }
 0x2e5   : > { %v21134_v33 = vunpack.c.l.b16 %v25403_v39  ;;  %v11663_v43 = vsel %vm10482_vm2, %v11662_v29, %v11661_v38  ;;  %v9146_v23 = vadd.f32 %v17503_v28, %v8884_v47  ;;  %v9148_v11 = vadd.f32 %v17503_v28, %v8886_v10 }
 0x2e6   : > { %v11665_v27 = vsel %vm10485_vm3, %v11664_v8, %v11663_v43  ;;  %v9403_v38 = vmax.f32 %v9147_v0, 0.0  ;;  %v6222_v55 = vpop.f32.mrf.mxu0  ;;  %v9657_v6 = vpack.c.bf16 %v9401_v16, %v9401_v16  ;;  %v6263_v8 = vpop.f32.mrf.mxu1  ;;  %v14854_v5 = vcombine.low %v21141_v31, %v21141_v31 }
 0x2e7   : > { %25404 = vst [vmem:[#allocation107_spill] sm:$0xff] %v21134_v33  ;;  %v11667_v42 = vsel %vm10488_vm4, %v11666_v51, %v11665_v27  ;;  %v9402_v39 = vmax.f32 %v9146_v23, 0.0  ;;  %v11674_v47 = vrot.slane %v21002_v53, 4  ;;  %v9404_v43 = vmax.f32 %v9148_v11, 0.0 }
 0x2e8   : > { %v21150_v32 = vsel %vm10491_vm5, %v21061_v57, %v11667_v42  ;;  %v9659_v51 = vpack.c.bf16 %v9403_v38, %v9403_v38  ;;  %v6379_v15 = vpop.f32.mrf.mxu0  ;;  %v14855_v61 = vcombine.high %v21141_v31, %v21141_v31  ;;  %v6420_v27 = vpop.f32.mrf.mxu1  ;;  %v11673_v16 = vrot.slane %v20979_v3, 5 }
 0x2e9   : > { %25405 = vst [vmem:[#allocation108_spill] sm:$0xff] %v21150_v32  ;;  %v9658_v0 = vpack.c.bf16 %v9402_v39, %v9402_v39  ;;  %v8887_v10 = vmul.f32 %v17393_v4, %v6379_v15  ;;  %v11676_v23 = vrot.slane %v21016_v17, 3  ;;  %v9660_v42 = vpack.c.bf16 %v9404_v43, %v9404_v43 }
 0x2ea   : > { %v9847_v50 = vmax.bf16 %v9659_v51, %v9657_v6  ;;  %v8889_v55 = vmul.f32 %v17393_v4, %v6420_v27  ;;  %v6381_v38 = vpop.f32.mrf.mxu0  ;;  %v11678_v11 = vrot.slane %v21042_v56, 2  ;;  %v6422_v9 = vpop.f32.mrf.mxu1  ;;  %v11675_v39 = vsel %vm10479_vm1, %v11674_v47, %v11673_v16 }
 0x2eb   : > { %v9149_v8 = vadd.f32 %v17503_v28, %v8887_v10  ;;  %v8888_v31 = vmul.f32 %v17393_v4, %v6381_v38  ;;  %v11680_v15 = vrot.slane %v21056_v19, 1  ;;  %v9848_v29 = vmax.bf16 %v9660_v42, %v9658_v0 }
 0x2ec   : > { %v9151_v40 = vadd.f32 %v17503_v28, %v8889_v55  ;;  %v8890_v6 = vmul.f32 %v17393_v4, %v6422_v9  ;;  %v6383_v51 = vpop.f32.mrf.mxu0  ;;  %v11683_v43 = vrot.slane %v21082_v1, 7  ;;  %v9911_v27 = vmax.bf16 %v9847_v50, %v9783_v45  ;;  %v6424_v10 = vpop.f32.mrf.mxu1 }
 0x2ed   : > { %v9405_v17 = vmax.f32 %v9149_v8, 0.0  ;;  %v9150_v56 = vadd.f32 %v17503_v28, %v8888_v31  ;;  %v11677_v38 = vsel %vm10482_vm2, %v11676_v23, %v11675_v39  ;;  %v9912_v53 = vmax.bf16 %v9848_v29, %v9784_v54 }
 0x2ee   : > { %v9407_v3 = vmax.f32 %v9151_v40, 0.0  ;;  %v9152_v47 = vadd.f32 %v17503_v28, %v8890_v6  ;;  %v6384_v16 = vpop.f32.mrf.mxu0  ;;  %v11679_v0 = vsel %vm10485_vm3, %v11678_v11, %v11677_v38  ;;  %v6425_v55 = vpop.f32.mrf.mxu1  ;;  %v21174_v9 = vunpack.c.l.b16 %v14854_v5 }
 0x2ef   : > { %v9406_v42 = vmax.f32 %v9150_v56, 0.0  ;;  %v11681_v51 = vsel %vm10488_vm4, %v11680_v15, %v11679_v0  ;;  %v11685_v45 = vrot.slane %v21095_v24, 6  ;;  %v14503_v50 = vcombine.low %v9911_v27, %v9912_v53 }
 0x2f0   : > { %25406 = vst [vmem:[#allocation27_spill] sm:$0xff] %v21174_v9  ;;  %v21178_v8 = vpack.c.bf16 %v9405_v17, %v9405_v17  ;;  %v21180_v31 = vpack.c.bf16 %v9407_v3, %v9407_v3  ;;  %v9408_v29 = vmax.f32 %v9152_v47, 0.0  ;;  %v6461_v40 = vpop.f32.mrf.mxu0  ;;  %v6502_v23 = vpop.f32.mrf.mxu1  ;;  %v21183_v39 = vunpack.c.l.b16 %v14855_v61 }
 0x2f1   : > { %v8891_v54 = vmul.f32 %v17393_v4, %v6461_v40  ;;  %v11682_v56 = vsel %vm10491_vm5, %v21070_v13, %v11681_v51  ;;  %v11687_v5 = vrot.slane %v21104_v18, 5  ;;  %10146 = vst [vmem:[#allocation2 + $0x90] sm:$0xff] %v14503_v50  ;;  %v21188_v11 = vpack.c.bf16 %v9406_v42, %v9406_v42 }
 0x2f2   : > { %25407 = vst [vmem:[#allocation28_spill] sm:$0xff] %v21183_v39  ;;  %v21190_v53 = vpack.c.bf16 %v9408_v29, %v9408_v29  ;;  %v8893_v3 = vmul.f32 %v17393_v4, %v6502_v23  ;;  %v6463_v17 = vpop.f32.mrf.mxu0  ;;  %v11684_v15 = vsel %vm10494_vm6, %v11683_v43, %v11682_v56  ;;  %v6504_v27 = vpop.f32.mrf.mxu1  ;;  %v11701_v38 = vrot.slane %v21120_v14, 5  ;;  %v11348_v29 = vld [vmem:[#allocation2 + $0xb8] sm:$0x44] }
 0x2f3   : > { %v9153_v6 = vadd.f32 %v17503_v28, %v8891_v54  ;;  %v8892_v61 = vmul.f32 %v17393_v4, %v6463_v17  ;;  %v21197_v10 = vsel %vm10497_vm7, %v11685_v45, %v11684_v15  ;;  %v9785_v47 = vmax.bf16 %v21180_v31, %v21178_v8 }
 0x2f4   : > { %25408 = vst [vmem:[#allocation29_spill] sm:$0xff] %v21197_v10  ;;  %v9155_v16 = vadd.f32 %v17503_v28, %v8893_v3  ;;  %v8894_v0 = vmul.f32 %v17393_v4, %v6504_v27  ;;  %v6465_v42 = vpop.f32.mrf.mxu0  ;;  %v6506_v50 = vpop.f32.mrf.mxu1  ;;  %v9786_v54 = vmax.bf16 %v21190_v53, %v21188_v11  ;;  %v11688_v56 = vrot.slane %v21122_v7, 4 }
 0x2f5   : > { %v9409_v55 = vmax.f32 %v9153_v6, 0.0  ;;  %v9154_v51 = vadd.f32 %v17503_v28, %v8892_v61  ;;  %v11702_v6 = vrot.slane %v21134_v33, 4  ;;  %v14856_v40 = vcombine.low %v11348_v29, %v11348_v29 }
 0x2f6   : > { %v9411_v8 = vmax.f32 %v9155_v16, 0.0  ;;  %v9156_v31 = vadd.f32 %v17503_v28, %v8894_v0  ;;  %v6466_v23 = vpop.f32.mrf.mxu0  ;;  %v6507_v15 = vpop.f32.mrf.mxu1  ;;  %v14857_v45 = vcombine.high %v11348_v29, %v11348_v29  ;;  %v21219_v61 = vsel %vm10479_vm1, %v11688_v56, %v11687_v5  ;;  %v21230_v5 = vld [vmem:[#allocation2 + $0xb0] sm:$0x88]  ;;  %v21232_v56 = vld [vmem:[#allocation2] sm:$0x88] }
 0x2f7   : > { %v9665_v3 = vpack.c.bf16 %v9409_v55, %v9409_v55  ;;  %v9410_v17 = vmax.f32 %v9154_v51, 0.0  ;;  %v11704_v7 = vrot.slane %v21183_v39, 3 }
 0x2f8   : > { %v9667_v27 = vpack.c.bf16 %v9411_v8, %v9411_v8  ;;  %v9412_v42 = vmax.f32 %v9156_v31, 0.0  ;;  %v6623_v50 = vpop.f32.mrf.mxu0  ;;  %v6664_v53 = vpop.f32.mrf.mxu1  ;;  %v21587_v36 = vld [vmem:[#allocation2 + $0x90] sm:$0x11] }
 0x2f9   : > { %v9666_v43 = vpack.c.bf16 %v9410_v17, %v9410_v17  ;;  %v8895_v11 = vmul.f32 %v17393_v4, %v6623_v50  ;;  %v8897_v23 = vmul.f32 %v17393_v4, %v6664_v53  ;;  %v21224_v17 = vsel %vm10479_vm1, %v11702_v6, %v11701_v38  ;;  %v21240_v50 = vld [vmem:[#allocation2 + $0xd8] sm:$0x88] }
 0x2fa   : > { %v9849_v55 = vmax.bf16 %v9667_v27, %v9665_v3  ;;  %v9668_v51 = vpack.c.bf16 %v9412_v42, %v9412_v42  ;;  %v6625_v15 = vpop.f32.mrf.mxu0  ;;  %v6666_v31 = vpop.f32.mrf.mxu1  ;;  %v21235_v38 = vunpack.c.l.b16 %v14856_v40  ;;  %v21237_v6 = vunpack.c.l.b16 %v14857_v45 }
 0x2fb   : > { %v9157_v8 = vadd.f32 %v17503_v28, %v8895_v11  ;;  %v8896_v29 = vmul.f32 %v17393_v4, %v6625_v15  ;;  %v9159_v3 = vadd.f32 %v17503_v28, %v8897_v23  ;;  %v8898_v27 = vmul.f32 %v17393_v4, %v6666_v31 }
 0x2fc   : > { %v9850_v16 = vmax.bf16 %v9668_v51, %v9666_v43  ;;  %v6627_v42 = vpop.f32.mrf.mxu0  ;;  %v6668_v0 = vpop.f32.mrf.mxu1  ;;  %25409 = vst [vmem:[#allocation30_spill] sm:$0xff] %v21235_v38  ;;  %25410 = vst [vmem:[#allocation31_spill] sm:$0xff] %v21237_v6  ;;  %v9913_v43 = vmax.bf16 %v9849_v55, %v9785_v47 }
 0x2fd   : > { %v9413_v11 = vmax.f32 %v9157_v8, 0.0  ;;  %v9158_v15 = vadd.f32 %v17503_v28, %v8896_v29  ;;  %v9415_v23 = vmax.f32 %v9159_v3, 0.0  ;;  %v9160_v31 = vadd.f32 %v17503_v28, %v8898_v27  ;;  %v21254_v29 = vld [vmem:[#allocation2 + $0x50] sm:$0x88] }
 0x2fe   : > { %v9914_v51 = vmax.bf16 %v9850_v16, %v9786_v54  ;;  %v6628_v42 = vpop.f32.mrf.mxu0  ;;  %v6669_v57 = vpop.f32.mrf.mxu1 }
 0x2ff   : > { %v9414_v53 = vmax.f32 %v9158_v15, 0.0  ;;  %v21250_v54 = vpack.c.bf16 %v9413_v11, %v9413_v11  ;;  %v21252_v16 = vpack.c.bf16 %v9415_v23, %v9415_v23  ;;  %v9416_v0 = vmax.f32 %v9160_v31, 0.0  ;;  %v21268_v42 = vld [vmem:[#allocation2 + $0x68] sm:$0x88] }
 0x300   : > { %v14504_v45 = vcombine.low %v9913_v43, %v9914_v51  ;;  %v6705_v55 = vpop.f32.mrf.mxu0  ;;  %v6746_v3 = vpop.f32.mrf.mxu1 }
 0x301   : > { %v8899_v57 = vmul.f32 %v17393_v4, %v6705_v55  ;;  %v21263_v11 = vpack.c.bf16 %v9414_v53, %v9414_v53  ;;  %v21265_v51 = vpack.c.bf16 %v9416_v0, %v9416_v0  ;;  %v8901_v23 = vmul.f32 %v17393_v4, %v6746_v3 }
 0x302   : > { %10147 = vst [vmem:[#allocation2 + $0x70] sm:$0xff] %v14504_v45  ;;  %v6707_v31 = vpop.f32.mrf.mxu0  ;;  %v6748_v47 = vpop.f32.mrf.mxu1  ;;  %v9787_v0 = vmax.bf16 %v21252_v16, %v21250_v54 }
 0x303   : > { %v9161_v27 = vadd.f32 %v17503_v28, %v8899_v57  ;;  %v8900_v15 = vmul.f32 %v17393_v4, %v6707_v31  ;;  %v9163_v3 = vadd.f32 %v17503_v28, %v8901_v23  ;;  %v8902_v43 = vmul.f32 %v17393_v4, %v6748_v47 }
 0x304   : > { %v6709_v40 = vpop.f32.mrf.mxu0  ;;  %v6750_v8 = vpop.f32.mrf.mxu1  ;;  %v9788_v54 = vmax.bf16 %v21265_v51, %v21263_v11  ;;  %v11690_v23 = vrot.slane %v21174_v9, 3  ;;  %v14858_v11 = vcombine.low %v11349_v59, %v11349_v59  ;;  %v14859_v51 = vcombine.high %v11349_v59, %v11349_v59 }
 0x305   : > { %v9417_v57 = vmax.f32 %v9161_v27, 0.0  ;;  %v9162_v31 = vadd.f32 %v17503_v28, %v8900_v15  ;;  %v9419_v16 = vmax.f32 %v9163_v3, 0.0  ;;  %v9164_v47 = vadd.f32 %v17503_v28, %v8902_v43  ;;  %v21292_v27 = vld [vmem:[#allocation2 + $0x30] sm:$0x88]  ;;  %v21297_v3 = vld [vmem:[#allocation2 + $0x48] sm:$0x88] }
 0x306   : > { %v6710_v40 = vpop.f32.mrf.mxu0  ;;  %v6751_v55 = vpop.f32.mrf.mxu1  ;;  %25411 = vst [vmem:[#allocation32_spill] sm:$0xff] %v21297_v3  ;;  %v21307_v59 = vsel %vm10482_vm2, %v11690_v23, %v21219_v61  ;;  %v21319_v61 = vld [vmem:[#allocation2 + $0x80] sm:$0x88]  ;;  %v21321_v23 = vld [vmem:[#allocation2 + $0x88] sm:$0x88]  ;;  %v21326_v19 = vunpack.c.l.b16 %v14858_v11  ;;  %v15576_v11 = vld [vmem:[%s23672_s4 + $0x3f0] sm:$0xff]  }
 0x307   : > { %v9673_v15 = vpack.c.bf16 %v9417_v57, %v9417_v57  ;;  %v9418_v8 = vmax.f32 %v9162_v31, 0.0  ;;  %v9675_v53 = vpack.c.bf16 %v9419_v16, %v9419_v16  ;;  %v9420_v18 = vmax.f32 %v9164_v47, 0.0  ;;  %25412 = vst [vmem:[#allocation127_spill] sm:$0xff] %v21319_v61  ;;  %25413 = vst [vmem:[#allocation128_spill] sm:$0xff] %v21321_v23 }
 0x308   : > { %v6867_v58 = vpop.f32.mrf.mxu0  ;;  %v6908_v30 = vpop.f32.mrf.mxu1  ;;  %v21313_v57 = vsel %vm10482_vm2, %v11704_v7, %v21224_v17  ;;  %25414 = vst [vmem:[#allocation34_spill] sm:$0xff] %v21326_v19 }
 0x309   : > { %v9674_v43 = vpack.c.bf16 %v9418_v8, %v9418_v8  ;;  %v8903_v40 = vmul.f32 %v17393_v4, %v6867_v58  ;;  %v9851_v31 = vmax.bf16 %v9675_v53, %v9673_v15  ;;  %v9676_v39 = vpack.c.bf16 %v9420_v18, %v9420_v18  ;;  %v21608_v48 = vld [vmem:[#allocation2 + $0x70] sm:$0x11] }
 0x30a   : > { %v8905_v16 = vmul.f32 %v17393_v4, %v6908_v30  ;;  %v6869_v47 = vpop.f32.mrf.mxu0  ;;  %v6910_v45 = vpop.f32.mrf.mxu1  ;;  %v21328_v53 = vunpack.c.l.b16 %v14859_v51 }
 0x30b   : > { %v9165_v8 = vadd.f32 %v17503_v28, %v8903_v40  ;;  %v8904_v58 = vmul.f32 %v17393_v4, %v6869_v47  ;;  %v9852_v18 = vmax.bf16 %v9676_v39, %v9674_v43  ;;  %v8906_v15 = vmul.f32 %v17393_v4, %v6910_v45 }
 0x30c   : > { %v9167_v30 = vadd.f32 %v17503_v28, %v8905_v16  ;;  %v6871_v55 = vpop.f32.mrf.mxu0  ;;  %v6912_v17 = vpop.f32.mrf.mxu1  ;;  %25415 = vst [vmem:[#allocation35_spill] sm:$0xff] %v21328_v53  ;;  %v9915_v39 = vmax.bf16 %v9851_v31, %v9787_v0 }
 0x30d   : > { %v9421_v47 = vmax.f32 %v9165_v8, 0.0  ;;  %v9166_v7 = vadd.f32 %v17503_v28, %v8904_v58  ;;  %v9916_v43 = vmax.bf16 %v9852_v18, %v9788_v54  ;;  %v9168_v45 = vadd.f32 %v17503_v28, %v8906_v15 }
 0x30e   : > { %v9423_v16 = vmax.f32 %v9167_v30, 0.0  ;;  %v6872_v55 = vpop.f32.mrf.mxu0  ;;  %v6913_v14 = vpop.f32.mrf.mxu1  ;;  %v25416_v15 = vcombine.low %v21230_v5, %v21230_v5  ;;  %v25418_v17 = vcombine.high %v21230_v5, %v21230_v5  ;;  %v15573_v5 = vld [vmem:[%s23672_s4 + $0x2b8] sm:$0xff]  }
 0x30f   : > { %v9422_v33 = vmax.f32 %v9166_v7, 0.0  ;;  %v14505_v58 = vcombine.low %v9915_v39, %v9916_v43  ;;  %v21337_v51 = vpack.c.bf16 %v9421_v47, %v9421_v47  ;;  %v9424_v54 = vmax.f32 %v9168_v45, 0.0  ;;  %v15571_v55 = vld [vmem:[%s23672_s4 + $0x2f8] sm:$0xff]   ;;  %v15575_v14 = vld [vmem:[%s23672_s4 + $0x2f0] sm:$0xff]  }
 0x310   : > { %v21339_v0 = vpack.c.bf16 %v9423_v16, %v9423_v16  ;;  %v6949_v31 = vpop.f32.mrf.mxu0  ;;  %v6990_v30 = vpop.f32.mrf.mxu1  ;;  %v21347_v7 = vunpack.c.l.b16 %v25416_v15  ;;  %v21352_v47 = vunpack.c.l.b16 %v25418_v17  ;;  %v15574_v17 = vld [vmem:[%s23672_s4 + $0x3b8] sm:$0xff]   ;;  %15194 = vmatprep.subr.bf16.mxu0 %v15571_v55 }
 0x311   : > { %v8907_v18 = vmul.f32 %v17393_v4, %v6949_v31  ;;  %10148 = vst [vmem:[#allocation2 + $0xc0] sm:$0xff] %v14505_v58  ;;  %v21354_v39 = vpack.c.bf16 %v9422_v33, %v9422_v33  ;;  %v21356_v43 = vpack.c.bf16 %v9424_v54, %v9424_v54  ;;  %v8909_v16 = vmul.f32 %v17393_v4, %v6990_v30  ;;  %v15572_v31 = vld [vmem:[%s23672_s4 + $0x3f8] sm:$0xff]  }
 0x312   : > { %25417 = vst [vmem:[#allocation37_spill] sm:$0xff] %v21347_v7  ;;  %25419 = vst [vmem:[#allocation38_spill] sm:$0xff] %v21352_v47  ;;  %v6951_v45 = vpop.f32.mrf.mxu0  ;;  %v25420_v33 = vcombine.low %v21232_v56, %v21232_v56  ;;  %v6992_v15 = vpop.f32.mrf.mxu1  ;;  %15222 = vmatprep.subr.bf16.mxu1 %v15572_v31  ;;  %15195 = vmatpush3.bf16.msra.mxu0 %v15573_v5  ;;  %v25428_v31 = vcombine.low %v21242_v60, %v21242_v60 }
 0x313   : > { %v9169_v54 = vadd.f32 %v17503_v28, %v8907_v18  ;;  %v8908_v30 = vmul.f32 %v17393_v4, %v6951_v45  ;;  %v25424_v18 = vcombine.low %v21240_v50, %v21240_v50  ;;  %v9171_v40 = vadd.f32 %v17503_v28, %v8909_v16  ;;  %15223 = vmatpush3.bf16.msra.mxu1 %v15574_v17  ;;  %v15578_v16 = vld [vmem:[%s23672_s4 + $0x3b0] sm:$0xff]  }
 0x314   : > { %v21371_v58 = vunpack.c.l.b16 %v25420_v33  ;;  %v25422_v33 = vcombine.high %v21232_v56, %v21232_v56  ;;  %v8910_v1 = vmul.f32 %v17393_v4, %v6992_v15  ;;  %v6953_v13 = vpop.f32.mrf.mxu0  ;;  %v6994_v41 = vpop.f32.mrf.mxu1  ;;  %v11350_v15 = vld [vmem:[#allocation2 + $0xf0] sm:$0x44]  ;;  %v9790_v5 = vmax.bf16 %v21356_v43, %v21354_v39  ;;  %15196 = vmatprep.subr.bf16.mxu0 %v15575_v14  ;;  %15224 = vmatprep.subr.bf16.mxu1 %v15576_v11 }
 0x315   : > { %v21392_v45 = vunpack.c.l.b16 %v25424_v18  ;;  %v9425_v56 = vmax.f32 %v9169_v54, 0.0  ;;  %v15577_v18 = vld [vmem:[%s23672_s4 + $0x2b0] sm:$0xff]   ;;  %v25426_v13 = vcombine.high %v21240_v50, %v21240_v50  ;;  %v21414_v41 = vunpack.c.l.b16 %v25428_v31  ;;  %v15579_v50 = vld [vmem:[%s23672_s4 + $0x2e8] sm:$0xff]  }
 0x316   : > { %25421 = vst [vmem:[#allocation109_spill] sm:$0xff] %v21371_v58  ;;  %v21387_v8 = vunpack.c.l.b16 %v25422_v33  ;;  %v9170_v33 = vadd.f32 %v17503_v28, %v8908_v30  ;;  %v9427_v54 = vmax.f32 %v9171_v40, 0.0  ;;  %v9172_v30 = vadd.f32 %v17503_v28, %v8910_v1  ;;  %v6954_v17 = vpop.f32.mrf.mxu0  ;;  %v6995_v9 = vpop.f32.mrf.mxu1  ;;  %15197 = vmatpush3.bf16.msra.mxu0 %v15577_v18 }
 0x317   : > { %25425 = vst [vmem:[#allocation39_spill] sm:$0xff] %v21392_v45  ;;  %v21409_v55 = vunpack.c.l.b16 %v25426_v13  ;;  %25429 = vst [vmem:[#allocation41_spill] sm:$0xff] %v21414_v41  ;;  %v15580_v13 = vld [vmem:[%s23672_s4 + $0x3e8] sm:$0xff]   ;;  %v11692_v31 = vrot.slane %v21235_v38, 2  ;;  %v9681_v25 = vpack.c.bf16 %v9425_v56, %v9425_v56  ;;  %v11706_v40 = vrot.slane %v21237_v6, 2  ;;  %15225 = vmatpush3.bf16.msra.mxu1 %v15578_v16  ;;  %15198 = vmatprep.subr.bf16.mxu0 %v15579_v50 }
 0x318   : > { %25423 = vst [vmem:[#allocation129_spill] sm:$0xff] %v21387_v8  ;;  %v9426_v24 = vmax.f32 %v9170_v33, 0.0  ;;  %v25430_v1 = vcombine.high %v21242_v60, %v21242_v60  ;;  %v9683_v11 = vpack.c.bf16 %v9427_v54, %v9427_v54  ;;  %v9428_v39 = vmax.f32 %v9172_v30, 0.0  ;;  %v7111_v43 = vpop.f32.mrf.mxu0  ;;  %v7152_v22 = vpop.f32.mrf.mxu1  ;;  %v15581_v9 = vld [vmem:[%s23672_s4 + $0x2a8] sm:$0xff]   ;;  %15226 = vmatprep.subr.bf16.mxu1 %v15580_v13  ;;  %v15583_v30 = vld [vmem:[%s23672_s4 + $0x2e0] sm:$0xff]  }
 0x319   : > { %25427 = vst [vmem:[#allocation40_spill] sm:$0xff] %v21409_v55  ;;  %v14860_v17 = vcombine.low %v11350_v15, %v11350_v15  ;;  %v14861_v35 = vcombine.high %v11350_v15, %v11350_v15  ;;  %v8911_v34 = vmul.f32 %v17393_v4, %v7111_v43  ;;  %v15582_v60 = vld [vmem:[%s23672_s4 + $0x3a8] sm:$0xff]   ;;  %v21441_v56 = vsel %vm10485_vm3, %v11692_v31, %v21307_v59  ;;  %v15584_v59 = vld [vmem:[%s23672_s4 + $0x3e0] sm:$0xff]  }
 0x31a   : > { %v21430_v14 = vunpack.c.l.b16 %v25430_v1  ;;  %v9682_v46 = vpack.c.bf16 %v9426_v24, %v9426_v24  ;;  %25432 = vst [vmem:[#allocation44_spill] sm:$0xff] %v21441_v56  ;;  %v25433_v24 = vcombine.low %v21254_v29, %v21254_v29  ;;  %v9853_v15 = vmax.bf16 %v9683_v11, %v9681_v25  ;;  %v7113_v54 = vpop.f32.mrf.mxu0  ;;  %v7154_v11 = vpop.f32.mrf.mxu1  ;;  %v21473_v6 = vld [vmem:[#allocation2 + $0xe8] sm:$0x88]  ;;  %15199 = vmatpush3.bf16.msra.mxu0 %v15581_v9 }
 0x31b   : > { %v9684_v18 = vpack.c.bf16 %v9428_v39, %v9428_v39  ;;  %v8913_v16 = vmul.f32 %v17393_v4, %v7152_v22  ;;  %v25435_v31 = vcombine.high %v21254_v29, %v21254_v29  ;;  %v9173_v25 = vadd.f32 %v17503_v28, %v8911_v34  ;;  %25440 = vst [vmem:[#allocation132_spill] sm:$0xff] %v21473_v6 }
 0x31c   : > { %25431 = vst [vmem:[#allocation42_spill] sm:$0xff] %v21430_v14  ;;  %v21446_v33 = vunpack.c.l.b16 %v25433_v24  ;;  %v8912_v22 = vmul.f32 %v17393_v4, %v7113_v54  ;;  %v21464_v50 = vsel %vm10485_vm3, %v11706_v40, %v21313_v57  ;;  %v25438_v13 = vcombine.low %v21268_v42, %v21268_v42  ;;  %v7156_v26 = vpop.f32.mrf.mxu1  ;;  %15227 = vmatpush3.bf16.msra.mxu1 %v15582_v60 }
 0x31d   : > { %v21458_v1 = vunpack.c.l.b16 %v25435_v31  ;;  %25437 = vst [vmem:[#allocation131_spill] sm:$0xff] %v21464_v50  ;;  %v9854_v43 = vmax.bf16 %v9684_v18, %v9682_v46  ;;  %v9175_v24 = vadd.f32 %v17503_v28, %v8913_v16  ;;  %v8914_v29 = vmul.f32 %v17393_v4, %v7154_v11  ;;  %v7115_v31 = vpop.f32.mrf.mxu0  ;;  %v15585_v46 = vld [vmem:[%s23672_s4 + $0x2a0] sm:$0xff]   ;;  %15200 = vmatprep.subr.bf16.mxu0 %v15583_v30 }
 0x31e   : > { %25434 = vst [vmem:[#allocation45_spill] sm:$0xff] %v21446_v33  ;;  %v21469_v39 = vunpack.c.l.b16 %v25438_v13  ;;  %v25441_v34 = vcombine.high %v21268_v42, %v21268_v42  ;;  %v9429_v57 = vmax.f32 %v9173_v25, 0.0  ;;  %v9174_v40 = vadd.f32 %v17503_v28, %v8912_v22  ;;  %v15586_v18 = vld [vmem:[%s23672_s4 + $0x3a0] sm:$0xff]   ;;  %v15587_v42 = vld [vmem:[%s23672_s4 + $0x2d8] sm:$0xff]   ;;  %15228 = vmatprep.subr.bf16.mxu1 %v15584_v59  ;;  %v7157_v20 = vpop.f32.mrf.mxu1  ;;  %15201 = vmatpush3.bf16.msra.mxu0 %v15585_v46 }
 0x31f   : > { %25436 = vst [vmem:[#allocation130_spill] sm:$0xff] %v21458_v1  ;;  %v21490_v16 = vunpack.c.l.b16 %v14860_v17  ;;  %v21492_v25 = vunpack.c.l.b16 %v14861_v35  ;;  %v25445_v26 = vmax.bf16 %v21339_v0, %v21337_v51  ;;  %v9918_v60 = vmax.bf16 %v9854_v43, %v9790_v5  ;;  %v7116_v13 = vpop.f32.mrf.mxu0  ;;  %v15588_v31 = vld [vmem:[%s23672_s4 + $0x3d8] sm:$0xff]   ;;  %15202 = vmatprep.subr.bf16.mxu0 %v15587_v42 }
 0x320   : > { %25439 = vst [vmem:[#allocation47_spill] sm:$0xff] %v21469_v39  ;;  %v21478_v54 = vunpack.c.l.b16 %v25441_v34  ;;  %v9431_v22 = vmax.f32 %v9175_v24, 0.0  ;;  %v9176_v11 = vadd.f32 %v17503_v28, %v8914_v29  ;;  %v10173_v34 = vld [vmem:[#allocation2 + $0x38] sm:$0x11]  ;;  %v21501_v17 = vld [vmem:[#allocation2 + $0x38] sm:$0x22]  ;;  %v21503_v35 = vpack.c.bf16 %v9429_v57, %v9429_v57  ;;  %15229 = vmatpush3.bf16.msra.mxu1 %v15586_v18 }
 0x321   : > { %25443 = vst [vmem:[#allocation110_spill] sm:$0xff] %v21490_v16  ;;  %25444 = vst [vmem:[#allocation49_spill] sm:$0xff] %v21492_v25  ;;  %v9917_v9 = vmax.bf16 %v9853_v15, %v25445_v26  ;;  %v9430_v49 = vmax.f32 %v9174_v40, 0.0  ;;  %v14578_v51 = vcombine.low %v10173_v34, %v10173_v34  ;;  %v14579_v0 = vcombine.high %v10173_v34, %v10173_v34  ;;  %v7193_v24 = vpop.f32.mrf.mxu0  ;;  %v7234_v26 = vpop.f32.mrf.mxu1  ;;  %v15589_v20 = vld [vmem:[%s23672_s4 + $0x298] sm:$0xff]   ;;  %v15659_v40 = vld [vmem:[%s23672_s4 + $0x2c8] sm:$0xff]  }
 0x322   : > { %25442 = vst [vmem:[#allocation48_spill] sm:$0xff] %v21478_v54  ;;  %v21505_v15 = vpack.c.bf16 %v9431_v22, %v9431_v22  ;;  %v9432_v43 = vmax.f32 %v9176_v11, 0.0  ;;  %v14722_v30 = vcombine.low %v21501_v17, %v21501_v17  ;;  %v8915_v29 = vmul.f32 %v17393_v4, %v7193_v24  ;;  %v15590_v57 = vld [vmem:[%s23672_s4 + $0x398] sm:$0xff]   ;;  %15230 = vmatprep.subr.bf16.mxu1 %v15588_v31  ;;  %v15591_v22 = vld [vmem:[%s23672_s4 + $0x2d0] sm:$0xff]  }
 0x323   : > { %v14506_v5 = vcombine.low %v9917_v9, %v9918_v60  ;;  %v21509_v59 = vpack.c.bf16 %v9430_v49, %v9430_v49  ;;  %v25446_v49 = vcombine.low %v21292_v27, %v21292_v27  ;;  %v8917_v46 = vmul.f32 %v17393_v4, %v7234_v26  ;;  %v7195_v18 = vpop.f32.mrf.mxu0  ;;  %v15592_v11 = vld [vmem:[%s23672_s4 + $0x3d0] sm:$0xff]   ;;  %v7236_v31 = vpop.f32.mrf.mxu1  ;;  %v21543_v24 = vld [vmem:[#allocation2 + $0x58] sm:$0x11]  ;;  %15203 = vmatpush3.bf16.msra.mxu0 %v15589_v20  ;;  %v21571_v20 = vld [vmem:[#allocation2 + $0xe0] sm:$0x11] }
 0x324   : > { %v21525_v60 = vpack.c.bf16 %v9432_v43, %v9432_v43  ;;  %v25448_v34 = vcombine.high %v21292_v27, %v21292_v27  ;;  %v9177_v43 = vadd.f32 %v17503_v28, %v8915_v29  ;;  %v8916_v42 = vmul.f32 %v17393_v4, %v7195_v18  ;;  %15231 = vmatpush3.bf16.msra.mxu1 %v15590_v57 }
 0x325   : > { %v21523_v9 = vunpack.c.l.b16 %v25446_v49  ;;  %10149 = vst [vmem:[#allocation2 + $0xa8] sm:$0xff] %v14506_v5  ;;  %v21545_v26 = vunpack.c.l.b16 %v14578_v51  ;;  %v21547_v49 = vunpack.c.l.b16 %v14579_v0  ;;  %v9179_v13 = vadd.f32 %v17503_v28, %v8917_v46  ;;  %v7238_v0 = vpop.f32.mrf.mxu1  ;;  %v15593_v46 = vld [vmem:[%s23672_s4 + $0x290] sm:$0xff]   ;;  %15204 = vmatprep.subr.bf16.mxu0 %v15591_v22  ;;  %15232 = vmatprep.subr.bf16.mxu1 %v15592_v11  ;;  %v15660_v11 = vld [vmem:[%s23672_s4 + $0x3c8] sm:$0xff]  }
 0x326   : > { %v21539_v5 = vunpack.c.l.b16 %v25448_v34  ;;  %v8918_v27 = vmul.f32 %v17393_v4, %v7236_v31  ;;  %v7197_v34 = vpop.f32.mrf.mxu0  ;;  %v21555_v29 = vunpack.c.l.b16 %v14722_v30  ;;  %v9433_v63 = vmax.f32 %v9177_v43, 0.0  ;;  %v15594_v31 = vld [vmem:[%s23672_s4 + $0x390] sm:$0xff]  }
 0x327   : > { %25447 = vst [vmem:[#allocation50_spill] sm:$0xff] %v21523_v9  ;;  %25450 = vst [vmem:[#allocation52_spill] sm:$0xff] %v21545_v26  ;;  %v9178_v51 = vadd.f32 %v17503_v28, %v8916_v42  ;;  %v21566_v34 = vld [vmem:[#allocation2 + $0xc8] sm:$0x11]  ;;  %v9435_v18 = vmax.f32 %v9179_v13, 0.0  ;;  %v14580_v57 = vcombine.low %v21543_v24, %v21543_v24  ;;  %v7239_v13 = vpop.f32.mrf.mxu1  ;;  %15205 = vmatpush3.bf16.msra.mxu0 %v15593_v46 }
 0x328   : > { %25449 = vst [vmem:[#allocation51_spill] sm:$0xff] %v21539_v5  ;;  %25451 = vst [vmem:[#allocation54_spill] sm:$0xff] %v21547_v49  ;;  %v9180_v43 = vadd.f32 %v17503_v28, %v8918_v27  ;;  %v7198_v42 = vpop.f32.mrf.mxu0  ;;  %v9689_v37 = vpack.c.bf16 %v9433_v63, %v9433_v63  ;;  %15233 = vmatpush3.bf16.msra.mxu1 %v15594_v31  ;;  %v14587_v22 = vcombine.high %v21571_v20, %v21571_v20 }
 0x329   : > { %25452 = vst [vmem:[#allocation111_spill] sm:$0xff] %v21555_v29  ;;  %v9434_v30 = vmax.f32 %v9178_v51, 0.0  ;;  %v9691_v42 = vpack.c.bf16 %v9435_v18, %v9435_v18  ;;  %v7396_v21 = vpop.f32.mrf.mxu1  ;;  %v15661_v18 = vld [vmem:[%s23672_s4 + $0x288] sm:$0xff]   ;;  %v25453_v51 = vcombine.low %v21297_v3, %v21297_v3  ;;  %15206 = vmatprep.subr.bf16.mxu0 %v15659_v40  ;;  %15234 = vmatprep.subr.bf16.mxu1 %v15660_v11 }
 0x32a   : > { %v9436_v2 = vmax.f32 %v9180_v43, 0.0  ;;  %v7355_v0 = vpop.f32.mrf.mxu0  ;;  %v15662_v43 = vld [vmem:[%s23672_s4 + $0x388] sm:$0xff]   ;;  %v8921_v46 = vmul.f32 %v17393_v4, %v7396_v21  ;;  %v14591_v11 = vcombine.high %v21608_v48, %v21608_v48 }
 0x32b   : > { %v9690_v13 = vpack.c.bf16 %v9434_v30, %v9434_v30  ;;  %v8919_v27 = vmul.f32 %v17393_v4, %v7355_v0  ;;  %v21605_v30 = vunpack.c.l.b16 %v25453_v51  ;;  %v9855_v0 = vmax.bf16 %v9691_v42, %v9689_v37  ;;  %v7398_v44 = vpop.f32.mrf.mxu1  ;;  %15207 = vmatpush3.bf16.msra.mxu0 %v15661_v18 }
 0x32c   : > { %v9692_v63 = vpack.c.bf16 %v9436_v2, %v9436_v2  ;;  %v7357_v31 = vpop.f32.mrf.mxu0  ;;  %v14588_v51 = vcombine.low %v21587_v36, %v21587_v36  ;;  %v14589_v2 = vcombine.high %v21587_v36, %v21587_v36  ;;  %v9183_v21 = vadd.f32 %v17503_v28, %v8921_v46  ;;  %v21622_v40 = vld [vmem:[#allocation2 + $0xa8] sm:$0x11]  ;;  %15235 = vmatpush3.bf16.msra.mxu1 %v15662_v43 }
 0x32d   : > { %25454 = vst [vmem:[#allocation134_spill] sm:$0xff] %v21605_v30  ;;  %v9181_v62 = vadd.f32 %v17503_v28, %v8919_v27  ;;  %v8920_v12 = vmul.f32 %v17393_v4, %v7357_v31  ;;  %v8922_v42 = vmul.f32 %v17393_v4, %v7398_v44  ;;  %v21620_v30 = vld [vmem:[#allocation2 + $0xc0] sm:$0x11]  ;;  %v21624_v27 = vunpack.c.l.b16 %v14580_v57  ;;  %v7400_v54 = vpop.f32.mrf.mxu1 }
 0x32e   : > { %v9856_v37 = vmax.bf16 %v9692_v63, %v9690_v13  ;;  %v7359_v32 = vpop.f32.mrf.mxu0  ;;  %v14590_v36 = vcombine.low %v21608_v48, %v21608_v48  ;;  %v25456_v44 = vmax.bf16 %v21505_v15, %v21503_v35  ;;  %v25457_v57 = vmax.bf16 %v21525_v60, %v21509_v59 }
 0x32f   : > { %25455 = vst [vmem:[#allocation135_spill] sm:$0xff] %v21624_v27  ;;  %v9437_v31 = vmax.f32 %v9181_v62, 0.0  ;;  %v9182_v5 = vadd.f32 %v17503_v28, %v8920_v12  ;;  %v9439_v62 = vmax.f32 %v9183_v21, 0.0  ;;  %v9184_v12 = vadd.f32 %v17503_v28, %v8922_v42  ;;  %v7401_v46 = vpop.f32.mrf.mxu1 }
 0x330   : > { %v9919_v32 = vmax.bf16 %v9855_v0, %v25456_v44  ;;  %v9920_v63 = vmax.bf16 %v9856_v37, %v25457_v57  ;;  %v7360_v54 = vpop.f32.mrf.mxu0  ;;  %v14592_v1 = vcombine.low %v21620_v30, %v21620_v30  ;;  %v14593_v48 = vcombine.high %v21620_v30, %v21620_v30 }
 0x331   : > { %v9438_v13 = vmax.f32 %v9182_v5, 0.0  ;;  %v14594_v35 = vcombine.low %v21622_v40, %v21622_v40  ;;  %v21644_v18 = vpack.c.bf16 %v9437_v31, %v9437_v31  ;;  %v21646_v59 = vpack.c.bf16 %v9439_v62, %v9439_v62  ;;  %v7478_v5 = vpop.f32.mrf.mxu1 }
 0x332   : > { %v14507_v15 = vcombine.low %v9919_v32, %v9920_v63  ;;  %v9440_v60 = vmax.f32 %v9184_v12, 0.0  ;;  %v7437_v43 = vpop.f32.mrf.mxu0  ;;  %v14595_v37 = vcombine.high %v21622_v40, %v21622_v40  ;;  %v25458_v21 = vcombine.high %v21543_v24, %v21543_v24 }
 0x333   : > { %v8923_v0 = vmul.f32 %v17393_v4, %v7437_v43  ;;  %v25460_v42 = vcombine.low %v21553_v52, %v21553_v52  ;;  %v21661_v44 = vpack.c.bf16 %v9438_v13, %v9438_v13  ;;  %v8925_v57 = vmul.f32 %v17393_v4, %v7478_v5  ;;  %v7480_v54 = vpop.f32.mrf.mxu1 }
 0x334   : > { %v21654_v30 = vunpack.c.l.b16 %v25458_v21  ;;  %10150 = vst [vmem:[#allocation2 + $0xd0] sm:$0xff] %v14507_v15  ;;  %v9696_v32 = vpack.c.bf16 %v9440_v60, %v9440_v60  ;;  %v7439_v63 = vpop.f32.mrf.mxu0  ;;  %v25462_v40 = vcombine.high %v21553_v52, %v21553_v52  ;;  %v25464_v46 = vcombine.low %v21566_v34, %v21566_v34 }
 0x335   : > { %v21659_v31 = vunpack.c.l.b16 %v25460_v42  ;;  %v9185_v24 = vadd.f32 %v17503_v28, %v8923_v0  ;;  %v8924_v12 = vmul.f32 %v17393_v4, %v7439_v63  ;;  %v25466_v13 = vcombine.high %v21566_v34, %v21566_v34 }
 0x336   : > { %25459 = vst [vmem:[#allocation136_spill] sm:$0xff] %v21654_v30  ;;  %v21667_v62 = vunpack.c.l.b16 %v25462_v40  ;;  %v21674_v15 = vunpack.c.l.b16 %v25464_v46  ;;  %v9793_v52 = vmax.bf16 %v21646_v59, %v21644_v18  ;;  %v9187_v43 = vadd.f32 %v17503_v28, %v8925_v57  ;;  %v7441_v5 = vpop.f32.mrf.mxu0  ;;  %v7482_v46 = vpop.f32.mrf.mxu1 }
 0x337   : > { %25461 = vst [vmem:[#allocation137_spill] sm:$0xff] %v21659_v31  ;;  %v21679_v60 = vunpack.c.l.b16 %v25466_v13  ;;  %v8926_v0 = vmul.f32 %v17393_v4, %v7480_v54  ;;  %v25468_v21 = vcombine.low %v21571_v20, %v21571_v20  ;;  %v9441_v63 = vmax.f32 %v9185_v24, 0.0 }
 0x338   : > { %25463 = vst [vmem:[#allocation138_spill] sm:$0xff] %v21667_v62  ;;  %25465 = vst [vmem:[#allocation139_spill] sm:$0xff] %v21674_v15  ;;  %v9186_v40 = vadd.f32 %v17503_v28, %v8924_v12  ;;  %v21691_v34 = vunpack.c.l.b16 %v14587_v22  ;;  %v21693_v13 = vunpack.c.l.b16 %v14588_v51  ;;  %v9794_v18 = vmax.bf16 %v9696_v32, %v21661_v44  ;;  %v7442_v54 = vpop.f32.mrf.mxu0 }
 0x339   : > { %25467 = vst [vmem:[#allocation140_spill] sm:$0xff] %v21679_v60  ;;  %v21688_v42 = vunpack.c.l.b16 %v25468_v21  ;;  %v9443_v59 = vmax.f32 %v9187_v43, 0.0  ;;  %v9188_v57 = vadd.f32 %v17503_v28, %v8926_v0  ;;  %v21697_v5 = vunpack.c.l.b16 %v14589_v2  ;;  %v7483_v21 = vpop.f32.mrf.mxu1 }
 0x33a   : > { %25470 = vst [vmem:[#allocation142_spill] sm:$0xff] %v21691_v34  ;;  %25471 = vst [vmem:[#allocation143_spill] sm:$0xff] %v21693_v13  ;;  %v9697_v9 = vpack.c.bf16 %v9441_v63, %v9441_v63  ;;  %v9442_v20 = vmax.f32 %v9186_v40, 0.0  ;;  %v21699_v14 = vunpack.c.l.b16 %v14590_v36  ;;  %v21701_v24 = vunpack.c.l.b16 %v14591_v11  ;;  %v7599_v46 = vpop.f32.mrf.mxu0 }
 0x33b   : > { %25469 = vst [vmem:[#allocation141_spill] sm:$0xff] %v21688_v42  ;;  %25472 = vst [vmem:[#allocation144_spill] sm:$0xff] %v21697_v5  ;;  %v9699_v12 = vpack.c.bf16 %v9443_v59, %v9443_v59  ;;  %v9444_v22 = vmax.f32 %v9188_v57, 0.0  ;;  %v21703_v51 = vunpack.c.l.b16 %v14592_v1  ;;  %v21705_v55 = vunpack.c.l.b16 %v14593_v48  ;;  %v7640_v43 = vpop.f32.mrf.mxu1  ;;  %v10182_v59 = vld [vmem:[#allocation2 + $0xd0] sm:$0x11] }
 0x33c   : > { %25473 = vst [vmem:[#allocation145_spill] sm:$0xff] %v21699_v14  ;;  %25474 = vst [vmem:[#allocation146_spill] sm:$0xff] %v21701_v24  ;;  %v9698_v44 = vpack.c.bf16 %v9442_v20, %v9442_v20  ;;  %v8927_v32 = vmul.f32 %v17393_v4, %v7599_v46  ;;  %v21708_v2 = vunpack.c.l.b16 %v14594_v35  ;;  %v21710_v0 = vunpack.c.l.b16 %v14595_v37  ;;  %v7601_v40 = vpop.f32.mrf.mxu0 }
 0x33d   : > { %25475 = vst [vmem:[#allocation147_spill] sm:$0xff] %v21703_v51  ;;  %25476 = vst [vmem:[#allocation148_spill] sm:$0xff] %v21705_v55  ;;  %v9857_v63 = vmax.bf16 %v9699_v12, %v9697_v9  ;;  %v9700_v36 = vpack.c.bf16 %v9444_v22, %v9444_v22  ;;  %v8929_v11 = vmul.f32 %v17393_v4, %v7640_v43  ;;  %v10555_v57 = vrot.slane %v21547_v49, 1  ;;  %v7642_v54 = vpop.f32.mrf.mxu1 }
 0x33e   : > { %25477 = vst [vmem:[#allocation149_spill] sm:$0xff] %v21708_v2  ;;  %25478 = vst [vmem:[#allocation150_spill] sm:$0xff] %v21710_v0  ;;  %v9189_v1 = vadd.f32 %v17503_v28, %v8927_v32  ;;  %v8928_v48 = vmul.f32 %v17393_v4, %v7601_v40  ;;  %v10557_v20 = vrot.slane %v21667_v62, 7  ;;  %v10559_v35 = vrot.slane %v21679_v60, 6  ;;  %v7603_v12 = vpop.f32.mrf.mxu0 }
 0x33f   : > { %v9858_v21 = vmax.bf16 %v9700_v36, %v9698_v44  ;;  %v9191_v37 = vadd.f32 %v17503_v28, %v8929_v11  ;;  %v8930_v9 = vmul.f32 %v17393_v4, %v7642_v54  ;;  %v10561_v22 = vrot.slane %v21691_v34, 5  ;;  %v7644_v49 = vpop.f32.mrf.mxu1 }
 0x340   : > { %v9445_v46 = vmax.f32 %v9189_v1, 0.0  ;;  %v9190_v43 = vadd.f32 %v17503_v28, %v8928_v48  ;;  %v14596_v32 = vcombine.low %v10182_v59, %v10182_v59  ;;  %v10556_v40 = vsel %vm10479_vm1, %v21654_v30, %v10555_v57  ;;  %v7604_v36 = vpop.f32.mrf.mxu0 }
 0x341   : > { %v9921_v39 = vmax.bf16 %v9857_v63, %v9793_v52  ;;  %v9922_v62 = vmax.bf16 %v9858_v21, %v9794_v18  ;;  %v9447_v8 = vmax.f32 %v9191_v37, 0.0  ;;  %v9192_v44 = vadd.f32 %v17503_v28, %v8930_v9  ;;  %v7645_v12 = vpop.f32.mrf.mxu1  ;;  %v15727_v52 = vld [vmem:[%s23672_s4 + $0x2c0] sm:$0xff]   ;;  %v15731_v37 = vld [vmem:[%s23672_s4 + $0x78] sm:$0xff]  }
 0x342   : > { %v21725_v11 = vpack.c.bf16 %v9445_v46, %v9445_v46  ;;  %v9446_v54 = vmax.f32 %v9190_v43, 0.0  ;;  %v14597_v60 = vcombine.high %v10182_v59, %v10182_v59  ;;  %v10558_v1 = vsel %vm10482_vm2, %v10557_v20, %v10556_v40  ;;  %v7681_v47 = vpop.f32.mrf.mxu0  ;;  %v15728_v18 = vld [vmem:[%s23672_s4 + $0x3c0] sm:$0xff]   ;;  %v15732_v9 = vld [vmem:[%s23672_s4 + $0x178] sm:$0xff]   ;;  %15208 = vmatprep.subr.bf16.mxu0 %v15727_v52 }
 0x343   : > { %v14508_v34 = vcombine.low %v9921_v39, %v9922_v62  ;;  %v21728_v48 = vpack.c.bf16 %v9447_v8, %v9447_v8  ;;  %v9448_v49 = vmax.f32 %v9192_v44, 0.0  ;;  %v10563_v57 = vrot.slane %v21697_v5, 4  ;;  %v15729_v63 = vld [vmem:[%s23672_s4 + $0x280] sm:$0xff]   ;;  %v7722_v8 = vpop.f32.mrf.mxu1  ;;  %15236 = vmatprep.subr.bf16.mxu1 %v15728_v18 }
 0x344   : > { %v8931_v39 = vmul.f32 %v17393_v4, %v7681_v47  ;;  %v21741_v62 = vunpack.c.l.b16 %v14596_v32  ;;  %v10560_v59 = vsel %vm10485_vm3, %v10559_v35, %v10558_v1  ;;  %v10565_v20 = vrot.slane %v21701_v24, 3  ;;  %v15730_v21 = vld [vmem:[%s23672_s4 + $0x380] sm:$0xff]   ;;  %v7683_v43 = vpop.f32.mrf.mxu0  ;;  %15209 = vmatpush3.bf16.msra.mxu0 %v15729_v63 }
 0x345   : > { %10151 = vst [vmem:[#allocation2 + $0x10] sm:$0xff] %v14508_v34  ;;  %v21754_v47 = vpack.c.bf16 %v9446_v54, %v9446_v54  ;;  %v21756_v46 = vpack.c.bf16 %v9448_v49, %v9448_v49  ;;  %v8933_v35 = vmul.f32 %v17393_v4, %v7722_v8  ;;  %v10567_v32 = vrot.slane %v21705_v55, 2  ;;  %v7724_v36 = vpop.f32.mrf.mxu1  ;;  %15237 = vmatpush3.bf16.msra.mxu1 %v15730_v21 }
 0x346   : > { %25479 = vst [vmem:[#allocation151_spill] sm:$0xff] %v21741_v62  ;;  %v9193_v40 = vadd.f32 %v17503_v28, %v8931_v39  ;;  %v8932_v44 = vmul.f32 %v17393_v4, %v7683_v43  ;;  %v21762_v12 = vunpack.c.l.b16 %v14597_v60  ;;  %v10562_v34 = vsel %vm10488_vm4, %v10561_v22, %v10560_v59  ;;  %v7685_v52 = vpop.f32.mrf.mxu0  ;;  %v21770_v39 = vld [vmem:[#allocation2 + $0x58] sm:$0x22]  ;;  %15250 = vmatprep.subr.bf16.mxu0 %v15731_v37  ;;  %v21775_v59 = vld [vmem:[#allocation2 + $0x40] sm:$0x22] }
 0x347   : > { %v9795_v54 = vmax.bf16 %v21728_v48, %v21725_v11  ;;  %v9195_v1 = vadd.f32 %v17503_v28, %v8933_v35  ;;  %v8934_v49 = vmul.f32 %v17393_v4, %v7724_v36  ;;  %v10564_v18 = vsel %vm10491_vm5, %v10563_v57, %v10562_v34  ;;  %v7726_v43 = vpop.f32.mrf.mxu1  ;;  %15278 = vmatprep.subr.bf16.mxu1 %v15732_v9  ;;  %v21783_v35 = vld [vmem:[#allocation2 + $0xc8] sm:$0x22] }
 0x348   : > { %25480 = vst [vmem:[#allocation152_spill] sm:$0xff] %v21762_v12  ;;  %v9449_v8 = vmax.f32 %v9193_v40, 0.0  ;;  %v9194_v60 = vadd.f32 %v17503_v28, %v8932_v44  ;;  %v10566_v22 = vsel %vm10494_vm6, %v10565_v20, %v10564_v18  ;;  %v10583_v63 = vrot.slane %v21710_v0, 1  ;;  %v7686_v21 = vpop.f32.mrf.mxu0 }
 0x349   : > { %v9796_v11 = vmax.bf16 %v21756_v46, %v21754_v47  ;;  %v9451_v48 = vmax.f32 %v9195_v1, 0.0  ;;  %v9196_v57 = vadd.f32 %v17503_v28, %v8934_v49  ;;  %v21781_v37 = vsel %vm10497_vm7, %v10567_v32, %v10566_v22  ;;  %v7727_v20 = vpop.f32.mrf.mxu1  ;;  %v21791_v1 = vld [vmem:[#allocation2 + $0xe0] sm:$0x22] }
 0x34a   : > { %25481 = vst [vmem:[#allocation153_spill] sm:$0xff] %v21781_v37  ;;  %v9705_v40 = vpack.c.bf16 %v9449_v8, %v9449_v8  ;;  %v9450_v44 = vmax.f32 %v9194_v60, 0.0  ;;  %v21787_v36 = vsel %vm10479_vm1, %v21762_v12, %v10583_v63  ;;  %v7843_v34 = vpop.f32.mrf.mxu0 }
 0x34b   : > { %v9707_v47 = vpack.c.bf16 %v9451_v48, %v9451_v48  ;;  %v9452_v46 = vmax.f32 %v9196_v57, 0.0  ;;  %v8935_v18 = vmul.f32 %v17393_v4, %v7843_v34  ;;  %v7884_v8 = vpop.f32.mrf.mxu1 }
 0x34c   : > { %v9706_v52 = vpack.c.bf16 %v9450_v44, %v9450_v44  ;;  %v10183_v60 = vld [vmem:[#allocation2 + $0x10] sm:$0x11]  ;;  %v8937_v57 = vmul.f32 %v17393_v4, %v7884_v8  ;;  %v7845_v21 = vpop.f32.mrf.mxu0  ;;  %v21822_v8 = vld [vmem:[#allocation2 + $0xc0] sm:$0x22] }
 0x34d   : > { %v9859_v63 = vmax.bf16 %v9707_v47, %v9705_v40  ;;  %v9708_v48 = vpack.c.bf16 %v9452_v46, %v9452_v46  ;;  %v9197_v44 = vadd.f32 %v17503_v28, %v8935_v18  ;;  %v8936_v34 = vmul.f32 %v17393_v4, %v7845_v21  ;;  %v7886_v49 = vpop.f32.mrf.mxu1  ;;  %v21811_v46 = vld [vmem:[#allocation2 + $0x90] sm:$0x22] }
 0x34e   : > { %v14599_v32 = vcombine.high %v10183_v60, %v10183_v60  ;;  %v9199_v22 = vadd.f32 %v17503_v28, %v8937_v57  ;;  %v8938_v40 = vmul.f32 %v17393_v4, %v7886_v49  ;;  %v7847_v47 = vpop.f32.mrf.mxu0  ;;  %v14598_v0 = vcombine.low %v10183_v60, %v10183_v60  ;;  %v21819_v49 = vld [vmem:[#allocation2 + $0x70] sm:$0x22] }
 0x34f   : > { %v9860_v9 = vmax.bf16 %v9708_v48, %v9706_v52  ;;  %v9453_v20 = vmax.f32 %v9197_v44, 0.0  ;;  %v9198_v18 = vadd.f32 %v17503_v28, %v8936_v34  ;;  %v7888_v21 = vpop.f32.mrf.mxu1  ;;  %v9923_v55 = vmax.bf16 %v9859_v63, %v9795_v54 }
 0x350   : > { %v21816_v12 = vunpack.c.l.b16 %v14599_v32  ;;  %v9455_v52 = vmax.f32 %v9199_v22, 0.0  ;;  %v9200_v48 = vadd.f32 %v17503_v28, %v8938_v40  ;;  %v7848_v57 = vpop.f32.mrf.mxu0  ;;  %v21833_v34 = vunpack.c.l.b16 %v14598_v0  ;;  %v21835_v40 = vld [vmem:[#allocation2 + $0xa8] sm:$0x22]  ;;  %v21862_v32 = vld [vmem:[#allocation2 + $0x10] sm:$0x22] }
 0x351   : > { %v9924_v43 = vmax.bf16 %v9860_v9, %v9796_v11  ;;  %v9454_v47 = vmax.f32 %v9198_v18, 0.0  ;;  %v7889_v24 = vpop.f32.mrf.mxu1  ;;  %v21828_v11 = vpack.c.bf16 %v9453_v20, %v9453_v20 }
 0x352   : > { %25482 = vst [vmem:[#allocation154_spill] sm:$0xff] %v21816_v12  ;;  %v10585_v5 = vrot.slane %v21816_v12, 7  ;;  %v21830_v9 = vpack.c.bf16 %v9455_v52, %v9455_v52  ;;  %v9456_v60 = vmax.f32 %v9200_v48, 0.0  ;;  %v7925_v22 = vpop.f32.mrf.mxu0  ;;  %25483 = vst [vmem:[#allocation155_spill] sm:$0xff] %v21833_v34  ;;  %v21846_v48 = vld [vmem:[#allocation2 + $0xd0] sm:$0x22] }
 0x353   : > { %v14509_v54 = vcombine.low %v9923_v55, %v9924_v43  ;;  %v8939_v63 = vmul.f32 %v17393_v4, %v7925_v22  ;;  %v7966_v24 = vpop.f32.mrf.mxu1  ;;  %v21841_v55 = vpack.c.bf16 %v9454_v47, %v9454_v47 }
 0x354   : > { %v21843_v43 = vpack.c.bf16 %v9456_v60, %v9456_v60  ;;  %v8941_v20 = vmul.f32 %v17393_v4, %v7966_v24  ;;  %v7927_v52 = vpop.f32.mrf.mxu0  ;;  %v9797_v60 = vmax.bf16 %v21830_v9, %v21828_v11 }
 0x355   : > { %10152 = vst [vmem:[#allocation2 + $0x28] sm:$0xff] %v14509_v54  ;;  %v9201_v57 = vadd.f32 %v17503_v28, %v8939_v63  ;;  %v8940_v22 = vmul.f32 %v17393_v4, %v7927_v52  ;;  %v7968_v18 = vpop.f32.mrf.mxu1  ;;  %v21854_v54 = vsel %vm10482_vm2, %v10585_v5, %v21787_v36 }
 0x356   : > { %v9203_v24 = vadd.f32 %v17503_v28, %v8941_v20  ;;  %v8942_v21 = vmul.f32 %v17393_v4, %v7968_v18  ;;  %v7929_v0 = vpop.f32.mrf.mxu0  ;;  %v9798_v9 = vmax.bf16 %v21843_v43, %v21841_v55  ;;  %v25484_v55 = vcombine.high %v21501_v17, %v21501_v17 }
 0x357   : > { %v9457_v52 = vmax.f32 %v9201_v57, 0.0  ;;  %v9202_v5 = vadd.f32 %v17503_v28, %v8940_v22  ;;  %v7970_v36 = vpop.f32.mrf.mxu1  ;;  %v25486_v43 = vcombine.low %v21770_v39, %v21770_v39  ;;  %v25490_v17 = vcombine.low %v21775_v59, %v21775_v59 }
 0x358   : > { %v9459_v18 = vmax.f32 %v9203_v24, 0.0  ;;  %v9204_v20 = vadd.f32 %v17503_v28, %v8942_v21  ;;  %v7930_v0 = vpop.f32.mrf.mxu0  ;;  %v21883_v21 = vunpack.c.l.b16 %v25484_v55 }
 0x359   : > { %v9713_v57 = vpack.c.bf16 %v9457_v52, %v9457_v52  ;;  %v9458_v44 = vmax.f32 %v9202_v5, 0.0  ;;  %v7971_v22 = vpop.f32.mrf.mxu1  ;;  %v21888_v24 = vunpack.c.l.b16 %v25486_v43  ;;  %v21899_v55 = vunpack.c.l.b16 %v25490_v17 }
 0x35a   : > { %v9715_v11 = vpack.c.bf16 %v9459_v18, %v9459_v18  ;;  %v9460_v12 = vmax.f32 %v9204_v20, 0.0  ;;  %v8087_v30 = vpop.f32.mrf.mxu0  ;;  %25485 = vst [vmem:[#allocation156_spill] sm:$0xff] %v21883_v21  ;;  %v25488_v18 = vcombine.high %v21770_v39, %v21770_v39  ;;  %v25494_v17 = vcombine.low %v21783_v35, %v21783_v35 }
 0x35b   : > { %25487 = vst [vmem:[#allocation157_spill] sm:$0xff] %v21888_v24  ;;  %v9714_v52 = vpack.c.bf16 %v9458_v44, %v9458_v44  ;;  %v8943_v5 = vmul.f32 %v17393_v4, %v8087_v30  ;;  %v8128_v0 = vpop.f32.mrf.mxu1  ;;  %25491 = vst [vmem:[#allocation159_spill] sm:$0xff] %v21899_v55  ;;  %v25492_v30 = vcombine.high %v21775_v59, %v21775_v59 }
 0x35c   : > { %v10184_v22 = vld [vmem:[#allocation2 + $0x28] sm:$0x11]  ;;  %v21894_v20 = vunpack.c.l.b16 %v25488_v18  ;;  %v9861_v47 = vmax.bf16 %v9715_v11, %v9713_v57  ;;  %v9716_v36 = vpack.c.bf16 %v9460_v12, %v9460_v12  ;;  %v8945_v43 = vmul.f32 %v17393_v4, %v8128_v0  ;;  %v8089_v63 = vpop.f32.mrf.mxu0  ;;  %v21916_v59 = vld [vmem:[#allocation2 + $0x28] sm:$0x22] }
 0x35d   : > { %v21905_v44 = vunpack.c.l.b16 %v25492_v30  ;;  %v9205_v33 = vadd.f32 %v17503_v28, %v8943_v5  ;;  %v8944_v39 = vmul.f32 %v17393_v4, %v8089_v63  ;;  %v8130_v18 = vpop.f32.mrf.mxu1  ;;  %v14601_v41 = vcombine.high %v10184_v22, %v10184_v22 }
 0x35e   : > { %25489 = vst [vmem:[#allocation158_spill] sm:$0xff] %v21894_v20  ;;  %v21912_v45 = vunpack.c.l.b16 %v25494_v17  ;;  %v9862_v12 = vmax.bf16 %v9716_v36, %v9714_v52  ;;  %v9207_v11 = vadd.f32 %v17503_v28, %v8945_v43  ;;  %v8946_v57 = vmul.f32 %v17393_v4, %v8130_v18  ;;  %v8091_v0 = vpop.f32.mrf.mxu0 }
 0x35f   : > { %25493 = vst [vmem:[#allocation160_spill] sm:$0xff] %v21905_v44  ;;  %v25496_v5 = vcombine.high %v21783_v35, %v21783_v35  ;;  %v9461_v63 = vmax.f32 %v9205_v33, 0.0  ;;  %v9206_v58 = vadd.f32 %v17503_v28, %v8944_v39  ;;  %v8132_v7 = vpop.f32.mrf.mxu1  ;;  %v14600_v6 = vcombine.low %v10184_v22, %v10184_v22 }
 0x360   : > { %25495 = vst [vmem:[#allocation161_spill] sm:$0xff] %v21912_v45  ;;  %v21924_v17 = vunpack.c.l.b16 %v14601_v41  ;;  %v9925_v36 = vmax.bf16 %v9861_v47, %v9797_v60  ;;  %v9926_v52 = vmax.bf16 %v9862_v12, %v9798_v9  ;;  %v9463_v43 = vmax.f32 %v9207_v11, 0.0  ;;  %v8092_v0 = vpop.f32.mrf.mxu0 }
 0x361   : > { %v21921_v30 = vunpack.c.l.b16 %v25496_v5  ;;  %v9208_v18 = vadd.f32 %v17503_v28, %v8946_v57  ;;  %v9462_v23 = vmax.f32 %v9206_v58, 0.0  ;;  %v8133_v61 = vpop.f32.mrf.mxu1  ;;  %v14744_v35 = vcombine.low %v21916_v59, %v21916_v59 }
 0x362   : > { %25498 = vst [vmem:[#allocation163_spill] sm:$0xff] %v21924_v17  ;;  %v10587_v10 = vrot.slane %v21924_v17, 6  ;;  %v25499_v33 = vcombine.low %v21791_v1, %v21791_v1  ;;  %v14510_v41 = vcombine.low %v9925_v36, %v9926_v52  ;;  %v21935_v22 = vpack.c.bf16 %v9461_v63, %v9461_v63  ;;  %v8169_v9 = vpop.f32.mrf.mxu0 }
 0x363   : > { %25497 = vst [vmem:[#allocation162_spill] sm:$0xff] %v21921_v30  ;;  %v21937_v47 = vpack.c.bf16 %v9463_v43, %v9463_v43  ;;  %v9464_v60 = vmax.f32 %v9208_v18, 0.0  ;;  %v8947_v58 = vmul.f32 %v17393_v4, %v8169_v9  ;;  %v8210_v61 = vpop.f32.mrf.mxu1  ;;  %v21940_v39 = vunpack.c.l.b16 %v14600_v6 }
 0x364   : > { %v21933_v7 = vunpack.c.l.b16 %v25499_v33  ;;  %v25502_v11 = vcombine.high %v21791_v1, %v21791_v1  ;;  %10153 = vst [vmem:[#allocation2 + $0xa0] sm:$0xff] %v14510_v41  ;;  %v21949_v5 = vpack.c.bf16 %v9462_v23, %v9462_v23  ;;  %v8949_v36 = vmul.f32 %v17393_v4, %v8210_v61  ;;  %v8171_v52 = vpop.f32.mrf.mxu0 }
 0x365   : > { %25501 = vst [vmem:[#allocation165_spill] sm:$0xff] %v21940_v39  ;;  %v9720_v63 = vpack.c.bf16 %v9464_v60, %v9464_v60  ;;  %v25504_v43 = vcombine.low %v21811_v46, %v21811_v46  ;;  %v9209_v18 = vadd.f32 %v17503_v28, %v8947_v58  ;;  %v8948_v0 = vmul.f32 %v17393_v4, %v8171_v52  ;;  %v8212_v33 = vpop.f32.mrf.mxu1 }
 0x366   : > { %25500 = vst [vmem:[#allocation164_spill] sm:$0xff] %v21933_v7  ;;  %v21947_v57 = vunpack.c.l.b16 %v25502_v11  ;;  %v21961_v1 = vsel %vm10485_vm3, %v10587_v10, %v21854_v54  ;;  %v25506_v23 = vcombine.high %v21811_v46, %v21811_v46  ;;  %v9799_v60 = vmax.bf16 %v21937_v47, %v21935_v22  ;;  %v8173_v58 = vpop.f32.mrf.mxu0 }
 0x367   : > { %v21955_v6 = vunpack.c.l.b16 %v25504_v43  ;;  %v9211_v9 = vadd.f32 %v17503_v28, %v8949_v36  ;;  %v8950_v61 = vmul.f32 %v17393_v4, %v8212_v33  ;;  %v25508_v11 = vcombine.low %v21819_v49, %v21819_v49  ;;  %v8214_v43 = vpop.f32.mrf.mxu1 }
 0x368   : > { %25503 = vst [vmem:[#allocation166_spill] sm:$0xff] %v21947_v57  ;;  %v21966_v41 = vunpack.c.l.b16 %v25506_v23  ;;  %v9465_v10 = vmax.f32 %v9209_v18, 0.0  ;;  %v9210_v54 = vadd.f32 %v17503_v28, %v8948_v0  ;;  %v25510_v46 = vcombine.high %v21819_v49, %v21819_v49 }
 0x369   : > { %25505 = vst [vmem:[#allocation167_spill] sm:$0xff] %v21955_v6  ;;  %v21975_v52 = vunpack.c.l.b16 %v25508_v11  ;;  %v25512_v22 = vcombine.low %v21822_v8, %v21822_v8  ;;  %v9800_v36 = vmax.bf16 %v9720_v63, %v21949_v5  ;;  %v9467_v33 = vmax.f32 %v9211_v9, 0.0  ;;  %v8174_v11 = vpop.f32.mrf.mxu0 }
 0x36a   : > { %25507 = vst [vmem:[#allocation168_spill] sm:$0xff] %v21966_v41  ;;  %v21981_v23 = vunpack.c.l.b16 %v25510_v46  ;;  %v9212_v58 = vadd.f32 %v17503_v28, %v8950_v61  ;;  %v25514_v18 = vcombine.high %v21822_v8, %v21822_v8  ;;  %v9721_v43 = vpack.c.bf16 %v9465_v10, %v9465_v10  ;;  %v8215_v46 = vpop.f32.mrf.mxu1 }
 0x36b   : > { %25509 = vst [vmem:[#allocation169_spill] sm:$0xff] %v21975_v52  ;;  %v21986_v47 = vunpack.c.l.b16 %v25512_v22  ;;  %v9466_v49 = vmax.f32 %v9210_v54, 0.0  ;;  %v25516_v12 = vcombine.low %v21835_v40, %v21835_v40  ;;  %v25518_v5 = vcombine.high %v21835_v40, %v21835_v40  ;;  %v8331_v22 = vpop.f32.mrf.mxu0  ;;  %v10185_v40 = vld [vmem:[#allocation2 + $0xa0] sm:$0x11] }
 0x36c   : > { %25511 = vst [vmem:[#allocation170_spill] sm:$0xff] %v21981_v23  ;;  %v21993_v0 = vunpack.c.l.b16 %v25514_v18  ;;  %v9723_v9 = vpack.c.bf16 %v9467_v33, %v9467_v33  ;;  %v9468_v61 = vmax.f32 %v9212_v58, 0.0  ;;  %v25520_v8 = vcombine.low %v21846_v48, %v21846_v48  ;;  %v8372_v46 = vpop.f32.mrf.mxu1 }
 0x36d   : > { %25513 = vst [vmem:[#allocation171_spill] sm:$0xff] %v21986_v47  ;;  %v21998_v17 = vunpack.c.l.b16 %v25516_v12  ;;  %v22003_v63 = vunpack.c.l.b16 %v25518_v5  ;;  %v25522_v10 = vcombine.high %v21846_v48, %v21846_v48  ;;  %v9722_v12 = vpack.c.bf16 %v9466_v49, %v9466_v49  ;;  %v10778_v5 = vld [vmem:[#allocation2 + $0xa0] sm:$0x22]  ;;  %v8333_v49 = vpop.f32.mrf.mxu0 }
 0x36e   : > { %25515 = vst [vmem:[#allocation172_spill] sm:$0xff] %v21993_v0  ;;  %v22008_v11 = vunpack.c.l.b16 %v25520_v8  ;;  %v8951_v18 = vmul.f32 %v17393_v4, %v8331_v22  ;;  %v25524_v33 = vcombine.low %v21862_v32, %v21862_v32  ;;  %v25526_v8 = vcombine.high %v21862_v32, %v21862_v32  ;;  %v8374_v50 = vpop.f32.mrf.mxu1 }
 0x36f   : > { %25517 = vst [vmem:[#allocation173_spill] sm:$0xff] %v21998_v17  ;;  %25519 = vst [vmem:[#allocation174_spill] sm:$0xff] %v22003_v63  ;;  %v22013_v54 = vunpack.c.l.b16 %v25522_v10  ;;  %v9863_v38 = vmax.bf16 %v9723_v9, %v9721_v43  ;;  %v9724_v48 = vpack.c.bf16 %v9468_v61, %v9468_v61  ;;  %v8953_v10 = vmul.f32 %v17393_v4, %v8372_v46 }
 0x370   : > { %25521 = vst [vmem:[#allocation175_spill] sm:$0xff] %v22008_v11  ;;  %v22019_v58 = vunpack.c.l.b16 %v25524_v33  ;;  %v22024_v3 = vunpack.c.l.b16 %v25526_v8  ;;  %v22027_v25 = vunpack.c.l.b16 %v14744_v35  ;;  %v9213_v22 = vadd.f32 %v17503_v28, %v8951_v18  ;;  %v8335_v8 = vpop.f32.mrf.mxu0  ;;  %v8376_v35 = vpop.f32.mrf.mxu1 }
 0x371   : > { %25523 = vst [vmem:[#allocation176_spill] sm:$0xff] %v22013_v54  ;;  %v8952_v16 = vmul.f32 %v17393_v4, %v8333_v49  ;;  %v14602_v56 = vcombine.low %v10185_v40, %v10185_v40  ;;  %v14603_v33 = vcombine.high %v10185_v40, %v10185_v40  ;;  %v9864_v37 = vmax.bf16 %v9724_v48, %v9722_v12 }
 0x372   : > { %25525 = vst [vmem:[#allocation177_spill] sm:$0xff] %v22019_v58  ;;  %25527 = vst [vmem:[#allocation178_spill] sm:$0xff] %v22024_v3  ;;  %v9215_v53 = vadd.f32 %v17503_v28, %v8953_v10  ;;  %v8954_v32 = vmul.f32 %v17393_v4, %v8374_v50  ;;  %v14746_v43 = vcombine.low %v10778_v5, %v10778_v5  ;;  %v9469_v61 = vmax.f32 %v9213_v22, 0.0  ;;  %v8336_v45 = vpop.f32.mrf.mxu0  ;;  %v8377_v48 = vpop.f32.mrf.mxu1 }
 0x373   : > { %25528 = vst [vmem:[#allocation179_spill] sm:$0xff] %v22027_v25  ;;  %v9927_v9 = vmax.bf16 %v9863_v38, %v9799_v60  ;;  %v9214_v46 = vadd.f32 %v17503_v28, %v8952_v16  ;;  %v22034_v19 = vunpack.c.l.b16 %v14603_v33  ;;  %v9928_v18 = vmax.bf16 %v9864_v37, %v9800_v36 }
 0x374   : > { %v9471_v25 = vmax.f32 %v9215_v53, 0.0  ;;  %v9216_v49 = vadd.f32 %v17503_v28, %v8954_v32  ;;  %v14747_v40 = vcombine.high %v10778_v5, %v10778_v5  ;;  %v25529_v50 = vcombine.high %v21916_v59, %v21916_v59  ;;  %v8413_v33 = vpop.f32.mrf.mxu0  ;;  %v8454_v32 = vpop.f32.mrf.mxu1 }
 0x375   : > { %v9470_v12 = vmax.f32 %v9214_v46, 0.0  ;;  %v10589_v10 = vrot.slane %v22034_v19, 5  ;;  %v11142_v16 = vrot.slane %v21883_v21, 3  ;;  %v14511_v60 = vcombine.low %v9927_v9, %v9928_v18 }
 0x376   : > { %v22041_v38 = vunpack.c.l.b16 %v25529_v50  ;;  %v9472_v22 = vmax.f32 %v9216_v49, 0.0  ;;  %v22044_v37 = vunpack.c.l.b16 %v14602_v56  ;;  %v11143_v53 = vrot.slane %v21894_v20, 2  ;;  %v8415_v46 = vpop.f32.mrf.mxu0  ;;  %v8456_v49 = vpop.f32.mrf.mxu1 }
 0x377   : > { %v22047_v45 = vpack.c.bf16 %v9469_v61, %v9469_v61  ;;  %v22049_v36 = vpack.c.bf16 %v9471_v25, %v9471_v25  ;;  %v8955_v5 = vmul.f32 %v17393_v4, %v8413_v33  ;;  %v22052_v8 = vunpack.c.l.b16 %v14746_v43  ;;  %10154 = vst [vmem:[#allocation2 + $0xf8] sm:$0xff] %v14511_v60 }
 0x378   : > { %25530 = vst [vmem:[#allocation180_spill] sm:$0xff] %v22041_v38  ;;  %25531 = vst [vmem:[#allocation181_spill] sm:$0xff] %v22044_v37  ;;  %v22054_v59 = vpack.c.bf16 %v9470_v12, %v9470_v12  ;;  %v8957_v9 = vmul.f32 %v17393_v4, %v8454_v32  ;;  %v22057_v35 = vunpack.c.l.b16 %v14747_v40  ;;  %v11145_v56 = vrot.slane %v21905_v44, 1  ;;  %v8417_v50 = vpop.f32.mrf.mxu0  ;;  %v8458_v32 = vpop.f32.mrf.mxu1 }
 0x379   : > { %25532 = vst [vmem:[#allocation182_spill] sm:$0xff] %v22052_v8  ;;  %v9728_v18 = vpack.c.bf16 %v9472_v22, %v9472_v22  ;;  %v9217_v61 = vadd.f32 %v17503_v28, %v8955_v5  ;;  %v8956_v25 = vmul.f32 %v17393_v4, %v8415_v46  ;;  %v22064_v43 = vsel %vm10488_vm4, %v10589_v10, %v21961_v1 }
 0x37a   : > { %25533 = vst [vmem:[#allocation183_spill] sm:$0xff] %v22057_v35  ;;  %v9219_v12 = vadd.f32 %v17503_v28, %v8957_v9  ;;  %v8958_v48 = vmul.f32 %v17393_v4, %v8456_v49  ;;  %v11144_v40 = vsel %vm10479_vm1, %v11143_v53, %v11142_v16  ;;  %v11148_v60 = vrot.slane %v21947_v57, 7  ;;  %v8418_v9 = vpop.f32.mrf.mxu0  ;;  %v8459_v57 = vpop.f32.mrf.mxu1 }
 0x37b   : > { %v9801_v22 = vmax.bf16 %v22049_v36, %v22047_v45  ;;  %v9473_v33 = vmax.f32 %v9217_v61, 0.0  ;;  %v9218_v5 = vadd.f32 %v17503_v28, %v8956_v25  ;;  %v11150_v46 = vrot.slane %v21966_v41, 6 }
 0x37c   : > { %v9475_v1 = vmax.f32 %v9219_v12, 0.0  ;;  %v9220_v10 = vadd.f32 %v17503_v28, %v8958_v48  ;;  %v11146_v49 = vsel %vm10482_vm2, %v11145_v56, %v11144_v40  ;;  %v11152_v50 = vrot.slane %v21981_v23, 5  ;;  %v8575_v25 = vpop.f32.mrf.mxu0  ;;  %v8616_v40 = vpop.f32.mrf.mxu1 }
 0x37d   : > { %v9802_v16 = vmax.bf16 %v9728_v18, %v22054_v59  ;;  %v9729_v53 = vpack.c.bf16 %v9473_v33, %v9473_v33  ;;  %v9474_v44 = vmax.f32 %v9218_v5, 0.0  ;;  %v11147_v45 = vsel %vm10485_vm3, %v21921_v30, %v11146_v49 }
 0x37e   : > { %v9731_v36 = vpack.c.bf16 %v9475_v1, %v9475_v1  ;;  %v9476_v61 = vmax.f32 %v9220_v10, 0.0  ;;  %v11149_v12 = vsel %vm10488_vm4, %v11148_v60, %v11147_v45  ;;  %v11154_v48 = vrot.slane %v21993_v0, 4  ;;  %v10186_v9 = vld [vmem:[#allocation2 + $0xf8] sm:$0x11]  ;;  %v10779_v23 = vld [vmem:[#allocation2 + $0xf8] sm:$0x22]  ;;  %v8577_v1 = vpop.f32.mrf.mxu0  ;;  %v8618_v49 = vpop.f32.mrf.mxu1 }
 0x37f   : > { %v9730_v32 = vpack.c.bf16 %v9474_v44, %v9474_v44  ;;  %v8959_v56 = vmul.f32 %v17393_v4, %v8575_v25  ;;  %v11151_v59 = vsel %vm10491_vm5, %v11150_v46, %v11149_v12  ;;  %v11170_v57 = vrot.slane %v22003_v63, 3 }
 0x380   : > { %v9865_v18 = vmax.bf16 %v9731_v36, %v9729_v53  ;;  %v9732_v33 = vpack.c.bf16 %v9476_v61, %v9476_v61  ;;  %v8961_v5 = vmul.f32 %v17393_v4, %v8616_v40  ;;  %v11153_v10 = vsel %vm10494_vm6, %v11152_v50, %v11151_v59  ;;  %v8579_v12 = vpop.f32.mrf.mxu0  ;;  %v8620_v63 = vpop.f32.mrf.mxu1 }
 0x381   : > { %v9221_v60 = vadd.f32 %v17503_v28, %v8959_v56  ;;  %v8960_v44 = vmul.f32 %v17393_v4, %v8577_v1  ;;  %v14604_v45 = vcombine.low %v10186_v9, %v10186_v9  ;;  %v14605_v25 = vcombine.high %v10186_v9, %v10186_v9 }
 0x382   : > { %v9866_v0 = vmax.bf16 %v9732_v33, %v9730_v32  ;;  %v9223_v41 = vadd.f32 %v17503_v28, %v8961_v5  ;;  %v8962_v46 = vmul.f32 %v17393_v4, %v8618_v49  ;;  %v14748_v53 = vcombine.low %v10779_v23, %v10779_v23  ;;  %v8580_v30 = vpop.f32.mrf.mxu0  ;;  %v8621_v5 = vpop.f32.mrf.mxu1 }
 0x383   : > { %v9929_v36 = vmax.bf16 %v9865_v18, %v9801_v22  ;;  %v9477_v61 = vmax.f32 %v9221_v60, 0.0  ;;  %v9222_v40 = vadd.f32 %v17503_v28, %v8960_v44  ;;  %v22092_v50 = vunpack.c.l.b16 %v14605_v25 }
 0x384   : > { %v9930_v56 = vmax.bf16 %v9866_v0, %v9802_v16  ;;  %v9479_v59 = vmax.f32 %v9223_v41, 0.0  ;;  %v9224_v1 = vadd.f32 %v17503_v28, %v8962_v46  ;;  %v14749_v9 = vcombine.high %v10779_v23, %v10779_v23  ;;  %v8657_v44 = vpop.f32.mrf.mxu0  ;;  %v8698_v16 = vpop.f32.mrf.mxu1 }
 0x385   : > { %v22095_v32 = vpack.c.bf16 %v9477_v61, %v9477_v61  ;;  %v9478_v33 = vmax.f32 %v9222_v40, 0.0  ;;  %v10591_v49 = vrot.slane %v22092_v50, 4  ;;  %v11171_v22 = vrot.slane %v22013_v54, 2 }
 0x386   : > { %v14512_v18 = vcombine.low %v9929_v36, %v9930_v56  ;;  %v22099_v60 = vpack.c.bf16 %v9479_v59, %v9479_v59  ;;  %v9480_v63 = vmax.f32 %v9224_v1, 0.0  ;;  %v11173_v0 = vrot.slane %v22024_v3, 1  ;;  %v8659_v36 = vpop.f32.mrf.mxu0 }
 0x387   : > { %v8963_v41 = vmul.f32 %v17393_v4, %v8657_v44  ;;  %v22103_v30 = vunpack.c.l.b16 %v14604_v45  ;;  %v22105_v23 = vunpack.c.l.b16 %v14748_v53  ;;  %v22108_v25 = vsel %vm10497_vm7, %v11154_v48, %v11153_v10  ;;  %v8700_v48 = vpop.f32.mrf.mxu1 }
 0x388   : > { %10155 = vst [vmem:[#allocation2 + $0x20] sm:$0xff] %v14512_v18  ;;  %v9734_v46 = vpack.c.bf16 %v9478_v33, %v9478_v33  ;;  %v8965_v12 = vmul.f32 %v17393_v4, %v8698_v16  ;;  %v22113_v61 = vsel %vm10491_vm5, %v10591_v49, %v22064_v43  ;;  %v22115_v40 = vunpack.c.l.b16 %v14749_v9  ;;  %v8661_v5 = vpop.f32.mrf.mxu0 }
 0x389   : > { %25534 = vst [vmem:[#allocation184_spill] sm:$0xff] %v22103_v30  ;;  %25535 = vst [vmem:[#allocation185_spill] sm:$0xff] %v22105_v23  ;;  %v9803_v45 = vmax.bf16 %v22099_v60, %v22095_v32  ;;  %v9225_v53 = vadd.f32 %v17503_v28, %v8963_v41  ;;  %v8964_v56 = vmul.f32 %v17393_v4, %v8659_v36  ;;  %v8702_v18 = vpop.f32.mrf.mxu1  ;;  %v11176_v60 = vrot.slane %v22057_v35, 7 }
 0x38a   : > { %25536 = vst [vmem:[#allocation186_spill] sm:$0xff] %v22115_v40  ;;  %v11172_v10 = vsel %vm10479_vm1, %v11171_v22, %v11170_v57  ;;  %v9736_v59 = vpack.c.bf16 %v9480_v63, %v9480_v63  ;;  %v9227_v1 = vadd.f32 %v17503_v28, %v8965_v12  ;;  %v8966_v33 = vmul.f32 %v17393_v4, %v8700_v48  ;;  %v8662_v22 = vpop.f32.mrf.mxu0 }
 0x38b   : > { %v11174_v43 = vsel %vm10482_vm2, %v11173_v0, %v11172_v10  ;;  %v9481_v9 = vmax.f32 %v9225_v53, 0.0  ;;  %v9226_v49 = vadd.f32 %v17503_v28, %v8964_v56  ;;  %v10541_v63 = vrot.slane %v21545_v26, 1  ;;  %v8703_v0 = vpop.f32.mrf.mxu1 }
 0x38c   : > { %v11175_v32 = vsel %vm10485_vm3, %v22041_v38, %v11174_v43  ;;  %v9483_v44 = vmax.f32 %v9227_v1, 0.0  ;;  %v9228_v57 = vadd.f32 %v17503_v28, %v8966_v33  ;;  %v10543_v4 = vrot.slane %v21659_v31, 7 }
 0x38d   : > { %v9737_v41 = vpack.c.bf16 %v9481_v9, %v9481_v9  ;;  %v9482_v16 = vmax.f32 %v9226_v49, 0.0  ;;  %v11178_v12 = vrot.slane %v22115_v40, 6  ;;  %v10545_v36 = vrot.slane %v21674_v15, 6  ;;  %v25599_v15 = vld [vmem:[#allocation51_spill] sm:$0xff] }
 0x38e   : > { %v9804_v53 = vmax.bf16 %v9736_v59, %v9734_v46  ;;  %v9739_v56 = vpack.c.bf16 %v9483_v44, %v9483_v44  ;;  %v9484_v48 = vmax.f32 %v9228_v57, 0.0  ;;  %v10542_v10 = vsel %vm10479_vm1, %v21624_v27, %v10541_v63  ;;  %v15827_v27 = vld [vmem:[%s23672_s4 + $0x278] sm:$0xff]  }
 0x38f   : > { %v9738_v1 = vpack.c.bf16 %v9482_v16, %v9482_v16  ;;  %v10187_v28 = vld [vmem:[#allocation2 + $0x20] sm:$0x11]  ;;  %v10780_v33 = vld [vmem:[#allocation2 + $0x20] sm:$0x22]  ;;  %v11177_v5 = vsel %vm10488_vm4, %v11176_v60, %v11175_v32  ;;  %v10544_v43 = vsel %vm10482_vm2, %v10543_v4, %v10542_v10  ;;  %v10547_v9 = vrot.slane %v21688_v42, 5 }
 0x390   : > { %v9867_v49 = vmax.bf16 %v9739_v56, %v9737_v41  ;;  %v9740_v18 = vpack.c.bf16 %v9484_v48, %v9484_v48  ;;  %v14606_v22 = vcombine.low %v10187_v28, %v10187_v28  ;;  %v14607_v0 = vcombine.high %v10187_v28, %v10187_v28  ;;  %v25598_v42 = vld [vmem:[#allocation48_spill] sm:$0xff] }
 0x391   : > { %v14750_v26 = vcombine.low %v10780_v33, %v10780_v33  ;;  %v14751_v46 = vcombine.high %v10780_v33, %v10780_v33  ;;  %v11179_v59 = vsel %vm10491_vm5, %v11178_v12, %v11177_v5  ;;  %v10546_v44 = vsel %vm10485_vm3, %v10545_v36, %v10544_v43 }
 0x392   : > { %v9868_v57 = vmax.bf16 %v9740_v18, %v9738_v1  ;;  %v22141_v63 = vunpack.c.l.b16 %v14607_v0  ;;  %v10549_v16 = vrot.slane %v21693_v13, 4  ;;  %v10551_v32 = vrot.slane %v21699_v14, 3  ;;  %v25597_v14 = vld [vmem:[#allocation130_spill] sm:$0xff] }
 0x393   : > { %v22145_v60 = vunpack.c.l.b16 %v14606_v22  ;;  %v22147_v4 = vunpack.c.l.b16 %v14751_v46  ;;  %v10548_v41 = vsel %vm10488_vm4, %v10547_v9, %v10546_v44  ;;  %v10553_v56 = vrot.slane %v21703_v51, 2 }
 0x394   : > { %v9931_v48 = vmax.bf16 %v9867_v49, %v9803_v45  ;;  %v9932_v10 = vmax.bf16 %v9868_v57, %v9804_v53  ;;  %v10569_v12 = vrot.slane %v21708_v2, 1  ;;  %v10571_v36 = vrot.slane %v21833_v34, 7  ;;  %v25596_v34 = vld [vmem:[#allocation50_spill] sm:$0xff] }
 0x395   : > { %25537 = vst [vmem:[#allocation187_spill] sm:$0xff] %v22145_v60  ;;  %25538 = vst [vmem:[#allocation188_spill] sm:$0xff] %v22147_v4  ;;  %v10593_v1 = vrot.slane %v22141_v63, 3  ;;  %v22154_v28 = vunpack.c.l.b16 %v14750_v26  ;;  %v11180_v33 = vrot.slane %v22147_v4, 5  ;;  %v10573_v5 = vrot.slane %v21940_v39, 6 }
 0x396   : > { %v14513_v43 = vcombine.low %v9931_v48, %v9932_v10  ;;  %v10550_v18 = vsel %vm10491_vm5, %v10549_v16, %v10548_v41  ;;  %v10570_v9 = vsel %vm10479_vm1, %v21741_v62, %v10569_v12  ;;  %v10575_v45 = vrot.slane %v22044_v37, 5  ;;  %v11351_v10 = vld [vmem:[#allocation2 + $0x8] sm:$0x44]  ;;  %v25595_v37 = vld [vmem:[#allocation42_spill] sm:$0xff] }
 0x397   : > { %25539 = vst [vmem:[#allocation189_spill] sm:$0xff] %v22154_v28  ;;  %v10552_v53 = vsel %vm10494_vm6, %v10551_v32, %v10550_v18  ;;  %v10572_v49 = vsel %vm10482_vm2, %v10571_v36, %v10570_v9  ;;  %v10577_v22 = vrot.slane %v22103_v30, 4  ;;  %v10579_v26 = vrot.slane %v22145_v60, 3 }
 0x398   : > { %10156 = vst [vmem:[#allocation2 + $0x98] sm:$0xff] %v14513_v43  ;;  %v22167_v0 = vsel %vm10497_vm7, %v10553_v56, %v10552_v53  ;;  %v10574_v46 = vsel %vm10485_vm3, %v10573_v5, %v10572_v49  ;;  %v11129_v44 = vrot.slane %v21888_v24, 2  ;;  %v11131_v57 = vrot.slane %v21899_v55, 1  ;;  %v25540_v49 = vld [vmem:[#allocation161_spill] sm:$0xff] }
 0x399   : > { %v10594_v16 = vsel %vm10494_vm6, %v10593_v1, %v22113_v61  ;;  %v11181_v32 = vsel %vm10494_vm6, %v11180_v33, %v11179_v59  ;;  %v10576_v41 = vsel %vm10488_vm4, %v10575_v45, %v10574_v46  ;;  %v11128_v48 = vrot.slane %v21555_v29, 3  ;;  %v11352_v1 = vld [vmem:[#allocation2 + $0x78] sm:$0x44] }
 0x39a   : > { %v10578_v12 = vsel %vm10491_vm5, %v10577_v22, %v10576_v41  ;;  %v11134_v56 = vrot.slane %v21933_v7, 7  ;;  %v11136_v36 = vrot.slane %v21955_v6, 6  ;;  %v11138_v5 = vrot.slane %v21975_v52, 5 }
 0x39b   : > { %v10580_v43 = vsel %vm10494_vm6, %v10579_v26, %v10578_v12  ;;  %v11130_v18 = vsel %vm10479_vm1, %v11129_v44, %v11128_v48  ;;  %v11157_v61 = vrot.slane %v22008_v11, 2  ;;  %v11159_v59 = vrot.slane %v22019_v58, 1 }
 0x39c   : > { %v11132_v33 = vsel %vm10482_vm2, %v11131_v57, %v11130_v18  ;;  %v11140_v9 = vrot.slane %v21986_v47, 4  ;;  %v11156_v45 = vrot.slane %v21998_v17, 3  ;;  %v14862_v53 = vcombine.low %v11351_v10, %v11351_v10 }
 0x39d   : > { %v11133_v22 = vsel %vm10485_vm3, %v25540_v49, %v11132_v33  ;;  %v11162_v46 = vrot.slane %v22052_v8, 7  ;;  %v11164_v26 = vrot.slane %v22105_v23, 6  ;;  %v14863_v44 = vcombine.high %v11351_v10, %v11351_v10 }
 0x39e   : > { %v11135_v41 = vsel %vm10488_vm4, %v11134_v56, %v11133_v22  ;;  %v11158_v48 = vsel %vm10479_vm1, %v11157_v61, %v11156_v45  ;;  %v11166_v12 = vrot.slane %v22154_v28, 5  ;;  %v14865_v57 = vcombine.high %v11352_v1, %v11352_v1  ;;  %v25542_v22 = vld [vmem:[#allocation179_spill] sm:$0xff] }
 0x39f   : > { %v10188_v18 = vld [vmem:[#allocation2 + $0x98] sm:$0x11]  ;;  %v10781_v58 = vld [vmem:[#allocation2 + $0x98] sm:$0x22]  ;;  %v11137_v11 = vsel %vm10491_vm5, %v11136_v36, %v11135_v41  ;;  %v11160_v55 = vsel %vm10482_vm2, %v11159_v59, %v11158_v48  ;;  %v14864_v17 = vcombine.low %v11352_v1, %v11352_v1  ;;  %v22197_v33 = vunpack.c.l.b16 %v14862_v53 }
 0x3a0   : > { %v14608_v8 = vcombine.low %v10188_v18, %v10188_v18  ;;  %v14609_v47 = vcombine.high %v10188_v18, %v10188_v18  ;;  %v14752_v23 = vcombine.low %v10781_v58, %v10781_v58  ;;  %v14753_v10 = vcombine.high %v10781_v58, %v10781_v58 }
 0x3a1   : > { %25541 = vst [vmem:[#allocation190_spill] sm:$0xff] %v22197_v33  ;;  %v11139_v56 = vsel %vm10494_vm6, %v11138_v5, %v11137_v11  ;;  %v11161_v61 = vsel %vm10485_vm3, %v25542_v22, %v11160_v55  ;;  %v22202_v45 = vunpack.c.l.b16 %v14863_v44  ;;  %v22204_v28 = vunpack.c.l.b16 %v14865_v57  ;;  %v25549_v5 = vld [vmem:[#allocation34_spill] sm:$0xff]  ;;  %v25550_v57 = vld [vmem:[#allocation35_spill] sm:$0xff] }
 0x3a2   : > { %v22206_v52 = vunpack.c.l.b16 %v14608_v8  ;;  %v22208_v36 = vunpack.c.l.b16 %v14609_v47  ;;  %v22210_v59 = vunpack.c.l.b16 %v14752_v23  ;;  %v22212_v1 = vunpack.c.l.b16 %v14753_v10 }
 0x3a3   : > { %25543 = vst [vmem:[#allocation191_spill] sm:$0xff] %v22202_v45  ;;  %25544 = vst [vmem:[#allocation192_spill] sm:$0xff] %v22204_v28  ;;  %v11141_v53 = vsel %vm10497_vm7, %v11140_v9, %v11139_v56  ;;  %v11163_v58 = vsel %vm10488_vm4, %v11162_v46, %v11161_v61  ;;  %v22216_v11 = vunpack.c.l.b16 %v14864_v17  ;;  %v11694_v55 = vrot.slane %v25549_v5, 1  ;;  %v25551_v61 = vld [vmem:[#allocation153_spill] sm:$0xff] }
 0x3a4   : > { %25545 = vst [vmem:[#allocation193_spill] sm:$0xff] %v22206_v52  ;;  %25546 = vst [vmem:[#allocation194_spill] sm:$0xff] %v22210_v59  ;;  %v10595_v44 = vrot.slane %v22208_v36, 2  ;;  %v11182_v41 = vrot.slane %v22212_v1, 4  ;;  %v10581_v8 = vrot.slane %v22206_v52, 2  ;;  %v11165_v47 = vsel %vm10491_vm5, %v11164_v26, %v11163_v58 }
 0x3a5   : > { %25547 = vst [vmem:[#allocation195_spill] sm:$0xff] %v22212_v1  ;;  %25548 = vst [vmem:[#allocation196_spill] sm:$0xff] %v22216_v11  ;;  %v11167_v23 = vsel %vm10494_vm6, %v11166_v12, %v11165_v47  ;;  %v11168_v48 = vrot.slane %v22210_v59, 4  ;;  %v11708_v9 = vrot.slane %v25550_v57, 1  ;;  %v11711_v46 = vrot.slane %v22202_v45, 7  ;;  %v25552_v57 = vld [vmem:[#allocation44_spill] sm:$0xff] }
 0x3a6   : > { %v10596_v17 = vsel %vm10497_vm7, %v10595_v44, %v10594_v16  ;;  %v11183_v18 = vsel %vm10497_vm7, %v11182_v41, %v11181_v32  ;;  %v10582_v10 = vsel %vm10497_vm7, %v10581_v8, %v10580_v43  ;;  %v11713_v56 = vrot.slane %v22204_v28, 6  ;;  %v25553_v44 = vld [vmem:[#allocation131_spill] sm:$0xff]  ;;  %v11936_v41 = vld [vmem:[#allocation2 + $0x60] sm:$0x88]  ;;  %v25554_v8 = vld [vmem:[#allocation110_spill] sm:$0xff] }
 0x3a7   : > { %v10600_v5 = vpack.c.b16 %v10596_v17, %v25551_v61  ;;  %v11187_v26 = vpack.c.b16 %v11183_v18, %v22108_v25  ;;  %v10599_v12 = vpack.c.b16 %v10582_v10, %v22167_v0  ;;  %v11169_v58 = vsel %vm10497_vm7, %v11168_v48, %v11167_v23  ;;  %v11935_v43 = vld [vmem:[#allocation2 + $0xb8] sm:$0x88]  ;;  %v25555_v23 = vld [vmem:[#allocation49_spill] sm:$0xff] }
 0x3a8   : > { %v11186_v47 = vpack.c.b16 %v11169_v58, %v11141_v53  ;;  %v11695_v45 = vsel %vm10488_vm4, %v11694_v55, %v25552_v57  ;;  %v11709_v32 = vsel %vm10488_vm4, %v11708_v9, %v25553_v44  ;;  %v11937_v57 = vld [vmem:[#allocation2 + $0xf0] sm:$0x88]  ;;  %v11938_v17 = vld [vmem:[#allocation2 + $0x8] sm:$0x88]  ;;  %v11939_v10 = vld [vmem:[#allocation2 + $0x78] sm:$0x88]  ;;  %v15001_v58 = vcombine.high %v11935_v43, %v11935_v43 }
 0x3a9   : > { %10741 = vmatprep.mubr.bf16.mxu0 %v10600_v5  ;;  %11328 = vmatprep.mubr.bf16.mxu1 %v11187_v26  ;;  %v22242_v25 = vsel %vm10491_vm5, %v25554_v8, %v11695_v45  ;;  %v11710_v53 = vsel %vm10491_vm5, %v25555_v23, %v11709_v32  ;;  %v15000_v26 = vcombine.low %v11935_v43, %v11935_v43  ;;  %v25557_v44 = vld [vmem:[#allocation32_spill] sm:$0xff]  ;;  %v25561_v48 = vld [vmem:[#allocation127_spill] sm:$0xff]  ;;  %v12265_v2 = vrot.slane %v25595_v37, 4 }
 0x3aa   : > { %10742 = vmatmul.mubr.bf16.gmra.mxu0 %v10599_v12  ;;  %11329 = vmatmul.mubr.bf16.gmra.mxu1 %v11186_v47  ;;  %v11712_v9 = vsel %vm10494_vm6, %v11711_v46, %v11710_v53  ;;  %v25558_v32 = vcombine.high %v25557_v44, %v25557_v44  ;;  %v25560_v12 = vld [vmem:[#allocation29_spill] sm:$0xff]  ;;  %v15002_v0 = vcombine.low %v11936_v41, %v11936_v41  ;;  %v22291_v28 = vunpack.c.l.b16 %v15001_v58 }
 0x3ab   : > { %v11714_v61 = vsel %vm10497_vm7, %v11713_v56, %v11712_v9  ;;  %v15003_v46 = vcombine.high %v11936_v41, %v11936_v41  ;;  %v15004_v53 = vcombine.low %v11937_v57, %v11937_v57  ;;  %v15005_v5 = vcombine.high %v11937_v57, %v11937_v57  ;;  %v25587_v58 = vld [vmem:[#allocation109_spill] sm:$0xff] }
 0x3ac   : > { %v22256_v55 = vunpack.c.l.b16 %v25558_v32  ;;  %v11772_v47 = vpack.c.b16 %v11714_v61, %v25560_v12  ;;  %v15006_v16 = vcombine.low %v11938_v17, %v11938_v17  ;;  %v15007_v18 = vcombine.high %v11938_v17, %v11938_v17  ;;  %v25566_v61 = vld [vmem:[#allocation128_spill] sm:$0xff]  ;;  %25577 = vst [vmem:[#allocation197_spill] sm:$0xff] %v22291_v28 }
 0x3ad   : > { %v15008_v8 = vcombine.low %v11939_v10, %v11939_v10  ;;  %v15009_v45 = vcombine.high %v11939_v10, %v11939_v10  ;;  %v25562_v56 = vcombine.low %v25561_v48, %v25561_v48  ;;  %v25564_v9 = vcombine.high %v25561_v48, %v25561_v48  ;;  %v25571_v10 = vld [vmem:[#allocation132_spill] sm:$0xff] }
 0x3ae   : > { %25559 = vst [vmem:[#allocation153_spill] sm:$0xff] %v22256_v55  ;;  %11907 = vmatprep.mubr.bf16.mxu0 %v11772_v47  ;;  %v25567_v41 = vcombine.low %v25566_v61, %v25566_v61  ;;  %v25569_v57 = vcombine.high %v25566_v61, %v25566_v61  ;;  %v25572_v12 = vcombine.low %v25571_v10, %v25571_v10  ;;  %v22295_v23 = vunpack.c.l.b16 %v15003_v46  ;;  %v25589_v46 = vld [vmem:[#allocation41_spill] sm:$0xff] }
 0x3af   : > { %v22262_v43 = vunpack.c.l.b16 %v25562_v56  ;;  %v22267_v44 = vunpack.c.l.b16 %v25564_v9  ;;  %v25574_v48 = vcombine.high %v25571_v10, %v25571_v10  ;;  %v22289_v9 = vunpack.c.l.b16 %v15000_v26  ;;  %v25586_v26 = vld [vmem:[#allocation37_spill] sm:$0xff] }
 0x3b0   : > { %v22272_v32 = vunpack.c.l.b16 %v25567_v41  ;;  %v22277_v17 = vunpack.c.l.b16 %v25569_v57  ;;  %v22282_v47 = vunpack.c.l.b16 %v25572_v12  ;;  %v22293_v41 = vunpack.c.l.b16 %v15002_v0  ;;  %25579 = vst [vmem:[#allocation199_spill] sm:$0xff] %v22295_v23  ;;  %v25588_v0 = vld [vmem:[#allocation39_spill] sm:$0xff] }
 0x3b1   : > { %25563 = vst [vmem:[#allocation44_spill] sm:$0xff] %v22262_v43  ;;  %25565 = vst [vmem:[#allocation131_spill] sm:$0xff] %v22267_v44  ;;  %v22287_v56 = vunpack.c.l.b16 %v25574_v48  ;;  %v22297_v61 = vunpack.c.l.b16 %v15004_v53  ;;  %v22299_v57 = vunpack.c.l.b16 %v15005_v5  ;;  %v22301_v59 = vunpack.c.l.b16 %v15006_v16  ;;  %v25590_v53 = vld [vmem:[#allocation45_spill] sm:$0xff]  ;;  %v25591_v5 = vld [vmem:[#allocation38_spill] sm:$0xff] }
 0x3b2   : > { %25568 = vst [vmem:[#allocation32_spill] sm:$0xff] %v22272_v32  ;;  %25570 = vst [vmem:[#allocation29_spill] sm:$0xff] %v22277_v17  ;;  %v22303_v12 = vunpack.c.l.b16 %v15007_v18  ;;  %v22305_v22 = vunpack.c.l.b16 %v15008_v8  ;;  %v22307_v10 = vunpack.c.l.b16 %v15009_v45  ;;  %v12246_v48 = vrot.slane %v25586_v26, 7  ;;  %v25592_v16 = vld [vmem:[#allocation129_spill] sm:$0xff]  ;;  %v25593_v8 = vld [vmem:[#allocation47_spill] sm:$0xff] }
 0x3b3   : > { %25573 = vst [vmem:[#allocation127_spill] sm:$0xff] %v22282_v47  ;;  %25575 = vst [vmem:[#allocation128_spill] sm:$0xff] %v22287_v56  ;;  %v12247_v6 = vrot.slane %v25587_v58, 6  ;;  %v12249_v7 = vrot.slane %v25588_v0, 5  ;;  %v12251_v49 = vrot.slane %v25589_v46, 4  ;;  %v12253_v24 = vrot.slane %v25590_v53, 3 }
 0x3b4   : > { %25576 = vst [vmem:[#allocation132_spill] sm:$0xff] %v22289_v9  ;;  %25578 = vst [vmem:[#allocation198_spill] sm:$0xff] %v22293_v41  ;;  %v12260_v29 = vrot.slane %v25591_v5, 7  ;;  %v12261_v52 = vrot.slane %v25592_v16, 6  ;;  %v12255_v60 = vrot.slane %v25593_v8, 2  ;;  %v25594_v45 = vld [vmem:[#allocation40_spill] sm:$0xff] }
 0x3b5   : > { %25580 = vst [vmem:[#allocation200_spill] sm:$0xff] %v22297_v61  ;;  %25581 = vst [vmem:[#allocation201_spill] sm:$0xff] %v22299_v57  ;;  %v12248_v18 = vsel %vm10479_vm1, %v12247_v6, %v12246_v48  ;;  %v12263_v30 = vrot.slane %v25594_v45, 5  ;;  %v12257_v62 = vrot.slane %v25596_v34, 1  ;;  %v12267_v13 = vrot.slane %v25597_v14, 3 }
 0x3b6   : > { %25582 = vst [vmem:[#allocation202_spill] sm:$0xff] %v22301_v59  ;;  %25583 = vst [vmem:[#allocation203_spill] sm:$0xff] %v22303_v12  ;;  %v12250_v39 = vsel %vm10482_vm2, %v12249_v7, %v12248_v18  ;;  %v12262_v51 = vsel %vm10479_vm1, %v12261_v52, %v12260_v29  ;;  %v12269_v5 = vrot.slane %v25598_v42, 2  ;;  %v12271_v16 = vrot.slane %v25599_v15, 1 }
 0x3b7   : > { %25584 = vst [vmem:[#allocation204_spill] sm:$0xff] %v22305_v22  ;;  %25585 = vst [vmem:[#allocation205_spill] sm:$0xff] %v22307_v10  ;;  %v12274_v6 = vrot.slane %v22262_v43, 7  ;;  %v12275_v48 = vrot.slane %v22272_v32, 6  ;;  %v12252_v45 = vsel %vm10485_vm3, %v12251_v49, %v12250_v39  ;;  %v12264_v37 = vsel %vm10482_vm2, %v12263_v30, %v12262_v51  ;;  %v22471_v32 = vld [vmem:[#allocation2 + $0x20] sm:$0x44] }
 0x3b8   : > { %v12277_v7 = vrot.slane %v22282_v47, 5  ;;  %v12279_v18 = vrot.slane %v22289_v9, 4  ;;  %v12254_v29 = vsel %vm10488_vm4, %v12253_v24, %v12252_v45  ;;  %v12266_v52 = vsel %vm10485_vm3, %v12265_v2, %v12264_v37  ;;  %v25600_v37 = vld [vmem:[#allocation134_spill] sm:$0xff] }
 0x3b9   : > { %v12276_v34 = vsel %vm10479_vm1, %v12275_v48, %v12274_v6  ;;  %v12281_v15 = vrot.slane %v22293_v41, 3  ;;  %v12256_v42 = vsel %vm10491_vm5, %v12255_v60, %v12254_v29  ;;  %v12268_v14 = vsel %vm10488_vm4, %v12267_v13, %v12266_v52  ;;  %v22453_v41 = vld [vmem:[#allocation2 + $0xa0] sm:$0x44] }
 0x3ba   : > { %v12278_v39 = vsel %vm10482_vm2, %v12277_v7, %v12276_v34  ;;  %v12283_v51 = vrot.slane %v22297_v61, 2  ;;  %v12258_v30 = vsel %vm10494_vm6, %v12257_v62, %v12256_v42  ;;  %v12270_v49 = vsel %vm10491_vm5, %v12269_v5, %v12268_v14 }
 0x3bb   : > { %v12280_v24 = vsel %vm10485_vm3, %v12279_v18, %v12278_v39  ;;  %v12285_v2 = vrot.slane %v22301_v59, 1  ;;  %v12259_v45 = vsel %vm10497_vm7, %v25600_v37, %v12258_v30  ;;  %v12288_v60 = vrot.slane %v22267_v44, 7  ;;  %v22413_v30 = vld [vmem:[#allocation2 + $0x90] sm:$0x44] }
 0x3bc   : > { %v12282_v6 = vsel %vm10488_vm4, %v12281_v15, %v12280_v24  ;;  %v12289_v13 = vrot.slane %v22277_v17, 6  ;;  %v12291_v48 = vrot.slane %v22287_v56, 5  ;;  %v12293_v42 = vrot.slane %v22291_v28, 4  ;;  %v22633_v56 = vld [vmem:[#allocation2 + $0x58] sm:$0x88] }
 0x3bd   : > { %v12284_v34 = vsel %vm10491_vm5, %v12283_v51, %v12282_v6  ;;  %v12295_v14 = vrot.slane %v22295_v23, 3  ;;  %v12272_v62 = vsel %vm10494_vm6, %v12271_v16, %v12270_v49  ;;  %v12297_v15 = vrot.slane %v22299_v57, 2  ;;  %v22408_v49 = vld [vmem:[#allocation2 + $0xe0] sm:$0x44]  ;;  %v22425_v16 = vld [vmem:[#allocation2 + $0xa8] sm:$0x44] }
 0x3be   : > { %v12286_v5 = vsel %vm10494_vm6, %v12285_v2, %v12284_v34  ;;  %v12290_v7 = vsel %vm10479_vm1, %v12289_v13, %v12288_v60  ;;  %v12273_v18 = vsel %vm10497_vm7, %v22256_v55, %v12272_v62  ;;  %v12299_v39 = vrot.slane %v22303_v12, 1  ;;  %v22375_v62 = vld [vmem:[#allocation2 + $0x38] sm:$0x44]  ;;  %v15826_v55 = vld [vmem:[%s23672_s4 + $0x100] sm:$0xff]  }
 0x3bf   : > { %v12287_v29 = vsel %vm10497_vm7, %v22305_v22, %v12286_v5  ;;  %v12292_v52 = vsel %vm10482_vm2, %v12291_v48, %v12290_v7  ;;  %v25602_v48 = vld [vmem:[#allocation18_spill] sm:$0xff]  ;;  %v22394_v7 = vld [vmem:[#allocation2 + $0x40] sm:$0x44]  ;;  %v14874_v61 = vcombine.low %v22408_v49, %v22408_v49  ;;  %v14876_v9 = vcombine.low %v22413_v30, %v22413_v30 }
 0x3c0   : > { %v12294_v51 = vsel %vm10485_vm3, %v12293_v42, %v12292_v52  ;;  %v25601_v42 = vld [vmem:[#allocation108_spill] sm:$0xff]  ;;  %v25603_v60 = vrot.slane %v25602_v48, 7  ;;  %v12358_v2 = vpack.c.b16 %v12287_v29, %v12259_v45  ;;  %v14867_v45 = vcombine.high %v22375_v62, %v22375_v62 }
 0x3c1   : > { %v12296_v24 = vsel %vm10488_vm4, %v12295_v14, %v12294_v51  ;;  %v22381_v51 = vld [vmem:[#allocation2 + $0x58] sm:$0x44]  ;;  %v25604_v14 = vld [vmem:[#allocation21_spill] sm:$0xff]  ;;  %v14870_v22 = vcombine.low %v22394_v7, %v22394_v7  ;;  %v14871_v59 = vcombine.high %v22394_v7, %v22394_v7  ;;  %v14875_v7 = vcombine.high %v22408_v49, %v22408_v49  ;;  %v15801_v49 = vld [vmem:[%s23672_s4 + $0x30] sm:$0xff]  }
 0x3c2   : > { %v12298_v13 = vsel %vm10491_vm5, %v12297_v15, %v12296_v24  ;;  %v25605_v6 = vrot.slane %v25604_v14, 6  ;;  %v25606_v24 = vrot.slane %v22197_v33, 7  ;;  %v14868_v29 = vcombine.low %v22381_v51, %v22381_v51  ;;  %v15803_v33 = vld [vmem:[%s23672_s4 + $0x68] sm:$0xff]  }
 0x3c3   : > { %v12300_v5 = vsel %vm10494_vm6, %v12299_v39, %v12298_v13  ;;  %v11670_v39 = vsel %vm10494_vm6, %v25603_v60, %v25601_v42  ;;  %v15733_v13 = vld [vmem:[%s23672_s4 + $0x38] sm:$0xff]   ;;  %v22406_v42 = vld [vmem:[#allocation2 + $0xc8] sm:$0x44]  ;;  %v14882_v8 = vcombine.low %v22425_v16, %v22425_v16  ;;  %v14883_v14 = vcombine.high %v22425_v16, %v22425_v16 }
 0x3c4   : > { %v12301_v15 = vsel %vm10497_vm7, %v22307_v10, %v12300_v5  ;;  %v11672_v5 = vsel %vm10497_vm7, %v25605_v6, %v11670_v39  ;;  %v11698_v34 = vsel %vm10494_vm6, %v25606_v24, %v22242_v25  ;;  %v15734_v60 = vld [vmem:[%s23672_s4 + $0x138] sm:$0xff]   ;;  %v22415_v6 = vld [vmem:[#allocation2 + $0x70] sm:$0x44]  ;;  %v22417_v39 = vld [vmem:[#allocation2 + $0xc0] sm:$0x44]  ;;  %v14866_v25 = vcombine.low %v22375_v62, %v22375_v62 }
 0x3c5   : > { %v12359_v52 = vpack.c.b16 %v12301_v15, %v12273_v18  ;;  %v25607_v18 = vrot.slane %v22216_v11, 6  ;;  %v15799_v62 = vld [vmem:[%s23672_s4 + $0x70] sm:$0xff]   ;;  %v14878_v37 = vcombine.low %v22415_v6, %v22415_v6  ;;  %v14881_v43 = vcombine.high %v22417_v39, %v22417_v39  ;;  %v22484_v11 = vld [vmem:[#allocation2 + $0x98] sm:$0x44] }
 0x3c6   : > { %v22461_v47 = vunpack.c.l.b16 %v14866_v25  ;;  %v14880_v25 = vcombine.low %v22417_v39, %v22417_v39  ;;  %v14897_v58 = vcombine.high %v22484_v11, %v22484_v11  ;;  %v22522_v26 = vunpack.c.l.b16 %v14867_v45 }
 0x3c7   : > { %v11700_v15 = vsel %vm10497_vm7, %v25607_v18, %v11698_v34  ;;  %12494 = vmatprep.mubr.bf16.mxu1 %v12359_v52  ;;  %v22427_v34 = vld [vmem:[#allocation2 + $0xd0] sm:$0x44]  ;;  %v14869_v18 = vcombine.high %v22381_v51, %v22381_v51  ;;  %v14873_v51 = vcombine.high %v22406_v42, %v22406_v42  ;;  %v22530_v10 = vunpack.c.l.b16 %v14868_v29 }
 0x3c8   : > { %v11771_v24 = vpack.c.b16 %v11700_v15, %v11672_v5  ;;  %12495 = vmatmul.mubr.bf16.vlgmr.msra.gmra.mxu1 %v12358_v2  ;;  %v22438_v52 = vld [vmem:[#allocation2 + $0x10] sm:$0x44]  ;;  %v22440_v5 = vld [vmem:[#allocation2 + $0x28] sm:$0x44]  ;;  %v14872_v15 = vcombine.low %v22406_v42, %v22406_v42  ;;  %v14877_v42 = vcombine.high %v22413_v30, %v22413_v30  ;;  %v14879_v30 = vcombine.high %v22415_v6, %v22415_v6 }
 0x3c9   : > { %v15800_v2 = vld [vmem:[%s23672_s4 + $0x170] sm:$0xff]   ;;  %15279 = vmatpush3.bf16.msra.mxu1 %v15734_v60  ;;  %v14884_v6 = vcombine.low %v22427_v34, %v22427_v34  ;;  %v14885_v53 = vcombine.high %v22427_v34, %v22427_v34  ;;  %v14886_v39 = vcombine.low %v22438_v52, %v22438_v52  ;;  %v14887_v48 = vcombine.high %v22438_v52, %v22438_v52 }
 0x3ca   : > { %11908 = vmatmul.mubr.bf16.vlgmr.msra.gmra.mxu0 %v11771_v24  ;;  %v15802_v60 = vld [vmem:[%s23672_s4 + $0x130] sm:$0xff]   ;;  %v22469_v24 = vld [vmem:[#allocation2 + $0xf8] sm:$0x44]  ;;  %v14888_v16 = vcombine.low %v22440_v5, %v22440_v5  ;;  %v14889_v46 = vcombine.high %v22440_v5, %v22440_v5  ;;  %v14890_v34 = vcombine.low %v22453_v41, %v22453_v41  ;;  %15280 = vmatprep.subr.bf16.mxu1 %v15800_v2  ;;  %v15806_v5 = vld [vmem:[%s23672_s4 + $0x128] sm:$0xff]   ;;  %v22534_v57 = vunpack.c.l.b16 %v14870_v22 }
 0x3cb   : > { %15251 = vmatpush3.bf16.msra.mxu0 %v15733_v13  ;;  %v15804_v13 = vld [vmem:[%s23672_s4 + $0x168] sm:$0xff]   ;;  %v14892_v0 = vcombine.low %v22469_v24, %v22469_v24  ;;  %v14893_v12 = vcombine.high %v22469_v24, %v22469_v24  ;;  %v14894_v52 = vcombine.low %v22471_v32, %v22471_v32  ;;  %v14895_v2 = vcombine.high %v22471_v32, %v22471_v32  ;;  %v15808_v24 = vld [vmem:[%s23672_s4 + $0x160] sm:$0xff]  }
 0x3cc   : > { %15252 = vmatprep.subr.bf16.mxu0 %v15799_v62  ;;  %v14891_v62 = vcombine.high %v22453_v41, %v22453_v41  ;;  %v14896_v41 = vcombine.low %v22484_v11, %v22484_v11  ;;  %25608 = vst [vmem:[#allocation108_spill] sm:$0xff] %v22522_v26  ;;  %v22532_v32 = vunpack.c.l.b16 %v14869_v18  ;;  %v22536_v23 = vunpack.c.l.b16 %v14871_v59  ;;  %v15807_v11 = vld [vmem:[%s23672_s4 + $0x60] sm:$0xff]  }
 0x3cd   : > { %15281 = vmatpush3.bf16.msra.mxu1 %v15802_v60  ;;  %v15805_v60 = vld [vmem:[%s23672_s4 + $0x28] sm:$0xff]   ;;  %v22541_v45 = vunpack.c.l.b16 %v14872_v15  ;;  %v22547_v28 = vunpack.c.l.b16 %v14875_v7  ;;  %v22549_v29 = vunpack.c.l.b16 %v14876_v9  ;;  %v22551_v18 = vunpack.c.l.b16 %v14877_v42  ;;  %v15809_v9 = vld [vmem:[%s23672_s4 + $0x20] sm:$0xff]  }
 0x3ce   : > { %15282 = vmatprep.subr.bf16.mxu1 %v15804_v13  ;;  %25609 = vst [vmem:[#allocation206_spill] sm:$0xff] %v22532_v32  ;;  %25610 = vst [vmem:[#allocation207_spill] sm:$0xff] %v22536_v23  ;;  %v22545_v13 = vunpack.c.l.b16 %v14874_v61  ;;  %v22553_v22 = vunpack.c.l.b16 %v14878_v37  ;;  %v22555_v59 = vunpack.c.l.b16 %v14879_v30  ;;  %v22560_v15 = vunpack.c.l.b16 %v14880_v25  ;;  %v15812_v37 = vld [vmem:[%s23672_s4 + $0x158] sm:$0xff]  }
 0x3cf   : > { %15253 = vmatpush3.bf16.msra.mxu0 %v15801_v49  ;;  %v22543_v49 = vunpack.c.l.b16 %v14873_v51  ;;  %25612 = vst [vmem:[#allocation209_spill] sm:$0xff] %v22547_v28  ;;  %25613 = vst [vmem:[#allocation210_spill] sm:$0xff] %v22551_v18  ;;  %v22562_v51 = vunpack.c.l.b16 %v14881_v43  ;;  %v22564_v61 = vunpack.c.l.b16 %v14882_v8  ;;  %v22566_v7 = vunpack.c.l.b16 %v14883_v14  ;;  %v15811_v14 = vld [vmem:[%s23672_s4 + $0x58] sm:$0xff]  }
 0x3d0   : > { %15254 = vmatprep.subr.bf16.mxu0 %v15803_v33  ;;  %25614 = vst [vmem:[#allocation211_spill] sm:$0xff] %v22555_v59  ;;  %v15810_v33 = vld [vmem:[%s23672_s4 + $0x120] sm:$0xff]   ;;  %v22574_v42 = vunpack.c.l.b16 %v14884_v6  ;;  %v22576_v30 = vunpack.c.l.b16 %v14885_v53  ;;  %v22578_v43 = vunpack.c.l.b16 %v14886_v39  ;;  %v22580_v8 = vunpack.c.l.b16 %v14887_v48 }
 0x3d1   : > { %25611 = vst [vmem:[#allocation208_spill] sm:$0xff] %v22543_v49  ;;  %15283 = vmatpush3.bf16.msra.mxu1 %v15806_v5  ;;  %25615 = vst [vmem:[#allocation212_spill] sm:$0xff] %v22562_v51  ;;  %v22585_v25 = vunpack.c.l.b16 %v14888_v16  ;;  %v22587_v5 = vunpack.c.l.b16 %v14889_v46  ;;  %v22593_v6 = vunpack.c.l.b16 %v14892_v0  ;;  %v22595_v53 = vunpack.c.l.b16 %v14893_v12  ;;  %v15814_v16 = vld [vmem:[%s23672_s4 + $0x118] sm:$0xff]  }
 0x3d2   : > { %25616 = vst [vmem:[#allocation213_spill] sm:$0xff] %v22566_v7  ;;  %15284 = vmatprep.subr.bf16.mxu1 %v15808_v24  ;;  %25617 = vst [vmem:[#allocation214_spill] sm:$0xff] %v22576_v30  ;;  %v22591_v24 = vunpack.c.l.b16 %v14891_v62  ;;  %v22597_v39 = vunpack.c.l.b16 %v14894_v52  ;;  %v22599_v48 = vunpack.c.l.b16 %v14895_v2  ;;  %v22606_v46 = vunpack.c.l.b16 %v14897_v58  ;;  %v15813_v12 = vld [vmem:[%s23672_s4 + $0x18] sm:$0xff]   ;;  %v15816_v62 = vld [vmem:[%s23672_s4 + $0x150] sm:$0xff]  }
 0x3d3   : > { %15255 = vmatpush3.bf16.msra.mxu0 %v15805_v60  ;;  %25618 = vst [vmem:[#allocation215_spill] sm:$0xff] %v22580_v8  ;;  %25619 = vst [vmem:[#allocation216_spill] sm:$0xff] %v22587_v5  ;;  %v22589_v60 = vunpack.c.l.b16 %v14890_v34  ;;  %v11729_v34 = vrot.slane %v22522_v26, 5  ;;  %v11730_v0 = vrot.slane %v22532_v32, 4  ;;  %v11732_v52 = vrot.slane %v22536_v23, 3 }
 0x3d4   : > { %15256 = vmatprep.subr.bf16.mxu0 %v15807_v11  ;;  %25620 = vst [vmem:[#allocation217_spill] sm:$0xff] %v22591_v24  ;;  %25621 = vst [vmem:[#allocation218_spill] sm:$0xff] %v22595_v53  ;;  %v22604_v11 = vunpack.c.l.b16 %v14896_v41  ;;  %v11734_v2 = vrot.slane %v22543_v49, 2  ;;  %v11736_v58 = vrot.slane %v22547_v28, 1  ;;  %v11739_v41 = vrot.slane %v22555_v59, 7 }
 0x3d5   : > { %25622 = vst [vmem:[#allocation219_spill] sm:$0xff] %v22599_v48  ;;  %15285 = vmatpush3.bf16.msra.mxu1 %v15810_v33  ;;  %25623 = vst [vmem:[#allocation220_spill] sm:$0xff] %v22606_v46  ;;  %v15815_v33 = vld [vmem:[%s23672_s4 + $0x50] sm:$0xff]   ;;  %v11757_v32 = vrot.slane %v22566_v7, 5  ;;  %v11758_v26 = vrot.slane %v22576_v30, 4  ;;  %v11760_v28 = vrot.slane %v22580_v8, 3 }
 0x3d6   : > { %15286 = vmatprep.subr.bf16.mxu1 %v15812_v37  ;;  %v11741_v37 = vrot.slane %v22562_v51, 6  ;;  %v22627_v23 = vld [vmem:[#allocation2 + $0x38] sm:$0x88]  ;;  %v11764_v59 = vrot.slane %v22591_v24, 1  ;;  %v11767_v7 = vrot.slane %v22599_v48, 7 }
 0x3d7   : > { %15257 = vmatpush3.bf16.msra.mxu0 %v15809_v9  ;;  %v11731_v9 = vsel %vm10479_vm1, %v11730_v0, %v11729_v34  ;;  %v15818_v34 = vld [vmem:[%s23672_s4 + $0x110] sm:$0xff]   ;;  %v11759_v30 = vsel %vm10479_vm1, %v11758_v26, %v11757_v32  ;;  %v22649_v8 = vld [vmem:[#allocation2 + $0xc8] sm:$0x88]  ;;  %v25624_v38 = vcombine.low %v22627_v23, %v22627_v23 }
 0x3d8   : > { %15258 = vmatprep.subr.bf16.mxu0 %v15811_v14  ;;  %v11733_v49 = vsel %vm10482_vm2, %v11732_v52, %v11731_v9  ;;  %v11762_v14 = vrot.slane %v22587_v5, 2  ;;  %v11769_v52 = vrot.slane %v22606_v46, 6  ;;  %v22642_v9 = vld [vmem:[#allocation2 + $0x40] sm:$0x88]  ;;  %v11761_v5 = vsel %vm10482_vm2, %v11760_v28, %v11759_v30  ;;  %v22663_v28 = vld [vmem:[#allocation2 + $0x90] sm:$0x88] }
 0x3d9   : > { %15287 = vmatpush3.bf16.msra.mxu1 %v15814_v16  ;;  %v11735_v0 = vsel %vm10485_vm3, %v11734_v2, %v11733_v49  ;;  %v15817_v16 = vld [vmem:[%s23672_s4 + $0x10] sm:$0xff]   ;;  %v15819_v49 = vld [vmem:[%s23672_s4 + $0x48] sm:$0xff]   ;;  %v22661_v2 = vld [vmem:[#allocation2 + $0xe0] sm:$0x88]  ;;  %v22770_v54 = vunpack.c.l.b16 %v25624_v38  ;;  %v25628_v38 = vcombine.high %v22642_v9, %v22642_v9 }
 0x3da   : > { %15288 = vmatprep.subr.bf16.mxu1 %v15816_v62  ;;  %v11737_v24 = vsel %vm10488_vm4, %v11736_v58, %v11735_v0  ;;  %v11763_v62 = vsel %vm10485_vm3, %v11762_v14, %v11761_v5  ;;  %v22674_v32 = vld [vmem:[#allocation2 + $0x70] sm:$0x88]  ;;  %v15014_v5 = vcombine.low %v22642_v9, %v22642_v9  ;;  %v15822_v58 = vld [vmem:[%s23672_s4 + $0x108] sm:$0xff]   ;;  %v15017_v14 = vcombine.high %v22649_v8, %v22649_v8 }
 0x3db   : > { %15259 = vmatpush3.bf16.msra.mxu0 %v15813_v12  ;;  %v11738_v12 = vsel %vm10491_vm5, %v22551_v18, %v11737_v24  ;;  %v11765_v24 = vsel %vm10488_vm4, %v11764_v59, %v11763_v62  ;;  %v22688_v59 = vld [vmem:[#allocation2 + $0xa8] sm:$0x88]  ;;  %v15016_v62 = vcombine.low %v22649_v8, %v22649_v8  ;;  %v15018_v26 = vcombine.low %v22661_v2, %v22661_v2 }
 0x3dc   : > { %15260 = vmatprep.subr.bf16.mxu0 %v15815_v33  ;;  %v15820_v33 = vld [vmem:[%s23672_s4 + $0x148] sm:$0xff]   ;;  %v11740_v0 = vsel %vm10494_vm6, %v11739_v41, %v11738_v12  ;;  %v11766_v41 = vsel %vm10491_vm5, %v22595_v53, %v11765_v24  ;;  %v22686_v12 = vld [vmem:[#allocation2 + $0xc0] sm:$0x88]  ;;  %v22700_v24 = vld [vmem:[#allocation2 + $0x10] sm:$0x88]  ;;  %v15019_v46 = vcombine.high %v22661_v2, %v22661_v2  ;;  %v15020_v8 = vcombine.low %v22663_v28, %v22663_v28 }
 0x3dd   : > { %15289 = vmatpush3.bf16.msra.mxu1 %v15818_v34  ;;  %v11742_v30 = vsel %vm10497_vm7, %v11741_v37, %v11740_v0  ;;  %v15821_v34 = vld [vmem:[%s23672_s4 + $0x8] sm:$0xff]   ;;  %v11768_v37 = vsel %vm10494_vm6, %v11767_v7, %v11766_v41  ;;  %v22698_v0 = vld [vmem:[#allocation2 + $0xd0] sm:$0x88]  ;;  %v22711_v53 = vld [vmem:[#allocation2 + $0xa0] sm:$0x88]  ;;  %v15021_v7 = vcombine.high %v22663_v28, %v22663_v28  ;;  %v15022_v41 = vcombine.low %v22674_v32, %v22674_v32 }
 0x3de   : > { %v22709_v48 = vld [vmem:[#allocation2 + $0x28] sm:$0x88]  ;;  %v15023_v51 = vcombine.high %v22674_v32, %v22674_v32  ;;  %15290 = vmatprep.subr.bf16.mxu1 %v15820_v33  ;;  %v15024_v18 = vcombine.low %v22686_v12, %v22686_v12  ;;  %v15025_v28 = vcombine.high %v22686_v12, %v22686_v12  ;;  %v15026_v17 = vcombine.low %v22688_v59, %v22688_v59  ;;  %v15824_v32 = vld [vmem:[%s23672_s4 + $0x140] sm:$0xff]   ;;  %v11955_v33 = vld [vmem:[#allocation2 + $0x98] sm:$0x88] }
 0x3df   : > { %15261 = vmatpush3.bf16.msra.mxu0 %v15817_v16  ;;  %v11770_v16 = vsel %vm10497_vm7, %v11769_v52, %v11768_v37  ;;  %v11953_v52 = vld [vmem:[#allocation2 + $0xf8] sm:$0x88]  ;;  %v22722_v37 = vld [vmem:[#allocation2 + $0x20] sm:$0x88]  ;;  %v15029_v44 = vcombine.high %v22698_v0, %v22698_v0  ;;  %v15030_v12 = vcombine.low %v22700_v24, %v22700_v24  ;;  %v15032_v31 = vcombine.low %v22709_v48, %v22709_v48 }
 0x3e0   : > { %15262 = vmatprep.subr.bf16.mxu0 %v15819_v49  ;;  %v15823_v49 = vld [vmem:[%s23672_s4 + $0x40] sm:$0xff]   ;;  %v11774_v2 = vpack.c.b16 %v11770_v16, %v11742_v30  ;;  %v15027_v30 = vcombine.high %v22688_v59, %v22688_v59  ;;  %v15028_v16 = vcombine.low %v22698_v0, %v22698_v0  ;;  %v15031_v59 = vcombine.high %v22700_v24, %v22700_v24 }
 0x3e1   : > { %15291 = vmatpush3.bf16.msra.mxu1 %v15822_v58  ;;  %v15825_v58 = vld [vmem:[%s23672_s4] sm:$0xff]   ;;  %v15033_v0 = vcombine.high %v22709_v48, %v22709_v48  ;;  %v15035_v24 = vcombine.high %v22711_v53, %v22711_v53  ;;  %v15036_v1 = vcombine.low %v11953_v52, %v11953_v52  ;;  %v15037_v4 = vcombine.high %v11953_v52, %v11953_v52 }
 0x3e2   : > { %11915 = vmatprep.mubr.bf16.mxu0 %v11774_v2  ;;  %v15828_v2 = vld [vmem:[%s23672_s4 + $0x378] sm:$0xff]   ;;  %v15038_v3 = vcombine.low %v22722_v37, %v22722_v37  ;;  %v15039_v48 = vcombine.high %v22722_v37, %v22722_v37  ;;  %v15040_v40 = vcombine.low %v11955_v33, %v11955_v33  ;;  %v15041_v35 = vcombine.high %v11955_v33, %v11955_v33 }
 0x3e3   : > { %15263 = vmatpush3.bf16.msra.mxu0 %v15821_v34  ;;  %v15034_v34 = vcombine.low %v22711_v53, %v22711_v53  ;;  %15292 = vmatprep.subr.bf16.mxu1 %v15824_v32  ;;  %v25625_v53 = vcombine.high %v22627_v23, %v22627_v23  ;;  %v25626_v52 = vcombine.low %v22633_v56, %v22633_v56  ;;  %v22787_v21 = vunpack.c.l.b16 %v15014_v5 }
 0x3e4   : > { %15264 = vmatprep.subr.bf16.mxu0 %v15823_v49  ;;  %v25627_v37 = vcombine.high %v22633_v56, %v22633_v56  ;;  %v22792_v23 = vunpack.c.l.b16 %v25628_v38  ;;  %v22794_v32 = vunpack.c.l.b16 %v15016_v62  ;;  %v22800_v56 = vunpack.c.l.b16 %v15019_v46 }
 0x3e5   : > { %v22775_v20 = vunpack.c.l.b16 %v25625_v53  ;;  %v22780_v49 = vunpack.c.l.b16 %v25626_v52  ;;  %15293 = vmatpush3.bf16.msra.mxu1 %v15826_v55  ;;  %v22796_v53 = vunpack.c.l.b16 %v15017_v14  ;;  %v22798_v52 = vunpack.c.l.b16 %v15018_v26 }
 0x3e6   : > { %v22785_v33 = vunpack.c.l.b16 %v25627_v37  ;;  %25629 = vst [vmem:[#allocation221_spill] sm:$0xff] %v22792_v23  ;;  %15334 = vmatprep.subr.bf16.mxu1 %v15828_v2  ;;  %25631 = vst [vmem:[#allocation223_spill] sm:$0xff] %v22800_v56  ;;  %v22802_v37 = vunpack.c.l.b16 %v15020_v8  ;;  %v22804_v5 = vunpack.c.l.b16 %v15021_v7  ;;  %v22806_v55 = vunpack.c.l.b16 %v15022_v41 }
 0x3e7   : > { %15265 = vmatpush3.bf16.msra.mxu0 %v15825_v58  ;;  %25630 = vst [vmem:[#allocation222_spill] sm:$0xff] %v22796_v53  ;;  %v22808_v58 = vunpack.c.l.b16 %v15023_v51  ;;  %v22810_v9 = vunpack.c.l.b16 %v15024_v18  ;;  %v22812_v62 = vunpack.c.l.b16 %v15025_v28  ;;  %v22814_v14 = vunpack.c.l.b16 %v15026_v17 }
 0x3e8   : > { %15306 = vmatprep.subr.bf16.mxu0 %v15827_v27  ;;  %25632 = vst [vmem:[#allocation224_spill] sm:$0xff] %v22802_v37  ;;  %25633 = vst [vmem:[#allocation225_spill] sm:$0xff] %v22804_v5  ;;  %v22816_v26 = vunpack.c.l.b16 %v15027_v30  ;;  %v22818_v27 = vunpack.c.l.b16 %v15028_v16  ;;  %v22820_v46 = vunpack.c.l.b16 %v15029_v44  ;;  %v22822_v8 = vunpack.c.l.b16 %v15030_v12 }
 0x3e9   : > { %25634 = vst [vmem:[#allocation226_spill] sm:$0xff] %v22806_v55  ;;  %25635 = vst [vmem:[#allocation227_spill] sm:$0xff] %v22808_v58  ;;  %v22824_v7 = vunpack.c.l.b16 %v15031_v59  ;;  %v22826_v41 = vunpack.c.l.b16 %v15032_v31  ;;  %v22828_v51 = vunpack.c.l.b16 %v15033_v0  ;;  %v22830_v18 = vunpack.c.l.b16 %v15034_v34 }
 0x3ea   : > { %25636 = vst [vmem:[#allocation228_spill] sm:$0xff] %v22810_v9  ;;  %25637 = vst [vmem:[#allocation229_spill] sm:$0xff] %v22816_v26  ;;  %v22832_v28 = vunpack.c.l.b16 %v15035_v24  ;;  %v22834_v17 = vunpack.c.l.b16 %v15036_v1  ;;  %v22836_v30 = vunpack.c.l.b16 %v15037_v4  ;;  %v22838_v16 = vunpack.c.l.b16 %v15038_v3 }
 0x3eb   : > { %25638 = vst [vmem:[#allocation230_spill] sm:$0xff] %v22820_v46  ;;  %25639 = vst [vmem:[#allocation231_spill] sm:$0xff] %v22828_v51  ;;  %v22840_v44 = vunpack.c.l.b16 %v15039_v48  ;;  %v22842_v12 = vunpack.c.l.b16 %v15040_v40  ;;  %v22844_v59 = vunpack.c.l.b16 %v15041_v35  ;;  %v12316_v31 = vrot.slane %v22775_v20, 7 }
 0x3ec   : > { %25640 = vst [vmem:[#allocation232_spill] sm:$0xff] %v22832_v28  ;;  %25641 = vst [vmem:[#allocation233_spill] sm:$0xff] %v22838_v16  ;;  %v12317_v0 = vrot.slane %v22785_v33, 6  ;;  %v12319_v34 = vrot.slane %v22792_v23, 5  ;;  %v12321_v2 = vrot.slane %v22796_v53, 4  ;;  %v12323_v1 = vrot.slane %v22800_v56, 3 }
 0x3ed   : > { %25642 = vst [vmem:[#allocation234_spill] sm:$0xff] %v22842_v12  ;;  %v12325_v4 = vrot.slane %v22804_v5, 2  ;;  %v12327_v3 = vrot.slane %v22808_v58, 1  ;;  %v12344_v24 = vrot.slane %v22816_v26, 7  ;;  %v12345_v40 = vrot.slane %v22820_v46, 6 }
 0x3ee   : > { %v12318_v35 = vsel %vm10479_vm1, %v12317_v0, %v12316_v31  ;;  %v12347_v48 = vrot.slane %v22824_v7, 5  ;;  %v12349_v38 = vrot.slane %v22828_v51, 4  ;;  %v12351_v23 = vrot.slane %v22832_v28, 3 }
 0x3ef   : > { %v12320_v53 = vsel %vm10482_vm2, %v12319_v34, %v12318_v35  ;;  %v12346_v56 = vsel %vm10479_vm1, %v12345_v40, %v12344_v24  ;;  %v12353_v5 = vrot.slane %v22836_v30, 2  ;;  %v12355_v58 = vrot.slane %v22840_v44, 1 }
 0x3f0   : > { %v12322_v26 = vsel %vm10485_vm3, %v12321_v2, %v12320_v53  ;;  %v12348_v46 = vsel %vm10482_vm2, %v12347_v48, %v12346_v56  ;;  %v11715_v31 = vrot.slane %v22461_v47, 5  ;;  %v11716_v0 = vrot.slane %v22530_v10, 4 }
 0x3f1   : > { %v12324_v51 = vsel %vm10488_vm4, %v12323_v1, %v12322_v26  ;;  %v12350_v28 = vsel %vm10485_vm3, %v12349_v38, %v12348_v46  ;;  %v11718_v34 = vrot.slane %v22534_v57, 3  ;;  %v11720_v24 = vrot.slane %v22541_v45, 2 }
 0x3f2   : > { %v12326_v40 = vsel %vm10491_vm5, %v12325_v4, %v12324_v51  ;;  %v12352_v35 = vsel %vm10488_vm4, %v12351_v23, %v12350_v28  ;;  %v11717_v53 = vsel %vm10479_vm1, %v11716_v0, %v11715_v31  ;;  %v11722_v56 = vrot.slane %v22545_v13, 1 }
 0x3f3   : > { %v12328_v2 = vsel %vm10494_vm6, %v12327_v3, %v12326_v40  ;;  %v12354_v48 = vsel %vm10491_vm5, %v12353_v5, %v12352_v35  ;;  %v11719_v26 = vsel %vm10482_vm2, %v11718_v34, %v11717_v53  ;;  %v11725_v46 = vrot.slane %v22553_v22, 7 }
 0x3f4   : > { %v12329_v1 = vsel %vm10497_vm7, %v22812_v62, %v12328_v2  ;;  %v12356_v38 = vsel %vm10494_vm6, %v12355_v58, %v12354_v48  ;;  %v11721_v51 = vsel %vm10485_vm3, %v11720_v24, %v11719_v26  ;;  %v11727_v23 = vrot.slane %v22560_v15, 6 }
 0x3f5   : > { %v12357_v28 = vsel %vm10497_vm7, %v22844_v59, %v12356_v38  ;;  %v11723_v4 = vsel %vm10488_vm4, %v11722_v56, %v11721_v51  ;;  %v11743_v5 = vrot.slane %v22564_v61, 5  ;;  %v11744_v3 = vrot.slane %v22574_v42, 4 }
 0x3f6   : > { %v12361_v31 = vpack.c.b16 %v12357_v28, %v12329_v1  ;;  %v11724_v0 = vsel %vm10491_vm5, %v22549_v29, %v11723_v4  ;;  %v11746_v34 = vrot.slane %v22578_v43, 3  ;;  %v11748_v58 = vrot.slane %v22585_v25, 2 }
 0x3f7   : > { %v11726_v24 = vsel %vm10494_vm6, %v11725_v46, %v11724_v0  ;;  %v11745_v40 = vsel %vm10479_vm1, %v11744_v3, %v11743_v5  ;;  %v11750_v35 = vrot.slane %v22589_v60, 1  ;;  %v11753_v53 = vrot.slane %v22597_v39, 7 }
 0x3f8   : > { %12502 = vmatprep.mubr.bf16.mxu1 %v12361_v31  ;;  %v11728_v56 = vsel %vm10497_vm7, %v11727_v23, %v11726_v24  ;;  %v11747_v2 = vsel %vm10482_vm2, %v11746_v34, %v11745_v40  ;;  %v11755_v48 = vrot.slane %v22604_v11, 6  ;;  %v12302_v26 = vrot.slane %v22770_v54, 7 }
 0x3f9   : > { %v11749_v1 = vsel %vm10485_vm3, %v11748_v58, %v11747_v2  ;;  %v12303_v38 = vrot.slane %v22780_v49, 6  ;;  %v12305_v46 = vrot.slane %v22787_v21, 5  ;;  %v12307_v51 = vrot.slane %v22794_v32, 4 }
 0x3fa   : > { %v11751_v28 = vsel %vm10488_vm4, %v11750_v35, %v11749_v1  ;;  %v12309_v4 = vrot.slane %v22798_v52, 3  ;;  %v12311_v23 = vrot.slane %v22802_v37, 2  ;;  %v12313_v5 = vrot.slane %v22806_v55, 1 }
 0x3fb   : > { %v11752_v3 = vsel %vm10491_vm5, %v22593_v6, %v11751_v28  ;;  %v12304_v31 = vsel %vm10479_vm1, %v12303_v38, %v12302_v26  ;;  %v12330_v0 = vrot.slane %v22814_v14, 7  ;;  %v12331_v34 = vrot.slane %v22818_v27, 6 }
 0x3fc   : > { %v11754_v58 = vsel %vm10494_vm6, %v11753_v53, %v11752_v3  ;;  %v12306_v24 = vsel %vm10482_vm2, %v12305_v46, %v12304_v31  ;;  %v12333_v40 = vrot.slane %v22822_v8, 5  ;;  %v12335_v35 = vrot.slane %v22826_v41, 4 }
 0x3fd   : > { %v11756_v2 = vsel %vm10497_vm7, %v11755_v48, %v11754_v58  ;;  %v12308_v1 = vsel %vm10485_vm3, %v12307_v51, %v12306_v24  ;;  %v12332_v28 = vsel %vm10479_vm1, %v12331_v34, %v12330_v0  ;;  %v12337_v26 = vrot.slane %v22830_v18, 3  ;;  %v25643_v48 = vld [vmem:[#allocation116_spill] sm:$0xff] }
 0x3fe   : > { %v11773_v38 = vpack.c.b16 %v11756_v2, %v11728_v56  ;;  %v12310_v55 = vsel %vm10488_vm4, %v12309_v4, %v12308_v1  ;;  %v12334_v37 = vsel %vm10482_vm2, %v12333_v40, %v12332_v28  ;;  %v12339_v53 = vrot.slane %v22834_v17, 2  ;;  %v25644_v56 = vld [vmem:[#allocation119_spill] sm:$0xff]  ;;  %v25645_v4 = vld [vmem:[#allocation122_spill] sm:$0xff]  ;;  %v25648_v28 = vld [vmem:[#allocation24_spill] sm:$0xff] }
 0x3ff   : > { %v12312_v46 = vsel %vm10491_vm5, %v12311_v23, %v12310_v55  ;;  %v12336_v3 = vsel %vm10485_vm3, %v12335_v35, %v12334_v37  ;;  %v12341_v31 = vrot.slane %v22838_v16, 1  ;;  %v12525_v58 = vrot.slane %v25643_v48, 7  ;;  %v25646_v23 = vld [vmem:[#allocation64_spill] sm:$0xff]  ;;  %v25656_v16 = vld [vmem:[#allocation85_spill] sm:$0xff] }
 0x400   : > { %11916 = vmatmul.mubr.bf16.gmra.mxu0 %v11773_v38  ;;  %v12314_v51 = vsel %vm10494_vm6, %v12313_v5, %v12312_v46  ;;  %v12338_v0 = vsel %vm10488_vm4, %v12337_v26, %v12336_v3  ;;  %v12527_v34 = vrot.slane %v25644_v56, 6  ;;  %v12529_v24 = vrot.slane %v25645_v4, 5  ;;  %v25647_v35 = vld [vmem:[#allocation124_spill] sm:$0xff]  ;;  %v25649_v38 = vld [vmem:[#allocation33_spill] sm:$0xff] }
 0x401   : > { %v12315_v40 = vsel %vm10497_vm7, %v22810_v9, %v12314_v51  ;;  %v12340_v55 = vsel %vm10491_vm5, %v12339_v53, %v12338_v0  ;;  %v12526_v37 = vsel %vm10479_vm1, %v12525_v58, %v25646_v23  ;;  %v12531_v2 = vrot.slane %v25647_v35, 4  ;;  %v25650_v51 = vld [vmem:[#allocation46_spill] sm:$0xff]  ;;  %v25651_v0 = vld [vmem:[#allocation112_spill] sm:$0xff]  ;;  %v25654_v35 = vld [vmem:[#allocation133_spill] sm:$0xff] }
 0x402   : > { %v12342_v1 = vsel %vm10494_vm6, %v12341_v31, %v12340_v55  ;;  %v12528_v5 = vsel %vm10482_vm2, %v12527_v34, %v12526_v37  ;;  %v12533_v26 = vrot.slane %v25648_v28, 3  ;;  %v12535_v46 = vrot.slane %v25649_v38, 2  ;;  %v25652_v23 = vld [vmem:[#allocation56_spill] sm:$0xff]  ;;  %v25653_v55 = vld [vmem:[#allocation115_spill] sm:$0xff] }
 0x403   : > { %v12343_v3 = vsel %vm10497_vm7, %v22842_v12, %v12342_v1  ;;  %v12530_v48 = vsel %vm10485_vm3, %v12529_v24, %v12528_v5  ;;  %v12537_v53 = vrot.slane %v25650_v51, 1  ;;  %v12553_v56 = vrot.slane %v25651_v0, 7  ;;  %v25655_v38 = vld [vmem:[#allocation79_spill] sm:$0xff] }
 0x404   : > { %v12360_v58 = vpack.c.b16 %v12343_v3, %v12315_v40  ;;  %v12532_v4 = vsel %vm10488_vm4, %v12531_v2, %v12530_v48  ;;  %v12555_v31 = vrot.slane %v25652_v23, 6  ;;  %v12557_v34 = vrot.slane %v25653_v55, 5  ;;  %v25657_v3 = vld [vmem:[#allocation88_spill] sm:$0xff] }
 0x405   : > { %v12534_v37 = vsel %vm10491_vm5, %v12533_v26, %v12532_v4  ;;  %v12554_v28 = vsel %vm10479_vm1, %v12553_v56, %v25654_v35  ;;  %v12559_v1 = vrot.slane %v25655_v38, 4  ;;  %v12561_v24 = vrot.slane %v25656_v16, 3  ;;  %v25658_v48 = vld [vmem:[#allocation92_spill] sm:$0xff]  ;;  %v25659_v4 = vld [vmem:[#allocation81_spill] sm:$0xff]  ;;  %v25660_v56 = vld [vmem:[#allocation58_spill] sm:$0xff] }
 0x406   : > { %12503 = vmatmul.mubr.bf16.gmra.mxu1 %v12360_v58  ;;  %v12536_v5 = vsel %vm10494_vm6, %v12535_v46, %v12534_v37  ;;  %v12556_v40 = vsel %vm10482_vm2, %v12555_v31, %v12554_v28  ;;  %v12563_v2 = vrot.slane %v25657_v3, 2  ;;  %v12565_v51 = vrot.slane %v25658_v48, 1  ;;  %v25661_v16 = vld [vmem:[#allocation65_spill] sm:$0xff]  ;;  %v25662_v38 = vld [vmem:[#allocation114_spill] sm:$0xff]  ;;  %v25663_v37 = vld [vmem:[#allocation67_spill] sm:$0xff] }
 0x407   : > { %v12538_v0 = vsel %vm10497_vm7, %v12537_v53, %v12536_v5  ;;  %v12558_v26 = vsel %vm10485_vm3, %v12557_v34, %v12556_v40  ;;  %v12790_v23 = vrot.slane %v25659_v4, 2  ;;  %v12791_v55 = vrot.slane %v25660_v56, 1  ;;  %v25664_v48 = vld [vmem:[#allocation71_spill] sm:$0xff]  ;;  %v25665_v5 = vld [vmem:[#allocation118_spill] sm:$0xff] }
 0x408   : > { %v12560_v35 = vsel %vm10488_vm4, %v12559_v1, %v12558_v26  ;;  %v12794_v58 = vrot.slane %v25661_v16, 7  ;;  %v12796_v46 = vrot.slane %v25662_v38, 6  ;;  %v12798_v31 = vrot.slane %v25663_v37, 5  ;;  %v25666_v4 = vld [vmem:[#allocation62_spill] sm:$0xff]  ;;  %v25667_v1 = vld [vmem:[#allocation121_spill] sm:$0xff] }
 0x409   : > { %v12562_v28 = vsel %vm10491_vm5, %v12561_v24, %v12560_v35  ;;  %v12792_v3 = vsel %vm10479_vm1, %v12791_v55, %v12790_v23  ;;  %v12800_v53 = vrot.slane %v25664_v48, 4  ;;  %v12802_v34 = vrot.slane %v25665_v5, 3  ;;  %v25668_v16 = vld [vmem:[#allocation74_spill] sm:$0xff]  ;;  %v25670_v23 = vld [vmem:[#allocation83_spill] sm:$0xff] }
 0x40a   : > { %v12564_v40 = vsel %vm10494_vm6, %v12563_v2, %v12562_v28  ;;  %v12793_v56 = vsel %vm10482_vm2, %v25666_v4, %v12792_v3  ;;  %v12818_v26 = vrot.slane %v25667_v1, 2  ;;  %v12819_v12 = vrot.slane %v25668_v16, 1  ;;  %v25669_v24 = vld [vmem:[#allocation78_spill] sm:$0xff]  ;;  %v25671_v28 = vld [vmem:[#allocation87_spill] sm:$0xff]  ;;  %v25672_v4 = vld [vmem:[#allocation76_spill] sm:$0xff] }
 0x40b   : > { %v12566_v38 = vsel %vm10497_vm7, %v12565_v51, %v12564_v40  ;;  %v12795_v37 = vsel %vm10485_vm3, %v12794_v58, %v12793_v56  ;;  %v12822_v35 = vrot.slane %v25669_v24, 7  ;;  %v12824_v55 = vrot.slane %v25670_v23, 6  ;;  %v25673_v16 = vld [vmem:[#allocation91_spill] sm:$0xff]  ;;  %v25674_v40 = vld [vmem:[#allocation93_spill] sm:$0xff] }
 0x40c   : > { %v12624_v48 = vpack.c.b16 %v12566_v38, %v12538_v0  ;;  %v12797_v5 = vsel %vm10488_vm4, %v12796_v46, %v12795_v37  ;;  %v12820_v2 = vsel %vm10479_vm1, %v12819_v12, %v12818_v26  ;;  %v12826_v9 = vrot.slane %v25671_v28, 5  ;;  %v25675_v38 = vld [vmem:[#allocation61_spill] sm:$0xff]  ;;  %v25676_v46 = vld [vmem:[#allocation72_spill] sm:$0xff]  ;;  %v25679_v24 = vld [vmem:[#allocation55_spill] sm:$0xff] }
 0x40d   : > { %v12799_v3 = vsel %vm10491_vm5, %v12798_v31, %v12797_v5  ;;  %v12821_v1 = vsel %vm10482_vm2, %v25672_v4, %v12820_v2  ;;  %v12828_v51 = vrot.slane %v25673_v16, 4  ;;  %v12830_v58 = vrot.slane %v25674_v40, 3  ;;  %v25678_v26 = vld [vmem:[#allocation53_spill] sm:$0xff]  ;;  %v25681_v28 = vld [vmem:[#allocation84_spill] sm:$0xff]  ;;  %v25685_v16 = vld [vmem:[#allocation94_spill] sm:$0xff] }
 0x40e   : > { %12759 = vmatprep.mubr.bf16.mxu0 %v12624_v48  ;;  %v12801_v56 = vsel %vm10494_vm6, %v12800_v53, %v12799_v3  ;;  %v12823_v0 = vsel %vm10485_vm3, %v12822_v35, %v12821_v1  ;;  %v25677_v37 = vrot.slane %v25676_v46, 7  ;;  %v25680_v31 = vrot.slane %v25679_v24, 7  ;;  %v25683_v3 = vld [vmem:[#allocation59_spill] sm:$0xff]  ;;  %v25687_v46 = vld [vmem:[#allocation68_spill] sm:$0xff] }
 0x40f   : > { %v12803_v5 = vsel %vm10497_vm7, %v12802_v34, %v12801_v56  ;;  %v12825_v2 = vsel %vm10488_vm4, %v12824_v55, %v12823_v0  ;;  %v25682_v48 = vrot.slane %v25681_v28, 6  ;;  %v25684_v35 = vrot.slane %v25683_v3, 6  ;;  %v25689_v56 = vld [vmem:[#allocation69_spill] sm:$0xff] }
 0x410   : > { %v12512_v12 = vsel %vm10479_vm1, %v25677_v37, %v25675_v38  ;;  %v12540_v23 = vsel %vm10479_vm1, %v25680_v31, %v25678_v26  ;;  %v12827_v1 = vsel %vm10491_vm5, %v12826_v9, %v12825_v2  ;;  %v25686_v40 = vrot.slane %v25685_v16, 5  ;;  %v25691_v0 = vld [vmem:[#allocation57_spill] sm:$0xff]  ;;  %v25693_v31 = vld [vmem:[#allocation19_spill] sm:$0xff]  ;;  %v25695_v2 = vld [vmem:[#allocation80_spill] sm:$0xff] }
 0x411   : > { %v12514_v53 = vsel %vm10482_vm2, %v25682_v48, %v12512_v12  ;;  %v12542_v4 = vsel %vm10482_vm2, %v25684_v35, %v12540_v23  ;;  %v25688_v37 = vrot.slane %v25687_v46, 5  ;;  %v25690_v55 = vrot.slane %v25689_v56, 2  ;;  %v25700_v46 = vld [vmem:[#allocation86_spill] sm:$0xff] }
 0x412   : > { %v12516_v38 = vsel %vm10485_vm3, %v25686_v40, %v12514_v53  ;;  %v25692_v26 = vrot.slane %v25691_v0, 1  ;;  %v12829_v24 = vsel %vm10494_vm6, %v12828_v51, %v12827_v1  ;;  %v25694_v23 = vrot.slane %v25693_v31, 4  ;;  %v25697_v53 = vld [vmem:[#allocation60_spill] sm:$0xff]  ;;  %v25702_v1 = vld [vmem:[#allocation63_spill] sm:$0xff] }
 0x413   : > { %v12544_v34 = vsel %vm10485_vm3, %v25688_v37, %v12542_v4  ;;  %v25696_v28 = vrot.slane %v25695_v2, 4  ;;  %v12831_v35 = vsel %vm10497_vm7, %v12830_v58, %v12829_v24  ;;  %v25698_v4 = vld [vmem:[#allocation106_spill] sm:$0xff]  ;;  %v25701_v37 = vrot.slane %v25700_v46, 3  ;;  %v25704_v0 = vld [vmem:[#allocation36_spill] sm:$0xff]  ;;  %v25708_v24 = vld [vmem:[#allocation113_spill] sm:$0xff] }
 0x414   : > { %v12778_v12 = vsel %vm10479_vm1, %v25692_v26, %v25690_v55  ;;  %v12518_v9 = vsel %vm10488_vm4, %v25694_v23, %v12516_v38  ;;  %v25699_v16 = vrot.slane %v25698_v4, 3  ;;  %v25703_v56 = vrot.slane %v25702_v1, 7  ;;  %v25710_v2 = vld [vmem:[#allocation43_spill] sm:$0xff] }
 0x415   : > { %v12546_v48 = vsel %vm10488_vm4, %v25696_v28, %v12544_v34  ;;  %v12779_v3 = vsel %vm10482_vm2, %v25697_v53, %v12778_v12  ;;  %v12889_v55 = vpack.c.b16 %v12831_v35, %v12803_v5  ;;  %v25705_v34 = vrot.slane %v25704_v0, 2  ;;  %v25706_v12 = vld [vmem:[#allocation89_spill] sm:$0xff]  ;;  %v25712_v53 = vld [vmem:[#allocation95_spill] sm:$0xff]  ;;  %v25720_v0 = vld [vmem:[#allocation70_spill] sm:$0xff] }
 0x416   : > { %v12520_v40 = vsel %vm10491_vm5, %v25699_v16, %v12518_v9  ;;  %v12548_v51 = vsel %vm10491_vm5, %v25701_v37, %v12546_v48  ;;  %v12781_v38 = vsel %vm10485_vm3, %v25703_v56, %v12779_v3  ;;  %v25707_v31 = vrot.slane %v25706_v12, 2  ;;  %v25714_v3 = vld [vmem:[#allocation66_spill] sm:$0xff]  ;;  %v25718_v37 = vld [vmem:[#allocation73_spill] sm:$0xff]  ;;  %v15829_v56 = vld [vmem:[%s23672_s4 + $0x238] sm:$0xff]  }
 0x417   : > { %v12522_v26 = vsel %vm10494_vm6, %v25705_v34, %v12520_v40  ;;  %v25709_v23 = vrot.slane %v25708_v24, 6  ;;  %v25711_v28 = vrot.slane %v25710_v2, 1  ;;  %v25713_v4 = vrot.slane %v25712_v53, 1  ;;  %v25716_v40 = vld [vmem:[#allocation120_spill] sm:$0xff]  ;;  %13024 = vmatprep.mubr.bf16.mxu1 %v12889_v55  ;;  %v25722_v12 = vld [vmem:[#allocation75_spill] sm:$0xff]  ;;  %v25726_v53 = vld [vmem:[#allocation77_spill] sm:$0xff] }
 0x418   : > { %v12550_v58 = vsel %vm10494_vm6, %v25707_v31, %v12548_v51  ;;  %v25715_v35 = vrot.slane %v25714_v3, 5  ;;  %v25717_v46 = vrot.slane %v25716_v40, 2  ;;  %v25719_v51 = vrot.slane %v25718_v37, 1  ;;  %v25729_v3 = vld [vmem:[#allocation140_spill] sm:$0xff]  ;;  %v25732_v37 = vld [vmem:[#allocation54_spill] sm:$0xff] }
 0x419   : > { %v12783_v9 = vsel %vm10488_vm4, %v25709_v23, %v12781_v38  ;;  %v12524_v48 = vsel %vm10497_vm7, %v25711_v28, %v12522_v26  ;;  %v12552_v5 = vsel %vm10497_vm7, %v25713_v4, %v12550_v58  ;;  %v25721_v34 = vrot.slane %v25720_v0, 4  ;;  %v25723_v58 = vld [vmem:[#allocation136_spill] sm:$0xff]  ;;  %v15831_v23 = vld [vmem:[%s23672_s4 + $0x270] sm:$0xff]  }
 0x41a   : > { %v12785_v16 = vsel %vm10491_vm5, %v25715_v35, %v12783_v9  ;;  %v12806_v1 = vsel %vm10479_vm1, %v25719_v51, %v25717_v46  ;;  %v12623_v38 = vpack.c.b16 %v12552_v5, %v12524_v48  ;;  %v12581_v24 = vrot.slane %v25723_v58, 7  ;;  %v25724_v9 = vld [vmem:[#allocation117_spill] sm:$0xff]  ;;  %v25728_v4 = vld [vmem:[#allocation138_spill] sm:$0xff] }
 0x41b   : > { %v12787_v26 = vsel %vm10494_vm6, %v25721_v34, %v12785_v16  ;;  %v12807_v31 = vsel %vm10482_vm2, %v25722_v12, %v12806_v1  ;;  %v25725_v2 = vrot.slane %v25724_v9, 3  ;;  %v25727_v55 = vrot.slane %v25726_v53, 7  ;;  %v25730_v16 = vld [vmem:[#allocation82_spill] sm:$0xff]  ;;  %v25734_v34 = vld [vmem:[#allocation144_spill] sm:$0xff]  ;;  %v25735_v12 = vld [vmem:[#allocation123_spill] sm:$0xff] }
 0x41c   : > { %v12583_v5 = vrot.slane %v25728_v4, 6  ;;  %v12585_v35 = vrot.slane %v25729_v3, 5  ;;  %12760 = vmatmul.mubr.bf16.vlgmr.msra.gmra.mxu0 %v12623_v38  ;;  %v25731_v40 = vrot.slane %v25730_v16, 6  ;;  %v12582_v51 = vsel %vm10479_vm1, %v12581_v24, %v25732_v37  ;;  %v25733_v1 = vld [vmem:[#allocation142_spill] sm:$0xff]  ;;  %v25738_v38 = vld [vmem:[#allocation148_spill] sm:$0xff] }
 0x41d   : > { %v12789_v28 = vsel %vm10497_vm7, %v25725_v2, %v12787_v26  ;;  %v12809_v48 = vsel %vm10485_vm3, %v25727_v55, %v12807_v31  ;;  %v12587_v0 = vrot.slane %v25733_v1, 4  ;;  %v12589_v26 = vrot.slane %v25734_v34, 3  ;;  %v25737_v2 = vld [vmem:[#allocation146_spill] sm:$0xff]  ;;  %15307 = vmatpush3.bf16.msra.mxu0 %v15829_v56  ;;  %v25743_v56 = vld [vmem:[#allocation96_spill] sm:$0xff] }
 0x41e   : > { %v12811_v46 = vsel %vm10488_vm4, %v25731_v40, %v12809_v48  ;;  %v25736_v58 = vrot.slane %v25735_v12, 5  ;;  %v12584_v9 = vsel %vm10482_vm2, %v12583_v5, %v12582_v51  ;;  %v12591_v53 = vrot.slane %v25737_v2, 2  ;;  %v15833_v48 = vld [vmem:[%s23672_s4 + $0x230] sm:$0xff]   ;;  %v25741_v40 = vld [vmem:[#allocation152_spill] sm:$0xff]  ;;  %15308 = vmatprep.subr.bf16.mxu0 %v15831_v23  ;;  %v15835_v5 = vld [vmem:[%s23672_s4 + $0x268] sm:$0xff]  }
 0x41f   : > { %v12593_v55 = vrot.slane %v25738_v38, 1  ;;  %v25739_v24 = vld [vmem:[#allocation90_spill] sm:$0xff]  ;;  %v12586_v16 = vsel %vm10485_vm3, %v12585_v35, %v12584_v9  ;;  %v12609_v37 = vrot.slane %v25741_v40, 7  ;;  %v25744_v51 = vrot.slane %v25743_v56, 3  ;;  %v15830_v35 = vld [vmem:[%s23672_s4 + $0x338] sm:$0xff]  }
 0x420   : > { %v12813_v31 = vsel %vm10491_vm5, %v25736_v58, %v12811_v46  ;;  %v25740_v4 = vrot.slane %v25739_v24, 4  ;;  %v25742_v46 = vld [vmem:[#allocation154_spill] sm:$0xff]  ;;  %v12588_v12 = vsel %vm10488_vm4, %v12587_v0, %v12586_v16  ;;  %v25745_v58 = vld [vmem:[#allocation163_spill] sm:$0xff]  ;;  %v12619_v16 = vrot.slane %v22141_v63, 2  ;;  %v15839_v63 = vld [vmem:[%s23672_s4 + $0x260] sm:$0xff]  }
 0x421   : > { %v12611_v1 = vrot.slane %v25742_v46, 6  ;;  %v12613_v2 = vrot.slane %v25745_v58, 5  ;;  %v12590_v23 = vsel %vm10491_vm5, %v12589_v26, %v12588_v12  ;;  %v25746_v38 = vld [vmem:[#allocation150_spill] sm:$0xff]  ;;  %v12621_v40 = vrot.slane %v22208_v36, 1  ;;  %15309 = vmatpush3.bf16.msra.mxu0 %v15833_v48  ;;  %v25751_v12 = vld [vmem:[#allocation168_spill] sm:$0xff] }
 0x422   : > { %v12815_v3 = vsel %vm10494_vm6, %v25740_v4, %v12813_v31  ;;  %v12615_v31 = vrot.slane %v22034_v19, 4  ;;  %v12610_v24 = vsel %vm10479_vm1, %v12609_v37, %v25746_v38  ;;  %v12617_v4 = vrot.slane %v22092_v50, 3  ;;  %v15832_v0 = vld [vmem:[%s23672_s4 + $0x370] sm:$0xff]   ;;  %v25747_v37 = vld [vmem:[#allocation156_spill] sm:$0xff]  ;;  %15310 = vmatprep.subr.bf16.mxu0 %v15835_v5 }
 0x423   : > { %v12817_v34 = vsel %vm10497_vm7, %v25744_v51, %v12815_v3  ;;  %v12592_v3 = vsel %vm10494_vm6, %v12591_v53, %v12590_v23  ;;  %v12612_v19 = vsel %vm10482_vm2, %v12611_v1, %v12610_v24  ;;  %v12846_v46 = vrot.slane %v25747_v37, 2  ;;  %v25748_v56 = vld [vmem:[#allocation158_spill] sm:$0xff]  ;;  %v25753_v38 = vld [vmem:[#allocation172_spill] sm:$0xff] }
 0x424   : > { %v12888_v9 = vpack.c.b16 %v12817_v34, %v12789_v28  ;;  %v15837_v28 = vld [vmem:[%s23672_s4 + $0x228] sm:$0xff]   ;;  %v12594_v50 = vsel %vm10497_vm7, %v12593_v55, %v12592_v3  ;;  %v12614_v26 = vsel %vm10485_vm3, %v12613_v2, %v12612_v19  ;;  %v12847_v53 = vrot.slane %v25748_v56, 1  ;;  %v25749_v48 = vld [vmem:[#allocation162_spill] sm:$0xff]  ;;  %v25756_v56 = vld [vmem:[#allocation176_spill] sm:$0xff] }
 0x425   : > { %v12616_v36 = vsel %vm10488_vm4, %v12615_v31, %v12614_v26  ;;  %v12850_v1 = vrot.slane %v25749_v48, 7  ;;  %v25750_v51 = vld [vmem:[#allocation166_spill] sm:$0xff]  ;;  %v12854_v58 = vrot.slane %v25751_v12, 5  ;;  %v12858_v24 = vrot.slane %v25753_v38, 3  ;;  %v15836_v31 = vld [vmem:[%s23672_s4 + $0x368] sm:$0xff]   ;;  %15311 = vmatpush3.bf16.msra.mxu0 %v15837_v28  ;;  %v15843_v12 = vld [vmem:[%s23672_s4 + $0x258] sm:$0xff]  }
 0x426   : > { %13025 = vmatmul.mubr.bf16.vlgmr.msra.gmra.mxu1 %v12888_v9  ;;  %v12852_v34 = vrot.slane %v25750_v51, 6  ;;  %v15834_v55 = vld [vmem:[%s23672_s4 + $0x330] sm:$0xff]   ;;  %v12618_v2 = vsel %vm10491_vm5, %v12617_v4, %v12616_v36  ;;  %v12848_v5 = vsel %vm10479_vm1, %v12847_v53, %v12846_v46  ;;  %v12875_v4 = vrot.slane %v25756_v56, 1  ;;  %v15841_v46 = vld [vmem:[%s23672_s4 + $0x220] sm:$0xff]   ;;  %v25758_v51 = vld [vmem:[#allocation183_spill] sm:$0xff]  ;;  %15312 = vmatprep.subr.bf16.mxu0 %v15839_v63 }
 0x427   : > { %15335 = vmatpush3.bf16.msra.mxu1 %v15830_v35  ;;  %v25752_v9 = vld [vmem:[#allocation170_spill] sm:$0xff]  ;;  %v12620_v3 = vsel %vm10494_vm6, %v12619_v16, %v12618_v2  ;;  %v25754_v35 = vld [vmem:[#allocation160_spill] sm:$0xff]  ;;  %v12880_v16 = vrot.slane %v25758_v51, 6  ;;  %v25763_v56 = vld [vmem:[#allocation135_spill] sm:$0xff] }
 0x428   : > { %v12856_v23 = vrot.slane %v25752_v9, 4  ;;  %15336 = vmatprep.subr.bf16.mxu1 %v15832_v0  ;;  %v12849_v19 = vsel %vm10482_vm2, %v25754_v35, %v12848_v5  ;;  %v25755_v26 = vld [vmem:[#allocation174_spill] sm:$0xff]  ;;  %v12622_v0 = vsel %vm10497_vm7, %v12621_v40, %v12620_v3  ;;  %v25757_v36 = vld [vmem:[#allocation180_spill] sm:$0xff]  ;;  %v15838_v40 = vld [vmem:[%s23672_s4 + $0x328] sm:$0xff]  }
 0x429   : > { %v12874_v37 = vrot.slane %v25755_v26, 2  ;;  %v12851_v53 = vsel %vm10485_vm3, %v12850_v1, %v12849_v19  ;;  %v12878_v48 = vrot.slane %v25757_v36, 7  ;;  %v12626_v2 = vpack.c.b16 %v12622_v0, %v12594_v50  ;;  %v25759_v9 = vld [vmem:[#allocation186_spill] sm:$0xff]  ;;  %v25761_v35 = vld [vmem:[#allocation188_spill] sm:$0xff]  ;;  %v25762_v26 = vld [vmem:[#allocation195_spill] sm:$0xff]  ;;  %15313 = vmatpush3.bf16.msra.mxu0 %v15841_v46 }
 0x42a   : > { %v12853_v28 = vsel %vm10488_vm4, %v12852_v34, %v12851_v53  ;;  %v12882_v38 = vrot.slane %v25759_v9, 5  ;;  %v25760_v3 = vld [vmem:[#allocation178_spill] sm:$0xff]  ;;  %v12884_v19 = vrot.slane %v25761_v35, 4  ;;  %v12886_v50 = vrot.slane %v25762_v26, 3  ;;  %v15840_v34 = vld [vmem:[%s23672_s4 + $0x360] sm:$0xff]   ;;  %v15845_v53 = vld [vmem:[%s23672_s4 + $0x218] sm:$0xff]   ;;  %15314 = vmatprep.subr.bf16.mxu0 %v15843_v12 }
 0x42b   : > { %v12876_v5 = vsel %vm10479_vm1, %v12875_v4, %v12874_v37  ;;  %15337 = vmatpush3.bf16.msra.mxu1 %v15834_v55  ;;  %v12855_v1 = vsel %vm10491_vm5, %v12854_v58, %v12853_v28  ;;  %12767 = vmatprep.mubr.bf16.mxu0 %v12626_v2  ;;  %v12567_v4 = vrot.slane %v25763_v56, 7  ;;  %v25764_v58 = vld [vmem:[#allocation137_spill] sm:$0xff]  ;;  %v25765_v51 = vld [vmem:[#allocation139_spill] sm:$0xff]  ;;  %v25767_v46 = vld [vmem:[#allocation52_spill] sm:$0xff] }
 0x42c   : > { %v12877_v63 = vsel %vm10482_vm2, %v25760_v3, %v12876_v5  ;;  %15338 = vmatprep.subr.bf16.mxu1 %v15836_v31  ;;  %v12857_v55 = vsel %vm10494_vm6, %v12856_v23, %v12855_v1  ;;  %v12569_v0 = vrot.slane %v25764_v58, 6  ;;  %v12571_v28 = vrot.slane %v25765_v51, 5  ;;  %v25766_v2 = vld [vmem:[#allocation141_spill] sm:$0xff]  ;;  %v15847_v23 = vld [vmem:[%s23672_s4 + $0x250] sm:$0xff]   ;;  %v25768_v1 = vld [vmem:[#allocation143_spill] sm:$0xff] }
 0x42d   : > { %v12879_v37 = vsel %vm10485_vm3, %v12878_v48, %v12877_v63  ;;  %v12859_v31 = vsel %vm10497_vm7, %v12858_v24, %v12857_v55  ;;  %v12573_v5 = vrot.slane %v25766_v2, 4  ;;  %v12568_v9 = vsel %vm10479_vm1, %v12567_v4, %v25767_v46  ;;  %v25769_v63 = vld [vmem:[#allocation145_spill] sm:$0xff]  ;;  %v25770_v26 = vld [vmem:[#allocation147_spill] sm:$0xff]  ;;  %15315 = vmatpush3.bf16.msra.mxu0 %v15845_v53 }
 0x42e   : > { %v12881_v36 = vsel %vm10488_vm4, %v12880_v16, %v12879_v37  ;;  %v12575_v3 = vrot.slane %v25768_v1, 3  ;;  %v12577_v24 = vrot.slane %v25769_v63, 2  ;;  %v15842_v16 = vld [vmem:[%s23672_s4 + $0x320] sm:$0xff]   ;;  %v12570_v35 = vsel %vm10482_vm2, %v12569_v0, %v12568_v9  ;;  %v25771_v37 = vld [vmem:[#allocation151_spill] sm:$0xff]  ;;  %v25773_v51 = vld [vmem:[#allocation165_spill] sm:$0xff]  ;;  %15316 = vmatprep.subr.bf16.mxu0 %v15847_v23 }
 0x42f   : > { %v12883_v48 = vsel %vm10491_vm5, %v12882_v38, %v12881_v36  ;;  %15339 = vmatpush3.bf16.msra.mxu1 %v15838_v40  ;;  %v12579_v55 = vrot.slane %v25770_v26, 1  ;;  %v12595_v38 = vrot.slane %v25771_v37, 7  ;;  %v15844_v56 = vld [vmem:[%s23672_s4 + $0x358] sm:$0xff]   ;;  %v12572_v40 = vsel %vm10485_vm3, %v12571_v28, %v12570_v35  ;;  %v25775_v9 = vld [vmem:[#allocation181_spill] sm:$0xff]  ;;  %v25776_v63 = vld [vmem:[#allocation184_spill] sm:$0xff] }
 0x430   : > { %v12885_v12 = vsel %vm10494_vm6, %v12884_v19, %v12883_v48  ;;  %15340 = vmatprep.subr.bf16.mxu1 %v15840_v34  ;;  %v25772_v58 = vld [vmem:[#allocation155_spill] sm:$0xff]  ;;  %v12599_v2 = vrot.slane %v25773_v51, 5  ;;  %v15849_v19 = vld [vmem:[%s23672_s4 + $0x210] sm:$0xff]   ;;  %v12574_v34 = vsel %vm10488_vm4, %v12573_v5, %v12572_v40  ;;  %v25774_v48 = vld [vmem:[#allocation149_spill] sm:$0xff]  ;;  %v12601_v1 = vrot.slane %v25775_v9, 4 }
 0x431   : > { %v12887_v4 = vsel %vm10497_vm7, %v12886_v50, %v12885_v12  ;;  %v12597_v36 = vrot.slane %v25772_v58, 6  ;;  %v12596_v46 = vsel %vm10479_vm1, %v12595_v38, %v25774_v48  ;;  %v15851_v50 = vld [vmem:[%s23672_s4 + $0x248] sm:$0xff]   ;;  %v12576_v28 = vsel %vm10491_vm5, %v12575_v3, %v12574_v34  ;;  %v25777_v35 = vld [vmem:[#allocation187_spill] sm:$0xff]  ;;  %v15848_v40 = vld [vmem:[%s23672_s4 + $0x350] sm:$0xff]   ;;  %15317 = vmatpush3.bf16.msra.mxu0 %v15849_v19 }
 0x432   : > { %v12891_v0 = vpack.c.b16 %v12887_v4, %v12859_v31  ;;  %v12603_v12 = vrot.slane %v25776_v63, 3  ;;  %v12605_v31 = vrot.slane %v25777_v35, 2  ;;  %v15846_v5 = vld [vmem:[%s23672_s4 + $0x318] sm:$0xff]   ;;  %v12578_v23 = vsel %vm10494_vm6, %v12577_v24, %v12576_v28  ;;  %v25778_v37 = vld [vmem:[#allocation193_spill] sm:$0xff]  ;;  %15318 = vmatprep.subr.bf16.mxu0 %v15851_v50 }
 0x433   : > { %v12598_v53 = vsel %vm10482_vm2, %v12597_v36, %v12596_v46  ;;  %15341 = vmatpush3.bf16.msra.mxu1 %v15842_v16  ;;  %v12607_v38 = vrot.slane %v25778_v37, 1  ;;  %v25779_v4 = vld [vmem:[#allocation111_spill] sm:$0xff]  ;;  %v12580_v16 = vsel %vm10497_vm7, %v12579_v55, %v12578_v23  ;;  %v25780_v36 = vld [vmem:[#allocation157_spill] sm:$0xff]  ;;  %v15855_v55 = vld [vmem:[%s23672_s4 + $0x240] sm:$0xff]  }
 0x434   : > { %13032 = vmatprep.mubr.bf16.mxu1 %v12891_v0  ;;  %v12600_v26 = vsel %vm10485_vm3, %v12599_v2, %v12598_v53  ;;  %v12832_v3 = vrot.slane %v25779_v4, 2  ;;  %15342 = vmatprep.subr.bf16.mxu1 %v15844_v56  ;;  %v12833_v51 = vrot.slane %v25780_v36, 1  ;;  %v25781_v0 = vld [vmem:[#allocation161_spill] sm:$0xff]  ;;  %v25782_v56 = vld [vmem:[#allocation164_spill] sm:$0xff]  ;;  %v25783_v46 = vld [vmem:[#allocation167_spill] sm:$0xff] }
 0x435   : > { %v12602_v58 = vsel %vm10488_vm4, %v12601_v1, %v12600_v26  ;;  %v12836_v34 = vrot.slane %v25781_v0, 7  ;;  %v15853_v24 = vld [vmem:[%s23672_s4 + $0x208] sm:$0xff]   ;;  %v12838_v48 = vrot.slane %v25782_v56, 6  ;;  %v12840_v9 = vrot.slane %v25783_v46, 5  ;;  %v25785_v63 = vld [vmem:[#allocation171_spill] sm:$0xff] }
 0x436   : > { %v12604_v2 = vsel %vm10491_vm5, %v12603_v12, %v12602_v58  ;;  %v25784_v28 = vld [vmem:[#allocation169_spill] sm:$0xff]  ;;  %v12834_v19 = vsel %vm10479_vm1, %v12833_v51, %v12832_v3  ;;  %v12844_v35 = vrot.slane %v25785_v63, 3  ;;  %v15850_v12 = vld [vmem:[%s23672_s4 + $0x310] sm:$0xff]   ;;  %v25787_v50 = vld [vmem:[#allocation159_spill] sm:$0xff]  ;;  %15319 = vmatpush3.bf16.msra.mxu0 %v15853_v24 }
 0x437   : > { %v12842_v53 = vrot.slane %v25784_v28, 4  ;;  %v12606_v1 = vsel %vm10494_vm6, %v12605_v31, %v12604_v2  ;;  %v25786_v23 = vld [vmem:[#allocation173_spill] sm:$0xff]  ;;  %15343 = vmatpush3.bf16.msra.mxu1 %v15846_v5  ;;  %v12835_v4 = vsel %vm10482_vm2, %v25787_v50, %v12834_v19  ;;  %v25788_v58 = vld [vmem:[#allocation175_spill] sm:$0xff]  ;;  %v25790_v2 = vld [vmem:[#allocation182_spill] sm:$0xff]  ;;  %15320 = vmatprep.subr.bf16.mxu0 %v15855_v55 }
 0x438   : > { %v12860_v26 = vrot.slane %v25786_v23, 2  ;;  %v12608_v37 = vsel %vm10497_vm7, %v12607_v38, %v12606_v1  ;;  %v12861_v36 = vrot.slane %v25788_v58, 1  ;;  %v25789_v0 = vld [vmem:[#allocation179_spill] sm:$0xff]  ;;  %15344 = vmatprep.subr.bf16.mxu1 %v15848_v40  ;;  %v15852_v3 = vld [vmem:[%s23672_s4 + $0x348] sm:$0xff]   ;;  %v12837_v5 = vsel %vm10485_vm3, %v12836_v34, %v12835_v4  ;;  %v15857_v38 = vld [vmem:[%s23672_s4 + $0x200] sm:$0xff]  }
 0x439   : > { %v12864_v31 = vrot.slane %v25789_v0, 7  ;;  %v12625_v51 = vpack.c.b16 %v12608_v37, %v12580_v16  ;;  %v12866_v56 = vrot.slane %v25790_v2, 6  ;;  %v25791_v46 = vld [vmem:[#allocation185_spill] sm:$0xff]  ;;  %v12839_v1 = vsel %vm10488_vm4, %v12838_v48, %v12837_v5  ;;  %v25793_v23 = vld [vmem:[#allocation194_spill] sm:$0xff]  ;;  %v25797_v55 = vld [vmem:[#allocation100_spill] sm:$0xff] }
 0x43a   : > { %v12868_v28 = vrot.slane %v25791_v46, 5  ;;  %v12862_v40 = vsel %vm10479_vm1, %v12861_v36, %v12860_v26  ;;  %v25792_v19 = vld [vmem:[#allocation189_spill] sm:$0xff]  ;;  %v12872_v50 = vrot.slane %v25793_v23, 3  ;;  %v12841_v16 = vsel %vm10491_vm5, %v12840_v9, %v12839_v1  ;;  %v25795_v24 = vld [vmem:[#allocation98_spill] sm:$0xff]  ;;  %v15856_v2 = vld [vmem:[%s23672_s4 + $0x340] sm:$0xff]   ;;  %15321 = vmatpush3.bf16.msra.mxu0 %v15857_v38 }
 0x43b   : > { %v12870_v63 = vrot.slane %v25792_v19, 4  ;;  %12768 = vmatmul.mubr.bf16.gmra.mxu0 %v12625_v51  ;;  %v25794_v34 = vld [vmem:[#allocation177_spill] sm:$0xff]  ;;  %v13055_v4 = vrot.slane %v25795_v24, 4  ;;  %v25796_v58 = vld [vmem:[#allocation126_spill] sm:$0xff]  ;;  %15345 = vmatpush3.bf16.msra.mxu1 %v15850_v12  ;;  %v12843_v26 = vsel %vm10494_vm6, %v12842_v53, %v12841_v16  ;;  %v13058_v51 = vrot.slane %v25797_v55, 2  ;;  %v25800_v23 = vld [vmem:[#allocation20_spill] sm:$0xff] }
 0x43c   : > { %v12863_v37 = vsel %vm10482_vm2, %v25794_v34, %v12862_v40  ;;  %v13056_v0 = vrot.slane %v25796_v58, 3  ;;  %v15854_v48 = vld [vmem:[%s23672_s4 + $0x308] sm:$0xff]   ;;  %v25798_v5 = vld [vmem:[#allocation102_spill] sm:$0xff]  ;;  %15346 = vmatprep.subr.bf16.mxu1 %v15852_v3  ;;  %v12845_v46 = vsel %vm10497_vm7, %v12844_v35, %v12843_v26  ;;  %v13065_v16 = vrot.slane %v25800_v23, 6  ;;  %v25804_v38 = vld [vmem:[#allocation104_spill] sm:$0xff] }
 0x43d   : > { %v12865_v36 = vsel %vm10485_vm3, %v12864_v31, %v12863_v37  ;;  %v13060_v9 = vrot.slane %v25798_v5, 1  ;;  %v25799_v40 = vld [vmem:[#allocation105_spill] sm:$0xff]  ;;  %v25801_v3 = vld [vmem:[#allocation22_spill] sm:$0xff]  ;;  %v25806_v55 = vld [vmem:[#allocation31_spill] sm:$0xff] }
 0x43e   : > { %v12867_v12 = vsel %vm10488_vm4, %v12866_v56, %v12865_v36  ;;  %v13057_v1 = vsel %vm10479_vm1, %v13056_v0, %v13055_v4  ;;  %v13063_v19 = vrot.slane %v25799_v40, 7  ;;  %v13067_v34 = vrot.slane %v25801_v3, 5  ;;  %v25802_v35 = vld [vmem:[#allocation25_spill] sm:$0xff]  ;;  %v25803_v56 = vld [vmem:[#allocation107_spill] sm:$0xff]  ;;  %v25805_v0 = vld [vmem:[#allocation28_spill] sm:$0xff] }
 0x43f   : > { %v12869_v53 = vsel %vm10491_vm5, %v12868_v28, %v12867_v12  ;;  %v13059_v31 = vsel %vm10482_vm2, %v13058_v51, %v13057_v1  ;;  %v13083_v58 = vrot.slane %v25802_v35, 4  ;;  %v13084_v26 = vrot.slane %v25803_v56, 3  ;;  %15347 = vmatpush3.bf16.msra.mxu1 %v15854_v48  ;;  %v25807_v48 = vld [vmem:[#allocation49_spill] sm:$0xff]  ;;  %v25809_v23 = vld [vmem:[#allocation192_spill] sm:$0xff] }
 0x440   : > { %v12871_v37 = vsel %vm10494_vm6, %v12870_v63, %v12869_v53  ;;  %v13061_v24 = vsel %vm10485_vm3, %v13060_v9, %v13059_v31  ;;  %v13086_v36 = vrot.slane %v25805_v0, 2  ;;  %v13088_v51 = vrot.slane %v25806_v55, 1  ;;  %15348 = vmatprep.subr.bf16.mxu1 %v15856_v2  ;;  %v15858_v63 = vld [vmem:[%s23672_s4 + $0x300] sm:$0xff]   ;;  %v25808_v53 = vld [vmem:[#allocation191_spill] sm:$0xff] }
 0x441   : > { %v12873_v4 = vsel %vm10497_vm7, %v12872_v50, %v12871_v37  ;;  %v13062_v28 = vsel %vm10488_vm4, %v25804_v38, %v13061_v24  ;;  %v13085_v12 = vsel %vm10479_vm1, %v13084_v26, %v13083_v58  ;;  %v13091_v1 = vrot.slane %v25807_v48, 7  ;;  %v25812_v58 = vld [vmem:[#allocation35_spill] sm:$0xff]  ;;  %v25813_v26 = vld [vmem:[#allocation40_spill] sm:$0xff] }
 0x442   : > { %v12890_v5 = vpack.c.b16 %v12873_v4, %v12845_v46  ;;  %v13064_v9 = vsel %vm10491_vm5, %v13063_v19, %v13062_v28  ;;  %v13087_v40 = vsel %vm10482_vm2, %v13086_v36, %v13085_v12  ;;  %v13093_v31 = vrot.slane %v25808_v53, 6  ;;  %v25810_v46 = vld [vmem:[#allocation38_spill] sm:$0xff]  ;;  %v25811_v19 = vld [vmem:[#allocation129_spill] sm:$0xff]  ;;  %v25816_v55 = vld [vmem:[#allocation48_spill] sm:$0xff] }
 0x443   : > { %v13066_v50 = vsel %vm10494_vm6, %v13065_v16, %v13064_v9  ;;  %v13095_v3 = vrot.slane %v25809_v23, 5  ;;  %v13089_v37 = vsel %vm10485_vm3, %v13088_v51, %v13087_v40  ;;  %v13320_v24 = vrot.slane %v25810_v46, 6  ;;  %v25814_v4 = vld [vmem:[#allocation42_spill] sm:$0xff]  ;;  %15349 = vmatpush3.bf16.msra.mxu1 %v15858_v63  ;;  %v25819_v53 = vld [vmem:[#allocation29_spill] sm:$0xff]  ;;  %v25820_v46 = vld [vmem:[#allocation128_spill] sm:$0xff] }
 0x444   : > { %13033 = vmatmul.mubr.bf16.gmra.mxu1 %v12890_v5  ;;  %v13068_v2 = vsel %vm10497_vm7, %v13067_v34, %v13066_v50  ;;  %v13321_v35 = vrot.slane %v25811_v19, 5  ;;  %v13090_v56 = vsel %vm10488_vm4, %v25812_v58, %v13089_v37  ;;  %v13323_v16 = vrot.slane %v25813_v26, 4  ;;  %v25815_v28 = vld [vmem:[#allocation130_spill] sm:$0xff]  ;;  %v25817_v5 = vld [vmem:[#allocation153_spill] sm:$0xff]  ;;  %v25818_v50 = vld [vmem:[#allocation131_spill] sm:$0xff] }
 0x445   : > { %v13325_v38 = vrot.slane %v25814_v4, 3  ;;  %v13327_v0 = vrot.slane %v25815_v28, 2  ;;  %v13092_v36 = vsel %vm10491_vm5, %v13091_v1, %v13090_v56  ;;  %v13329_v51 = vrot.slane %v25816_v55, 1  ;;  %v25821_v19 = vld [vmem:[#allocation197_spill] sm:$0xff] }
 0x446   : > { %v13322_v34 = vsel %vm10479_vm1, %v13321_v35, %v13320_v24  ;;  %v13332_v9 = vrot.slane %v25817_v5, 7  ;;  %v13094_v12 = vsel %vm10494_vm6, %v13093_v31, %v13092_v36  ;;  %v13348_v40 = vrot.slane %v25818_v50, 6  ;;  %v25822_v31 = vld [vmem:[#allocation199_spill] sm:$0xff]  ;;  %v25823_v28 = vld [vmem:[#allocation201_spill] sm:$0xff] }
 0x447   : > { %v13324_v48 = vsel %vm10482_vm2, %v13323_v16, %v13322_v34  ;;  %v13349_v23 = vrot.slane %v25819_v53, 5  ;;  %v13096_v37 = vsel %vm10497_vm7, %v13095_v3, %v13094_v12  ;;  %v13351_v1 = vrot.slane %v25820_v46, 4  ;;  %v25824_v3 = vld [vmem:[#allocation205_spill] sm:$0xff]  ;;  %v25832_v53 = vld [vmem:[#allocation26_spill] sm:$0xff] }
 0x448   : > { %v13326_v63 = vsel %vm10485_vm3, %v13325_v38, %v13324_v48  ;;  %v13353_v24 = vrot.slane %v25821_v19, 3  ;;  %v13154_v35 = vpack.c.b16 %v13096_v37, %v13068_v2  ;;  %v13355_v26 = vrot.slane %v25822_v31, 2  ;;  %v25825_v38 = vld [vmem:[#allocation51_spill] sm:$0xff]  ;;  %v25826_v5 = vld [vmem:[#allocation97_spill] sm:$0xff] }
 0x449   : > { %v13328_v58 = vsel %vm10488_vm4, %v13327_v0, %v13326_v63  ;;  %v13350_v56 = vsel %vm10479_vm1, %v13349_v23, %v13348_v40  ;;  %v13357_v36 = vrot.slane %v25823_v28, 1  ;;  %v13360_v34 = vrot.slane %v25824_v3, 7  ;;  %v25828_v12 = vld [vmem:[#allocation125_spill] sm:$0xff]  ;;  %v25830_v40 = vld [vmem:[#allocation23_spill] sm:$0xff]  ;;  %v25840_v3 = vld [vmem:[#allocation30_spill] sm:$0xff] }
 0x44a   : > { %v13330_v16 = vsel %vm10491_vm5, %v13329_v51, %v13328_v58  ;;  %v13352_v4 = vsel %vm10482_vm2, %v13351_v1, %v13350_v56  ;;  %13289 = vmatprep.mubr.bf16.mxu0 %v13154_v35  ;;  %v25827_v0 = vrot.slane %v25826_v5, 4  ;;  %v25829_v48 = vrot.slane %v25828_v12, 3  ;;  %v25834_v1 = vld [vmem:[#allocation99_spill] sm:$0xff] }
 0x44b   : > { %v13331_v55 = vsel %vm10494_vm6, %v25825_v38, %v13330_v16  ;;  %v13354_v2 = vsel %vm10485_vm3, %v13353_v24, %v13352_v4  ;;  %v25831_v51 = vrot.slane %v25830_v40, 4  ;;  %v25833_v23 = vrot.slane %v25832_v53, 3  ;;  %v25836_v35 = vld [vmem:[#allocation27_spill] sm:$0xff]  ;;  %v25838_v16 = vld [vmem:[#allocation101_spill] sm:$0xff]  ;;  %v25848_v40 = vld [vmem:[#allocation34_spill] sm:$0xff] }
 0x44c   : > { %v13043_v50 = vsel %vm10479_vm1, %v25829_v48, %v25827_v0  ;;  %v13333_v63 = vsel %vm10497_vm7, %v13332_v9, %v13331_v55  ;;  %v13356_v46 = vsel %vm10488_vm4, %v13355_v26, %v13354_v2  ;;  %v25835_v19 = vrot.slane %v25834_v1, 2  ;;  %v25842_v55 = vld [vmem:[#allocation37_spill] sm:$0xff]  ;;  %v25846_v12 = vld [vmem:[#allocation203_spill] sm:$0xff] }
 0x44d   : > { %v13071_v37 = vsel %vm10479_vm1, %v25833_v23, %v25831_v51  ;;  %v25837_v58 = vrot.slane %v25836_v35, 2  ;;  %v13358_v31 = vsel %vm10491_vm5, %v13357_v36, %v13356_v46  ;;  %v25839_v4 = vrot.slane %v25838_v16, 1  ;;  %v25844_v2 = vld [vmem:[#allocation109_spill] sm:$0xff]  ;;  %v25849_v53 = vld [vmem:[#allocation39_spill] sm:$0xff]  ;;  %v25853_v35 = vld [vmem:[#allocation110_spill] sm:$0xff] }
 0x44e   : > { %v13045_v24 = vsel %vm10482_vm2, %v25835_v19, %v13043_v50  ;;  %v25841_v38 = vrot.slane %v25840_v3, 1  ;;  %v25843_v26 = vrot.slane %v25842_v55, 6  ;;  %v25845_v5 = vrot.slane %v25844_v2, 5  ;;  %v25847_v50 = vld [vmem:[#allocation103_spill] sm:$0xff]  ;;  %v25851_v1 = vld [vmem:[#allocation17_spill] sm:$0xff]  ;;  %v25857_v3 = vld [vmem:[#allocation18_spill] sm:$0xff] }
 0x44f   : > { %v13073_v56 = vsel %vm10482_vm2, %v25837_v58, %v13071_v37  ;;  %v13047_v28 = vsel %vm10485_vm3, %v25839_v4, %v13045_v24  ;;  %v13359_v48 = vsel %vm10494_vm6, %v25846_v12, %v13358_v31  ;;  %v25850_v23 = vrot.slane %v25849_v53, 4  ;;  %v25855_v31 = vld [vmem:[#allocation41_spill] sm:$0xff]  ;;  %v25859_v55 = vld [vmem:[#allocation190_spill] sm:$0xff] }
 0x450   : > { %v13075_v9 = vsel %vm10485_vm3, %v25841_v38, %v13073_v56  ;;  %v13308_v0 = vsel %vm10479_vm1, %v25845_v5, %v25843_v26  ;;  %v13048_v36 = vsel %vm10488_vm4, %v25847_v50, %v13047_v28  ;;  %v13361_v46 = vsel %vm10497_vm7, %v13360_v34, %v13359_v48  ;;  %v25861_v2 = vld [vmem:[#allocation45_spill] sm:$0xff] }
 0x451   : > { %v13076_v51 = vsel %vm10488_vm4, %v25848_v40, %v13075_v9  ;;  %v13310_v37 = vsel %vm10482_vm2, %v25850_v23, %v13308_v0  ;;  %v25852_v19 = vrot.slane %v25851_v1, 7  ;;  %v25854_v58 = vrot.slane %v25853_v35, 7  ;;  %v25863_v12 = vld [vmem:[#allocation21_spill] sm:$0xff]  ;;  %v25871_v1 = vld [vmem:[#allocation32_spill] sm:$0xff] }
 0x452   : > { %v25856_v16 = vrot.slane %v25855_v31, 3  ;;  %v13419_v28 = vpack.c.b16 %v13361_v46, %v13333_v63  ;;  %v25858_v38 = vrot.slane %v25857_v3, 6  ;;  %v25860_v26 = vrot.slane %v25859_v55, 6  ;;  %v25874_v31 = vld [vmem:[#allocation127_spill] sm:$0xff]  ;;  %v25876_v3 = vld [vmem:[#allocation108_spill] sm:$0xff] }
 0x453   : > { %v13050_v24 = vsel %vm10491_vm5, %v25852_v19, %v13048_v36  ;;  %v13078_v56 = vsel %vm10491_vm5, %v25854_v58, %v13076_v51  ;;  %v25862_v5 = vrot.slane %v25861_v2, 2  ;;  %v25864_v48 = vrot.slane %v25863_v12, 5  ;;  %v25865_v36 = vld [vmem:[#allocation196_spill] sm:$0xff]  ;;  %v25867_v51 = vld [vmem:[#allocation47_spill] sm:$0xff]  ;;  %v25873_v58 = vld [vmem:[#allocation50_spill] sm:$0xff] }
 0x454   : > { %v13312_v4 = vsel %vm10485_vm3, %v25856_v16, %v13310_v37  ;;  %v13052_v9 = vsel %vm10494_vm6, %v25858_v38, %v13050_v24  ;;  %v13080_v34 = vsel %vm10494_vm6, %v25860_v26, %v13078_v56  ;;  %v25866_v40 = vrot.slane %v25865_v36, 5  ;;  %v25869_v37 = vld [vmem:[#allocation44_spill] sm:$0xff]  ;;  %13554 = vmatprep.mubr.bf16.mxu1 %v13419_v28  ;;  %v25882_v12 = vld [vmem:[#allocation207_spill] sm:$0xff] }
 0x455   : > { %v13314_v0 = vsel %vm10488_vm4, %v25862_v5, %v13312_v4  ;;  %v13054_v50 = vsel %vm10497_vm7, %v25864_v48, %v13052_v9  ;;  %v25868_v53 = vrot.slane %v25867_v51, 1  ;;  %v25870_v46 = vrot.slane %v25869_v37, 6  ;;  %v25877_v9 = vld [vmem:[#allocation134_spill] sm:$0xff]  ;;  %v25887_v37 = vld [vmem:[#allocation211_spill] sm:$0xff] }
 0x456   : > { %v13082_v63 = vsel %vm10497_vm7, %v25866_v40, %v13080_v34  ;;  %v25872_v19 = vrot.slane %v25871_v1, 5  ;;  %v25875_v16 = vrot.slane %v25874_v31, 4  ;;  %v13111_v38 = vrot.slane %v25876_v3, 4  ;;  %v25879_v34 = vld [vmem:[#allocation132_spill] sm:$0xff] }
 0x457   : > { %v13316_v23 = vsel %vm10491_vm5, %v25868_v53, %v13314_v0  ;;  %v13153_v35 = vpack.c.b16 %v13082_v63, %v13054_v50  ;;  %v25878_v55 = vrot.slane %v25877_v9, 7  ;;  %v25880_v2 = vrot.slane %v25879_v34, 3  ;;  %v25881_v0 = vld [vmem:[#allocation206_spill] sm:$0xff]  ;;  %v25885_v63 = vld [vmem:[#allocation208_spill] sm:$0xff] }
 0x458   : > { %v13336_v24 = vsel %vm10479_vm1, %v25872_v19, %v25870_v46  ;;  %v13317_v56 = vsel %vm10494_vm6, %v25873_v58, %v13316_v23  ;;  %v13112_v28 = vrot.slane %v25881_v0, 3  ;;  %v13114_v48 = vrot.slane %v25882_v12, 2  ;;  %v25883_v50 = vld [vmem:[#allocation198_spill] sm:$0xff]  ;;  %v25888_v1 = vld [vmem:[#allocation200_spill] sm:$0xff] }
 0x459   : > { %v13338_v4 = vsel %vm10482_vm2, %v25875_v16, %v13336_v24  ;;  %v13319_v26 = vsel %vm10497_vm7, %v25878_v55, %v13317_v56  ;;  %13290 = vmatmul.mubr.bf16.vlgmr.msra.gmra.mxu0 %v13153_v35  ;;  %v25884_v36 = vrot.slane %v25883_v50, 2  ;;  %v13116_v51 = vrot.slane %v25885_v63, 1  ;;  %v25886_v53 = vld [vmem:[#allocation210_spill] sm:$0xff]  ;;  %v25890_v56 = vld [vmem:[#allocation212_spill] sm:$0xff]  ;;  %v25891_v16 = vld [vmem:[#allocation213_spill] sm:$0xff] }
 0x45a   : > { %v13340_v5 = vsel %vm10485_vm3, %v25880_v2, %v13338_v4  ;;  %v13119_v23 = vrot.slane %v25886_v53, 7  ;;  %v13121_v46 = vrot.slane %v25887_v37, 6  ;;  %v25889_v19 = vrot.slane %v25888_v1, 1  ;;  %v25892_v4 = vld [vmem:[#allocation202_spill] sm:$0xff]  ;;  %v25894_v2 = vld [vmem:[#allocation215_spill] sm:$0xff]  ;;  %v25895_v0 = vld [vmem:[#allocation204_spill] sm:$0xff] }
 0x45b   : > { %v13342_v40 = vsel %vm10488_vm4, %v25884_v36, %v13340_v5  ;;  %v13113_v58 = vsel %vm10479_vm1, %v13112_v28, %v13111_v38  ;;  %v13123_v31 = vrot.slane %v25890_v56, 5  ;;  %v13139_v35 = vrot.slane %v25891_v16, 4  ;;  %v25893_v55 = vld [vmem:[#allocation214_spill] sm:$0xff]  ;;  %v25897_v38 = vld [vmem:[#allocation216_spill] sm:$0xff]  ;;  %v25899_v37 = vld [vmem:[#allocation209_spill] sm:$0xff] }
 0x45c   : > { %v13344_v24 = vsel %vm10491_vm5, %v25889_v19, %v13342_v40  ;;  %v13115_v9 = vsel %vm10482_vm2, %v13114_v48, %v13113_v58  ;;  %v13140_v34 = vrot.slane %v25893_v55, 3  ;;  %v13142_v5 = vrot.slane %v25894_v2, 2  ;;  %v25898_v40 = vld [vmem:[#allocation218_spill] sm:$0xff]  ;;  %v25900_v19 = vld [vmem:[#allocation219_spill] sm:$0xff]  ;;  %v25901_v16 = vld [vmem:[#allocation220_spill] sm:$0xff] }
 0x45d   : > { %v13345_v3 = vsel %vm10494_vm6, %v25892_v4, %v13344_v24  ;;  %v25896_v12 = vrot.slane %v25895_v0, 7  ;;  %v13117_v36 = vsel %vm10485_vm3, %v13116_v51, %v13115_v9  ;;  %v13144_v28 = vrot.slane %v25897_v38, 1  ;;  %v25902_v55 = vld [vmem:[#allocation221_spill] sm:$0xff]  ;;  %v25904_v0 = vld [vmem:[#allocation222_spill] sm:$0xff] }
 0x45e   : > { %v13147_v63 = vrot.slane %v25898_v40, 7  ;;  %v13118_v1 = vsel %vm10488_vm4, %v25899_v37, %v13117_v36  ;;  %v13141_v48 = vsel %vm10479_vm1, %v13140_v34, %v13139_v35  ;;  %v13149_v24 = vrot.slane %v25900_v19, 6  ;;  %v25903_v34 = vld [vmem:[#allocation217_spill] sm:$0xff]  ;;  %v25908_v37 = vld [vmem:[#allocation230_spill] sm:$0xff] }
 0x45f   : > { %v13347_v50 = vsel %vm10497_vm7, %v25896_v12, %v13345_v3  ;;  %v13120_v58 = vsel %vm10491_vm5, %v13119_v23, %v13118_v1  ;;  %v13143_v56 = vsel %vm10482_vm2, %v13142_v5, %v13141_v48  ;;  %v13151_v4 = vrot.slane %v25901_v16, 5  ;;  %v25905_v12 = vld [vmem:[#allocation223_spill] sm:$0xff] }
 0x460   : > { %v13418_v53 = vpack.c.b16 %v13347_v50, %v13319_v26  ;;  %v13376_v51 = vrot.slane %v22775_v20, 6  ;;  %v13122_v3 = vsel %vm10494_vm6, %v13121_v46, %v13120_v58  ;;  %v13145_v26 = vsel %vm10485_vm3, %v13144_v28, %v13143_v56  ;;  %v25906_v46 = vld [vmem:[#allocation225_spill] sm:$0xff]  ;;  %v25909_v58 = vld [vmem:[#allocation231_spill] sm:$0xff] }
 0x461   : > { %v13377_v9 = vrot.slane %v22785_v33, 5  ;;  %v13379_v2 = vrot.slane %v25902_v55, 4  ;;  %v13124_v35 = vsel %vm10497_vm7, %v13123_v31, %v13122_v3  ;;  %v13146_v23 = vsel %vm10488_vm4, %v25903_v34, %v13145_v26  ;;  %v25907_v31 = vld [vmem:[#allocation229_spill] sm:$0xff]  ;;  %v25911_v34 = vld [vmem:[#allocation227_spill] sm:$0xff] }
 0x462   : > { %13555 = vmatmul.mubr.bf16.vlgmr.msra.gmra.mxu1 %v13418_v53  ;;  %v13381_v5 = vrot.slane %v25904_v0, 3  ;;  %v13383_v50 = vrot.slane %v25905_v12, 2  ;;  %v13148_v20 = vsel %vm10491_vm5, %v13147_v63, %v13146_v23  ;;  %v13385_v38 = vrot.slane %v25906_v46, 1  ;;  %v23509_v46 = vpop.f32.mrf.mxu0 }
 0x463   : > { %v13378_v36 = vsel %vm10479_vm1, %v13377_v9, %v13376_v51  ;;  %v13388_v28 = vrot.slane %v22812_v62, 7  ;;  %v13150_v33 = vsel %vm10494_vm6, %v13149_v24, %v13148_v20  ;;  %v13404_v53 = vrot.slane %v25907_v31, 6  ;;  %v25910_v24 = vld [vmem:[#allocation232_spill] sm:$0xff] }
 0x464   : > { %v13380_v40 = vsel %vm10482_vm2, %v13379_v2, %v13378_v36  ;;  %v13405_v1 = vrot.slane %v25908_v37, 5  ;;  %v13152_v48 = vsel %vm10497_vm7, %v13151_v4, %v13150_v33  ;;  %v13407_v63 = vrot.slane %v22824_v7, 4 }
 0x465   : > { %v13382_v19 = vsel %vm10485_vm3, %v13381_v5, %v13380_v40  ;;  %v13409_v56 = vrot.slane %v25909_v58, 3  ;;  %v13156_v16 = vpack.c.b16 %v13152_v48, %v13124_v35  ;;  %v13411_v3 = vrot.slane %v25910_v24, 2  ;;  %v23528_v48 = vpop.f32.mrf.mxu0 }
 0x466   : > { %v13384_v51 = vsel %vm10488_vm4, %v13383_v50, %v13382_v19  ;;  %v13406_v62 = vsel %vm10479_vm1, %v13405_v1, %v13404_v53  ;;  %v13413_v55 = vrot.slane %v22836_v30, 1  ;;  %v13416_v7 = vrot.slane %v22844_v59, 7 }
 0x467   : > { %v13386_v26 = vsel %vm10491_vm5, %v13385_v38, %v13384_v51  ;;  %v13408_v9 = vsel %vm10482_vm2, %v13407_v63, %v13406_v62  ;;  %13297 = vmatprep.mubr.bf16.mxu0 %v13156_v16  ;;  %v13097_v2 = vrot.slane %v22461_v47, 4  ;;  %v13098_v35 = vrot.slane %v22530_v10, 3  ;;  %v23547_v24 = vpop.f32.mrf.mxu0 }
 0x468   : > { %v13410_v4 = vsel %vm10485_vm3, %v13409_v56, %v13408_v9  ;;  %v13387_v23 = vsel %vm10494_vm6, %v25911_v34, %v13386_v26  ;;  %v13100_v5 = vrot.slane %v22534_v57, 2  ;;  %v13102_v12 = vrot.slane %v22541_v45, 1  ;;  %v23511_v57 = vpop.f32.mrf.mxu1  ;;  %v25914_v34 = vld [vmem:[#allocation234_spill] sm:$0xff] }
 0x469   : > { %v13412_v0 = vsel %vm10488_vm4, %v13411_v3, %v13410_v4  ;;  %v13389_v30 = vsel %vm10497_vm7, %v13388_v28, %v13387_v23  ;;  %v13099_v20 = vsel %vm10479_vm1, %v13098_v35, %v13097_v2  ;;  %v13105_v59 = vrot.slane %v22549_v29, 7  ;;  %v25913_v35 = vld [vmem:[#allocation228_spill] sm:$0xff]  ;;  %v23564_v23 = vpop.f32.mrf.mxu0 }
 0x46a   : > { %v13414_v50 = vsel %vm10491_vm5, %v13413_v55, %v13412_v0  ;;  %v13101_v10 = vsel %vm10482_vm2, %v13100_v5, %v13099_v20  ;;  %v13107_v36 = vrot.slane %v22553_v22, 6  ;;  %v13125_v38 = vrot.slane %v22564_v61, 4  ;;  %v25912_v55 = vld [vmem:[#allocation224_spill] sm:$0xff] }
 0x46b   : > { %v13415_v47 = vsel %vm10494_vm6, %v22840_v44, %v13414_v50  ;;  %v13126_v28 = vrot.slane %v22574_v42, 3  ;;  %v13128_v33 = vrot.slane %v22578_v43, 2  ;;  %v13103_v44 = vsel %vm10485_vm3, %v13102_v12, %v13101_v10  ;;  %v25915_v50 = vld [vmem:[#allocation226_spill] sm:$0xff] }
 0x46c   : > { %v13417_v45 = vsel %vm10497_vm7, %v13416_v7, %v13415_v47  ;;  %v13109_v31 = vrot.slane %v22560_v15, 5  ;;  %v13130_v29 = vrot.slane %v22585_v25, 1  ;;  %v13104_v22 = vsel %vm10488_vm4, %v22545_v13, %v13103_v44  ;;  %v23530_v15 = vpop.f32.mrf.mxu1  ;;  %v25916_v47 = vld [vmem:[#allocation233_spill] sm:$0xff] }
 0x46d   : > { %v13421_v40 = vpack.c.b16 %v13417_v45, %v13389_v30  ;;  %v13127_v53 = vsel %vm10479_vm1, %v13126_v28, %v13125_v38  ;;  %v13133_v37 = vrot.slane %v22593_v6, 7  ;;  %v13106_v61 = vsel %vm10491_vm5, %v13105_v59, %v13104_v22  ;;  %v15160_v59 = vpop.f32.mrf.mxu0 }
 0x46e   : > { %v13129_v42 = vsel %vm10482_vm2, %v13128_v33, %v13127_v53  ;;  %v13135_v43 = vrot.slane %v22597_v39, 6  ;;  %v13363_v1 = vrot.slane %v22780_v49, 5  ;;  %v13108_v25 = vsel %vm10494_vm6, %v13107_v36, %v13106_v61  ;;  %v23549_v3 = vpop.f32.mrf.mxu1 }
 0x46f   : > { %13562 = vmatprep.mubr.bf16.mxu1 %v13421_v40  ;;  %v13131_v13 = vsel %vm10485_vm3, %v13130_v29, %v13129_v42  ;;  %v13137_v19 = vrot.slane %v22604_v11, 5  ;;  %v13362_v6 = vrot.slane %v22770_v54, 6  ;;  %v13110_v63 = vsel %vm10497_vm7, %v13109_v31, %v13108_v25  ;;  %v15161_v33 = vpop.f32.mrf.mxu0  ;;  %v15861_v25 = vld [vmem:[#allocation9 + $0x8] sm:$0xff]  }
 0x470   : > { %v13132_v58 = vsel %vm10488_vm4, %v22589_v60, %v13131_v13  ;;  %v13365_v56 = vrot.slane %v22787_v21, 4  ;;  %v13367_v16 = vrot.slane %v22794_v32, 3  ;;  %v13390_v62 = vrot.slane %v22814_v14, 6  ;;  %v23566_v0 = vpop.f32.mrf.mxu1 }
 0x471   : > { %v13134_v39 = vsel %vm10491_vm5, %v13133_v37, %v13132_v58  ;;  %v13364_v49 = vsel %vm10479_vm1, %v13363_v1, %v13362_v6  ;;  %v13391_v11 = vrot.slane %v22818_v27, 5  ;;  %v13393_v54 = vrot.slane %v22822_v8, 4  ;;  %v15163_v29 = vpop.f32.mrf.mxu0  ;;  %v15860_v1 = vld [vmem:[#allocation9 + $0x10] sm:$0xff]  }
 0x472   : > { %v13136_v51 = vsel %vm10494_vm6, %v13135_v43, %v13134_v39  ;;  %v13369_v26 = vrot.slane %v22798_v52, 2  ;;  %v13395_v21 = vrot.slane %v22826_v41, 3  ;;  %v13397_v32 = vrot.slane %v22830_v18, 2  ;;  %v15188_v36 = vpop.f32.mrf.mxu1  ;;  %v15859_v43 = vld [vmem:[#allocation9 + $0x18] sm:$0xff]  }
 0x473   : > { %v13138_v60 = vsel %vm10497_vm7, %v13137_v19, %v13136_v51  ;;  %v13371_v4 = vrot.slane %v25912_v55, 1  ;;  %v13392_v14 = vsel %vm10479_vm1, %v13391_v11, %v13390_v62  ;;  %v13399_v27 = vrot.slane %v22834_v17, 1  ;;  %v15164_v53 = vpop.f32.mrf.mxu0  ;;  %15368 = vmatprep.subr.bf16.mxu0 %v15859_v43  ;;  %v15862_v19 = vld [vmem:[#allocation9] sm:$0xff]  }
 0x474   : > { %v13155_v9 = vpack.c.b16 %v13138_v60, %v13110_v63  ;;  %v13366_v8 = vsel %vm10482_vm2, %v13365_v56, %v13364_v49  ;;  %v13394_v7 = vsel %vm10482_vm2, %v13393_v54, %v13392_v14  ;;  %v13374_v52 = vrot.slane %v25913_v35, 7  ;;  %v15189_v40 = vpop.f32.mrf.mxu1  ;;  %15369 = vmatpush3.bf16.msra.mxu0 %v15859_v43 }
 0x475   : > { %v13368_v2 = vsel %vm10485_vm3, %v13367_v16, %v13366_v8  ;;  %v13396_v41 = vsel %vm10485_vm3, %v13395_v21, %v13394_v7  ;;  %v13402_v18 = vrot.slane %v25914_v34, 7  ;;  %v15162_v44 = vadd.f32 %v15161_v33, %v15160_v59  ;;  %15370 = vmatprep.subr.bf16.mxu0 %v15860_v1 }
 0x476   : > { %13298 = vmatmul.mubr.bf16.gmra.mxu0 %v13155_v9  ;;  %v13370_v5 = vsel %vm10488_vm4, %v13369_v26, %v13368_v2  ;;  %v13398_v17 = vsel %vm10488_vm4, %v13397_v32, %v13396_v41  ;;  %v15190_v31 = vadd.f32 %v15189_v40, %v15188_v36  ;;  %v15191_v22 = vpop.f32.mrf.mxu1  ;;  %v15165_v61 = vadd.f32 %v15164_v53, %v15163_v29 }
 0x477   : > { %v13372_v12 = vsel %vm10491_vm5, %v13371_v4, %v13370_v5  ;;  %v13400_v30 = vsel %vm10491_vm5, %v13399_v27, %v13398_v17 }
 0x478   : > { %v13373_v20 = vsel %vm10494_vm6, %v25915_v50, %v13372_v12  ;;  %v13401_v10 = vsel %vm10494_vm6, %v25916_v47, %v13400_v30  ;;  %v15192_v37 = vpop.f32.mrf.mxu1  ;;  %15371 = vmatpush3.bf16.msra.mxu0 %v15860_v1 }
 0x479   : > { %v13375_v45 = vsel %vm10497_vm7, %v13374_v52, %v13373_v20  ;;  %v13403_v38 = vsel %vm10497_vm7, %v13402_v18, %v13401_v10  ;;  %v15193_v42 = vadd.f32 %v15192_v37, %v15191_v22  ;;  %15372 = vmatprep.subr.bf16.mxu0 %v15861_v25 }
 0x47a   : > { %v13420_v28 = vpack.c.b16 %v13403_v38, %v13375_v45 }
 0x47c   : > { %13563 = vmatmul.mubr.bf16.gmra.mxu1 %v13420_v28  ;;  %15373 = vmatpush3.bf16.msra.mxu0 %v15861_v25 }
 0x47d   : > { %15374 = vmatprep.subr.bf16.mxu0 %v15862_v19 }
 0x480   : > { %15375 = vmatpush3.bf16.msra.mxu0 %v15862_v19 }
 0x488   : > { %v15238_v63 = vpop.f32.mrf.mxu1 }
 0x48a   : > { %v15210_v13 = vpop.f32.mrf.mxu0  ;;  %v15239_v39 = vpop.f32.mrf.mxu1 }
 0x48c   : > { %v15211_v6 = vpop.f32.mrf.mxu0  ;;  %v15241_v56 = vpop.f32.mrf.mxu1 }
 0x48d   : > { %v15212_v25 = vadd.f32 %v15211_v6, %v15210_v13 }
 0x48e   : > { %v15213_v58 = vpop.f32.mrf.mxu0  ;;  %v15242_v51 = vpop.f32.mrf.mxu1 }
 0x490   : > { %v15214_v49 = vpop.f32.mrf.mxu0 }
 0x4c0   : > { %v23578_v16 = vpop.f32.mrf.mxu0 }
 0x4c2   : > { %v23580_v62 = vpop.f32.mrf.mxu0 }
 0x4c4   : > { %v23584_v54 = vpop.f32.mrf.mxu0 }
 0x4c6   : > { %v23582_v11 = vpop.f32.mrf.mxu1  ;;  %v23588_v26 = vpop.f32.mrf.mxu0 }
 0x4c8   : > { %v23586_v60 = vpop.f32.mrf.mxu1 }
 0x4ca   : > { %v23590_v32 = vpop.f32.mrf.mxu1 }
 0x4cc   : > { %v23592_v55 = vpop.f32.mrf.mxu1 }
 0x4dc   : > { %v15266_v21 = vpop.f32.mrf.mxu0 }
 0x4de   : > { %v15267_v9 = vpop.f32.mrf.mxu0 }
 0x4df   : > { %v15268_v29 = vadd.f32 %v15267_v9, %v15266_v21 }
 0x4e0   : > { %v15269_v14 = vpop.f32.mrf.mxu0 }
 0x4e2   : > { %v15270_v8 = vpop.f32.mrf.mxu0 }
 0x4e6   : > { %v15294_v4 = vpop.f32.mrf.mxu1 }
 0x4e8   : > { %v15295_v27 = vpop.f32.mrf.mxu1 }
 0x4e9   : > { %v15296_v22 = vadd.f32 %v15295_v27, %v15294_v4  ;;  %v15159_v4 = vadd.f32 %v23564_v23, %v23547_v24 }
 0x4ea   : > { %v15297_v7 = vpop.f32.mrf.mxu1 }
 0x4ec   : > { %v15298_v52 = vpop.f32.mrf.mxu1 }
 0x4fb   : > { %v15272_v2 = vpop.f32.mrf.mxu0 }
 0x4fd   : > { %v15273_v35 = vpop.f32.mrf.mxu0 }
 0x4fe   : > { %v15274_v34 = vadd.f32 %v15273_v35, %v15272_v2  ;;  %v15271_v2 = vadd.f32 %v15270_v8, %v15269_v14 }
 0x4ff   : > { %v15275_v41 = vpop.f32.mrf.mxu0 }
 0x500   : > { %v12770_v12 = vadd.f32 %v15274_v34, %v15162_v44  ;;  %v15156_v44 = vadd.f32 %v23528_v48, %v23509_v46  ;;  %v15187_v46 = vadd.f32 %v23566_v0, %v23549_v3  ;;  %v12765_v6 = vadd.f32 %v15271_v2, %v15159_v4 }
 0x501   : > { %v15276_v5 = vpop.f32.mrf.mxu0 }
 0x502   : > { %v15277_v50 = vadd.f32 %v15276_v5, %v15275_v41  ;;  %v12762_v19 = vadd.f32 %v15268_v29, %v15156_v44  ;;  %v15299_v41 = vadd.f32 %v15298_v52, %v15297_v7  ;;  %v15122_v5 = vld [vmem:[#allocation8] ss:$0 sm:$0xff]  ;;  %v15249_v44 = vadd.f32 %v23592_v55, %v23590_v32 }
 0x504   : > { %v15300_v18 = vpop.f32.mrf.mxu1  ;;  %v12773_v36 = vadd.f32 %v15277_v50, %v15165_v61  ;;  %v15240_v61 = vadd.f32 %v15239_v39, %v15238_v63  ;;  %v13030_v39 = vadd.f32 %v15299_v41, %v15187_v46 }
 0x506   : > { %v15301_v17 = vpop.f32.mrf.mxu1 }
 0x507   : > { %v15302_v30 = vadd.f32 %v15301_v17, %v15300_v18  ;;  %v13572_v17 = vadd.f32 %v13030_v39, %v12765_v6 }
 0x508   : > { %v15303_v20 = vpop.f32.mrf.mxu1 }
 0x509   : > { %v13035_v47 = vadd.f32 %v15302_v30, %v15190_v31  ;;  %v15184_v31 = vadd.f32 %v23530_v15, %v23511_v57  ;;  %v15215_v57 = vadd.f32 %v15214_v49, %v15213_v58  ;;  %v15243_v15 = vadd.f32 %v15242_v51, %v15241_v56 }
 0x50a   : > { %v15304_v10 = vpop.f32.mrf.mxu1 }
 0x50b   : > { %v23594_v59 = vadd.f32 %v13035_v47, %v12770_v12  ;;  %v15305_v45 = vadd.f32 %v15304_v10, %v15303_v20  ;;  %v15218_v10 = vadd.f32 %v23580_v62, %v23578_v16 }
 0x50d   : > { %v13038_v38 = vadd.f32 %v15305_v45, %v15193_v42  ;;  %v13027_v42 = vadd.f32 %v15296_v22, %v15184_v31  ;;  %v15246_v45 = vadd.f32 %v23586_v60, %v23582_v11  ;;  %v15221_v22 = vadd.f32 %v23588_v26, %v23584_v54 }
 0x50f   : > { %v23596_v28 = vadd.f32 %v13038_v38, %v12773_v36  ;;  %v13571_v13 = vadd.f32 %v13027_v42, %v12762_v19  ;;  %v15123_v42 = vld [vmem:[#allocation11] ss:$0 sm:$0xff] }
 0x519   : > { %v15322_v33 = vpop.f32.mrf.mxu0 }
 0x51b   : > { %v15323_v40 = vpop.f32.mrf.mxu0 }
 0x51c   : > { %v15324_v37 = vadd.f32 %v15323_v40, %v15322_v33 }
 0x51d   : > { %v15325_v53 = vpop.f32.mrf.mxu0 }
 0x51e   : > { %v13292_v34 = vadd.f32 %v15324_v37, %v15212_v25 }
 0x51f   : > { %v15326_v1 = vpop.f32.mrf.mxu0 }
 0x520   : > { %v15327_v9 = vadd.f32 %v15326_v1, %v15325_v53 }
 0x522   : > { %v15350_v43 = vpop.f32.mrf.mxu1  ;;  %v13295_v8 = vadd.f32 %v15327_v9, %v15215_v57 }
 0x524   : > { %v15351_v35 = vpop.f32.mrf.mxu1 }
 0x525   : > { %v15352_v21 = vadd.f32 %v15351_v35, %v15350_v43 }
 0x526   : > { %v15353_v27 = vpop.f32.mrf.mxu1 }
 0x527   : > { %v13557_v48 = vadd.f32 %v15352_v21, %v15240_v61 }
 0x528   : > { %v15354_v63 = vpop.f32.mrf.mxu1 }
 0x529   : > { %v13575_v14 = vadd.f32 %v13557_v48, %v13292_v34  ;;  %v15355_v7 = vadd.f32 %v15354_v63, %v15353_v27 }
 0x52b   : > { %v13579_v52 = vadd.f32 %v13575_v14, %v13571_v13  ;;  %v13560_v18 = vadd.f32 %v15355_v7, %v15243_v15 }
 0x52d   : > { %v13576_v12 = vadd.f32 %v13560_v18, %v13295_v8  ;;  %v13590_v24 = vadd.f32 %v15122_v5, %v13579_v52 }
 0x52f   : > { %v13580_v23 = vadd.f32 %v13576_v12, %v13572_v17  ;;  %v13594_v50 = vmax.f32 %v13590_v24, 0.0 }
 0x531   : > { %v13591_v30 = vadd.f32 %v15122_v5, %v13580_v23 }
 0x533   : > { %v13595_v3 = vmax.f32 %v13591_v30, 0.0 }
 0x535   : > { %v13598_v0 = vpack.c.bf16 %v13595_v3, %v13594_v50 }
 0x536   : > { %v15328_v58 = vpop.f32.mrf.mxu0 }
 0x537   : > { %15376 = vmatprep.mubr.msk.bf16.mxu0 %vm13639_vm8, %v13598_v0 }
 0x538   : > { %v15329_v49 = vpop.f32.mrf.mxu0 }
 0x539   : > { %v15330_v51 = vadd.f32 %v15329_v49, %v15328_v58 }
 0x53a   : > { %v15331_v56 = vpop.f32.mrf.mxu0 }
 0x53b   : > { %v13300_v38 = vadd.f32 %v15330_v51, %v15218_v10 }
 0x53c   : > { %v15356_v20 = vpop.f32.mrf.mxu1  ;;  %v15332_v47 = vpop.f32.mrf.mxu0 }
 0x53d   : > { %v15333_v40 = vadd.f32 %v15332_v47, %v15331_v56 }
 0x53e   : > { %v15357_v36 = vpop.f32.mrf.mxu1 }
 0x53f   : > { %v15358_v33 = vadd.f32 %v15357_v36, %v15356_v20  ;;  %v13303_v43 = vadd.f32 %v15333_v40, %v15221_v22 }
 0x540   : > { %v15359_v29 = vpop.f32.mrf.mxu1 }
 0x541   : > { %v13565_v53 = vadd.f32 %v15358_v33, %v15246_v45 }
 0x542   : > { %v15360_v37 = vpop.f32.mrf.mxu1 }
 0x543   : > { %v13577_v31 = vadd.f32 %v13565_v53, %v13300_v38  ;;  %v15361_v16 = vadd.f32 %v15360_v37, %v15359_v29 }
 0x545   : > { %v13581_v62 = vadd.f32 %v13577_v31, %v23594_v59  ;;  %v13568_v1 = vadd.f32 %v15361_v16, %v15249_v44 }
 0x547   : > { %v13578_v11 = vadd.f32 %v13568_v1, %v13303_v43  ;;  %v13592_v60 = vadd.f32 %v15122_v5, %v13581_v62 }
 0x549   : > { %v13582_v25 = vadd.f32 %v13578_v11, %v23596_v28  ;;  %v13596_v19 = vmax.f32 %v13592_v60, 0.0 }
 0x54b   : > { %v13593_v61 = vadd.f32 %v15122_v5, %v13582_v25 }
 0x54d   : > { %v13597_v54 = vmax.f32 %v13593_v61, 0.0 }
 0x54f   : > { %v13599_v26 = vpack.c.bf16 %v13597_v54, %v13596_v19 }
 0x551   : > { %15377 = vmatmul.mubr.msk.bf16.vlgmr.msra.gmra.mxu0 %vm13639_vm8, %v13599_v26 }
 0x611   : > { %v15378_v32 = vpop.f32.mrf.mxu0 }
 0x612   : > { %v13689_v55 = vadd.f32 %v15378_v32, %v15123_v42 }
 0x613   : > { %v13680_v59 = vpop.f32.mrf.mxu0 }
 0x614   : > { %13697 = vst [vmem:[%s376_s18 + $0x10] sm:$0xff] %v13689_v55  ;;  %v13681_v2 = vadd.f32 %v15123_v42, %v13680_v59 }
 0x615   : > { %v15379_v35 = vpop.f32.mrf.mxu0 }
 0x616   : > { %13695 = vst [vmem:[%s376_s18] sm:$0xff] %v13681_v2  ;;  %v13692_v28 = vadd.f32 %v15379_v35, %v15123_v42 }
 0x617   : > { %v13683_v41 = vpop.f32.mrf.mxu0 }
 0x618   : > { %13698 = vst [vmem:[%s376_s18 + $0x18] sm:$0xff] %v13692_v28  ;;  %v13684_v34 = vadd.f32 %v15123_v42, %v13683_v41 }
 0x61a   : > { %13696 = vst [vmem:[%s376_s18 + $0x8] sm:$0xff] %v13684_v34 }
 0x61b   : > { %16014 = shalt.err (!%p16011_p13)
}
 0x61c   : > { %s16015_s10 = scalar_lea.hbm %s23625_s11, 512  ;;  %s16019_s21 = scalar_lea.hbm %s23676_s8, 1024 }
 0x61d   : > { %p16016_p10 = scmp.ne.s32.totalorder %s23625_s11, %s16015_s10  ;;  %p16020_p0 = scmp.lt.s32.totalorder %s23625_s11, %s23676_s8 }
 0x61e   : > { %p16021_p9 = scmp.lt.s32.totalorder %s16019_s21, %s16015_s10 }
 0x61f   : > { %p16017_p6 = pnand %p16016_p10, %p25917_p2 }
 0x620   : > { %p16022_p1 = por %p16021_p9, %p16020_p0 }
 0x621   : > { %p16018_p11 = pneg %p16017_p6 }
 0x623   : > { %p16023_p12 = pnand %p16022_p1, %p16018_p11 }
 0x625   : > { %16026 = shalt.err (!%p16023_p12)
}
 0x626   : > { %s16086_s19 = smov 128   ;;  %s16087_s22 = smov 8  }
 0x627   : > { %15398 = dma.vmem_to_hbm [thread:$0]  (%p25917_p2), %s23620_s17, 512, %s23625_s11, %s13700_s13, %s16086_s19, %s16086_s19, %s16087_s22  }
 0x628 PF: > { %s13728_s23 = sand.u32 1, %s16061_s27   ;;  %p25918_p3 = scmp.ne.s32.totalorder %s24399_s12, 0 }
 0x629   : > { %p25919_p4 = scmp.ge.s32.totalorder %s16073_s30, 2  ;;  %s13729_s9 = scalar_lea.sflag [#allocation5], %s13728_s23 }
 0x62b   : > { %p15418_p8 = pnand %p25919_p4, %p25918_p3 }
 0x62d   : > { %p15419_p5 = pneg %p15418_p8 }
 0x62f   : > { %16056 = dma.done.wait (%p15419_p5), %s13729_s9, 512  }
 0x630   : > { %16058 = vsyncadd (%p15419_p5), %s13729_s9, 4294966784  ;;  %p23_p7 = scmp.ge.s32.totalorder %s16221_s20, 4   ;;  %s25920_s27 = smov %s16065_s28 }
 0x631   : > { %s25921_s28 = smov %s16069_s29  ;;  %s25922_s29 = smov %s16237_s15 }
 0x632   : > { %s25923_s30 = smov %s16221_s20  ;;  %25 = sbr.rel (!%p23_p7) target bundleno = 10 (0xa), region = 120 }
 0x637   :  { %13734 = vsyncpa [#allocation4], 1 }
 0x638   :  { %13736 = vsyncpa [#allocation4 + $0x1], 1 }
 0x639   :  { %13737 = vsyncpa [#allocation7], 1 }
 0x63a   :  { %13738 = vsyncpa [#allocation10], 1 }
 0x63b   :  { %13739 = vsyncpa [#allocation5], 1 }
 0x63c   :  { %13741 = vsyncpa [#allocation5 + $0x1], 1 }

</bundles_post_ra>
